<compile_context>
chip_gen: v6e
topology: v6e:2x2x1
jax: 0.10.0
libtpu: 0.0.40
codegen_flags: <defaults>
</compile_context>

<pallas_src>
import functools

import numpy as np
import jax
import jax.numpy as jnp
from jax.experimental import pallas as pl
from jax.experimental.pallas import tpu as pltpu


_TAPS_2x2 = tuple((dh, dw) for dh in range(2) for dw in range(2))
_TAPS_3x3 = tuple((dh, dw) for dh in range(3) for dw in range(3))


# ----------------------------------------------------------------------------
# Pallas kernel: fused multi-input shifted-tap conv
#   act( sum_i sum_t  x_i[tap_t : tap_t + L] @ W_i[t]  + b )
# ----------------------------------------------------------------------------
def _conv_taps_kernel(*refs, n_inputs, taps, w_flat, length, act):
    x_refs = refs[:n_inputs]
    w_refs = refs[n_inputs:2 * n_inputs]
    b_ref = refs[2 * n_inputs]
    o_ref = refs[2 * n_inputs + 1]

    acc = None
    for xi in range(n_inputs):
        x_ref, w_ref = x_refs[xi], w_refs[xi]
        for ti, (dh, dw) in enumerate(taps):
            start = dh * w_flat + dw                    # static shifted VMEM load
            tap = x_ref[pl.ds(start, length), :]        # (L, Cin) bf16, contiguous
            part = jnp.dot(tap, w_ref[ti],
                           preferred_element_type=jnp.float32)
            acc = part if acc is None else acc + part
    acc = acc + b_ref[...]                              # (L, Nout) + (1, Nout), f32
    if act == "relu":
        acc = jnp.maximum(acc, 0.0)
    elif act == "sigmoid":
        # exact, numerically stable sigmoid (no approx reciprocal on the output)
        e = jnp.exp(-jnp.abs(acc))
        acc = jnp.where(acc >= 0.0, 1.0, e) / (1.0 + e)
    o_ref[...] = acc.astype(o_ref.dtype)


def fused_conv(x_list, w_list, b, *, taps, w_flat, n_rows, act,
               out_dtype=jnp.bfloat16):
    """act( sum_i conv_taps(x_i, W_i) + b ) over flat padded bf16 inputs.

    x_list[i]: (B, L_in_i, Cin_i)  flat padded image (rows = padded_h * w_flat)
    w_list[i]: (T, Cin_i, Nout)    one (Cin_i, Nout) matrix per tap
    b        : (Nout,)
    Returns (B, n_rows * w_flat, Nout); within each flat row only the leading
    valid-width columns are meaningful (garbage cols are dropped by the caller,
    fused into the next layer's re-layout).
    """
    n_in = len(x_list)
    assert len(w_list) == n_in
    B = x_list[0].shape[0]
    n_out = w_list[0].shape[-1]
    length = n_rows * w_flat

    xs = [x.astype(jnp.bfloat16) for x in x_list]
    ws = [w.astype(jnp.bfloat16) for w in w_list]
    bias = b.astype(jnp.float32).reshape(1, n_out)

    in_specs = []
    for x in xs:                                        # inputs: resident per batch item
        in_specs.append(pl.BlockSpec((None,) + x.shape[1:], lambda i: (i, 0, 0)))
    for w in ws:                                        # weights: resident
        in_specs.append(pl.BlockSpec(w.shape, lambda i: (0, 0, 0)))
    in_specs.append(pl.BlockSpec((1, n_out), lambda i: (0, 0)))

    kernel = functools.partial(_conv_taps_kernel, n_inputs=n_in, taps=taps,
                               w_flat=w_flat, length=length, act=act)
    return pl.pallas_call(
        kernel,
        out_shape=jax.ShapeDtypeStruct((B, length, n_out), out_dtype),
        grid=(B,),
        in_specs=in_specs,
        out_specs=pl.BlockSpec((None, length, n_out), lambda i: (i, 0, 0)),
        compiler_params=pltpu.CompilerParams(dimension_semantics=("parallel",)),
    )(*xs, *ws, bias)


# ----------------------------------------------------------------------------
# Encoder: Conv2d(k=3, stride=2, pad=1) via space-to-depth (4 unit-stride taps)
# ----------------------------------------------------------------------------
def _s2d_tap_weights(w):
    """(Cout,Cin,3,3) Conv2d weight -> (4, 4*Cin, Cout) tap matrices acting on
    the factor-2 space-to-depth of the padded input (dead taps are zero)."""
    cout, cin = w.shape[0], w.shape[1]
    w4 = jnp.pad(w, ((0, 0), (0, 0), (0, 1), (0, 1)))      # kh/kw == 3 -> zeros
    wt = jnp.transpose(w4, (2, 3, 1, 0))                   # (kh, kw, ci, co)
    wt = wt.reshape(2, 2, 2, 2, cin, cout)                 # (dq, ph, dr, pw, ci, co)
    wt = jnp.transpose(wt, (0, 2, 1, 3, 4, 5))             # (dq, dr, ph, pw, ci, co)
    return wt.reshape(4, 4 * cin, cout)


def encoder_conv(x, w, b, act="relu"):
    """Conv2d(Cin->Cout, 3, stride=2, padding=1) + act; NHWC in / NHWC out."""
    B, H, W, C = x.shape
    assert H % 2 == 0 and W % 2 == 0
    cout = w.shape[0]
    ho, wo = H // 2, W // 2
    # pad (+1 top/left = conv padding, +3/+1 bottom/right keeps the flat tap
    # windows in-bounds), cast bf16 BEFORE any expansion, then space-to-depth.
    xp = jnp.pad(x.astype(jnp.bfloat16), ((0, 0), (1, 3), (1, 1), (0, 0)))
    hs, ws = (H + 4) // 2, (W + 2) // 2
    xs = xp.reshape(B, hs, 2, ws, 2, C)
    xs = jnp.transpose(xs, (0, 1, 3, 2, 4, 5)).reshape(B, hs * ws, 4 * C)
    y = fused_conv([xs], [_s2d_tap_weights(w)], b,
                   taps=_TAPS_2x2, w_flat=ws, n_rows=ho, act=act)
    return y.reshape(B, ho, ws, cout)[:, :, :wo, :]        # drop garbage column


# ----------------------------------------------------------------------------
# Decoder: ConvTranspose2d(k=4, stride=2, pad=1) as a sub-pixel 3x3 conv
# ----------------------------------------------------------------------------
_KMAP = np.array([[3, 1, 4],
                  [4, 2, 0]])    # [output parity, neighbor offset] -> deconv tap (4 == zero)


def _subpixel_tap_weights(w):
    """(Cin,Cout,4,4) ConvTranspose2d weight slice -> (9, Cin, 4*Cout);
    output channels ordered (ph, pw, Cout)."""
    cin, cout = w.shape[0], w.shape[1]
    w_ext = jnp.pad(w, ((0, 0), (0, 0), (0, 1), (0, 1)))   # tap index 4 -> zeros
    sub = w_ext[:, :, _KMAP[:, :, None, None], _KMAP[None, None, :, :]]  # (ci,co,ph,dh,pw,dw)
    sub = jnp.transpose(sub, (3, 5, 0, 2, 4, 1))           # (dh, dw, ci, ph, pw, co)
    return sub.reshape(9, cin, 4 * cout)


def decoder_conv(x_list, w, b, act, out_dtype=jnp.bfloat16):
    """ConvTranspose2d(k=4, stride=2, padding=1) + act.

    x_list are the (virtually) channel-concatenated NHWC inputs (deconv output
    first, encoder skip second).  The concat is never materialized: each input
    gets its own weight K-block and both accumulate into the same f32 acc.
    """
    B, H, W, _ = x_list[0].shape
    cin_total, cout = w.shape[0], w.shape[1]
    assert sum(x.shape[-1] for x in x_list) == cin_total
    wp = W + 2
    flats, w_parts, off = [], [], 0
    for x in x_list:
        ci = x.shape[-1]
        xp = jnp.pad(x.astype(jnp.bfloat16), ((0, 0), (1, 2), (1, 1), (0, 0)))
        flats.append(xp.reshape(B, (H + 3) * wp, ci))
        w_parts.append(_subpixel_tap_weights(w[off:off + ci]))
        off += ci
    y = fused_conv(flats, w_parts, jnp.tile(b, 4),
                   taps=_TAPS_3x3, w_flat=wp, n_rows=H, act=act,
                   out_dtype=out_dtype)
    # (B, H*wp, 4*cout): drop garbage cols + interleave 4 parities -> (B,2H,2W,cout)
    y = y.reshape(B, H, wp, 2, 2, cout)[:, :, :W]
    y = jnp.transpose(y, (0, 1, 3, 2, 4, 5)).reshape(B, 2 * H, 2 * W, cout)
    return y


# ----------------------------------------------------------------------------
# Net: parameters + forward (encoder, decoder, skip-concat hooks after ReLUs)
# ----------------------------------------------------------------------------
def init_params(key, in_channels=3):
    enc_shapes = [(8, in_channels, 3, 3), (16, 8, 3, 3),
                  (32, 16, 3, 3), (64, 32, 3, 3)]
    dec_shapes = [(64, 32, 4, 4), (64, 16, 4, 4),
                  (32, 8, 4, 4), (16, in_channels, 4, 4)]
    params = {"enc": [], "dec": []}
    for shp in enc_shapes:
        key, k1, k2 = jax.random.split(key, 3)
        fan_in = shp[1] * shp[2] * shp[3]
        w = jax.random.normal(k1, shp, jnp.float32) / jnp.sqrt(fan_in)
        b = jax.random.normal(k2, (shp[0],), jnp.float32) * 0.01
        params["enc"].append((w, b))
    for shp in dec_shapes:
        key, k1, k2 = jax.random.split(key, 3)
        fan_in = shp[0] * shp[2] * shp[3]
        w = jax.random.normal(k1, shp, jnp.float32) / jnp.sqrt(fan_in)
        b = jax.random.normal(k2, (shp[1],), jnp.float32) * 0.01
        params["dec"].append((w, b))
    return params


def net_forward(params, x_nchw):
    x = jnp.transpose(x_nchw, (0, 2, 3, 1)).astype(jnp.bfloat16)   # NCHW -> NHWC
    (w1, b1), (w2, b2), (w3, b3), (w4, b4) = params["enc"]
    # encoder (activations after each ReLU are the skip features saved by hooks)
    e1 = encoder_conv(x,  w1, b1)                                   # (N, H/2,  W/2,  8)
    e2 = encoder_conv(e1, w2, b2)                                   # (N, H/4,  W/4, 16)
    e3 = encoder_conv(e2, w3, b3)                                   # (N, H/8,  W/8, 32)
    e4 = encoder_conv(e3, w4, b4)                                   # (N, H/16, W/16,64)

    (dw1, db1), (dw2, db2), (dw3, db3), (dw4, db4) = params["dec"]
    # decoder: hook on each ReLU replaces its output with cat([relu_out, enc_ftrs])
    d1 = decoder_conv([e4],     dw1, db1, "relu")
    d2 = decoder_conv([d1, e3], dw2, db2, "relu")
    d3 = decoder_conv([d2, e2], dw3, db3, "relu")
    out = decoder_conv([d3, e1], dw4, db4, "sigmoid", out_dtype=jnp.float32)
    return jnp.transpose(out, (0, 3, 1, 2))                         # NHWC -> NCHW


# ----------------------------------------------------------------------------
# Pure-JAX f32 reference (for in-script correctness check)
# ----------------------------------------------------------------------------
def _ref_conv2d(x, w, b, stride, pad):
    y = jax.lax.conv_general_dilated(
        x, jnp.transpose(w, (2, 3, 1, 0)),
        window_strides=(stride, stride),
        padding=[(pad, pad), (pad, pad)],
        dimension_numbers=("NHWC", "HWIO", "NHWC"),
        precision=jax.lax.Precision.HIGHEST)
    return y + b


def _ref_deconv2d(x, w, b, stride, pad):
    k = w.shape[2]
    wf = jnp.transpose(jnp.flip(w, (2, 3)), (2, 3, 0, 1))   # (kh,kw,Cin,Cout)
    y = jax.lax.conv_general_dilated(
        x, wf, window_strides=(1, 1),
        padding=[(k - 1 - pad, k - 1 - pad)] * 2,
        lhs_dilation=(stride, stride),
        dimension_numbers=("NHWC", "HWIO", "NHWC"),
        precision=jax.lax.Precision.HIGHEST)
    return y + b


def net_forward_ref(params, x_nchw):
    x = jnp.transpose(x_nchw, (0, 2, 3, 1))
    (w1, b1), (w2, b2), (w3, b3), (w4, b4) = params["enc"]
    e1 = jax.nn.relu(_ref_conv2d(x,  w1, b1, 2, 1))
    e2 = jax.nn.relu(_ref_conv2d(e1, w2, b2, 2, 1))
    e3 = jax.nn.relu(_ref_conv2d(e2, w3, b3, 2, 1))
    e4 = jax.nn.relu(_ref_conv2d(e3, w4, b4, 2, 1))
    (dw1, db1), (dw2, db2), (dw3, db3), (dw4, db4) = params["dec"]
    d1 = jnp.concatenate([jax.nn.relu(_ref_deconv2d(e4, dw1, db1, 2, 1)), e3], -1)
    d2 = jnp.concatenate([jax.nn.relu(_ref_deconv2d(d1, dw2, db2, 2, 1)), e2], -1)
    d3 = jnp.concatenate([jax.nn.relu(_ref_deconv2d(d2, dw3, db3, 2, 1)), e1], -1)
    out = jax.nn.sigmoid(_ref_deconv2d(d3, dw4, db4, 2, 1))
    return jnp.transpose(out, (0, 3, 1, 2))


if __name__ == "__main__":
    key = jax.random.PRNGKey(0)
    kx, kp = jax.random.split(key)
    x = jax.random.normal(kx, (2, 3, 16, 16), jnp.float32)   # NCHW, like PyTorch
    params = init_params(kp, in_channels=3)

    y = jax.jit(net_forward)(params, x)
    jax.block_until_ready(y)
    assert y.shape == (2, 3, 16, 16), y.shape
    assert bool(jnp.all(jnp.isfinite(y)))
    assert bool(jnp.all((y >= 0.0) & (y <= 1.0)))            # sigmoid output

    y_ref = jax.jit(net_forward_ref)(params, x)
    jax.block_until_ready(y_ref)
    max_err = float(jnp.max(jnp.abs(y.astype(jnp.float32) - y_ref)))
    assert max_err < 5e-2, max_err                           # bf16 MXU tolerance

    print("KERNEL_OK")
</pallas_src>

<mosaic_0001>
module attributes {stable_mosaic.version = 11 : i64} {
  func.func @_conv_taps_kernel(%arg0: i32, %arg1: memref<1x90x12xbf16, #tpu.memory_space<vmem>>, %arg2: memref<4x12x8xbf16, #tpu.memory_space<vmem>>, %arg3: memref<1x8xf32, #tpu.memory_space<vmem>>, %arg4: memref<1x72x8xbf16, #tpu.memory_space<vmem>>) attributes {dimension_semantics = [#tpu.dimension_semantics<parallel>], iteration_bounds = array<i64: 2>, scalar_prefetch = 0 : i64, scratch_operands = 0 : i64, tpu.core_type = #tpu.core_type<tc>, window_params = [{transform_indices = @transform_0, window_bounds = array<i64: 1, 90, 12>}, {pipeline_mode = #tpu.pipeline_mode<synchronous>, transform_indices = @transform_1, window_bounds = array<i64: 4, 12, 8>}, {pipeline_mode = #tpu.pipeline_mode<synchronous>, transform_indices = @transform_2, window_bounds = array<i64: 1, 8>}, {transform_indices = @transform_3, window_bounds = array<i64: 1, 72, 8>}]} {
    %c0 = arith.constant 0 : index
    %c0_0 = arith.constant 0 : index
    %c0_1 = arith.constant 0 : index
    %0 = vector.load %arg1[%c0, %c0_0, %c0_1] : memref<1x90x12xbf16, #tpu.memory_space<vmem>>, vector<1x72x12xbf16>
    %1 = vector.shape_cast %0 : vector<1x72x12xbf16> to vector<72x12xbf16>
    %c0_2 = arith.constant 0 : index
    %c0_3 = arith.constant 0 : index
    %c0_4 = arith.constant 0 : index
    %2 = vector.load %arg2[%c0_2, %c0_3, %c0_4] : memref<4x12x8xbf16, #tpu.memory_space<vmem>>, vector<1x12x8xbf16>
    %3 = vector.shape_cast %2 : vector<1x12x8xbf16> to vector<12x8xbf16>
    %cst = arith.constant dense<0.000000e+00> : vector<72x8xf32>
    %4 = tpu.matmul %1, %3, %cst {dimension_numbers = #tpu.dot_dimension_numbers<[1], [0], [0], [1], [0, 0, 1, 1], [], []>} : vector<72x12xbf16>, vector<12x8xbf16>, vector<72x8xf32> -> vector<72x8xf32>
    %c0_5 = arith.constant 0 : index
    %c1 = arith.constant 1 : index
    %c0_6 = arith.constant 0 : index
    %5 = vector.load %arg1[%c0_5, %c1, %c0_6] : memref<1x90x12xbf16, #tpu.memory_space<vmem>>, vector<1x72x12xbf16>
    %6 = vector.shape_cast %5 : vector<1x72x12xbf16> to vector<72x12xbf16>
    %c1_7 = arith.constant 1 : index
    %c0_8 = arith.constant 0 : index
    %c0_9 = arith.constant 0 : index
    %7 = vector.load %arg2[%c1_7, %c0_8, %c0_9] : memref<4x12x8xbf16, #tpu.memory_space<vmem>>, vector<1x12x8xbf16>
    %8 = vector.shape_cast %7 : vector<1x12x8xbf16> to vector<12x8xbf16>
    %cst_10 = arith.constant dense<0.000000e+00> : vector<72x8xf32>
    %9 = tpu.matmul %6, %8, %cst_10 {dimension_numbers = #tpu.dot_dimension_numbers<[1], [0], [0], [1], [0, 0, 1, 1], [], []>} : vector<72x12xbf16>, vector<12x8xbf16>, vector<72x8xf32> -> vector<72x8xf32>
    %10 = arith.addf %4, %9 : vector<72x8xf32>
    %c0_11 = arith.constant 0 : index
    %c9 = arith.constant 9 : index
    %c0_12 = arith.constant 0 : index
    %11 = vector.load %arg1[%c0_11, %c9, %c0_12] : memref<1x90x12xbf16, #tpu.memory_space<vmem>>, vector<1x72x12xbf16>
    %12 = vector.shape_cast %11 : vector<1x72x12xbf16> to vector<72x12xbf16>
    %c2 = arith.constant 2 : index
    %c0_13 = arith.constant 0 : index
    %c0_14 = arith.constant 0 : index
    %13 = vector.load %arg2[%c2, %c0_13, %c0_14] : memref<4x12x8xbf16, #tpu.memory_space<vmem>>, vector<1x12x8xbf16>
    %14 = vector.shape_cast %13 : vector<1x12x8xbf16> to vector<12x8xbf16>
    %cst_15 = arith.constant dense<0.000000e+00> : vector<72x8xf32>
    %15 = tpu.matmul %12, %14, %cst_15 {dimension_numbers = #tpu.dot_dimension_numbers<[1], [0], [0], [1], [0, 0, 1, 1], [], []>} : vector<72x12xbf16>, vector<12x8xbf16>, vector<72x8xf32> -> vector<72x8xf32>
    %16 = arith.addf %10, %15 : vector<72x8xf32>
    %c0_16 = arith.constant 0 : index
    %c10 = arith.constant 10 : index
    %c0_17 = arith.constant 0 : index
    %17 = vector.load %arg1[%c0_16, %c10, %c0_17] : memref<1x90x12xbf16, #tpu.memory_space<vmem>>, vector<1x72x12xbf16>
    %18 = vector.shape_cast %17 : vector<1x72x12xbf16> to vector<72x12xbf16>
    %c3 = arith.constant 3 : index
    %c0_18 = arith.constant 0 : index
    %c0_19 = arith.constant 0 : index
    %19 = vector.load %arg2[%c3, %c0_18, %c0_19] : memref<4x12x8xbf16, #tpu.memory_space<vmem>>, vector<1x12x8xbf16>
    %20 = vector.shape_cast %19 : vector<1x12x8xbf16> to vector<12x8xbf16>
    %cst_20 = arith.constant dense<0.000000e+00> : vector<72x8xf32>
    %21 = tpu.matmul %18, %20, %cst_20 {dimension_numbers = #tpu.dot_dimension_numbers<[1], [0], [0], [1], [0, 0, 1, 1], [], []>} : vector<72x12xbf16>, vector<12x8xbf16>, vector<72x8xf32> -> vector<72x8xf32>
    %22 = arith.addf %16, %21 : vector<72x8xf32>
    %c0_21 = arith.constant 0 : index
    %c0_22 = arith.constant 0 : index
    %23 = vector.load %arg3[%c0_21, %c0_22] : memref<1x8xf32, #tpu.memory_space<vmem>>, vector<1x8xf32>
    %24 = vector.broadcast %23 : vector<1x8xf32> to vector<72x8xf32>
    %25 = arith.addf %22, %24 : vector<72x8xf32>
    %cst_23 = arith.constant 0.000000e+00 : f32
    %26 = vector.broadcast %cst_23 : f32 to vector<72x8xf32>
    %27 = arith.maximumf %25, %26 : vector<72x8xf32>
    %28 = arith.truncf %27 : vector<72x8xf32> to vector<72x8xbf16>
    %c0_24 = arith.constant 0 : index
    %c0_25 = arith.constant 0 : index
    %c0_26 = arith.constant 0 : index
    %29 = vector.load %arg4[%c0_24, %c0_25, %c0_26] : memref<1x72x8xbf16, #tpu.memory_space<vmem>>, vector<1x72x8xbf16>
    %30 = vector.shape_cast %29 : vector<1x72x8xbf16> to vector<72x8xbf16>
    %31 = vector.shape_cast %28 : vector<72x8xbf16> to vector<1x72x8xbf16>
    tpu.vector_store %arg4[%c0_24, %c0_25, %c0_26], %31 {strides = array<i32>} : memref<1x72x8xbf16, #tpu.memory_space<vmem>>, vector<1x72x8xbf16>,
    return
  }
  func.func @transform_0(%arg0: i32) -> (i32, i32, i32) {
    %c0_i32 = arith.constant 0 : i32
    %c0_i32_0 = arith.constant 0 : i32
    %c0_i32_1 = arith.constant 0 : i32
    return %arg0, %c0_i32, %c0_i32_0 : i32, i32, i32
  }
  func.func @transform_1(%arg0: i32) -> (i32, i32, i32) {
    %c0_i32 = arith.constant 0 : i32
    %c0_i32_0 = arith.constant 0 : i32
    %c0_i32_1 = arith.constant 0 : i32
    %c0_i32_2 = arith.constant 0 : i32
    return %c0_i32, %c0_i32_0, %c0_i32_1 : i32, i32, i32
  }
  func.func @transform_2(%arg0: i32) -> (i32, i32) {
    %c0_i32 = arith.constant 0 : i32
    %c0_i32_0 = arith.constant 0 : i32
    %c0_i32_1 = arith.constant 0 : i32
    return %c0_i32, %c0_i32_0 : i32, i32
  }
  func.func @transform_3(%arg0: i32) -> (i32, i32, i32) {
    %c0_i32 = arith.constant 0 : i32
    %c0_i32_0 = arith.constant 0 : i32
    %c0_i32_1 = arith.constant 0 : i32
    return %arg0, %c0_i32, %c0_i32_0 : i32, i32, i32
  }
}

module attributes {stable_mosaic.version = 11 : i64} {
  func.func @_conv_taps_kernel(%arg0: i32, %arg1: memref<1x30x32xbf16, #tpu.memory_space<vmem>>, %arg2: memref<4x32x16xbf16, #tpu.memory_space<vmem>>, %arg3: memref<1x16xf32, #tpu.memory_space<vmem>>, %arg4: memref<1x20x16xbf16, #tpu.memory_space<vmem>>) attributes {dimension_semantics = [#tpu.dimension_semantics<parallel>], iteration_bounds = array<i64: 2>, scalar_prefetch = 0 : i64, scratch_operands = 0 : i64, tpu.core_type = #tpu.core_type<tc>, window_params = [{transform_indices = @transform_0, window_bounds = array<i64: 1, 30, 32>}, {pipeline_mode = #tpu.pipeline_mode<synchronous>, transform_indices = @transform_1, window_bounds = array<i64: 4, 32, 16>}, {pipeline_mode = #tpu.pipeline_mode<synchronous>, transform_indices = @transform_2, window_bounds = array<i64: 1, 16>}, {transform_indices = @transform_3, window_bounds = array<i64: 1, 20, 16>}]} {
    %c0 = arith.constant 0 : index
    %c0_0 = arith.constant 0 : index
    %c0_1 = arith.constant 0 : index
    %0 = vector.load %arg1[%c0, %c0_0, %c0_1] : memref<1x30x32xbf16, #tpu.memory_space<vmem>>, vector<1x20x32xbf16>
    %1 = vector.shape_cast %0 : vector<1x20x32xbf16> to vector<20x32xbf16>
    %c0_2 = arith.constant 0 : index
    %c0_3 = arith.constant 0 : index
    %c0_4 = arith.constant 0 : index
    %2 = vector.load %arg2[%c0_2, %c0_3, %c0_4] : memref<4x32x16xbf16, #tpu.memory_space<vmem>>, vector<1x32x16xbf16>
    %3 = vector.shape_cast %2 : vector<1x32x16xbf16> to vector<32x16xbf16>
    %cst = arith.constant dense<0.000000e+00> : vector<20x16xf32>
    %4 = tpu.matmul %1, %3, %cst {dimension_numbers = #tpu.dot_dimension_numbers<[1], [0], [0], [1], [0, 0, 1, 1], [], []>} : vector<20x32xbf16>, vector<32x16xbf16>, vector<20x16xf32> -> vector<20x16xf32>
    %c0_5 = arith.constant 0 : index
    %c1 = arith.constant 1 : index
    %c0_6 = arith.constant 0 : index
    %5 = vector.load %arg1[%c0_5, %c1, %c0_6] : memref<1x30x32xbf16, #tpu.memory_space<vmem>>, vector<1x20x32xbf16>
    %6 = vector.shape_cast %5 : vector<1x20x32xbf16> to vector<20x32xbf16>
    %c1_7 = arith.constant 1 : index
    %c0_8 = arith.constant 0 : index
    %c0_9 = arith.constant 0 : index
    %7 = vector.load %arg2[%c1_7, %c0_8, %c0_9] : memref<4x32x16xbf16, #tpu.memory_space<vmem>>, vector<1x32x16xbf16>
    %8 = vector.shape_cast %7 : vector<1x32x16xbf16> to vector<32x16xbf16>
    %cst_10 = arith.constant dense<0.000000e+00> : vector<20x16xf32>
    %9 = tpu.matmul %6, %8, %cst_10 {dimension_numbers = #tpu.dot_dimension_numbers<[1], [0], [0], [1], [0, 0, 1, 1], [], []>} : vector<20x32xbf16>, vector<32x16xbf16>, vector<20x16xf32> -> vector<20x16xf32>
    %10 = arith.addf %4, %9 : vector<20x16xf32>
    %c0_11 = arith.constant 0 : index
    %c5 = arith.constant 5 : index
    %c0_12 = arith.constant 0 : index
    %11 = vector.load %arg1[%c0_11, %c5, %c0_12] : memref<1x30x32xbf16, #tpu.memory_space<vmem>>, vector<1x20x32xbf16>
    %12 = vector.shape_cast %11 : vector<1x20x32xbf16> to vector<20x32xbf16>
    %c2 = arith.constant 2 : index
    %c0_13 = arith.constant 0 : index
    %c0_14 = arith.constant 0 : index
    %13 = vector.load %arg2[%c2, %c0_13, %c0_14] : memref<4x32x16xbf16, #tpu.memory_space<vmem>>, vector<1x32x16xbf16>
    %14 = vector.shape_cast %13 : vector<1x32x16xbf16> to vector<32x16xbf16>
    %cst_15 = arith.constant dense<0.000000e+00> : vector<20x16xf32>
    %15 = tpu.matmul %12, %14, %cst_15 {dimension_numbers = #tpu.dot_dimension_numbers<[1], [0], [0], [1], [0, 0, 1, 1], [], []>} : vector<20x32xbf16>, vector<32x16xbf16>, vector<20x16xf32> -> vector<20x16xf32>
    %16 = arith.addf %10, %15 : vector<20x16xf32>
    %c0_16 = arith.constant 0 : index
    %c6 = arith.constant 6 : index
    %c0_17 = arith.constant 0 : index
    %17 = vector.load %arg1[%c0_16, %c6, %c0_17] : memref<1x30x32xbf16, #tpu.memory_space<vmem>>, vector<1x20x32xbf16>
    %18 = vector.shape_cast %17 : vector<1x20x32xbf16> to vector<20x32xbf16>
    %c3 = arith.constant 3 : index
    %c0_18 = arith.constant 0 : index
    %c0_19 = arith.constant 0 : index
    %19 = vector.load %arg2[%c3, %c0_18, %c0_19] : memref<4x32x16xbf16, #tpu.memory_space<vmem>>, vector<1x32x16xbf16>
    %20 = vector.shape_cast %19 : vector<1x32x16xbf16> to vector<32x16xbf16>
    %cst_20 = arith.constant dense<0.000000e+00> : vector<20x16xf32>
    %21 = tpu.matmul %18, %20, %cst_20 {dimension_numbers = #tpu.dot_dimension_numbers<[1], [0], [0], [1], [0, 0, 1, 1], [], []>} : vector<20x32xbf16>, vector<32x16xbf16>, vector<20x16xf32> -> vector<20x16xf32>
    %22 = arith.addf %16, %21 : vector<20x16xf32>
    %c0_21 = arith.constant 0 : index
    %c0_22 = arith.constant 0 : index
    %23 = vector.load %arg3[%c0_21, %c0_22] : memref<1x16xf32, #tpu.memory_space<vmem>>, vector<1x16xf32>
    %24 = vector.broadcast %23 : vector<1x16xf32> to vector<20x16xf32>
    %25 = arith.addf %22, %24 : vector<20x16xf32>
    %cst_23 = arith.constant 0.000000e+00 : f32
    %26 = vector.broadcast %cst_23 : f32 to vector<20x16xf32>
    %27 = arith.maximumf %25, %26 : vector<20x16xf32>
    %28 = arith.truncf %27 : vector<20x16xf32> to vector<20x16xbf16>
    %c0_24 = arith.constant 0 : index
    %c0_25 = arith.constant 0 : index
    %c0_26 = arith.constant 0 : index
    %29 = vector.load %arg4[%c0_24, %c0_25, %c0_26] : memref<1x20x16xbf16, #tpu.memory_space<vmem>>, vector<1x20x16xbf16>
    %30 = vector.shape_cast %29 : vector<1x20x16xbf16> to vector<20x16xbf16>
    %31 = vector.shape_cast %28 : vector<20x16xbf16> to vector<1x20x16xbf16>
    tpu.vector_store %arg4[%c0_24, %c0_25, %c0_26], %31 {strides = array<i32>} : memref<1x20x16xbf16, #tpu.memory_space<vmem>>, vector<1x20x16xbf16>,
    return
  }
  func.func @transform_0(%arg0: i32) -> (i32, i32, i32) {
    %c0_i32 = arith.constant 0 : i32
    %c0_i32_0 = arith.constant 0 : i32
    %c0_i32_1 = arith.constant 0 : i32
    return %arg0, %c0_i32, %c0_i32_0 : i32, i32, i32
  }
  func.func @transform_1(%arg0: i32) -> (i32, i32, i32) {
    %c0_i32 = arith.constant 0 : i32
    %c0_i32_0 = arith.constant 0 : i32
    %c0_i32_1 = arith.constant 0 : i32
    %c0_i32_2 = arith.constant 0 : i32
    return %c0_i32, %c0_i32_0, %c0_i32_1 : i32, i32, i32
  }
  func.func @transform_2(%arg0: i32) -> (i32, i32) {
    %c0_i32 = arith.constant 0 : i32
    %c0_i32_0 = arith.constant 0 : i32
    %c0_i32_1 = arith.constant 0 : i32
    return %c0_i32, %c0_i32_0 : i32, i32
  }
  func.func @transform_3(%arg0: i32) -> (i32, i32, i32) {
    %c0_i32 = arith.constant 0 : i32
    %c0_i32_0 = arith.constant 0 : i32
    %c0_i32_1 = arith.constant 0 : i32
    return %arg0, %c0_i32, %c0_i32_0 : i32, i32, i32
  }
}

module attributes {stable_mosaic.version = 11 : i64} {
  func.func @_conv_taps_kernel(%arg0: i32, %arg1: memref<1x12x64xbf16, #tpu.memory_space<vmem>>, %arg2: memref<4x64x32xbf16, #tpu.memory_space<vmem>>, %arg3: memref<1x32xf32, #tpu.memory_space<vmem>>, %arg4: memref<1x6x32xbf16, #tpu.memory_space<vmem>>) attributes {dimension_semantics = [#tpu.dimension_semantics<parallel>], iteration_bounds = array<i64: 2>, scalar_prefetch = 0 : i64, scratch_operands = 0 : i64, tpu.core_type = #tpu.core_type<tc>, window_params = [{transform_indices = @transform_0, window_bounds = array<i64: 1, 12, 64>}, {pipeline_mode = #tpu.pipeline_mode<synchronous>, transform_indices = @transform_1, window_bounds = array<i64: 4, 64, 32>}, {pipeline_mode = #tpu.pipeline_mode<synchronous>, transform_indices = @transform_2, window_bounds = array<i64: 1, 32>}, {transform_indices = @transform_3, window_bounds = array<i64: 1, 6, 32>}]} {
    %c0 = arith.constant 0 : index
    %c0_0 = arith.constant 0 : index
    %c0_1 = arith.constant 0 : index
    %0 = vector.load %arg1[%c0, %c0_0, %c0_1] : memref<1x12x64xbf16, #tpu.memory_space<vmem>>, vector<1x6x64xbf16>
    %1 = vector.shape_cast %0 : vector<1x6x64xbf16> to vector<6x64xbf16>
    %c0_2 = arith.constant 0 : index
    %c0_3 = arith.constant 0 : index
    %c0_4 = arith.constant 0 : index
    %2 = vector.load %arg2[%c0_2, %c0_3, %c0_4] : memref<4x64x32xbf16, #tpu.memory_space<vmem>>, vector<1x64x32xbf16>
    %3 = vector.shape_cast %2 : vector<1x64x32xbf16> to vector<64x32xbf16>
    %cst = arith.constant dense<0.000000e+00> : vector<6x32xf32>
    %4 = tpu.matmul %1, %3, %cst {dimension_numbers = #tpu.dot_dimension_numbers<[1], [0], [0], [1], [0, 0, 1, 1], [], []>} : vector<6x64xbf16>, vector<64x32xbf16>, vector<6x32xf32> -> vector<6x32xf32>
    %c0_5 = arith.constant 0 : index
    %c1 = arith.constant 1 : index
    %c0_6 = arith.constant 0 : index
    %5 = vector.load %arg1[%c0_5, %c1, %c0_6] : memref<1x12x64xbf16, #tpu.memory_space<vmem>>, vector<1x6x64xbf16>
    %6 = vector.shape_cast %5 : vector<1x6x64xbf16> to vector<6x64xbf16>
    %c1_7 = arith.constant 1 : index
    %c0_8 = arith.constant 0 : index
    %c0_9 = arith.constant 0 : index
    %7 = vector.load %arg2[%c1_7, %c0_8, %c0_9] : memref<4x64x32xbf16, #tpu.memory_space<vmem>>, vector<1x64x32xbf16>
    %8 = vector.shape_cast %7 : vector<1x64x32xbf16> to vector<64x32xbf16>
    %cst_10 = arith.constant dense<0.000000e+00> : vector<6x32xf32>
    %9 = tpu.matmul %6, %8, %cst_10 {dimension_numbers = #tpu.dot_dimension_numbers<[1], [0], [0], [1], [0, 0, 1, 1], [], []>} : vector<6x64xbf16>, vector<64x32xbf16>, vector<6x32xf32> -> vector<6x32xf32>
    %10 = arith.addf %4, %9 : vector<6x32xf32>
    %c0_11 = arith.constant 0 : index
    %c3 = arith.constant 3 : index
    %c0_12 = arith.constant 0 : index
    %11 = vector.load %arg1[%c0_11, %c3, %c0_12] : memref<1x12x64xbf16, #tpu.memory_space<vmem>>, vector<1x6x64xbf16>
    %12 = vector.shape_cast %11 : vector<1x6x64xbf16> to vector<6x64xbf16>
    %c2 = arith.constant 2 : index
    %c0_13 = arith.constant 0 : index
    %c0_14 = arith.constant 0 : index
    %13 = vector.load %arg2[%c2, %c0_13, %c0_14] : memref<4x64x32xbf16, #tpu.memory_space<vmem>>, vector<1x64x32xbf16>
    %14 = vector.shape_cast %13 : vector<1x64x32xbf16> to vector<64x32xbf16>
    %cst_15 = arith.constant dense<0.000000e+00> : vector<6x32xf32>
    %15 = tpu.matmul %12, %14, %cst_15 {dimension_numbers = #tpu.dot_dimension_numbers<[1], [0], [0], [1], [0, 0, 1, 1], [], []>} : vector<6x64xbf16>, vector<64x32xbf16>, vector<6x32xf32> -> vector<6x32xf32>
    %16 = arith.addf %10, %15 : vector<6x32xf32>
    %c0_16 = arith.constant 0 : index
    %c4 = arith.constant 4 : index
    %c0_17 = arith.constant 0 : index
    %17 = vector.load %arg1[%c0_16, %c4, %c0_17] : memref<1x12x64xbf16, #tpu.memory_space<vmem>>, vector<1x6x64xbf16>
    %18 = vector.shape_cast %17 : vector<1x6x64xbf16> to vector<6x64xbf16>
    %c3_18 = arith.constant 3 : index
    %c0_19 = arith.constant 0 : index
    %c0_20 = arith.constant 0 : index
    %19 = vector.load %arg2[%c3_18, %c0_19, %c0_20] : memref<4x64x32xbf16, #tpu.memory_space<vmem>>, vector<1x64x32xbf16>
    %20 = vector.shape_cast %19 : vector<1x64x32xbf16> to vector<64x32xbf16>
    %cst_21 = arith.constant dense<0.000000e+00> : vector<6x32xf32>
    %21 = tpu.matmul %18, %20, %cst_21 {dimension_numbers = #tpu.dot_dimension_numbers<[1], [0], [0], [1], [0, 0, 1, 1], [], []>} : vector<6x64xbf16>, vector<64x32xbf16>, vector<6x32xf32> -> vector<6x32xf32>
    %22 = arith.addf %16, %21 : vector<6x32xf32>
    %c0_22 = arith.constant 0 : index
    %c0_23 = arith.constant 0 : index
    %23 = vector.load %arg3[%c0_22, %c0_23] : memref<1x32xf32, #tpu.memory_space<vmem>>, vector<1x32xf32>
    %24 = vector.broadcast %23 : vector<1x32xf32> to vector<6x32xf32>
    %25 = arith.addf %22, %24 : vector<6x32xf32>
    %cst_24 = arith.constant 0.000000e+00 : f32
    %26 = vector.broadcast %cst_24 : f32 to vector<6x32xf32>
    %27 = arith.maximumf %25, %26 : vector<6x32xf32>
    %28 = arith.truncf %27 : vector<6x32xf32> to vector<6x32xbf16>
    %c0_25 = arith.constant 0 : index
    %c0_26 = arith.constant 0 : index
    %c0_27 = arith.constant 0 : index
    %29 = vector.load %arg4[%c0_25, %c0_26, %c0_27] : memref<1x6x32xbf16, #tpu.memory_space<vmem>>, vector<1x6x32xbf16>
    %30 = vector.shape_cast %29 : vector<1x6x32xbf16> to vector<6x32xbf16>
    %31 = vector.shape_cast %28 : vector<6x32xbf16> to vector<1x6x32xbf16>
    tpu.vector_store %arg4[%c0_25, %c0_26, %c0_27], %31 {strides = array<i32>} : memref<1x6x32xbf16, #tpu.memory_space<vmem>>, vector<1x6x32xbf16>,
    return
  }
  func.func @transform_0(%arg0: i32) -> (i32, i32, i32) {
    %c0_i32 = arith.constant 0 : i32
    %c0_i32_0 = arith.constant 0 : i32
    %c0_i32_1 = arith.constant 0 : i32
    return %arg0, %c0_i32, %c0_i32_0 : i32, i32, i32
  }
  func.func @transform_1(%arg0: i32) -> (i32, i32, i32) {
    %c0_i32 = arith.constant 0 : i32
    %c0_i32_0 = arith.constant 0 : i32
    %c0_i32_1 = arith.constant 0 : i32
    %c0_i32_2 = arith.constant 0 : i32
    return %c0_i32, %c0_i32_0, %c0_i32_1 : i32, i32, i32
  }
  func.func @transform_2(%arg0: i32) -> (i32, i32) {
    %c0_i32 = arith.constant 0 : i32
    %c0_i32_0 = arith.constant 0 : i32
    %c0_i32_1 = arith.constant 0 : i32
    return %c0_i32, %c0_i32_0 : i32, i32
  }
  func.func @transform_3(%arg0: i32) -> (i32, i32, i32) {
    %c0_i32 = arith.constant 0 : i32
    %c0_i32_0 = arith.constant 0 : i32
    %c0_i32_1 = arith.constant 0 : i32
    return %arg0, %c0_i32, %c0_i32_0 : i32, i32, i32
  }
}

module attributes {stable_mosaic.version = 11 : i64} {
  func.func @_conv_taps_kernel(%arg0: i32, %arg1: memref<1x6x128xbf16, #tpu.memory_space<vmem>>, %arg2: memref<4x128x64xbf16, #tpu.memory_space<vmem>>, %arg3: memref<1x64xf32, #tpu.memory_space<vmem>>, %arg4: memref<1x2x64xbf16, #tpu.memory_space<vmem>>) attributes {dimension_semantics = [#tpu.dimension_semantics<parallel>], iteration_bounds = array<i64: 2>, scalar_prefetch = 0 : i64, scratch_operands = 0 : i64, tpu.core_type = #tpu.core_type<tc>, window_params = [{transform_indices = @transform_0, window_bounds = array<i64: 1, 6, 128>}, {pipeline_mode = #tpu.pipeline_mode<synchronous>, transform_indices = @transform_1, window_bounds = array<i64: 4, 128, 64>}, {pipeline_mode = #tpu.pipeline_mode<synchronous>, transform_indices = @transform_2, window_bounds = array<i64: 1, 64>}, {transform_indices = @transform_3, window_bounds = array<i64: 1, 2, 64>}]} {
    %c0 = arith.constant 0 : index
    %c0_0 = arith.constant 0 : index
    %c0_1 = arith.constant 0 : index
    %0 = vector.load %arg1[%c0, %c0_0, %c0_1] : memref<1x6x128xbf16, #tpu.memory_space<vmem>>, vector<1x2x128xbf16>
    %1 = vector.shape_cast %0 : vector<1x2x128xbf16> to vector<2x128xbf16>
    %c0_2 = arith.constant 0 : index
    %c0_3 = arith.constant 0 : index
    %c0_4 = arith.constant 0 : index
    %2 = vector.load %arg2[%c0_2, %c0_3, %c0_4] : memref<4x128x64xbf16, #tpu.memory_space<vmem>>, vector<1x128x64xbf16>
    %3 = vector.shape_cast %2 : vector<1x128x64xbf16> to vector<128x64xbf16>
    %cst = arith.constant dense<0.000000e+00> : vector<2x64xf32>
    %4 = tpu.matmul %1, %3, %cst {dimension_numbers = #tpu.dot_dimension_numbers<[1], [0], [0], [1], [0, 0, 1, 1], [], []>} : vector<2x128xbf16>, vector<128x64xbf16>, vector<2x64xf32> -> vector<2x64xf32>
    %c0_5 = arith.constant 0 : index
    %c1 = arith.constant 1 : index
    %c0_6 = arith.constant 0 : index
    %5 = vector.load %arg1[%c0_5, %c1, %c0_6] : memref<1x6x128xbf16, #tpu.memory_space<vmem>>, vector<1x2x128xbf16>
    %6 = vector.shape_cast %5 : vector<1x2x128xbf16> to vector<2x128xbf16>
    %c1_7 = arith.constant 1 : index
    %c0_8 = arith.constant 0 : index
    %c0_9 = arith.constant 0 : index
    %7 = vector.load %arg2[%c1_7, %c0_8, %c0_9] : memref<4x128x64xbf16, #tpu.memory_space<vmem>>, vector<1x128x64xbf16>
    %8 = vector.shape_cast %7 : vector<1x128x64xbf16> to vector<128x64xbf16>
    %cst_10 = arith.constant dense<0.000000e+00> : vector<2x64xf32>
    %9 = tpu.matmul %6, %8, %cst_10 {dimension_numbers = #tpu.dot_dimension_numbers<[1], [0], [0], [1], [0, 0, 1, 1], [], []>} : vector<2x128xbf16>, vector<128x64xbf16>, vector<2x64xf32> -> vector<2x64xf32>
    %10 = arith.addf %4, %9 : vector<2x64xf32>
    %c0_11 = arith.constant 0 : index
    %c2 = arith.constant 2 : index
    %c0_12 = arith.constant 0 : index
    %11 = vector.load %arg1[%c0_11, %c2, %c0_12] : memref<1x6x128xbf16, #tpu.memory_space<vmem>>, vector<1x2x128xbf16>
    %12 = vector.shape_cast %11 : vector<1x2x128xbf16> to vector<2x128xbf16>
    %c2_13 = arith.constant 2 : index
    %c0_14 = arith.constant 0 : index
    %c0_15 = arith.constant 0 : index
    %13 = vector.load %arg2[%c2_13, %c0_14, %c0_15] : memref<4x128x64xbf16, #tpu.memory_space<vmem>>, vector<1x128x64xbf16>
    %14 = vector.shape_cast %13 : vector<1x128x64xbf16> to vector<128x64xbf16>
    %cst_16 = arith.constant dense<0.000000e+00> : vector<2x64xf32>
    %15 = tpu.matmul %12, %14, %cst_16 {dimension_numbers = #tpu.dot_dimension_numbers<[1], [0], [0], [1], [0, 0, 1, 1], [], []>} : vector<2x128xbf16>, vector<128x64xbf16>, vector<2x64xf32> -> vector<2x64xf32>
    %16 = arith.addf %10, %15 : vector<2x64xf32>
    %c0_17 = arith.constant 0 : index
    %c3 = arith.constant 3 : index
    %c0_18 = arith.constant 0 : index
    %17 = vector.load %arg1[%c0_17, %c3, %c0_18] : memref<1x6x128xbf16, #tpu.memory_space<vmem>>, vector<1x2x128xbf16>
    %18 = vector.shape_cast %17 : vector<1x2x128xbf16> to vector<2x128xbf16>
    %c3_19 = arith.constant 3 : index
    %c0_20 = arith.constant 0 : index
    %c0_21 = arith.constant 0 : index
    %19 = vector.load %arg2[%c3_19, %c0_20, %c0_21] : memref<4x128x64xbf16, #tpu.memory_space<vmem>>, vector<1x128x64xbf16>
    %20 = vector.shape_cast %19 : vector<1x128x64xbf16> to vector<128x64xbf16>
    %cst_22 = arith.constant dense<0.000000e+00> : vector<2x64xf32>
    %21 = tpu.matmul %18, %20, %cst_22 {dimension_numbers = #tpu.dot_dimension_numbers<[1], [0], [0], [1], [0, 0, 1, 1], [], []>} : vector<2x128xbf16>, vector<128x64xbf16>, vector<2x64xf32> -> vector<2x64xf32>
    %22 = arith.addf %16, %21 : vector<2x64xf32>
    %c0_23 = arith.constant 0 : index
    %c0_24 = arith.constant 0 : index
    %23 = vector.load %arg3[%c0_23, %c0_24] : memref<1x64xf32, #tpu.memory_space<vmem>>, vector<1x64xf32>
    %24 = vector.broadcast %23 : vector<1x64xf32> to vector<2x64xf32>
    %25 = arith.addf %22, %24 : vector<2x64xf32>
    %cst_25 = arith.constant 0.000000e+00 : f32
    %26 = vector.broadcast %cst_25 : f32 to vector<2x64xf32>
    %27 = arith.maximumf %25, %26 : vector<2x64xf32>
    %28 = arith.truncf %27 : vector<2x64xf32> to vector<2x64xbf16>
    %c0_26 = arith.constant 0 : index
    %c0_27 = arith.constant 0 : index
    %c0_28 = arith.constant 0 : index
    %29 = vector.load %arg4[%c0_26, %c0_27, %c0_28] : memref<1x2x64xbf16, #tpu.memory_space<vmem>>, vector<1x2x64xbf16>
    %30 = vector.shape_cast %29 : vector<1x2x64xbf16> to vector<2x64xbf16>
    %31 = vector.shape_cast %28 : vector<2x64xbf16> to vector<1x2x64xbf16>
    tpu.vector_store %arg4[%c0_26, %c0_27, %c0_28], %31 {strides = array<i32>} : memref<1x2x64xbf16, #tpu.memory_space<vmem>>, vector<1x2x64xbf16>,
    return
  }
  func.func @transform_0(%arg0: i32) -> (i32, i32, i32) {
    %c0_i32 = arith.constant 0 : i32
    %c0_i32_0 = arith.constant 0 : i32
    %c0_i32_1 = arith.constant 0 : i32
    return %arg0, %c0_i32, %c0_i32_0 : i32, i32, i32
  }
  func.func @transform_1(%arg0: i32) -> (i32, i32, i32) {
    %c0_i32 = arith.constant 0 : i32
    %c0_i32_0 = arith.constant 0 : i32
    %c0_i32_1 = arith.constant 0 : i32
    %c0_i32_2 = arith.constant 0 : i32
    return %c0_i32, %c0_i32_0, %c0_i32_1 : i32, i32, i32
  }
  func.func @transform_2(%arg0: i32) -> (i32, i32) {
    %c0_i32 = arith.constant 0 : i32
    %c0_i32_0 = arith.constant 0 : i32
    %c0_i32_1 = arith.constant 0 : i32
    return %c0_i32, %c0_i32_0 : i32, i32
  }
  func.func @transform_3(%arg0: i32) -> (i32, i32, i32) {
    %c0_i32 = arith.constant 0 : i32
    %c0_i32_0 = arith.constant 0 : i32
    %c0_i32_1 = arith.constant 0 : i32
    return %arg0, %c0_i32, %c0_i32_0 : i32, i32, i32
  }
}

module attributes {stable_mosaic.version = 11 : i64} {
  func.func @_conv_taps_kernel(%arg0: i32, %arg1: memref<1x12x64xbf16, #tpu.memory_space<vmem>>, %arg2: memref<9x64x128xbf16, #tpu.memory_space<vmem>>, %arg3: memref<1x128xf32, #tpu.memory_space<vmem>>, %arg4: memref<1x3x128xbf16, #tpu.memory_space<vmem>>) attributes {dimension_semantics = [#tpu.dimension_semantics<parallel>], iteration_bounds = array<i64: 2>, scalar_prefetch = 0 : i64, scratch_operands = 0 : i64, tpu.core_type = #tpu.core_type<tc>, window_params = [{transform_indices = @transform_0, window_bounds = array<i64: 1, 12, 64>}, {pipeline_mode = #tpu.pipeline_mode<synchronous>, transform_indices = @transform_1, window_bounds = array<i64: 9, 64, 128>}, {pipeline_mode = #tpu.pipeline_mode<synchronous>, transform_indices = @transform_2, window_bounds = array<i64: 1, 128>}, {transform_indices = @transform_3, window_bounds = array<i64: 1, 3, 128>}]} {
    %c0 = arith.constant 0 : index
    %c0_0 = arith.constant 0 : index
    %c0_1 = arith.constant 0 : index
    %0 = vector.load %arg1[%c0, %c0_0, %c0_1] : memref<1x12x64xbf16, #tpu.memory_space<vmem>>, vector<1x3x64xbf16>
    %1 = vector.shape_cast %0 : vector<1x3x64xbf16> to vector<3x64xbf16>
    %c0_2 = arith.constant 0 : index
    %c0_3 = arith.constant 0 : index
    %c0_4 = arith.constant 0 : index
    %2 = vector.load %arg2[%c0_2, %c0_3, %c0_4] : memref<9x64x128xbf16, #tpu.memory_space<vmem>>, vector<1x64x128xbf16>
    %3 = vector.shape_cast %2 : vector<1x64x128xbf16> to vector<64x128xbf16>
    %cst = arith.constant dense<0.000000e+00> : vector<3x128xf32>
    %4 = tpu.matmul %1, %3, %cst {dimension_numbers = #tpu.dot_dimension_numbers<[1], [0], [0], [1], [0, 0, 1, 1], [], []>} : vector<3x64xbf16>, vector<64x128xbf16>, vector<3x128xf32> -> vector<3x128xf32>
    %c0_5 = arith.constant 0 : index
    %c1 = arith.constant 1 : index
    %c0_6 = arith.constant 0 : index
    %5 = vector.load %arg1[%c0_5, %c1, %c0_6] : memref<1x12x64xbf16, #tpu.memory_space<vmem>>, vector<1x3x64xbf16>
    %6 = vector.shape_cast %5 : vector<1x3x64xbf16> to vector<3x64xbf16>
    %c1_7 = arith.constant 1 : index
    %c0_8 = arith.constant 0 : index
    %c0_9 = arith.constant 0 : index
    %7 = vector.load %arg2[%c1_7, %c0_8, %c0_9] : memref<9x64x128xbf16, #tpu.memory_space<vmem>>, vector<1x64x128xbf16>
    %8 = vector.shape_cast %7 : vector<1x64x128xbf16> to vector<64x128xbf16>
    %cst_10 = arith.constant dense<0.000000e+00> : vector<3x128xf32>
    %9 = tpu.matmul %6, %8, %cst_10 {dimension_numbers = #tpu.dot_dimension_numbers<[1], [0], [0], [1], [0, 0, 1, 1], [], []>} : vector<3x64xbf16>, vector<64x128xbf16>, vector<3x128xf32> -> vector<3x128xf32>
    %10 = arith.addf %4, %9 : vector<3x128xf32>
    %c0_11 = arith.constant 0 : index
    %c2 = arith.constant 2 : index
    %c0_12 = arith.constant 0 : index
    %11 = vector.load %arg1[%c0_11, %c2, %c0_12] : memref<1x12x64xbf16, #tpu.memory_space<vmem>>, vector<1x3x64xbf16>
    %12 = vector.shape_cast %11 : vector<1x3x64xbf16> to vector<3x64xbf16>
    %c2_13 = arith.constant 2 : index
    %c0_14 = arith.constant 0 : index
    %c0_15 = arith.constant 0 : index
    %13 = vector.load %arg2[%c2_13, %c0_14, %c0_15] : memref<9x64x128xbf16, #tpu.memory_space<vmem>>, vector<1x64x128xbf16>
    %14 = vector.shape_cast %13 : vector<1x64x128xbf16> to vector<64x128xbf16>
    %cst_16 = arith.constant dense<0.000000e+00> : vector<3x128xf32>
    %15 = tpu.matmul %12, %14, %cst_16 {dimension_numbers = #tpu.dot_dimension_numbers<[1], [0], [0], [1], [0, 0, 1, 1], [], []>} : vector<3x64xbf16>, vector<64x128xbf16>, vector<3x128xf32> -> vector<3x128xf32>
    %16 = arith.addf %10, %15 : vector<3x128xf32>
    %c0_17 = arith.constant 0 : index
    %c3 = arith.constant 3 : index
    %c0_18 = arith.constant 0 : index
    %17 = vector.load %arg1[%c0_17, %c3, %c0_18] : memref<1x12x64xbf16, #tpu.memory_space<vmem>>, vector<1x3x64xbf16>
    %18 = vector.shape_cast %17 : vector<1x3x64xbf16> to vector<3x64xbf16>
    %c3_19 = arith.constant 3 : index
    %c0_20 = arith.constant 0 : index
    %c0_21 = arith.constant 0 : index
    %19 = vector.load %arg2[%c3_19, %c0_20, %c0_21] : memref<9x64x128xbf16, #tpu.memory_space<vmem>>, vector<1x64x128xbf16>
    %20 = vector.shape_cast %19 : vector<1x64x128xbf16> to vector<64x128xbf16>
    %cst_22 = arith.constant dense<0.000000e+00> : vector<3x128xf32>
    %21 = tpu.matmul %18, %20, %cst_22 {dimension_numbers = #tpu.dot_dimension_numbers<[1], [0], [0], [1], [0, 0, 1, 1], [], []>} : vector<3x64xbf16>, vector<64x128xbf16>, vector<3x128xf32> -> vector<3x128xf32>
    %22 = arith.addf %16, %21 : vector<3x128xf32>
    %c0_23 = arith.constant 0 : index
    %c4 = arith.constant 4 : index
    %c0_24 = arith.constant 0 : index
    %23 = vector.load %arg1[%c0_23, %c4, %c0_24] : memref<1x12x64xbf16, #tpu.memory_space<vmem>>, vector<1x3x64xbf16>
    %24 = vector.shape_cast %23 : vector<1x3x64xbf16> to vector<3x64xbf16>
    %c4_25 = arith.constant 4 : index
    %c0_26 = arith.constant 0 : index
    %c0_27 = arith.constant 0 : index
    %25 = vector.load %arg2[%c4_25, %c0_26, %c0_27] : memref<9x64x128xbf16, #tpu.memory_space<vmem>>, vector<1x64x128xbf16>
    %26 = vector.shape_cast %25 : vector<1x64x128xbf16> to vector<64x128xbf16>
    %cst_28 = arith.constant dense<0.000000e+00> : vector<3x128xf32>
    %27 = tpu.matmul %24, %26, %cst_28 {dimension_numbers = #tpu.dot_dimension_numbers<[1], [0], [0], [1], [0, 0, 1, 1], [], []>} : vector<3x64xbf16>, vector<64x128xbf16>, vector<3x128xf32> -> vector<3x128xf32>
    %28 = arith.addf %22, %27 : vector<3x128xf32>
    %c0_29 = arith.constant 0 : index
    %c5 = arith.constant 5 : index
    %c0_30 = arith.constant 0 : index
    %29 = vector.load %arg1[%c0_29, %c5, %c0_30] : memref<1x12x64xbf16, #tpu.memory_space<vmem>>, vector<1x3x64xbf16>
    %30 = vector.shape_cast %29 : vector<1x3x64xbf16> to vector<3x64xbf16>
    %c5_31 = arith.constant 5 : index
    %c0_32 = arith.constant 0 : index
    %c0_33 = arith.constant 0 : index
    %31 = vector.load %arg2[%c5_31, %c0_32, %c0_33] : memref<9x64x128xbf16, #tpu.memory_space<vmem>>, vector<1x64x128xbf16>
    %32 = vector.shape_cast %31 : vector<1x64x128xbf16> to vector<64x128xbf16>
    %cst_34 = arith.constant dense<0.000000e+00> : vector<3x128xf32>
    %33 = tpu.matmul %30, %32, %cst_34 {dimension_numbers = #tpu.dot_dimension_numbers<[1], [0], [0], [1], [0, 0, 1, 1], [], []>} : vector<3x64xbf16>, vector<64x128xbf16>, vector<3x128xf32> -> vector<3x128xf32>
    %34 = arith.addf %28, %33 : vector<3x128xf32>
    %c0_35 = arith.constant 0 : index
    %c6 = arith.constant 6 : index
    %c0_36 = arith.constant 0 : index
    %35 = vector.load %arg1[%c0_35, %c6, %c0_36] : memref<1x12x64xbf16, #tpu.memory_space<vmem>>, vector<1x3x64xbf16>
    %36 = vector.shape_cast %35 : vector<1x3x64xbf16> to vector<3x64xbf16>
    %c6_37 = arith.constant 6 : index
    %c0_38 = arith.constant 0 : index
    %c0_39 = arith.constant 0 : index
    %37 = vector.load %arg2[%c6_37, %c0_38, %c0_39] : memref<9x64x128xbf16, #tpu.memory_space<vmem>>, vector<1x64x128xbf16>
    %38 = vector.shape_cast %37 : vector<1x64x128xbf16> to vector<64x128xbf16>
    %cst_40 = arith.constant dense<0.000000e+00> : vector<3x128xf32>
    %39 = tpu.matmul %36, %38, %cst_40 {dimension_numbers = #tpu.dot_dimension_numbers<[1], [0], [0], [1], [0, 0, 1, 1], [], []>} : vector<3x64xbf16>, vector<64x128xbf16>, vector<3x128xf32> -> vector<3x128xf32>
    %40 = arith.addf %34, %39 : vector<3x128xf32>
    %c0_41 = arith.constant 0 : index
    %c7 = arith.constant 7 : index
    %c0_42 = arith.constant 0 : index
    %41 = vector.load %arg1[%c0_41, %c7, %c0_42] : memref<1x12x64xbf16, #tpu.memory_space<vmem>>, vector<1x3x64xbf16>
    %42 = vector.shape_cast %41 : vector<1x3x64xbf16> to vector<3x64xbf16>
    %c7_43 = arith.constant 7 : index
    %c0_44 = arith.constant 0 : index
    %c0_45 = arith.constant 0 : index
    %43 = vector.load %arg2[%c7_43, %c0_44, %c0_45] : memref<9x64x128xbf16, #tpu.memory_space<vmem>>, vector<1x64x128xbf16>
    %44 = vector.shape_cast %43 : vector<1x64x128xbf16> to vector<64x128xbf16>
    %cst_46 = arith.constant dense<0.000000e+00> : vector<3x128xf32>
    %45 = tpu.matmul %42, %44, %cst_46 {dimension_numbers = #tpu.dot_dimension_numbers<[1], [0], [0], [1], [0, 0, 1, 1], [], []>} : vector<3x64xbf16>, vector<64x128xbf16>, vector<3x128xf32> -> vector<3x128xf32>
    %46 = arith.addf %40, %45 : vector<3x128xf32>
    %c0_47 = arith.constant 0 : index
    %c8 = arith.constant 8 : index
    %c0_48 = arith.constant 0 : index
    %47 = vector.load %arg1[%c0_47, %c8, %c0_48] : memref<1x12x64xbf16, #tpu.memory_space<vmem>>, vector<1x3x64xbf16>
    %48 = vector.shape_cast %47 : vector<1x3x64xbf16> to vector<3x64xbf16>
    %c8_49 = arith.constant 8 : index
    %c0_50 = arith.constant 0 : index
    %c0_51 = arith.constant 0 : index
    %49 = vector.load %arg2[%c8_49, %c0_50, %c0_51] : memref<9x64x128xbf16, #tpu.memory_space<vmem>>, vector<1x64x128xbf16>
    %50 = vector.shape_cast %49 : vector<1x64x128xbf16> to vector<64x128xbf16>
    %cst_52 = arith.constant dense<0.000000e+00> : vector<3x128xf32>
    %51 = tpu.matmul %48, %50, %cst_52 {dimension_numbers = #tpu.dot_dimension_numbers<[1], [0], [0], [1], [0, 0, 1, 1], [], []>} : vector<3x64xbf16>, vector<64x128xbf16>, vector<3x128xf32> -> vector<3x128xf32>
    %52 = arith.addf %46, %51 : vector<3x128xf32>
    %c0_53 = arith.constant 0 : index
    %c0_54 = arith.constant 0 : index
    %53 = vector.load %arg3[%c0_53, %c0_54] : memref<1x128xf32, #tpu.memory_space<vmem>>, vector<1x128xf32>
    %54 = vector.broadcast %53 : vector<1x128xf32> to vector<3x128xf32>
    %55 = arith.addf %52, %54 : vector<3x128xf32>
    %cst_55 = arith.constant 0.000000e+00 : f32
    %56 = vector.broadcast %cst_55 : f32 to vector<3x128xf32>
    %57 = arith.maximumf %55, %56 : vector<3x128xf32>
    %58 = arith.truncf %57 : vector<3x128xf32> to vector<3x128xbf16>
    %c0_56 = arith.constant 0 : index
    %c0_57 = arith.constant 0 : index
    %c0_58 = arith.constant 0 : index
    %59 = vector.load %arg4[%c0_56, %c0_57, %c0_58] : memref<1x3x128xbf16, #tpu.memory_space<vmem>>, vector<1x3x128xbf16>
    %60 = vector.shape_cast %59 : vector<1x3x128xbf16> to vector<3x128xbf16>
    %61 = vector.shape_cast %58 : vector<3x128xbf16> to vector<1x3x128xbf16>
    tpu.vector_store %arg4[%c0_56, %c0_57, %c0_58], %61 {strides = array<i32>} : memref<1x3x128xbf16, #tpu.memory_space<vmem>>, vector<1x3x128xbf16>,
    return
  }
  func.func @transform_0(%arg0: i32) -> (i32, i32, i32) {
    %c0_i32 = arith.constant 0 : i32
    %c0_i32_0 = arith.constant 0 : i32
    %c0_i32_1 = arith.constant 0 : i32
    return %arg0, %c0_i32, %c0_i32_0 : i32, i32, i32
  }
  func.func @transform_1(%arg0: i32) -> (i32, i32, i32) {
    %c0_i32 = arith.constant 0 : i32
    %c0_i32_0 = arith.constant 0 : i32
    %c0_i32_1 = arith.constant 0 : i32
    %c0_i32_2 = arith.constant 0 : i32
    return %c0_i32, %c0_i32_0, %c0_i32_1 : i32, i32, i32
  }
  func.func @transform_2(%arg0: i32) -> (i32, i32) {
    %c0_i32 = arith.constant 0 : i32
    %c0_i32_0 = arith.constant 0 : i32
    %c0_i32_1 = arith.constant 0 : i32
    return %c0_i32, %c0_i32_0 : i32, i32
  }
  func.func @transform_3(%arg0: i32) -> (i32, i32, i32) {
    %c0_i32 = arith.constant 0 : i32
    %c0_i32_0 = arith.constant 0 : i32
    %c0_i32_1 = arith.constant 0 : i32
    return %arg0, %c0_i32, %c0_i32_0 : i32, i32, i32
  }
}

module attributes {stable_mosaic.version = 11 : i64} {
  func.func @_conv_taps_kernel(%arg0: i32, %arg1: memref<1x20x32xbf16, #tpu.memory_space<vmem>>, %arg2: memref<1x20x32xbf16, #tpu.memory_space<vmem>>, %arg3: memref<9x32x64xbf16, #tpu.memory_space<vmem>>, %arg4: memref<9x32x64xbf16, #tpu.memory_space<vmem>>, %arg5: memref<1x64xf32, #tpu.memory_space<vmem>>, %arg6: memref<1x8x64xbf16, #tpu.memory_space<vmem>>) attributes {dimension_semantics = [#tpu.dimension_semantics<parallel>], iteration_bounds = array<i64: 2>, scalar_prefetch = 0 : i64, scratch_operands = 0 : i64, tpu.core_type = #tpu.core_type<tc>, window_params = [{transform_indices = @transform_0, window_bounds = array<i64: 1, 20, 32>}, {transform_indices = @transform_1, window_bounds = array<i64: 1, 20, 32>}, {pipeline_mode = #tpu.pipeline_mode<synchronous>, transform_indices = @transform_2, window_bounds = array<i64: 9, 32, 64>}, {pipeline_mode = #tpu.pipeline_mode<synchronous>, transform_indices = @transform_3, window_bounds = array<i64: 9, 32, 64>}, {pipeline_mode = #tpu.pipeline_mode<synchronous>, transform_indices = @transform_4, window_bounds = array<i64: 1, 64>}, {transform_indices = @transform_5, window_bounds = array<i64: 1, 8, 64>}]} {
    %c0 = arith.constant 0 : index
    %c0_0 = arith.constant 0 : index
    %c0_1 = arith.constant 0 : index
    %0 = vector.load %arg1[%c0, %c0_0, %c0_1] : memref<1x20x32xbf16, #tpu.memory_space<vmem>>, vector<1x8x32xbf16>
    %1 = vector.shape_cast %0 : vector<1x8x32xbf16> to vector<8x32xbf16>
    %c0_2 = arith.constant 0 : index
    %c0_3 = arith.constant 0 : index
    %c0_4 = arith.constant 0 : index
    %2 = vector.load %arg3[%c0_2, %c0_3, %c0_4] : memref<9x32x64xbf16, #tpu.memory_space<vmem>>, vector<1x32x64xbf16>
    %3 = vector.shape_cast %2 : vector<1x32x64xbf16> to vector<32x64xbf16>
    %cst = arith.constant dense<0.000000e+00> : vector<8x64xf32>
    %4 = tpu.matmul %1, %3, %cst {dimension_numbers = #tpu.dot_dimension_numbers<[1], [0], [0], [1], [0, 0, 1, 1], [], []>} : vector<8x32xbf16>, vector<32x64xbf16>, vector<8x64xf32> -> vector<8x64xf32>
    %c0_5 = arith.constant 0 : index
    %c1 = arith.constant 1 : index
    %c0_6 = arith.constant 0 : index
    %5 = vector.load %arg1[%c0_5, %c1, %c0_6] : memref<1x20x32xbf16, #tpu.memory_space<vmem>>, vector<1x8x32xbf16>
    %6 = vector.shape_cast %5 : vector<1x8x32xbf16> to vector<8x32xbf16>
    %c1_7 = arith.constant 1 : index
    %c0_8 = arith.constant 0 : index
    %c0_9 = arith.constant 0 : index
    %7 = vector.load %arg3[%c1_7, %c0_8, %c0_9] : memref<9x32x64xbf16, #tpu.memory_space<vmem>>, vector<1x32x64xbf16>
    %8 = vector.shape_cast %7 : vector<1x32x64xbf16> to vector<32x64xbf16>
    %cst_10 = arith.constant dense<0.000000e+00> : vector<8x64xf32>
    %9 = tpu.matmul %6, %8, %cst_10 {dimension_numbers = #tpu.dot_dimension_numbers<[1], [0], [0], [1], [0, 0, 1, 1], [], []>} : vector<8x32xbf16>, vector<32x64xbf16>, vector<8x64xf32> -> vector<8x64xf32>
    %10 = arith.addf %4, %9 : vector<8x64xf32>
    %c0_11 = arith.constant 0 : index
    %c2 = arith.constant 2 : index
    %c0_12 = arith.constant 0 : index
    %11 = vector.load %arg1[%c0_11, %c2, %c0_12] : memref<1x20x32xbf16, #tpu.memory_space<vmem>>, vector<1x8x32xbf16>
    %12 = vector.shape_cast %11 : vector<1x8x32xbf16> to vector<8x32xbf16>
    %c2_13 = arith.constant 2 : index
    %c0_14 = arith.constant 0 : index
    %c0_15 = arith.constant 0 : index
    %13 = vector.load %arg3[%c2_13, %c0_14, %c0_15] : memref<9x32x64xbf16, #tpu.memory_space<vmem>>, vector<1x32x64xbf16>
    %14 = vector.shape_cast %13 : vector<1x32x64xbf16> to vector<32x64xbf16>
    %cst_16 = arith.constant dense<0.000000e+00> : vector<8x64xf32>
    %15 = tpu.matmul %12, %14, %cst_16 {dimension_numbers = #tpu.dot_dimension_numbers<[1], [0], [0], [1], [0, 0, 1, 1], [], []>} : vector<8x32xbf16>, vector<32x64xbf16>, vector<8x64xf32> -> vector<8x64xf32>
    %16 = arith.addf %10, %15 : vector<8x64xf32>
    %c0_17 = arith.constant 0 : index
    %c4 = arith.constant 4 : index
    %c0_18 = arith.constant 0 : index
    %17 = vector.load %arg1[%c0_17, %c4, %c0_18] : memref<1x20x32xbf16, #tpu.memory_space<vmem>>, vector<1x8x32xbf16>
    %18 = vector.shape_cast %17 : vector<1x8x32xbf16> to vector<8x32xbf16>
    %c3 = arith.constant 3 : index
    %c0_19 = arith.constant 0 : index
    %c0_20 = arith.constant 0 : index
    %19 = vector.load %arg3[%c3, %c0_19, %c0_20] : memref<9x32x64xbf16, #tpu.memory_space<vmem>>, vector<1x32x64xbf16>
    %20 = vector.shape_cast %19 : vector<1x32x64xbf16> to vector<32x64xbf16>
    %cst_21 = arith.constant dense<0.000000e+00> : vector<8x64xf32>
    %21 = tpu.matmul %18, %20, %cst_21 {dimension_numbers = #tpu.dot_dimension_numbers<[1], [0], [0], [1], [0, 0, 1, 1], [], []>} : vector<8x32xbf16>, vector<32x64xbf16>, vector<8x64xf32> -> vector<8x64xf32>
    %22 = arith.addf %16, %21 : vector<8x64xf32>
    %c0_22 = arith.constant 0 : index
    %c5 = arith.constant 5 : index
    %c0_23 = arith.constant 0 : index
    %23 = vector.load %arg1[%c0_22, %c5, %c0_23] : memref<1x20x32xbf16, #tpu.memory_space<vmem>>, vector<1x8x32xbf16>
    %24 = vector.shape_cast %23 : vector<1x8x32xbf16> to vector<8x32xbf16>
    %c4_24 = arith.constant 4 : index
    %c0_25 = arith.constant 0 : index
    %c0_26 = arith.constant 0 : index
    %25 = vector.load %arg3[%c4_24, %c0_25, %c0_26] : memref<9x32x64xbf16, #tpu.memory_space<vmem>>, vector<1x32x64xbf16>
    %26 = vector.shape_cast %25 : vector<1x32x64xbf16> to vector<32x64xbf16>
    %cst_27 = arith.constant dense<0.000000e+00> : vector<8x64xf32>
    %27 = tpu.matmul %24, %26, %cst_27 {dimension_numbers = #tpu.dot_dimension_numbers<[1], [0], [0], [1], [0, 0, 1, 1], [], []>} : vector<8x32xbf16>, vector<32x64xbf16>, vector<8x64xf32> -> vector<8x64xf32>
    %28 = arith.addf %22, %27 : vector<8x64xf32>
    %c0_28 = arith.constant 0 : index
    %c6 = arith.constant 6 : index
    %c0_29 = arith.constant 0 : index
    %29 = vector.load %arg1[%c0_28, %c6, %c0_29] : memref<1x20x32xbf16, #tpu.memory_space<vmem>>, vector<1x8x32xbf16>
    %30 = vector.shape_cast %29 : vector<1x8x32xbf16> to vector<8x32xbf16>
    %c5_30 = arith.constant 5 : index
    %c0_31 = arith.constant 0 : index
    %c0_32 = arith.constant 0 : index
    %31 = vector.load %arg3[%c5_30, %c0_31, %c0_32] : memref<9x32x64xbf16, #tpu.memory_space<vmem>>, vector<1x32x64xbf16>
    %32 = vector.shape_cast %31 : vector<1x32x64xbf16> to vector<32x64xbf16>
    %cst_33 = arith.constant dense<0.000000e+00> : vector<8x64xf32>
    %33 = tpu.matmul %30, %32, %cst_33 {dimension_numbers = #tpu.dot_dimension_numbers<[1], [0], [0], [1], [0, 0, 1, 1], [], []>} : vector<8x32xbf16>, vector<32x64xbf16>, vector<8x64xf32> -> vector<8x64xf32>
    %34 = arith.addf %28, %33 : vector<8x64xf32>
    %c0_34 = arith.constant 0 : index
    %c8 = arith.constant 8 : index
    %c0_35 = arith.constant 0 : index
    %35 = vector.load %arg1[%c0_34, %c8, %c0_35] : memref<1x20x32xbf16, #tpu.memory_space<vmem>>, vector<1x8x32xbf16>
    %36 = vector.shape_cast %35 : vector<1x8x32xbf16> to vector<8x32xbf16>
    %c6_36 = arith.constant 6 : index
    %c0_37 = arith.constant 0 : index
    %c0_38 = arith.constant 0 : index
    %37 = vector.load %arg3[%c6_36, %c0_37, %c0_38] : memref<9x32x64xbf16, #tpu.memory_space<vmem>>, vector<1x32x64xbf16>
    %38 = vector.shape_cast %37 : vector<1x32x64xbf16> to vector<32x64xbf16>
    %cst_39 = arith.constant dense<0.000000e+00> : vector<8x64xf32>
    %39 = tpu.matmul %36, %38, %cst_39 {dimension_numbers = #tpu.dot_dimension_numbers<[1], [0], [0], [1], [0, 0, 1, 1], [], []>} : vector<8x32xbf16>, vector<32x64xbf16>, vector<8x64xf32> -> vector<8x64xf32>
    %40 = arith.addf %34, %39 : vector<8x64xf32>
    %c0_40 = arith.constant 0 : index
    %c9 = arith.constant 9 : index
    %c0_41 = arith.constant 0 : index
    %41 = vector.load %arg1[%c0_40, %c9, %c0_41] : memref<1x20x32xbf16, #tpu.memory_space<vmem>>, vector<1x8x32xbf16>
    %42 = vector.shape_cast %41 : vector<1x8x32xbf16> to vector<8x32xbf16>
    %c7 = arith.constant 7 : index
    %c0_42 = arith.constant 0 : index
    %c0_43 = arith.constant 0 : index
    %43 = vector.load %arg3[%c7, %c0_42, %c0_43] : memref<9x32x64xbf16, #tpu.memory_space<vmem>>, vector<1x32x64xbf16>
    %44 = vector.shape_cast %43 : vector<1x32x64xbf16> to vector<32x64xbf16>
    %cst_44 = arith.constant dense<0.000000e+00> : vector<8x64xf32>
    %45 = tpu.matmul %42, %44, %cst_44 {dimension_numbers = #tpu.dot_dimension_numbers<[1], [0], [0], [1], [0, 0, 1, 1], [], []>} : vector<8x32xbf16>, vector<32x64xbf16>, vector<8x64xf32> -> vector<8x64xf32>
    %46 = arith.addf %40, %45 : vector<8x64xf32>
    %c0_45 = arith.constant 0 : index
    %c10 = arith.constant 10 : index
    %c0_46 = arith.constant 0 : index
    %47 = vector.load %arg1[%c0_45, %c10, %c0_46] : memref<1x20x32xbf16, #tpu.memory_space<vmem>>, vector<1x8x32xbf16>
    %48 = vector.shape_cast %47 : vector<1x8x32xbf16> to vector<8x32xbf16>
    %c8_47 = arith.constant 8 : index
    %c0_48 = arith.constant 0 : index
    %c0_49 = arith.constant 0 : index
    %49 = vector.load %arg3[%c8_47, %c0_48, %c0_49] : memref<9x32x64xbf16, #tpu.memory_space<vmem>>, vector<1x32x64xbf16>
    %50 = vector.shape_cast %49 : vector<1x32x64xbf16> to vector<32x64xbf16>
    %cst_50 = arith.constant dense<0.000000e+00> : vector<8x64xf32>
    %51 = tpu.matmul %48, %50, %cst_50 {dimension_numbers = #tpu.dot_dimension_numbers<[1], [0], [0], [1], [0, 0, 1, 1], [], []>} : vector<8x32xbf16>, vector<32x64xbf16>, vector<8x64xf32> -> vector<8x64xf32>
    %52 = arith.addf %46, %51 : vector<8x64xf32>
    %c0_51 = arith.constant 0 : index
    %c0_52 = arith.constant 0 : index
    %c0_53 = arith.constant 0 : index
    %53 = vector.load %arg2[%c0_51, %c0_52, %c0_53] : memref<1x20x32xbf16, #tpu.memory_space<vmem>>, vector<1x8x32xbf16>
    %54 = vector.shape_cast %53 : vector<1x8x32xbf16> to vector<8x32xbf16>
    %c0_54 = arith.constant 0 : index
    %c0_55 = arith.constant 0 : index
    %c0_56 = arith.constant 0 : index
    %55 = vector.load %arg4[%c0_54, %c0_55, %c0_56] : memref<9x32x64xbf16, #tpu.memory_space<vmem>>, vector<1x32x64xbf16>
    %56 = vector.shape_cast %55 : vector<1x32x64xbf16> to vector<32x64xbf16>
    %cst_57 = arith.constant dense<0.000000e+00> : vector<8x64xf32>
    %57 = tpu.matmul %54, %56, %cst_57 {dimension_numbers = #tpu.dot_dimension_numbers<[1], [0], [0], [1], [0, 0, 1, 1], [], []>} : vector<8x32xbf16>, vector<32x64xbf16>, vector<8x64xf32> -> vector<8x64xf32>
    %58 = arith.addf %52, %57 : vector<8x64xf32>
    %c0_58 = arith.constant 0 : index
    %c1_59 = arith.constant 1 : index
    %c0_60 = arith.constant 0 : index
    %59 = vector.load %arg2[%c0_58, %c1_59, %c0_60] : memref<1x20x32xbf16, #tpu.memory_space<vmem>>, vector<1x8x32xbf16>
    %60 = vector.shape_cast %59 : vector<1x8x32xbf16> to vector<8x32xbf16>
    %c1_61 = arith.constant 1 : index
    %c0_62 = arith.constant 0 : index
    %c0_63 = arith.constant 0 : index
    %61 = vector.load %arg4[%c1_61, %c0_62, %c0_63] : memref<9x32x64xbf16, #tpu.memory_space<vmem>>, vector<1x32x64xbf16>
    %62 = vector.shape_cast %61 : vector<1x32x64xbf16> to vector<32x64xbf16>
    %cst_64 = arith.constant dense<0.000000e+00> : vector<8x64xf32>
    %63 = tpu.matmul %60, %62, %cst_64 {dimension_numbers = #tpu.dot_dimension_numbers<[1], [0], [0], [1], [0, 0, 1, 1], [], []>} : vector<8x32xbf16>, vector<32x64xbf16>, vector<8x64xf32> -> vector<8x64xf32>
    %64 = arith.addf %58, %63 : vector<8x64xf32>
    %c0_65 = arith.constant 0 : index
    %c2_66 = arith.constant 2 : index
    %c0_67 = arith.constant 0 : index
    %65 = vector.load %arg2[%c0_65, %c2_66, %c0_67] : memref<1x20x32xbf16, #tpu.memory_space<vmem>>, vector<1x8x32xbf16>
    %66 = vector.shape_cast %65 : vector<1x8x32xbf16> to vector<8x32xbf16>
    %c2_68 = arith.constant 2 : index
    %c0_69 = arith.constant 0 : index
    %c0_70 = arith.constant 0 : index
    %67 = vector.load %arg4[%c2_68, %c0_69, %c0_70] : memref<9x32x64xbf16, #tpu.memory_space<vmem>>, vector<1x32x64xbf16>
    %68 = vector.shape_cast %67 : vector<1x32x64xbf16> to vector<32x64xbf16>
    %cst_71 = arith.constant dense<0.000000e+00> : vector<8x64xf32>
    %69 = tpu.matmul %66, %68, %cst_71 {dimension_numbers = #tpu.dot_dimension_numbers<[1], [0], [0], [1], [0, 0, 1, 1], [], []>} : vector<8x32xbf16>, vector<32x64xbf16>, vector<8x64xf32> -> vector<8x64xf32>
    %70 = arith.addf %64, %69 : vector<8x64xf32>
    %c0_72 = arith.constant 0 : index
    %c4_73 = arith.constant 4 : index
    %c0_74 = arith.constant 0 : index
    %71 = vector.load %arg2[%c0_72, %c4_73, %c0_74] : memref<1x20x32xbf16, #tpu.memory_space<vmem>>, vector<1x8x32xbf16>
    %72 = vector.shape_cast %71 : vector<1x8x32xbf16> to vector<8x32xbf16>
    %c3_75 = arith.constant 3 : index
    %c0_76 = arith.constant 0 : index
    %c0_77 = arith.constant 0 : index
    %73 = vector.load %arg4[%c3_75, %c0_76, %c0_77] : memref<9x32x64xbf16, #tpu.memory_space<vmem>>, vector<1x32x64xbf16>
    %74 = vector.shape_cast %73 : vector<1x32x64xbf16> to vector<32x64xbf16>
    %cst_78 = arith.constant dense<0.000000e+00> : vector<8x64xf32>
    %75 = tpu.matmul %72, %74, %cst_78 {dimension_numbers = #tpu.dot_dimension_numbers<[1], [0], [0], [1], [0, 0, 1, 1], [], []>} : vector<8x32xbf16>, vector<32x64xbf16>, vector<8x64xf32> -> vector<8x64xf32>
    %76 = arith.addf %70, %75 : vector<8x64xf32>
    %c0_79 = arith.constant 0 : index
    %c5_80 = arith.constant 5 : index
    %c0_81 = arith.constant 0 : index
    %77 = vector.load %arg2[%c0_79, %c5_80, %c0_81] : memref<1x20x32xbf16, #tpu.memory_space<vmem>>, vector<1x8x32xbf16>
    %78 = vector.shape_cast %77 : vector<1x8x32xbf16> to vector<8x32xbf16>
    %c4_82 = arith.constant 4 : index
    %c0_83 = arith.constant 0 : index
    %c0_84 = arith.constant 0 : index
    %79 = vector.load %arg4[%c4_82, %c0_83, %c0_84] : memref<9x32x64xbf16, #tpu.memory_space<vmem>>, vector<1x32x64xbf16>
    %80 = vector.shape_cast %79 : vector<1x32x64xbf16> to vector<32x64xbf16>
    %cst_85 = arith.constant dense<0.000000e+00> : vector<8x64xf32>
    %81 = tpu.matmul %78, %80, %cst_85 {dimension_numbers = #tpu.dot_dimension_numbers<[1], [0], [0], [1], [0, 0, 1, 1], [], []>} : vector<8x32xbf16>, vector<32x64xbf16>, vector<8x64xf32> -> vector<8x64xf32>
    %82 = arith.addf %76, %81 : vector<8x64xf32>
    %c0_86 = arith.constant 0 : index
    %c6_87 = arith.constant 6 : index
    %c0_88 = arith.constant 0 : index
    %83 = vector.load %arg2[%c0_86, %c6_87, %c0_88] : memref<1x20x32xbf16, #tpu.memory_space<vmem>>, vector<1x8x32xbf16>
    %84 = vector.shape_cast %83 : vector<1x8x32xbf16> to vector<8x32xbf16>
    %c5_89 = arith.constant 5 : index
    %c0_90 = arith.constant 0 : index
    %c0_91 = arith.constant 0 : index
    %85 = vector.load %arg4[%c5_89, %c0_90, %c0_91] : memref<9x32x64xbf16, #tpu.memory_space<vmem>>, vector<1x32x64xbf16>
    %86 = vector.shape_cast %85 : vector<1x32x64xbf16> to vector<32x64xbf16>
    %cst_92 = arith.constant dense<0.000000e+00> : vector<8x64xf32>
    %87 = tpu.matmul %84, %86, %cst_92 {dimension_numbers = #tpu.dot_dimension_numbers<[1], [0], [0], [1], [0, 0, 1, 1], [], []>} : vector<8x32xbf16>, vector<32x64xbf16>, vector<8x64xf32> -> vector<8x64xf32>
    %88 = arith.addf %82, %87 : vector<8x64xf32>
    %c0_93 = arith.constant 0 : index
    %c8_94 = arith.constant 8 : index
    %c0_95 = arith.constant 0 : index
    %89 = vector.load %arg2[%c0_93, %c8_94, %c0_95] : memref<1x20x32xbf16, #tpu.memory_space<vmem>>, vector<1x8x32xbf16>
    %90 = vector.shape_cast %89 : vector<1x8x32xbf16> to vector<8x32xbf16>
    %c6_96 = arith.constant 6 : index
    %c0_97 = arith.constant 0 : index
    %c0_98 = arith.constant 0 : index
    %91 = vector.load %arg4[%c6_96, %c0_97, %c0_98] : memref<9x32x64xbf16, #tpu.memory_space<vmem>>, vector<1x32x64xbf16>
    %92 = vector.shape_cast %91 : vector<1x32x64xbf16> to vector<32x64xbf16>
    %cst_99 = arith.constant dense<0.000000e+00> : vector<8x64xf32>
    %93 = tpu.matmul %90, %92, %cst_99 {dimension_numbers = #tpu.dot_dimension_numbers<[1], [0], [0], [1], [0, 0, 1, 1], [], []>} : vector<8x32xbf16>, vector<32x64xbf16>, vector<8x64xf32> -> vector<8x64xf32>
    %94 = arith.addf %88, %93 : vector<8x64xf32>
    %c0_100 = arith.constant 0 : index
    %c9_101 = arith.constant 9 : index
    %c0_102 = arith.constant 0 : index
    %95 = vector.load %arg2[%c0_100, %c9_101, %c0_102] : memref<1x20x32xbf16, #tpu.memory_space<vmem>>, vector<1x8x32xbf16>
    %96 = vector.shape_cast %95 : vector<1x8x32xbf16> to vector<8x32xbf16>
    %c7_103 = arith.constant 7 : index
    %c0_104 = arith.constant 0 : index
    %c0_105 = arith.constant 0 : index
    %97 = vector.load %arg4[%c7_103, %c0_104, %c0_105] : memref<9x32x64xbf16, #tpu.memory_space<vmem>>, vector<1x32x64xbf16>
    %98 = vector.shape_cast %97 : vector<1x32x64xbf16> to vector<32x64xbf16>
    %cst_106 = arith.constant dense<0.000000e+00> : vector<8x64xf32>
    %99 = tpu.matmul %96, %98, %cst_106 {dimension_numbers = #tpu.dot_dimension_numbers<[1], [0], [0], [1], [0, 0, 1, 1], [], []>} : vector<8x32xbf16>, vector<32x64xbf16>, vector<8x64xf32> -> vector<8x64xf32>
    %100 = arith.addf %94, %99 : vector<8x64xf32>
    %c0_107 = arith.constant 0 : index
    %c10_108 = arith.constant 10 : index
    %c0_109 = arith.constant 0 : index
    %101 = vector.load %arg2[%c0_107, %c10_108, %c0_109] : memref<1x20x32xbf16, #tpu.memory_space<vmem>>, vector<1x8x32xbf16>
    %102 = vector.shape_cast %101 : vector<1x8x32xbf16> to vector<8x32xbf16>
    %c8_110 = arith.constant 8 : index
    %c0_111 = arith.constant 0 : index
    %c0_112 = arith.constant 0 : index
    %103 = vector.load %arg4[%c8_110, %c0_111, %c0_112] : memref<9x32x64xbf16, #tpu.memory_space<vmem>>, vector<1x32x64xbf16>
    %104 = vector.shape_cast %103 : vector<1x32x64xbf16> to vector<32x64xbf16>
    %cst_113 = arith.constant dense<0.000000e+00> : vector<8x64xf32>
    %105 = tpu.matmul %102, %104, %cst_113 {dimension_numbers = #tpu.dot_dimension_numbers<[1], [0], [0], [1], [0, 0, 1, 1], [], []>} : vector<8x32xbf16>, vector<32x64xbf16>, vector<8x64xf32> -> vector<8x64xf32>
    %106 = arith.addf %100, %105 : vector<8x64xf32>
    %c0_114 = arith.constant 0 : index
    %c0_115 = arith.constant 0 : index
    %107 = vector.load %arg5[%c0_114, %c0_115] : memref<1x64xf32, #tpu.memory_space<vmem>>, vector<1x64xf32>
    %108 = vector.broadcast %107 : vector<1x64xf32> to vector<8x64xf32>
    %109 = arith.addf %106, %108 : vector<8x64xf32>
    %cst_116 = arith.constant 0.000000e+00 : f32
    %110 = vector.broadcast %cst_116 : f32 to vector<8x64xf32>
    %111 = arith.maximumf %109, %110 : vector<8x64xf32>
    %112 = arith.truncf %111 : vector<8x64xf32> to vector<8x64xbf16>
    %c0_117 = arith.constant 0 : index
    %c0_118 = arith.constant 0 : index
    %c0_119 = arith.constant 0 : index
    %113 = vector.load %arg6[%c0_117, %c0_118, %c0_119] : memref<1x8x64xbf16, #tpu.memory_space<vmem>>, vector<1x8x64xbf16>
    %114 = vector.shape_cast %113 : vector<1x8x64xbf16> to vector<8x64xbf16>
    %115 = vector.shape_cast %112 : vector<8x64xbf16> to vector<1x8x64xbf16>
    tpu.vector_store %arg6[%c0_117, %c0_118, %c0_119], %115 {strides = array<i32>} : memref<1x8x64xbf16, #tpu.memory_space<vmem>>, vector<1x8x64xbf16>,
    return
  }
  func.func @transform_0(%arg0: i32) -> (i32, i32, i32) {
    %c0_i32 = arith.constant 0 : i32
    %c0_i32_0 = arith.constant 0 : i32
    %c0_i32_1 = arith.constant 0 : i32
    return %arg0, %c0_i32, %c0_i32_0 : i32, i32, i32
  }
  func.func @transform_1(%arg0: i32) -> (i32, i32, i32) {
    %c0_i32 = arith.constant 0 : i32
    %c0_i32_0 = arith.constant 0 : i32
    %c0_i32_1 = arith.constant 0 : i32
    return %arg0, %c0_i32, %c0_i32_0 : i32, i32, i32
  }
  func.func @transform_2(%arg0: i32) -> (i32, i32, i32) {
    %c0_i32 = arith.constant 0 : i32
    %c0_i32_0 = arith.constant 0 : i32
    %c0_i32_1 = arith.constant 0 : i32
    %c0_i32_2 = arith.constant 0 : i32
    return %c0_i32, %c0_i32_0, %c0_i32_1 : i32, i32, i32
  }
  func.func @transform_3(%arg0: i32) -> (i32, i32, i32) {
    %c0_i32 = arith.constant 0 : i32
    %c0_i32_0 = arith.constant 0 : i32
    %c0_i32_1 = arith.constant 0 : i32
    %c0_i32_2 = arith.constant 0 : i32
    return %c0_i32, %c0_i32_0, %c0_i32_1 : i32, i32, i32
  }
  func.func @transform_4(%arg0: i32) -> (i32, i32) {
    %c0_i32 = arith.constant 0 : i32
    %c0_i32_0 = arith.constant 0 : i32
    %c0_i32_1 = arith.constant 0 : i32
    return %c0_i32, %c0_i32_0 : i32, i32
  }
  func.func @transform_5(%arg0: i32) -> (i32, i32, i32) {
    %c0_i32 = arith.constant 0 : i32
    %c0_i32_0 = arith.constant 0 : i32
    %c0_i32_1 = arith.constant 0 : i32
    return %arg0, %c0_i32, %c0_i32_0 : i32, i32, i32
  }
}

module attributes {stable_mosaic.version = 11 : i64} {
  func.func @_conv_taps_kernel(%arg0: i32, %arg1: memref<1x42x16xbf16, #tpu.memory_space<vmem>>, %arg2: memref<1x42x16xbf16, #tpu.memory_space<vmem>>, %arg3: memref<9x16x32xbf16, #tpu.memory_space<vmem>>, %arg4: memref<9x16x32xbf16, #tpu.memory_space<vmem>>, %arg5: memref<1x32xf32, #tpu.memory_space<vmem>>, %arg6: memref<1x24x32xbf16, #tpu.memory_space<vmem>>) attributes {dimension_semantics = [#tpu.dimension_semantics<parallel>], iteration_bounds = array<i64: 2>, scalar_prefetch = 0 : i64, scratch_operands = 0 : i64, tpu.core_type = #tpu.core_type<tc>, window_params = [{transform_indices = @transform_0, window_bounds = array<i64: 1, 42, 16>}, {transform_indices = @transform_1, window_bounds = array<i64: 1, 42, 16>}, {pipeline_mode = #tpu.pipeline_mode<synchronous>, transform_indices = @transform_2, window_bounds = array<i64: 9, 16, 32>}, {pipeline_mode = #tpu.pipeline_mode<synchronous>, transform_indices = @transform_3, window_bounds = array<i64: 9, 16, 32>}, {pipeline_mode = #tpu.pipeline_mode<synchronous>, transform_indices = @transform_4, window_bounds = array<i64: 1, 32>}, {transform_indices = @transform_5, window_bounds = array<i64: 1, 24, 32>}]} {
    %c0 = arith.constant 0 : index
    %c0_0 = arith.constant 0 : index
    %c0_1 = arith.constant 0 : index
    %0 = vector.load %arg1[%c0, %c0_0, %c0_1] : memref<1x42x16xbf16, #tpu.memory_space<vmem>>, vector<1x24x16xbf16>
    %1 = vector.shape_cast %0 : vector<1x24x16xbf16> to vector<24x16xbf16>
    %c0_2 = arith.constant 0 : index
    %c0_3 = arith.constant 0 : index
    %c0_4 = arith.constant 0 : index
    %2 = vector.load %arg3[%c0_2, %c0_3, %c0_4] : memref<9x16x32xbf16, #tpu.memory_space<vmem>>, vector<1x16x32xbf16>
    %3 = vector.shape_cast %2 : vector<1x16x32xbf16> to vector<16x32xbf16>
    %cst = arith.constant dense<0.000000e+00> : vector<24x32xf32>
    %4 = tpu.matmul %1, %3, %cst {dimension_numbers = #tpu.dot_dimension_numbers<[1], [0], [0], [1], [0, 0, 1, 1], [], []>} : vector<24x16xbf16>, vector<16x32xbf16>, vector<24x32xf32> -> vector<24x32xf32>
    %c0_5 = arith.constant 0 : index
    %c1 = arith.constant 1 : index
    %c0_6 = arith.constant 0 : index
    %5 = vector.load %arg1[%c0_5, %c1, %c0_6] : memref<1x42x16xbf16, #tpu.memory_space<vmem>>, vector<1x24x16xbf16>
    %6 = vector.shape_cast %5 : vector<1x24x16xbf16> to vector<24x16xbf16>
    %c1_7 = arith.constant 1 : index
    %c0_8 = arith.constant 0 : index
    %c0_9 = arith.constant 0 : index
    %7 = vector.load %arg3[%c1_7, %c0_8, %c0_9] : memref<9x16x32xbf16, #tpu.memory_space<vmem>>, vector<1x16x32xbf16>
    %8 = vector.shape_cast %7 : vector<1x16x32xbf16> to vector<16x32xbf16>
    %cst_10 = arith.constant dense<0.000000e+00> : vector<24x32xf32>
    %9 = tpu.matmul %6, %8, %cst_10 {dimension_numbers = #tpu.dot_dimension_numbers<[1], [0], [0], [1], [0, 0, 1, 1], [], []>} : vector<24x16xbf16>, vector<16x32xbf16>, vector<24x32xf32> -> vector<24x32xf32>
    %10 = arith.addf %4, %9 : vector<24x32xf32>
    %c0_11 = arith.constant 0 : index
    %c2 = arith.constant 2 : index
    %c0_12 = arith.constant 0 : index
    %11 = vector.load %arg1[%c0_11, %c2, %c0_12] : memref<1x42x16xbf16, #tpu.memory_space<vmem>>, vector<1x24x16xbf16>
    %12 = vector.shape_cast %11 : vector<1x24x16xbf16> to vector<24x16xbf16>
    %c2_13 = arith.constant 2 : index
    %c0_14 = arith.constant 0 : index
    %c0_15 = arith.constant 0 : index
    %13 = vector.load %arg3[%c2_13, %c0_14, %c0_15] : memref<9x16x32xbf16, #tpu.memory_space<vmem>>, vector<1x16x32xbf16>
    %14 = vector.shape_cast %13 : vector<1x16x32xbf16> to vector<16x32xbf16>
    %cst_16 = arith.constant dense<0.000000e+00> : vector<24x32xf32>
    %15 = tpu.matmul %12, %14, %cst_16 {dimension_numbers = #tpu.dot_dimension_numbers<[1], [0], [0], [1], [0, 0, 1, 1], [], []>} : vector<24x16xbf16>, vector<16x32xbf16>, vector<24x32xf32> -> vector<24x32xf32>
    %16 = arith.addf %10, %15 : vector<24x32xf32>
    %c0_17 = arith.constant 0 : index
    %c6 = arith.constant 6 : index
    %c0_18 = arith.constant 0 : index
    %17 = vector.load %arg1[%c0_17, %c6, %c0_18] : memref<1x42x16xbf16, #tpu.memory_space<vmem>>, vector<1x24x16xbf16>
    %18 = vector.shape_cast %17 : vector<1x24x16xbf16> to vector<24x16xbf16>
    %c3 = arith.constant 3 : index
    %c0_19 = arith.constant 0 : index
    %c0_20 = arith.constant 0 : index
    %19 = vector.load %arg3[%c3, %c0_19, %c0_20] : memref<9x16x32xbf16, #tpu.memory_space<vmem>>, vector<1x16x32xbf16>
    %20 = vector.shape_cast %19 : vector<1x16x32xbf16> to vector<16x32xbf16>
    %cst_21 = arith.constant dense<0.000000e+00> : vector<24x32xf32>
    %21 = tpu.matmul %18, %20, %cst_21 {dimension_numbers = #tpu.dot_dimension_numbers<[1], [0], [0], [1], [0, 0, 1, 1], [], []>} : vector<24x16xbf16>, vector<16x32xbf16>, vector<24x32xf32> -> vector<24x32xf32>
    %22 = arith.addf %16, %21 : vector<24x32xf32>
    %c0_22 = arith.constant 0 : index
    %c7 = arith.constant 7 : index
    %c0_23 = arith.constant 0 : index
    %23 = vector.load %arg1[%c0_22, %c7, %c0_23] : memref<1x42x16xbf16, #tpu.memory_space<vmem>>, vector<1x24x16xbf16>
    %24 = vector.shape_cast %23 : vector<1x24x16xbf16> to vector<24x16xbf16>
    %c4 = arith.constant 4 : index
    %c0_24 = arith.constant 0 : index
    %c0_25 = arith.constant 0 : index
    %25 = vector.load %arg3[%c4, %c0_24, %c0_25] : memref<9x16x32xbf16, #tpu.memory_space<vmem>>, vector<1x16x32xbf16>
    %26 = vector.shape_cast %25 : vector<1x16x32xbf16> to vector<16x32xbf16>
    %cst_26 = arith.constant dense<0.000000e+00> : vector<24x32xf32>
    %27 = tpu.matmul %24, %26, %cst_26 {dimension_numbers = #tpu.dot_dimension_numbers<[1], [0], [0], [1], [0, 0, 1, 1], [], []>} : vector<24x16xbf16>, vector<16x32xbf16>, vector<24x32xf32> -> vector<24x32xf32>
    %28 = arith.addf %22, %27 : vector<24x32xf32>
    %c0_27 = arith.constant 0 : index
    %c8 = arith.constant 8 : index
    %c0_28 = arith.constant 0 : index
    %29 = vector.load %arg1[%c0_27, %c8, %c0_28] : memref<1x42x16xbf16, #tpu.memory_space<vmem>>, vector<1x24x16xbf16>
    %30 = vector.shape_cast %29 : vector<1x24x16xbf16> to vector<24x16xbf16>
    %c5 = arith.constant 5 : index
    %c0_29 = arith.constant 0 : index
    %c0_30 = arith.constant 0 : index
    %31 = vector.load %arg3[%c5, %c0_29, %c0_30] : memref<9x16x32xbf16, #tpu.memory_space<vmem>>, vector<1x16x32xbf16>
    %32 = vector.shape_cast %31 : vector<1x16x32xbf16> to vector<16x32xbf16>
    %cst_31 = arith.constant dense<0.000000e+00> : vector<24x32xf32>
    %33 = tpu.matmul %30, %32, %cst_31 {dimension_numbers = #tpu.dot_dimension_numbers<[1], [0], [0], [1], [0, 0, 1, 1], [], []>} : vector<24x16xbf16>, vector<16x32xbf16>, vector<24x32xf32> -> vector<24x32xf32>
    %34 = arith.addf %28, %33 : vector<24x32xf32>
    %c0_32 = arith.constant 0 : index
    %c12 = arith.constant 12 : index
    %c0_33 = arith.constant 0 : index
    %35 = vector.load %arg1[%c0_32, %c12, %c0_33] : memref<1x42x16xbf16, #tpu.memory_space<vmem>>, vector<1x24x16xbf16>
    %36 = vector.shape_cast %35 : vector<1x24x16xbf16> to vector<24x16xbf16>
    %c6_34 = arith.constant 6 : index
    %c0_35 = arith.constant 0 : index
    %c0_36 = arith.constant 0 : index
    %37 = vector.load %arg3[%c6_34, %c0_35, %c0_36] : memref<9x16x32xbf16, #tpu.memory_space<vmem>>, vector<1x16x32xbf16>
    %38 = vector.shape_cast %37 : vector<1x16x32xbf16> to vector<16x32xbf16>
    %cst_37 = arith.constant dense<0.000000e+00> : vector<24x32xf32>
    %39 = tpu.matmul %36, %38, %cst_37 {dimension_numbers = #tpu.dot_dimension_numbers<[1], [0], [0], [1], [0, 0, 1, 1], [], []>} : vector<24x16xbf16>, vector<16x32xbf16>, vector<24x32xf32> -> vector<24x32xf32>
    %40 = arith.addf %34, %39 : vector<24x32xf32>
    %c0_38 = arith.constant 0 : index
    %c13 = arith.constant 13 : index
    %c0_39 = arith.constant 0 : index
    %41 = vector.load %arg1[%c0_38, %c13, %c0_39] : memref<1x42x16xbf16, #tpu.memory_space<vmem>>, vector<1x24x16xbf16>
    %42 = vector.shape_cast %41 : vector<1x24x16xbf16> to vector<24x16xbf16>
    %c7_40 = arith.constant 7 : index
    %c0_41 = arith.constant 0 : index
    %c0_42 = arith.constant 0 : index
    %43 = vector.load %arg3[%c7_40, %c0_41, %c0_42] : memref<9x16x32xbf16, #tpu.memory_space<vmem>>, vector<1x16x32xbf16>
    %44 = vector.shape_cast %43 : vector<1x16x32xbf16> to vector<16x32xbf16>
    %cst_43 = arith.constant dense<0.000000e+00> : vector<24x32xf32>
    %45 = tpu.matmul %42, %44, %cst_43 {dimension_numbers = #tpu.dot_dimension_numbers<[1], [0], [0], [1], [0, 0, 1, 1], [], []>} : vector<24x16xbf16>, vector<16x32xbf16>, vector<24x32xf32> -> vector<24x32xf32>
    %46 = arith.addf %40, %45 : vector<24x32xf32>
    %c0_44 = arith.constant 0 : index
    %c14 = arith.constant 14 : index
    %c0_45 = arith.constant 0 : index
    %47 = vector.load %arg1[%c0_44, %c14, %c0_45] : memref<1x42x16xbf16, #tpu.memory_space<vmem>>, vector<1x24x16xbf16>
    %48 = vector.shape_cast %47 : vector<1x24x16xbf16> to vector<24x16xbf16>
    %c8_46 = arith.constant 8 : index
    %c0_47 = arith.constant 0 : index
    %c0_48 = arith.constant 0 : index
    %49 = vector.load %arg3[%c8_46, %c0_47, %c0_48] : memref<9x16x32xbf16, #tpu.memory_space<vmem>>, vector<1x16x32xbf16>
    %50 = vector.shape_cast %49 : vector<1x16x32xbf16> to vector<16x32xbf16>
    %cst_49 = arith.constant dense<0.000000e+00> : vector<24x32xf32>
    %51 = tpu.matmul %48, %50, %cst_49 {dimension_numbers = #tpu.dot_dimension_numbers<[1], [0], [0], [1], [0, 0, 1, 1], [], []>} : vector<24x16xbf16>, vector<16x32xbf16>, vector<24x32xf32> -> vector<24x32xf32>
    %52 = arith.addf %46, %51 : vector<24x32xf32>
    %c0_50 = arith.constant 0 : index
    %c0_51 = arith.constant 0 : index
    %c0_52 = arith.constant 0 : index
    %53 = vector.load %arg2[%c0_50, %c0_51, %c0_52] : memref<1x42x16xbf16, #tpu.memory_space<vmem>>, vector<1x24x16xbf16>
    %54 = vector.shape_cast %53 : vector<1x24x16xbf16> to vector<24x16xbf16>
    %c0_53 = arith.constant 0 : index
    %c0_54 = arith.constant 0 : index
    %c0_55 = arith.constant 0 : index
    %55 = vector.load %arg4[%c0_53, %c0_54, %c0_55] : memref<9x16x32xbf16, #tpu.memory_space<vmem>>, vector<1x16x32xbf16>
    %56 = vector.shape_cast %55 : vector<1x16x32xbf16> to vector<16x32xbf16>
    %cst_56 = arith.constant dense<0.000000e+00> : vector<24x32xf32>
    %57 = tpu.matmul %54, %56, %cst_56 {dimension_numbers = #tpu.dot_dimension_numbers<[1], [0], [0], [1], [0, 0, 1, 1], [], []>} : vector<24x16xbf16>, vector<16x32xbf16>, vector<24x32xf32> -> vector<24x32xf32>
    %58 = arith.addf %52, %57 : vector<24x32xf32>
    %c0_57 = arith.constant 0 : index
    %c1_58 = arith.constant 1 : index
    %c0_59 = arith.constant 0 : index
    %59 = vector.load %arg2[%c0_57, %c1_58, %c0_59] : memref<1x42x16xbf16, #tpu.memory_space<vmem>>, vector<1x24x16xbf16>
    %60 = vector.shape_cast %59 : vector<1x24x16xbf16> to vector<24x16xbf16>
    %c1_60 = arith.constant 1 : index
    %c0_61 = arith.constant 0 : index
    %c0_62 = arith.constant 0 : index
    %61 = vector.load %arg4[%c1_60, %c0_61, %c0_62] : memref<9x16x32xbf16, #tpu.memory_space<vmem>>, vector<1x16x32xbf16>
    %62 = vector.shape_cast %61 : vector<1x16x32xbf16> to vector<16x32xbf16>
    %cst_63 = arith.constant dense<0.000000e+00> : vector<24x32xf32>
    %63 = tpu.matmul %60, %62, %cst_63 {dimension_numbers = #tpu.dot_dimension_numbers<[1], [0], [0], [1], [0, 0, 1, 1], [], []>} : vector<24x16xbf16>, vector<16x32xbf16>, vector<24x32xf32> -> vector<24x32xf32>
    %64 = arith.addf %58, %63 : vector<24x32xf32>
    %c0_64 = arith.constant 0 : index
    %c2_65 = arith.constant 2 : index
    %c0_66 = arith.constant 0 : index
    %65 = vector.load %arg2[%c0_64, %c2_65, %c0_66] : memref<1x42x16xbf16, #tpu.memory_space<vmem>>, vector<1x24x16xbf16>
    %66 = vector.shape_cast %65 : vector<1x24x16xbf16> to vector<24x16xbf16>
    %c2_67 = arith.constant 2 : index
    %c0_68 = arith.constant 0 : index
    %c0_69 = arith.constant 0 : index
    %67 = vector.load %arg4[%c2_67, %c0_68, %c0_69] : memref<9x16x32xbf16, #tpu.memory_space<vmem>>, vector<1x16x32xbf16>
    %68 = vector.shape_cast %67 : vector<1x16x32xbf16> to vector<16x32xbf16>
    %cst_70 = arith.constant dense<0.000000e+00> : vector<24x32xf32>
    %69 = tpu.matmul %66, %68, %cst_70 {dimension_numbers = #tpu.dot_dimension_numbers<[1], [0], [0], [1], [0, 0, 1, 1], [], []>} : vector<24x16xbf16>, vector<16x32xbf16>, vector<24x32xf32> -> vector<24x32xf32>
    %70 = arith.addf %64, %69 : vector<24x32xf32>
    %c0_71 = arith.constant 0 : index
    %c6_72 = arith.constant 6 : index
    %c0_73 = arith.constant 0 : index
    %71 = vector.load %arg2[%c0_71, %c6_72, %c0_73] : memref<1x42x16xbf16, #tpu.memory_space<vmem>>, vector<1x24x16xbf16>
    %72 = vector.shape_cast %71 : vector<1x24x16xbf16> to vector<24x16xbf16>
    %c3_74 = arith.constant 3 : index
    %c0_75 = arith.constant 0 : index
    %c0_76 = arith.constant 0 : index
    %73 = vector.load %arg4[%c3_74, %c0_75, %c0_76] : memref<9x16x32xbf16, #tpu.memory_space<vmem>>, vector<1x16x32xbf16>
    %74 = vector.shape_cast %73 : vector<1x16x32xbf16> to vector<16x32xbf16>
    %cst_77 = arith.constant dense<0.000000e+00> : vector<24x32xf32>
    %75 = tpu.matmul %72, %74, %cst_77 {dimension_numbers = #tpu.dot_dimension_numbers<[1], [0], [0], [1], [0, 0, 1, 1], [], []>} : vector<24x16xbf16>, vector<16x32xbf16>, vector<24x32xf32> -> vector<24x32xf32>
    %76 = arith.addf %70, %75 : vector<24x32xf32>
    %c0_78 = arith.constant 0 : index
    %c7_79 = arith.constant 7 : index
    %c0_80 = arith.constant 0 : index
    %77 = vector.load %arg2[%c0_78, %c7_79, %c0_80] : memref<1x42x16xbf16, #tpu.memory_space<vmem>>, vector<1x24x16xbf16>
    %78 = vector.shape_cast %77 : vector<1x24x16xbf16> to vector<24x16xbf16>
    %c4_81 = arith.constant 4 : index
    %c0_82 = arith.constant 0 : index
    %c0_83 = arith.constant 0 : index
    %79 = vector.load %arg4[%c4_81, %c0_82, %c0_83] : memref<9x16x32xbf16, #tpu.memory_space<vmem>>, vector<1x16x32xbf16>
    %80 = vector.shape_cast %79 : vector<1x16x32xbf16> to vector<16x32xbf16>
    %cst_84 = arith.constant dense<0.000000e+00> : vector<24x32xf32>
    %81 = tpu.matmul %78, %80, %cst_84 {dimension_numbers = #tpu.dot_dimension_numbers<[1], [0], [0], [1], [0, 0, 1, 1], [], []>} : vector<24x16xbf16>, vector<16x32xbf16>, vector<24x32xf32> -> vector<24x32xf32>
    %82 = arith.addf %76, %81 : vector<24x32xf32>
    %c0_85 = arith.constant 0 : index
    %c8_86 = arith.constant 8 : index
    %c0_87 = arith.constant 0 : index
    %83 = vector.load %arg2[%c0_85, %c8_86, %c0_87] : memref<1x42x16xbf16, #tpu.memory_space<vmem>>, vector<1x24x16xbf16>
    %84 = vector.shape_cast %83 : vector<1x24x16xbf16> to vector<24x16xbf16>
    %c5_88 = arith.constant 5 : index
    %c0_89 = arith.constant 0 : index
    %c0_90 = arith.constant 0 : index
    %85 = vector.load %arg4[%c5_88, %c0_89, %c0_90] : memref<9x16x32xbf16, #tpu.memory_space<vmem>>, vector<1x16x32xbf16>
    %86 = vector.shape_cast %85 : vector<1x16x32xbf16> to vector<16x32xbf16>
    %cst_91 = arith.constant dense<0.000000e+00> : vector<24x32xf32>
    %87 = tpu.matmul %84, %86, %cst_91 {dimension_numbers = #tpu.dot_dimension_numbers<[1], [0], [0], [1], [0, 0, 1, 1], [], []>} : vector<24x16xbf16>, vector<16x32xbf16>, vector<24x32xf32> -> vector<24x32xf32>
    %88 = arith.addf %82, %87 : vector<24x32xf32>
    %c0_92 = arith.constant 0 : index
    %c12_93 = arith.constant 12 : index
    %c0_94 = arith.constant 0 : index
    %89 = vector.load %arg2[%c0_92, %c12_93, %c0_94] : memref<1x42x16xbf16, #tpu.memory_space<vmem>>, vector<1x24x16xbf16>
    %90 = vector.shape_cast %89 : vector<1x24x16xbf16> to vector<24x16xbf16>
    %c6_95 = arith.constant 6 : index
    %c0_96 = arith.constant 0 : index
    %c0_97 = arith.constant 0 : index
    %91 = vector.load %arg4[%c6_95, %c0_96, %c0_97] : memref<9x16x32xbf16, #tpu.memory_space<vmem>>, vector<1x16x32xbf16>
    %92 = vector.shape_cast %91 : vector<1x16x32xbf16> to vector<16x32xbf16>
    %cst_98 = arith.constant dense<0.000000e+00> : vector<24x32xf32>
    %93 = tpu.matmul %90, %92, %cst_98 {dimension_numbers = #tpu.dot_dimension_numbers<[1], [0], [0], [1], [0, 0, 1, 1], [], []>} : vector<24x16xbf16>, vector<16x32xbf16>, vector<24x32xf32> -> vector<24x32xf32>
    %94 = arith.addf %88, %93 : vector<24x32xf32>
    %c0_99 = arith.constant 0 : index
    %c13_100 = arith.constant 13 : index
    %c0_101 = arith.constant 0 : index
    %95 = vector.load %arg2[%c0_99, %c13_100, %c0_101] : memref<1x42x16xbf16, #tpu.memory_space<vmem>>, vector<1x24x16xbf16>
    %96 = vector.shape_cast %95 : vector<1x24x16xbf16> to vector<24x16xbf16>
    %c7_102 = arith.constant 7 : index
    %c0_103 = arith.constant 0 : index
    %c0_104 = arith.constant 0 : index
    %97 = vector.load %arg4[%c7_102, %c0_103, %c0_104] : memref<9x16x32xbf16, #tpu.memory_space<vmem>>, vector<1x16x32xbf16>
    %98 = vector.shape_cast %97 : vector<1x16x32xbf16> to vector<16x32xbf16>
    %cst_105 = arith.constant dense<0.000000e+00> : vector<24x32xf32>
    %99 = tpu.matmul %96, %98, %cst_105 {dimension_numbers = #tpu.dot_dimension_numbers<[1], [0], [0], [1], [0, 0, 1, 1], [], []>} : vector<24x16xbf16>, vector<16x32xbf16>, vector<24x32xf32> -> vector<24x32xf32>
    %100 = arith.addf %94, %99 : vector<24x32xf32>
    %c0_106 = arith.constant 0 : index
    %c14_107 = arith.constant 14 : index
    %c0_108 = arith.constant 0 : index
    %101 = vector.load %arg2[%c0_106, %c14_107, %c0_108] : memref<1x42x16xbf16, #tpu.memory_space<vmem>>, vector<1x24x16xbf16>
    %102 = vector.shape_cast %101 : vector<1x24x16xbf16> to vector<24x16xbf16>
    %c8_109 = arith.constant 8 : index
    %c0_110 = arith.constant 0 : index
    %c0_111 = arith.constant 0 : index
    %103 = vector.load %arg4[%c8_109, %c0_110, %c0_111] : memref<9x16x32xbf16, #tpu.memory_space<vmem>>, vector<1x16x32xbf16>
    %104 = vector.shape_cast %103 : vector<1x16x32xbf16> to vector<16x32xbf16>
    %cst_112 = arith.constant dense<0.000000e+00> : vector<24x32xf32>
    %105 = tpu.matmul %102, %104, %cst_112 {dimension_numbers = #tpu.dot_dimension_numbers<[1], [0], [0], [1], [0, 0, 1, 1], [], []>} : vector<24x16xbf16>, vector<16x32xbf16>, vector<24x32xf32> -> vector<24x32xf32>
    %106 = arith.addf %100, %105 : vector<24x32xf32>
    %c0_113 = arith.constant 0 : index
    %c0_114 = arith.constant 0 : index
    %107 = vector.load %arg5[%c0_113, %c0_114] : memref<1x32xf32, #tpu.memory_space<vmem>>, vector<1x32xf32>
    %108 = vector.broadcast %107 : vector<1x32xf32> to vector<24x32xf32>
    %109 = arith.addf %106, %108 : vector<24x32xf32>
    %cst_115 = arith.constant 0.000000e+00 : f32
    %110 = vector.broadcast %cst_115 : f32 to vector<24x32xf32>
    %111 = arith.maximumf %109, %110 : vector<24x32xf32>
    %112 = arith.truncf %111 : vector<24x32xf32> to vector<24x32xbf16>
    %c0_116 = arith.constant 0 : index
    %c0_117 = arith.constant 0 : index
    %c0_118 = arith.constant 0 : index
    %113 = vector.load %arg6[%c0_116, %c0_117, %c0_118] : memref<1x24x32xbf16, #tpu.memory_space<vmem>>, vector<1x24x32xbf16>
    %114 = vector.shape_cast %113 : vector<1x24x32xbf16> to vector<24x32xbf16>
    %115 = vector.shape_cast %112 : vector<24x32xbf16> to vector<1x24x32xbf16>
    tpu.vector_store %arg6[%c0_116, %c0_117, %c0_118], %115 {strides = array<i32>} : memref<1x24x32xbf16, #tpu.memory_space<vmem>>, vector<1x24x32xbf16>,
    return
  }
  func.func @transform_0(%arg0: i32) -> (i32, i32, i32) {
    %c0_i32 = arith.constant 0 : i32
    %c0_i32_0 = arith.constant 0 : i32
    %c0_i32_1 = arith.constant 0 : i32
    return %arg0, %c0_i32, %c0_i32_0 : i32, i32, i32
  }
  func.func @transform_1(%arg0: i32) -> (i32, i32, i32) {
    %c0_i32 = arith.constant 0 : i32
    %c0_i32_0 = arith.constant 0 : i32
    %c0_i32_1 = arith.constant 0 : i32
    return %arg0, %c0_i32, %c0_i32_0 : i32, i32, i32
  }
  func.func @transform_2(%arg0: i32) -> (i32, i32, i32) {
    %c0_i32 = arith.constant 0 : i32
    %c0_i32_0 = arith.constant 0 : i32
    %c0_i32_1 = arith.constant 0 : i32
    %c0_i32_2 = arith.constant 0 : i32
    return %c0_i32, %c0_i32_0, %c0_i32_1 : i32, i32, i32
  }
  func.func @transform_3(%arg0: i32) -> (i32, i32, i32) {
    %c0_i32 = arith.constant 0 : i32
    %c0_i32_0 = arith.constant 0 : i32
    %c0_i32_1 = arith.constant 0 : i32
    %c0_i32_2 = arith.constant 0 : i32
    return %c0_i32, %c0_i32_0, %c0_i32_1 : i32, i32, i32
  }
  func.func @transform_4(%arg0: i32) -> (i32, i32) {
    %c0_i32 = arith.constant 0 : i32
    %c0_i32_0 = arith.constant 0 : i32
    %c0_i32_1 = arith.constant 0 : i32
    return %c0_i32, %c0_i32_0 : i32, i32
  }
  func.func @transform_5(%arg0: i32) -> (i32, i32, i32) {
    %c0_i32 = arith.constant 0 : i32
    %c0_i32_0 = arith.constant 0 : i32
    %c0_i32_1 = arith.constant 0 : i32
    return %arg0, %c0_i32, %c0_i32_0 : i32, i32, i32
  }
}

module attributes {stable_mosaic.version = 11 : i64} {
  func.func @_conv_taps_kernel(%arg0: i32, %arg1: memref<1x110x8xbf16, #tpu.memory_space<vmem>>, %arg2: memref<1x110x8xbf16, #tpu.memory_space<vmem>>, %arg3: memref<9x8x12xbf16, #tpu.memory_space<vmem>>, %arg4: memref<9x8x12xbf16, #tpu.memory_space<vmem>>, %arg5: memref<1x12xf32, #tpu.memory_space<vmem>>, %arg6: memref<1x80x12xf32, #tpu.memory_space<vmem>>) attributes {dimension_semantics = [#tpu.dimension_semantics<parallel>], iteration_bounds = array<i64: 2>, scalar_prefetch = 0 : i64, scratch_operands = 0 : i64, tpu.core_type = #tpu.core_type<tc>, window_params = [{transform_indices = @transform_0, window_bounds = array<i64: 1, 110, 8>}, {transform_indices = @transform_1, window_bounds = array<i64: 1, 110, 8>}, {pipeline_mode = #tpu.pipeline_mode<synchronous>, transform_indices = @transform_2, window_bounds = array<i64: 9, 8, 12>}, {pipeline_mode = #tpu.pipeline_mode<synchronous>, transform_indices = @transform_3, window_bounds = array<i64: 9, 8, 12>}, {pipeline_mode = #tpu.pipeline_mode<synchronous>, transform_indices = @transform_4, window_bounds = array<i64: 1, 12>}, {transform_indices = @transform_5, window_bounds = array<i64: 1, 80, 12>}]} {
    %c0 = arith.constant 0 : index
    %c0_0 = arith.constant 0 : index
    %c0_1 = arith.constant 0 : index
    %0 = vector.load %arg1[%c0, %c0_0, %c0_1] : memref<1x110x8xbf16, #tpu.memory_space<vmem>>, vector<1x80x8xbf16>
    %1 = vector.shape_cast %0 : vector<1x80x8xbf16> to vector<80x8xbf16>
    %c0_2 = arith.constant 0 : index
    %c0_3 = arith.constant 0 : index
    %c0_4 = arith.constant 0 : index
    %2 = vector.load %arg3[%c0_2, %c0_3, %c0_4] : memref<9x8x12xbf16, #tpu.memory_space<vmem>>, vector<1x8x12xbf16>
    %3 = vector.shape_cast %2 : vector<1x8x12xbf16> to vector<8x12xbf16>
    %cst = arith.constant dense<0.000000e+00> : vector<80x12xf32>
    %4 = tpu.matmul %1, %3, %cst {dimension_numbers = #tpu.dot_dimension_numbers<[1], [0], [0], [1], [0, 0, 1, 1], [], []>} : vector<80x8xbf16>, vector<8x12xbf16>, vector<80x12xf32> -> vector<80x12xf32>
    %c0_5 = arith.constant 0 : index
    %c1 = arith.constant 1 : index
    %c0_6 = arith.constant 0 : index
    %5 = vector.load %arg1[%c0_5, %c1, %c0_6] : memref<1x110x8xbf16, #tpu.memory_space<vmem>>, vector<1x80x8xbf16>
    %6 = vector.shape_cast %5 : vector<1x80x8xbf16> to vector<80x8xbf16>
    %c1_7 = arith.constant 1 : index
    %c0_8 = arith.constant 0 : index
    %c0_9 = arith.constant 0 : index
    %7 = vector.load %arg3[%c1_7, %c0_8, %c0_9] : memref<9x8x12xbf16, #tpu.memory_space<vmem>>, vector<1x8x12xbf16>
    %8 = vector.shape_cast %7 : vector<1x8x12xbf16> to vector<8x12xbf16>
    %cst_10 = arith.constant dense<0.000000e+00> : vector<80x12xf32>
    %9 = tpu.matmul %6, %8, %cst_10 {dimension_numbers = #tpu.dot_dimension_numbers<[1], [0], [0], [1], [0, 0, 1, 1], [], []>} : vector<80x8xbf16>, vector<8x12xbf16>, vector<80x12xf32> -> vector<80x12xf32>
    %10 = arith.addf %4, %9 : vector<80x12xf32>
    %c0_11 = arith.constant 0 : index
    %c2 = arith.constant 2 : index
    %c0_12 = arith.constant 0 : index
    %11 = vector.load %arg1[%c0_11, %c2, %c0_12] : memref<1x110x8xbf16, #tpu.memory_space<vmem>>, vector<1x80x8xbf16>
    %12 = vector.shape_cast %11 : vector<1x80x8xbf16> to vector<80x8xbf16>
    %c2_13 = arith.constant 2 : index
    %c0_14 = arith.constant 0 : index
    %c0_15 = arith.constant 0 : index
    %13 = vector.load %arg3[%c2_13, %c0_14, %c0_15] : memref<9x8x12xbf16, #tpu.memory_space<vmem>>, vector<1x8x12xbf16>
    %14 = vector.shape_cast %13 : vector<1x8x12xbf16> to vector<8x12xbf16>
    %cst_16 = arith.constant dense<0.000000e+00> : vector<80x12xf32>
    %15 = tpu.matmul %12, %14, %cst_16 {dimension_numbers = #tpu.dot_dimension_numbers<[1], [0], [0], [1], [0, 0, 1, 1], [], []>} : vector<80x8xbf16>, vector<8x12xbf16>, vector<80x12xf32> -> vector<80x12xf32>
    %16 = arith.addf %10, %15 : vector<80x12xf32>
    %c0_17 = arith.constant 0 : index
    %c10 = arith.constant 10 : index
    %c0_18 = arith.constant 0 : index
    %17 = vector.load %arg1[%c0_17, %c10, %c0_18] : memref<1x110x8xbf16, #tpu.memory_space<vmem>>, vector<1x80x8xbf16>
    %18 = vector.shape_cast %17 : vector<1x80x8xbf16> to vector<80x8xbf16>
    %c3 = arith.constant 3 : index
    %c0_19 = arith.constant 0 : index
    %c0_20 = arith.constant 0 : index
    %19 = vector.load %arg3[%c3, %c0_19, %c0_20] : memref<9x8x12xbf16, #tpu.memory_space<vmem>>, vector<1x8x12xbf16>
    %20 = vector.shape_cast %19 : vector<1x8x12xbf16> to vector<8x12xbf16>
    %cst_21 = arith.constant dense<0.000000e+00> : vector<80x12xf32>
    %21 = tpu.matmul %18, %20, %cst_21 {dimension_numbers = #tpu.dot_dimension_numbers<[1], [0], [0], [1], [0, 0, 1, 1], [], []>} : vector<80x8xbf16>, vector<8x12xbf16>, vector<80x12xf32> -> vector<80x12xf32>
    %22 = arith.addf %16, %21 : vector<80x12xf32>
    %c0_22 = arith.constant 0 : index
    %c11 = arith.constant 11 : index
    %c0_23 = arith.constant 0 : index
    %23 = vector.load %arg1[%c0_22, %c11, %c0_23] : memref<1x110x8xbf16, #tpu.memory_space<vmem>>, vector<1x80x8xbf16>
    %24 = vector.shape_cast %23 : vector<1x80x8xbf16> to vector<80x8xbf16>
    %c4 = arith.constant 4 : index
    %c0_24 = arith.constant 0 : index
    %c0_25 = arith.constant 0 : index
    %25 = vector.load %arg3[%c4, %c0_24, %c0_25] : memref<9x8x12xbf16, #tpu.memory_space<vmem>>, vector<1x8x12xbf16>
    %26 = vector.shape_cast %25 : vector<1x8x12xbf16> to vector<8x12xbf16>
    %cst_26 = arith.constant dense<0.000000e+00> : vector<80x12xf32>
    %27 = tpu.matmul %24, %26, %cst_26 {dimension_numbers = #tpu.dot_dimension_numbers<[1], [0], [0], [1], [0, 0, 1, 1], [], []>} : vector<80x8xbf16>, vector<8x12xbf16>, vector<80x12xf32> -> vector<80x12xf32>
    %28 = arith.addf %22, %27 : vector<80x12xf32>
    %c0_27 = arith.constant 0 : index
    %c12 = arith.constant 12 : index
    %c0_28 = arith.constant 0 : index
    %29 = vector.load %arg1[%c0_27, %c12, %c0_28] : memref<1x110x8xbf16, #tpu.memory_space<vmem>>, vector<1x80x8xbf16>
    %30 = vector.shape_cast %29 : vector<1x80x8xbf16> to vector<80x8xbf16>
    %c5 = arith.constant 5 : index
    %c0_29 = arith.constant 0 : index
    %c0_30 = arith.constant 0 : index
    %31 = vector.load %arg3[%c5, %c0_29, %c0_30] : memref<9x8x12xbf16, #tpu.memory_space<vmem>>, vector<1x8x12xbf16>
    %32 = vector.shape_cast %31 : vector<1x8x12xbf16> to vector<8x12xbf16>
    %cst_31 = arith.constant dense<0.000000e+00> : vector<80x12xf32>
    %33 = tpu.matmul %30, %32, %cst_31 {dimension_numbers = #tpu.dot_dimension_numbers<[1], [0], [0], [1], [0, 0, 1, 1], [], []>} : vector<80x8xbf16>, vector<8x12xbf16>, vector<80x12xf32> -> vector<80x12xf32>
    %34 = arith.addf %28, %33 : vector<80x12xf32>
    %c0_32 = arith.constant 0 : index
    %c20 = arith.constant 20 : index
    %c0_33 = arith.constant 0 : index
    %35 = vector.load %arg1[%c0_32, %c20, %c0_33] : memref<1x110x8xbf16, #tpu.memory_space<vmem>>, vector<1x80x8xbf16>
    %36 = vector.shape_cast %35 : vector<1x80x8xbf16> to vector<80x8xbf16>
    %c6 = arith.constant 6 : index
    %c0_34 = arith.constant 0 : index
    %c0_35 = arith.constant 0 : index
    %37 = vector.load %arg3[%c6, %c0_34, %c0_35] : memref<9x8x12xbf16, #tpu.memory_space<vmem>>, vector<1x8x12xbf16>
    %38 = vector.shape_cast %37 : vector<1x8x12xbf16> to vector<8x12xbf16>
    %cst_36 = arith.constant dense<0.000000e+00> : vector<80x12xf32>
    %39 = tpu.matmul %36, %38, %cst_36 {dimension_numbers = #tpu.dot_dimension_numbers<[1], [0], [0], [1], [0, 0, 1, 1], [], []>} : vector<80x8xbf16>, vector<8x12xbf16>, vector<80x12xf32> -> vector<80x12xf32>
    %40 = arith.addf %34, %39 : vector<80x12xf32>
    %c0_37 = arith.constant 0 : index
    %c21 = arith.constant 21 : index
    %c0_38 = arith.constant 0 : index
    %41 = vector.load %arg1[%c0_37, %c21, %c0_38] : memref<1x110x8xbf16, #tpu.memory_space<vmem>>, vector<1x80x8xbf16>
    %42 = vector.shape_cast %41 : vector<1x80x8xbf16> to vector<80x8xbf16>
    %c7 = arith.constant 7 : index
    %c0_39 = arith.constant 0 : index
    %c0_40 = arith.constant 0 : index
    %43 = vector.load %arg3[%c7, %c0_39, %c0_40] : memref<9x8x12xbf16, #tpu.memory_space<vmem>>, vector<1x8x12xbf16>
    %44 = vector.shape_cast %43 : vector<1x8x12xbf16> to vector<8x12xbf16>
    %cst_41 = arith.constant dense<0.000000e+00> : vector<80x12xf32>
    %45 = tpu.matmul %42, %44, %cst_41 {dimension_numbers = #tpu.dot_dimension_numbers<[1], [0], [0], [1], [0, 0, 1, 1], [], []>} : vector<80x8xbf16>, vector<8x12xbf16>, vector<80x12xf32> -> vector<80x12xf32>
    %46 = arith.addf %40, %45 : vector<80x12xf32>
    %c0_42 = arith.constant 0 : index
    %c22 = arith.constant 22 : index
    %c0_43 = arith.constant 0 : index
    %47 = vector.load %arg1[%c0_42, %c22, %c0_43] : memref<1x110x8xbf16, #tpu.memory_space<vmem>>, vector<1x80x8xbf16>
    %48 = vector.shape_cast %47 : vector<1x80x8xbf16> to vector<80x8xbf16>
    %c8 = arith.constant 8 : index
    %c0_44 = arith.constant 0 : index
    %c0_45 = arith.constant 0 : index
    %49 = vector.load %arg3[%c8, %c0_44, %c0_45] : memref<9x8x12xbf16, #tpu.memory_space<vmem>>, vector<1x8x12xbf16>
    %50 = vector.shape_cast %49 : vector<1x8x12xbf16> to vector<8x12xbf16>
    %cst_46 = arith.constant dense<0.000000e+00> : vector<80x12xf32>
    %51 = tpu.matmul %48, %50, %cst_46 {dimension_numbers = #tpu.dot_dimension_numbers<[1], [0], [0], [1], [0, 0, 1, 1], [], []>} : vector<80x8xbf16>, vector<8x12xbf16>, vector<80x12xf32> -> vector<80x12xf32>
    %52 = arith.addf %46, %51 : vector<80x12xf32>
    %c0_47 = arith.constant 0 : index
    %c0_48 = arith.constant 0 : index
    %c0_49 = arith.constant 0 : index
    %53 = vector.load %arg2[%c0_47, %c0_48, %c0_49] : memref<1x110x8xbf16, #tpu.memory_space<vmem>>, vector<1x80x8xbf16>
    %54 = vector.shape_cast %53 : vector<1x80x8xbf16> to vector<80x8xbf16>
    %c0_50 = arith.constant 0 : index
    %c0_51 = arith.constant 0 : index
    %c0_52 = arith.constant 0 : index
    %55 = vector.load %arg4[%c0_50, %c0_51, %c0_52] : memref<9x8x12xbf16, #tpu.memory_space<vmem>>, vector<1x8x12xbf16>
    %56 = vector.shape_cast %55 : vector<1x8x12xbf16> to vector<8x12xbf16>
    %cst_53 = arith.constant dense<0.000000e+00> : vector<80x12xf32>
    %57 = tpu.matmul %54, %56, %cst_53 {dimension_numbers = #tpu.dot_dimension_numbers<[1], [0], [0], [1], [0, 0, 1, 1], [], []>} : vector<80x8xbf16>, vector<8x12xbf16>, vector<80x12xf32> -> vector<80x12xf32>
    %58 = arith.addf %52, %57 : vector<80x12xf32>
    %c0_54 = arith.constant 0 : index
    %c1_55 = arith.constant 1 : index
    %c0_56 = arith.constant 0 : index
    %59 = vector.load %arg2[%c0_54, %c1_55, %c0_56] : memref<1x110x8xbf16, #tpu.memory_space<vmem>>, vector<1x80x8xbf16>
    %60 = vector.shape_cast %59 : vector<1x80x8xbf16> to vector<80x8xbf16>
    %c1_57 = arith.constant 1 : index
    %c0_58 = arith.constant 0 : index
    %c0_59 = arith.constant 0 : index
    %61 = vector.load %arg4[%c1_57, %c0_58, %c0_59] : memref<9x8x12xbf16, #tpu.memory_space<vmem>>, vector<1x8x12xbf16>
    %62 = vector.shape_cast %61 : vector<1x8x12xbf16> to vector<8x12xbf16>
    %cst_60 = arith.constant dense<0.000000e+00> : vector<80x12xf32>
    %63 = tpu.matmul %60, %62, %cst_60 {dimension_numbers = #tpu.dot_dimension_numbers<[1], [0], [0], [1], [0, 0, 1, 1], [], []>} : vector<80x8xbf16>, vector<8x12xbf16>, vector<80x12xf32> -> vector<80x12xf32>
    %64 = arith.addf %58, %63 : vector<80x12xf32>
    %c0_61 = arith.constant 0 : index
    %c2_62 = arith.constant 2 : index
    %c0_63 = arith.constant 0 : index
    %65 = vector.load %arg2[%c0_61, %c2_62, %c0_63] : memref<1x110x8xbf16, #tpu.memory_space<vmem>>, vector<1x80x8xbf16>
    %66 = vector.shape_cast %65 : vector<1x80x8xbf16> to vector<80x8xbf16>
    %c2_64 = arith.constant 2 : index
    %c0_65 = arith.constant 0 : index
    %c0_66 = arith.constant 0 : index
    %67 = vector.load %arg4[%c2_64, %c0_65, %c0_66] : memref<9x8x12xbf16, #tpu.memory_space<vmem>>, vector<1x8x12xbf16>
    %68 = vector.shape_cast %67 : vector<1x8x12xbf16> to vector<8x12xbf16>
    %cst_67 = arith.constant dense<0.000000e+00> : vector<80x12xf32>
    %69 = tpu.matmul %66, %68, %cst_67 {dimension_numbers = #tpu.dot_dimension_numbers<[1], [0], [0], [1], [0, 0, 1, 1], [], []>} : vector<80x8xbf16>, vector<8x12xbf16>, vector<80x12xf32> -> vector<80x12xf32>
    %70 = arith.addf %64, %69 : vector<80x12xf32>
    %c0_68 = arith.constant 0 : index
    %c10_69 = arith.constant 10 : index
    %c0_70 = arith.constant 0 : index
    %71 = vector.load %arg2[%c0_68, %c10_69, %c0_70] : memref<1x110x8xbf16, #tpu.memory_space<vmem>>, vector<1x80x8xbf16>
    %72 = vector.shape_cast %71 : vector<1x80x8xbf16> to vector<80x8xbf16>
    %c3_71 = arith.constant 3 : index
    %c0_72 = arith.constant 0 : index
    %c0_73 = arith.constant 0 : index
    %73 = vector.load %arg4[%c3_71, %c0_72, %c0_73] : memref<9x8x12xbf16, #tpu.memory_space<vmem>>, vector<1x8x12xbf16>
    %74 = vector.shape_cast %73 : vector<1x8x12xbf16> to vector<8x12xbf16>
    %cst_74 = arith.constant dense<0.000000e+00> : vector<80x12xf32>
    %75 = tpu.matmul %72, %74, %cst_74 {dimension_numbers = #tpu.dot_dimension_numbers<[1], [0], [0], [1], [0, 0, 1, 1], [], []>} : vector<80x8xbf16>, vector<8x12xbf16>, vector<80x12xf32> -> vector<80x12xf32>
    %76 = arith.addf %70, %75 : vector<80x12xf32>
    %c0_75 = arith.constant 0 : index
    %c11_76 = arith.constant 11 : index
    %c0_77 = arith.constant 0 : index
    %77 = vector.load %arg2[%c0_75, %c11_76, %c0_77] : memref<1x110x8xbf16, #tpu.memory_space<vmem>>, vector<1x80x8xbf16>
    %78 = vector.shape_cast %77 : vector<1x80x8xbf16> to vector<80x8xbf16>
    %c4_78 = arith.constant 4 : index
    %c0_79 = arith.constant 0 : index
    %c0_80 = arith.constant 0 : index
    %79 = vector.load %arg4[%c4_78, %c0_79, %c0_80] : memref<9x8x12xbf16, #tpu.memory_space<vmem>>, vector<1x8x12xbf16>
    %80 = vector.shape_cast %79 : vector<1x8x12xbf16> to vector<8x12xbf16>
    %cst_81 = arith.constant dense<0.000000e+00> : vector<80x12xf32>
    %81 = tpu.matmul %78, %80, %cst_81 {dimension_numbers = #tpu.dot_dimension_numbers<[1], [0], [0], [1], [0, 0, 1, 1], [], []>} : vector<80x8xbf16>, vector<8x12xbf16>, vector<80x12xf32> -> vector<80x12xf32>
    %82 = arith.addf %76, %81 : vector<80x12xf32>
    %c0_82 = arith.constant 0 : index
    %c12_83 = arith.constant 12 : index
    %c0_84 = arith.constant 0 : index
    %83 = vector.load %arg2[%c0_82, %c12_83, %c0_84] : memref<1x110x8xbf16, #tpu.memory_space<vmem>>, vector<1x80x8xbf16>
    %84 = vector.shape_cast %83 : vector<1x80x8xbf16> to vector<80x8xbf16>
    %c5_85 = arith.constant 5 : index
    %c0_86 = arith.constant 0 : index
    %c0_87 = arith.constant 0 : index
    %85 = vector.load %arg4[%c5_85, %c0_86, %c0_87] : memref<9x8x12xbf16, #tpu.memory_space<vmem>>, vector<1x8x12xbf16>
    %86 = vector.shape_cast %85 : vector<1x8x12xbf16> to vector<8x12xbf16>
    %cst_88 = arith.constant dense<0.000000e+00> : vector<80x12xf32>
    %87 = tpu.matmul %84, %86, %cst_88 {dimension_numbers = #tpu.dot_dimension_numbers<[1], [0], [0], [1], [0, 0, 1, 1], [], []>} : vector<80x8xbf16>, vector<8x12xbf16>, vector<80x12xf32> -> vector<80x12xf32>
    %88 = arith.addf %82, %87 : vector<80x12xf32>
    %c0_89 = arith.constant 0 : index
    %c20_90 = arith.constant 20 : index
    %c0_91 = arith.constant 0 : index
    %89 = vector.load %arg2[%c0_89, %c20_90, %c0_91] : memref<1x110x8xbf16, #tpu.memory_space<vmem>>, vector<1x80x8xbf16>
    %90 = vector.shape_cast %89 : vector<1x80x8xbf16> to vector<80x8xbf16>
    %c6_92 = arith.constant 6 : index
    %c0_93 = arith.constant 0 : index
    %c0_94 = arith.constant 0 : index
    %91 = vector.load %arg4[%c6_92, %c0_93, %c0_94] : memref<9x8x12xbf16, #tpu.memory_space<vmem>>, vector<1x8x12xbf16>
    %92 = vector.shape_cast %91 : vector<1x8x12xbf16> to vector<8x12xbf16>
    %cst_95 = arith.constant dense<0.000000e+00> : vector<80x12xf32>
    %93 = tpu.matmul %90, %92, %cst_95 {dimension_numbers = #tpu.dot_dimension_numbers<[1], [0], [0], [1], [0, 0, 1, 1], [], []>} : vector<80x8xbf16>, vector<8x12xbf16>, vector<80x12xf32> -> vector<80x12xf32>
    %94 = arith.addf %88, %93 : vector<80x12xf32>
    %c0_96 = arith.constant 0 : index
    %c21_97 = arith.constant 21 : index
    %c0_98 = arith.constant 0 : index
    %95 = vector.load %arg2[%c0_96, %c21_97, %c0_98] : memref<1x110x8xbf16, #tpu.memory_space<vmem>>, vector<1x80x8xbf16>
    %96 = vector.shape_cast %95 : vector<1x80x8xbf16> to vector<80x8xbf16>
    %c7_99 = arith.constant 7 : index
    %c0_100 = arith.constant 0 : index
    %c0_101 = arith.constant 0 : index
    %97 = vector.load %arg4[%c7_99, %c0_100, %c0_101] : memref<9x8x12xbf16, #tpu.memory_space<vmem>>, vector<1x8x12xbf16>
    %98 = vector.shape_cast %97 : vector<1x8x12xbf16> to vector<8x12xbf16>
    %cst_102 = arith.constant dense<0.000000e+00> : vector<80x12xf32>
    %99 = tpu.matmul %96, %98, %cst_102 {dimension_numbers = #tpu.dot_dimension_numbers<[1], [0], [0], [1], [0, 0, 1, 1], [], []>} : vector<80x8xbf16>, vector<8x12xbf16>, vector<80x12xf32> -> vector<80x12xf32>
    %100 = arith.addf %94, %99 : vector<80x12xf32>
    %c0_103 = arith.constant 0 : index
    %c22_104 = arith.constant 22 : index
    %c0_105 = arith.constant 0 : index
    %101 = vector.load %arg2[%c0_103, %c22_104, %c0_105] : memref<1x110x8xbf16, #tpu.memory_space<vmem>>, vector<1x80x8xbf16>
    %102 = vector.shape_cast %101 : vector<1x80x8xbf16> to vector<80x8xbf16>
    %c8_106 = arith.constant 8 : index
    %c0_107 = arith.constant 0 : index
    %c0_108 = arith.constant 0 : index
    %103 = vector.load %arg4[%c8_106, %c0_107, %c0_108] : memref<9x8x12xbf16, #tpu.memory_space<vmem>>, vector<1x8x12xbf16>
    %104 = vector.shape_cast %103 : vector<1x8x12xbf16> to vector<8x12xbf16>
    %cst_109 = arith.constant dense<0.000000e+00> : vector<80x12xf32>
    %105 = tpu.matmul %102, %104, %cst_109 {dimension_numbers = #tpu.dot_dimension_numbers<[1], [0], [0], [1], [0, 0, 1, 1], [], []>} : vector<80x8xbf16>, vector<8x12xbf16>, vector<80x12xf32> -> vector<80x12xf32>
    %106 = arith.addf %100, %105 : vector<80x12xf32>
    %c0_110 = arith.constant 0 : index
    %c0_111 = arith.constant 0 : index
    %107 = vector.load %arg5[%c0_110, %c0_111] : memref<1x12xf32, #tpu.memory_space<vmem>>, vector<1x12xf32>
    %108 = vector.broadcast %107 : vector<1x12xf32> to vector<80x12xf32>
    %109 = arith.addf %106, %108 : vector<80x12xf32>
    %110 = math.absf %109 : vector<80x12xf32>
    %cst_112 = arith.constant 0.000000e+00 : f32
    %111 = vector.broadcast %cst_112 : f32 to vector<80x12xf32>
    %112 = arith.subf %111, %110 : vector<80x12xf32>
    %113 = math.exp %112 : vector<80x12xf32>
    %cst_113 = arith.constant 0.000000e+00 : f32
    %114 = vector.broadcast %cst_113 : f32 to vector<80x12xf32>
    %115 = arith.cmpf oge, %109, %114 : vector<80x12xf32>
    %cst_114 = arith.constant 1.000000e+00 : f32
    %116 = vector.broadcast %cst_114 : f32 to vector<80x12xf32>
    %117 = arith.select %115, %116, %113 : vector<80x12xi1>, vector<80x12xf32>
    %cst_115 = arith.constant 1.000000e+00 : f32
    %118 = vector.broadcast %cst_115 : f32 to vector<80x12xf32>
    %119 = arith.addf %118, %113 : vector<80x12xf32>
    %120 = arith.divf %117, %119 : vector<80x12xf32>
    %c0_116 = arith.constant 0 : index
    %c0_117 = arith.constant 0 : index
    %c0_118 = arith.constant 0 : index
    %121 = vector.load %arg6[%c0_116, %c0_117, %c0_118] : memref<1x80x12xf32, #tpu.memory_space<vmem>>, vector<1x80x12xf32>
    %122 = vector.shape_cast %121 : vector<1x80x12xf32> to vector<80x12xf32>
    %123 = vector.shape_cast %120 : vector<80x12xf32> to vector<1x80x12xf32>
    tpu.vector_store %arg6[%c0_116, %c0_117, %c0_118], %123 {strides = array<i32>} : memref<1x80x12xf32, #tpu.memory_space<vmem>>, vector<1x80x12xf32>,
    return
  }
  func.func @transform_0(%arg0: i32) -> (i32, i32, i32) {
    %c0_i32 = arith.constant 0 : i32
    %c0_i32_0 = arith.constant 0 : i32
    %c0_i32_1 = arith.constant 0 : i32
    return %arg0, %c0_i32, %c0_i32_0 : i32, i32, i32
  }
  func.func @transform_1(%arg0: i32) -> (i32, i32, i32) {
    %c0_i32 = arith.constant 0 : i32
    %c0_i32_0 = arith.constant 0 : i32
    %c0_i32_1 = arith.constant 0 : i32
    return %arg0, %c0_i32, %c0_i32_0 : i32, i32, i32
  }
  func.func @transform_2(%arg0: i32) -> (i32, i32, i32) {
    %c0_i32 = arith.constant 0 : i32
    %c0_i32_0 = arith.constant 0 : i32
    %c0_i32_1 = arith.constant 0 : i32
    %c0_i32_2 = arith.constant 0 : i32
    return %c0_i32, %c0_i32_0, %c0_i32_1 : i32, i32, i32
  }
  func.func @transform_3(%arg0: i32) -> (i32, i32, i32) {
    %c0_i32 = arith.constant 0 : i32
    %c0_i32_0 = arith.constant 0 : i32
    %c0_i32_1 = arith.constant 0 : i32
    %c0_i32_2 = arith.constant 0 : i32
    return %c0_i32, %c0_i32_0, %c0_i32_1 : i32, i32, i32
  }
  func.func @transform_4(%arg0: i32) -> (i32, i32) {
    %c0_i32 = arith.constant 0 : i32
    %c0_i32_0 = arith.constant 0 : i32
    %c0_i32_1 = arith.constant 0 : i32
    return %c0_i32, %c0_i32_0 : i32, i32
  }
  func.func @transform_5(%arg0: i32) -> (i32, i32, i32) {
    %c0_i32 = arith.constant 0 : i32
    %c0_i32_0 = arith.constant 0 : i32
    %c0_i32_1 = arith.constant 0 : i32
    return %arg0, %c0_i32, %c0_i32_0 : i32, i32, i32
  }
}

</mosaic_0001>

<bundles_post_ra>
// kernel: net_forward.8
= control target key start
LH: loop header
LB: loop body
LE: loop exit
PB: predicated region body
PF: predicated region fallthrough
CT: control target
= control target key end

     0   :  { %s1110_s12 = smov 0   ;;  %s1299_s0 = inlined_call_operand.vmem [shape: bf16[2,90,12], index: 0, kind: input, shape index: {}]   ;;  %s1300_s1 = inlined_call_operand.vmem [shape: bf16[4,12,8], index: 1, kind: input, shape index: {}]   ;;  %s1301_s2 = inlined_call_operand.vmem [shape: f32[1,8], index: 2, kind: input, shape index: {}]   ;;  %s1302_s3 = inlined_call_operand.vmem [shape: bf16[2,72,8], index: 3, kind: output, shape index: {}]  }
   0x1 LB: > { %s870_s13 = sadd.s32 4294967295, %s1086_s12   ;;  %p874_p0 = scmp.ge.s32.totalorder %s1086_s12, 1  ;;  %s1086_s12 = sphi %s1110_s12, %s13_s12  }
   0x2   : > { %p137_p1 = scmp.lt.s32.totalorder %s1086_s12, 3 }
   0x4   : > { %p138_p2 = pnand %p874_p0, %p137_p1 }
   0x5   : > { %p161_p3 = scmp.lt.s32.totalorder (!%p138_p2), %s870_s13, 1 }
   0x6   : > { %141 = sbr.rel (%p138_p2) target bundleno = 299 (0x12b), region = 32 }
   0xb   : > { %vm273_vm0 = vcmask 1045504   ;;  %v1088_v0 = vmov 0.0   ;;  %v1064_v1 = vld [vmem:[%s1300_s1] sm:$0x3f]   ;;  %vm1089_vm1 = vmmov 0   ;;  %s1304_s13 = smov (!%p161_p3, %s870_s13), 1 }
   0xc   : > { %986 = vmatprep.subr.bf16.mxu1 %v1088_v0  ;;  %964 = vmatprep.subr.bf16.mxu0 %v1088_v0  ;;  %v1065_v2 = vld [vmem:[%s1300_s1 + $0x8] sm:$0x3f]   ;;  %v367_v3 = vsel %vm273_vm0, %v1064_v1, 0  ;;  %s1052_s18 = smul.u32 48, %s1304_s13  ;;  %v1069_v5 = vld [vmem:[%s1300_s1 + $0x18] sm:$0x3f]  }
   0xd   : > { %988 = vmatprep.mubr.msk.bf16.mxu1 %vm1089_vm1, %v1088_v0  ;;  %966 = vmatprep.mubr.msk.bf16.mxu0 %vm1089_vm1, %v1088_v0  ;;  %v275_v4 = vsel %vm273_vm0, %v1065_v2, 0  ;;  %vm257_vm2 = vcmask 97280   ;;  %v660_v7 = vsel %vm273_vm0, %v1069_v5, 0  ;;  %v1068_v12 = vld [vmem:[%s1300_s1 + $0x10] sm:$0x3f]   ;;  %vm629_vm4 = vcmask 1046528  }
   0xe   : > { %987 = vmatpush3.bf16.msra.mxu1 %v367_v3  ;;  %965 = vmatpush3.bf16.msra.mxu0 %v275_v4  ;;  %s1143_s23 = scalar_lea.vmem %s1299_s0, %s1052_s18  ;;  %vm212_vm3 = vsmask.f32 7424  ;;  %v539_v19 = vsel %vm273_vm0, %v1068_v12, 0  ;;  %s1053_s28 = smul.u32 36, %s1304_s13  ;;  %vm805_vm5 = vcmask 60416  }
   0xf   : > { %1030 = vmatprep.subr.bf16.mxu1 %v1088_v0  ;;  %1008 = vmatprep.subr.bf16.mxu0 %v1088_v0  ;;  %v1066_v6 = vld [vmem:[%s1143_s23] sm:$0xff]   ;;  %v1067_v8 = vld [vmem:[%s1143_s23 + $0x8] sm:$0xff]   ;;  %v1070_v13 = vld [vmem:[%s1143_s23 + $0x10] sm:$0xff]  }
  0x10   : > { %v214_v9 = vshrl.u32 %v1066_v6, 16  ;;  %v216_v10 = vshll.u32 %v1066_v6, 16  ;;  %v221_v11 = vshll.u32 %v1067_v8, 16  ;;  %v225_v17 = vshrl.u32 %v1067_v8, 16  ;;  %v1071_v23 = vld [vmem:[%s1143_s23 + $0x18] sm:$0xff]   ;;  %v1075_v43 = vld [vmem:[%s1143_s23 + $0xc] sm:$0xff]   ;;  %s1259_s4 = scalar_lea.vmem %s1302_s3, %s1053_s28 }
  0x11   : > { %989 = vmatmul.mubr.msk.bf16.vlgmr.msra.gmra.mxu1 %vm257_vm2, %v1066_v6  ;;  %v229_v18 = vshll.u32 %v1070_v13, 16  ;;  %v233_v25 = vshrl.u32 %v1070_v13, 16  ;;  %v237_v26 = vshll.u32 %v1071_v23, 16  ;;  %v180_v27 = vld [vmem:[%s1143_s23 + $0x20] sm:$0xf]  ;;  %v241_v33 = vshrl.u32 %v1071_v23, 16 }
  0x12   : > { %1031 = vmatpush3.bf16.msra.mxu1 %v660_v7  ;;  %992 = vmatprep.mubr.msk.bf16.mxu1 %vm1089_vm1, %v1088_v0  ;;  %v218_v14 = vrot.slane %v216_v10, 1  ;;  %v223_v15 = vrot.slane %v221_v11, 1  ;;  %v183_v28 = vld [vmem:[%s1143_s23 + $0x24] sm:$0x1]  ;;  %v442_v38 = vld [vmem:[%s1143_s23 + $0x8] sm:$0xf]  ;;  %v890_v41 = vcombine.low %v180_v27, %v180_v27 }
  0x13   : > { %v231_v22 = vrot.slane %v229_v18, 1  ;;  %v239_v30 = vrot.slane %v237_v26, 1  ;;  %v883_v31 = vcombine.low %v180_v27, %v183_v28  ;;  %v441_v37 = vld [vmem:[%s1143_s23 + $0x4] sm:$0xf]  ;;  %v631_v48 = vrot.slane %v1075_v43, 1  ;;  %v1077_v54 = vld [vmem:[%s1143_s23 + $0x14] sm:$0xff]  }
  0x14   : > { %v219_v16 = vor.u32 %v218_v14, %v214_v9  ;;  %v227_v21 = vor.u32 %v225_v17, %v223_v15  ;;  %v622_v39 = vld [vmem:[%s1143_s23 + $0x4] sm:$0xe]  ;;  %v899_v42 = vcombine.low %v441_v37, %v442_v38  ;;  %v487_v52 = vshll.u32 %v1075_v43, 16  ;;  %v1078_v62 = vld [vmem:[%s1143_s23 + $0x1c] sm:$0xff]  }
  0x15   : > { %v235_v29 = vor.u32 %v233_v25, %v231_v22  ;;  %v245_v34 = vshll.u32 %v883_v31, 16  ;;  %v243_v35 = vor.u32 %v241_v33, %v239_v30  ;;  %v912_v44 = vcombine.low %v622_v39, %v442_v38  ;;  %v1079_v7 = vld [vmem:[%s1143_s23 + $0x24] sm:$0x1f]  }
  0x16   : > { %v224_v20 = vsel %vm212_vm3, %v219_v16, %v223_v15  ;;  %v232_v24 = vsel %vm212_vm3, %v227_v21, %v231_v22  ;;  %v249_v45 = vshrl.u32 %v883_v31, 16  ;;  %v482_v46 = vshll.u32 %v899_v42, 16 }
  0x17   : > { %967 = vmatmul.mubr.msk.bf16.vlgmr.msra.gmra.mxu0 %vm257_vm2, %v224_v20  ;;  %v240_v32 = vsel %vm212_vm3, %v235_v29, %v239_v30  ;;  %v247_v36 = vrot.slane %v245_v34, 1  ;;  %v630_v47 = vrot.slane %v912_v44, 1  ;;  %v480_v50 = vshrl.u32 %v899_v42, 16 }
  0x18   : > { %1009 = vmatpush3.bf16.msra.mxu0 %v539_v19  ;;  %970 = vmatprep.mubr.msk.bf16.mxu0 %vm1089_vm1, %v1088_v0  ;;  %v484_v51 = vrot.slane %v482_v46, 1  ;;  %v489_v56 = vrot.slane %v487_v52, 1  ;;  %v633_v57 = vrot.slane %v1077_v54, 1  ;;  %v491_v59 = vshrl.u32 %v1075_v43, 16 }
  0x19   : > { %993 = vmatmul.mubr.msk.bf16.gmra.mxu1 %vm257_vm2, %v1067_v8  ;;  %v248_v40 = vsel %vm212_vm3, %v243_v35, %v247_v36  ;;  %v251_v49 = vor.u32 %v249_v45, %v247_v36  ;;  %v632_v53 = vsel %vm629_vm4, %v630_v47, %v631_v48  ;;  %v495_v60 = vshll.u32 %v1077_v54, 16 }
  0x1a   : > { %996 = vmatprep.mubr.msk.bf16.mxu1 %vm1089_vm1, %v1088_v0  ;;  %v485_v55 = vor.u32 %v484_v51, %v480_v50  ;;  %v634_v61 = vsel %vm629_vm4, %v631_v48, %v633_v57  ;;  %v493_v63 = vor.u32 %v491_v59, %v489_v56  ;;  %v635_v2 = vrot.slane %v1078_v62, 1 }
  0x1b   : > { %v497_v1 = vrot.slane %v495_v60, 1  ;;  %v499_v4 = vshrl.u32 %v1077_v54, 16  ;;  %v503_v5 = vshll.u32 %v1078_v62, 16  ;;  %v637_v10 = vrot.slane %v1079_v7, 1 }
  0x1c   : > { %v490_v58 = vsel %vm212_vm3, %v485_v55, %v489_v56  ;;  %v636_v6 = vsel %vm629_vm4, %v633_v57, %v635_v2  ;;  %v507_v12 = vshrl.u32 %v1078_v62, 16  ;;  %v515_v18 = vshrl.u32 %v1079_v7, 16 }
  0x1d   : > { %v498_v3 = vsel %vm212_vm3, %v493_v63, %v497_v1  ;;  %v501_v8 = vor.u32 %v499_v4, %v497_v1  ;;  %v505_v9 = vrot.slane %v503_v5, 1  ;;  %v638_v14 = vsel %vm629_vm4, %v635_v2, %v637_v10  ;;  %v1252_v4 = vld [vmem:[%s1301_s2] ss:$0 sm:$0xff] }
  0x1f   : > { %971 = vmatmul.mubr.msk.bf16.gmra.mxu0 %vm257_vm2, %v232_v24  ;;  %v506_v11 = vsel %vm212_vm3, %v501_v8, %v505_v9  ;;  %v509_v15 = vor.u32 %v507_v12, %v505_v9 }
  0x20   : > { %974 = vmatprep.mubr.msk.bf16.mxu0 %vm1089_vm1, %v1088_v0 }
  0x21   : > { %997 = vmatmul.mubr.msk.bf16.gmra.mxu1 %vm257_vm2, %v1070_v13  ;;  %v511_v13 = vshll.u32 %v1079_v7, 16 }
  0x22   : > { %1000 = vmatprep.mubr.msk.bf16.mxu1 %vm1089_vm1, %v1088_v0 }
  0x23   : > { %v513_v16 = vrot.slane %v511_v13, 1 }
  0x25   : > { %v514_v17 = vsel %vm212_vm3, %v509_v15, %v513_v16  ;;  %v517_v19 = vor.u32 %v515_v18, %v513_v16 }
  0x27   : > { %975 = vmatmul.mubr.msk.bf16.gmra.mxu0 %vm257_vm2, %v240_v32 }
  0x28   : > { %978 = vmatprep.mubr.msk.bf16.mxu0 %vm1089_vm1, %v1088_v0 }
  0x29   : > { %1001 = vmatmul.mubr.msk.bf16.gmra.mxu1 %vm257_vm2, %v1071_v23 }
  0x2a   : > { %1004 = vmatprep.mubr.msk.bf16.mxu1 %vm1089_vm1, %v1088_v0 }
  0x2f   : > { %979 = vmatmul.mubr.msk.bf16.gmra.mxu0 %vm257_vm2, %v248_v40 }
  0x30   : > { %982 = vmatprep.mubr.msk.bf16.mxu0 %vm1089_vm1, %v1088_v0 }
  0x31   : > { %1005 = vmatmul.mubr.msk.bf16.gmra.mxu1 %vm257_vm2, %v890_v41 }
  0x32   : > { %1032 = vmatprep.mubr.msk.bf16.mxu1 %vm1089_vm1, %v1088_v0 }
  0x37   : > { %983 = vmatmul.mubr.msk.bf16.gmra.mxu0 %vm257_vm2, %v251_v49 }
  0x38   : > { %1010 = vmatprep.mubr.msk.bf16.mxu0 %vm1089_vm1, %v1088_v0 }
  0x39   : > { %1033 = vmatmul.mubr.msk.bf16.vlgmr.msra.gmra.mxu1 %vm257_vm2, %v632_v53 }
  0x3a   : > { %1036 = vmatprep.mubr.msk.bf16.mxu1 %vm1089_vm1, %v1088_v0 }
  0x3f   : > { %1011 = vmatmul.mubr.msk.bf16.vlgmr.msra.gmra.mxu0 %vm257_vm2, %v490_v58 }
  0x40   : > { %1014 = vmatprep.mubr.msk.bf16.mxu0 %vm1089_vm1, %v1088_v0 }
  0x41   : > { %1037 = vmatmul.mubr.msk.bf16.gmra.mxu1 %vm257_vm2, %v634_v61 }
  0x42   : > { %1040 = vmatprep.mubr.msk.bf16.mxu1 %vm1089_vm1, %v1088_v0 }
  0x47   : > { %1015 = vmatmul.mubr.msk.bf16.gmra.mxu0 %vm257_vm2, %v498_v3 }
  0x48   : > { %1018 = vmatprep.mubr.msk.bf16.mxu0 %vm1089_vm1, %v1088_v0 }
  0x49   : > { %1041 = vmatmul.mubr.msk.bf16.gmra.mxu1 %vm257_vm2, %v636_v6 }
  0x4a   : > { %1044 = vmatprep.mubr.msk.bf16.mxu1 %vm1089_vm1, %v1088_v0 }
  0x4f   : > { %1019 = vmatmul.mubr.msk.bf16.gmra.mxu0 %vm257_vm2, %v506_v11 }
  0x50   : > { %1022 = vmatprep.mubr.msk.bf16.mxu0 %vm1089_vm1, %v1088_v0 }
  0x51   : > { %1045 = vmatmul.mubr.msk.bf16.gmra.mxu1 %vm257_vm2, %v638_v14 }
  0x52   : > { %1048 = vmatprep.mubr.msk.bf16.mxu1 %vm1089_vm1, %v1088_v0 }
  0x57   : > { %1023 = vmatmul.mubr.msk.bf16.gmra.mxu0 %vm257_vm2, %v514_v17 }
  0x58   : > { %1026 = vmatprep.mubr.msk.bf16.mxu0 %vm1089_vm1, %v1088_v0 }
  0x59   : > { %1049 = vmatmul.mubr.msk.bf16.gmra.mxu1 %vm257_vm2, %v637_v10 }
  0x5f   : > { %1027 = vmatmul.mubr.msk.bf16.gmra.mxu0 %vm257_vm2, %v517_v19 }
  0xd1   : > { %v403_v20 = vpop.f32.mrf.mxu1 }
  0xd3   : > { %v990_v21 = vpop.f32.mrf.mxu1 }
  0xd5   : > { %v406_v22 = vpop.f32.mrf.mxu1 }
  0xd7   : > { %v991_v23 = vpop.f32.mrf.mxu1  ;;  %v311_v24 = vpop.f32.mrf.mxu0 }
  0xd8   : > { %v404_v62 = vadd.f32 %v403_v20, %v311_v24 }
  0xd9   : > { %v411_v25 = vpop.f32.mrf.mxu1  ;;  %v968_v26 = vpop.f32.mrf.mxu0 }
  0xdb   : > { %v994_v27 = vpop.f32.mrf.mxu1  ;;  %v314_v28 = vpop.f32.mrf.mxu0 }
  0xdc   : > { %v407_v6 = vadd.f32 %v406_v22, %v314_v28 }
  0xdd   : > { %v414_v29 = vpop.f32.mrf.mxu1  ;;  %v969_v30 = vpop.f32.mrf.mxu0 }
  0xdf   : > { %v995_v31 = vpop.f32.mrf.mxu1  ;;  %v319_v32 = vpop.f32.mrf.mxu0 }
  0xe0   : > { %v412_v14 = vadd.f32 %v411_v25, %v319_v32 }
  0xe1   : > { %v1231_v33 = vpop.f32.mrf.mxu1  ;;  %v972_v34 = vpop.f32.mrf.mxu0 }
  0xe3   : > { %v998_v0 = vpop.f32.mrf.mxu1  ;;  %v322_v35 = vpop.f32.mrf.mxu0 }
  0xe4   : > { %v415_v24 = vadd.f32 %v414_v29, %v322_v35 }
  0xe5   : > { %v1233_v36 = vpop.f32.mrf.mxu1  ;;  %v973_v37 = vpop.f32.mrf.mxu0 }
  0xe7   : > { %v999_v38 = vpop.f32.mrf.mxu1  ;;  %v327_v39 = vpop.f32.mrf.mxu0 }
  0xe8   : > { %v420_v37 = vadd.f32 %v1231_v33, %v327_v39 }
  0xe9   : > { %v1235_v40 = vpop.f32.mrf.mxu1  ;;  %v976_v41 = vpop.f32.mrf.mxu0 }
  0xeb   : > { %v1002_v42 = vpop.f32.mrf.mxu1  ;;  %v1237_v43 = vpop.f32.mrf.mxu0 }
  0xed   : > { %v1239_v44 = vpop.f32.mrf.mxu1  ;;  %v977_v45 = vpop.f32.mrf.mxu0 }
  0xef   : > { %v1003_v46 = vpop.f32.mrf.mxu1  ;;  %v1241_v47 = vpop.f32.mrf.mxu0 }
  0xf1   : > { %v1243_v48 = vpop.f32.mrf.mxu1  ;;  %v980_v49 = vpop.f32.mrf.mxu0 }
  0xf3   : > { %v1006_v50 = vpop.f32.mrf.mxu1  ;;  %v1245_v51 = vpop.f32.mrf.mxu0 }
  0xf5   : > { %v438_v52 = vpop.f32.mrf.mxu1  ;;  %v981_v53 = vpop.f32.mrf.mxu0 }
  0xf6   : > { %v423_v52 = vadd.f32 %v1233_v36, %v1237_v43 }
  0xf7   : > { %v1007_v54 = vpop.f32.mrf.mxu1  ;;  %v1247_v55 = vpop.f32.mrf.mxu0 }
  0xf9   : > { %v696_v56 = vpop.f32.mrf.mxu1  ;;  %v984_v57 = vpop.f32.mrf.mxu0 }
  0xfb   : > { %v1034_v58 = vpop.f32.mrf.mxu1  ;;  %v346_v59 = vpop.f32.mrf.mxu0 }
  0xfd   : > { %v699_v60 = vpop.f32.mrf.mxu1  ;;  %v985_v61 = vpop.f32.mrf.mxu0 }
  0xfe   : > { %v428_v61 = vadd.f32 %v1235_v40, %v1241_v47 }
  0xff   : > { %v1035_v63 = vpop.f32.mrf.mxu1  ;;  %v575_v1 = vpop.f32.mrf.mxu0 }
 0x100   : > { %v613_v2 = vadd.f32 %v575_v1, %v404_v62 }
 0x101   : > { %v704_v3 = vpop.f32.mrf.mxu1  ;;  %v1012_v5 = vpop.f32.mrf.mxu0 }
 0x102   : > { %v734_v7 = vadd.f32 %v696_v56, %v613_v2 }
 0x103   : > { %v1038_v8 = vpop.f32.mrf.mxu1  ;;  %v578_v9 = vpop.f32.mrf.mxu0 }
 0x104   : > { %v750_v10 = vadd.f32 %v1252_v4, %v734_v7  ;;  %v614_v11 = vadd.f32 %v578_v9, %v407_v6  ;;  %v431_v7 = vadd.f32 %v1239_v44, %v1245_v51 }
 0x105   : > { %v707_v12 = vpop.f32.mrf.mxu1  ;;  %v1013_v13 = vpop.f32.mrf.mxu0 }
 0x106   : > { %v759_v15 = vmax.f32 %v750_v10, 0.0  ;;  %v735_v16 = vadd.f32 %v699_v60, %v614_v11 }
 0x107   : > { %v1039_v17 = vpop.f32.mrf.mxu1  ;;  %v583_v18 = vpop.f32.mrf.mxu0 }
 0x108   : > { %v931_v19 = vpack.c.bf16 %v759_v15, %v759_v15  ;;  %v751_v20 = vadd.f32 %v1252_v4, %v735_v16  ;;  %v615_v21 = vadd.f32 %v583_v18, %v412_v14  ;;  %v436_v15 = vadd.f32 %v1243_v48, %v1247_v55 }
 0x109   : > { %v712_v22 = vpop.f32.mrf.mxu1  ;;  %v1016_v23 = vpop.f32.mrf.mxu0 }
 0x10a   : > { %806 = vst.msk [vmem:[%s1259_s4] sm:$0xf] %vm805_vm5, %v931_v19  ;;  %v760_v25 = vmax.f32 %v751_v20, 0.0  ;;  %v736_v26 = vadd.f32 %v704_v3, %v615_v21 }
 0x10b   : > { %v1042_v27 = vpop.f32.mrf.mxu1  ;;  %v586_v28 = vpop.f32.mrf.mxu0 }
 0x10c   : > { %v932_v30 = vpack.c.bf16 %v760_v25, %v760_v25  ;;  %v752_v31 = vadd.f32 %v1252_v4, %v736_v26  ;;  %v616_v32 = vadd.f32 %v586_v28, %v415_v24 }
 0x10d   : > { %v715_v34 = vpop.f32.mrf.mxu1  ;;  %v1017_v0 = vpop.f32.mrf.mxu0 }
 0x10e   : > { %807 = vst.msk [vmem:[%s1259_s4 + $0x4] sm:$0xf] %vm805_vm5, %v932_v30  ;;  %v761_v38 = vmax.f32 %v752_v31, 0.0  ;;  %v737_v41 = vadd.f32 %v707_v12, %v616_v32 }
 0x10f   : > { %v1043_v29 = vpop.f32.mrf.mxu1  ;;  %v591_v35 = vpop.f32.mrf.mxu0 }
 0x110   : > { %v933_v42 = vpack.c.bf16 %v761_v38, %v761_v38  ;;  %v753_v45 = vadd.f32 %v1252_v4, %v737_v41  ;;  %v617_v46 = vadd.f32 %v591_v35, %v420_v37 }
 0x111   : > { %v720_v49 = vpop.f32.mrf.mxu1  ;;  %v1020_v50 = vpop.f32.mrf.mxu0 }
 0x112   : > { %808 = vst.msk [vmem:[%s1259_s4 + $0x8] sm:$0xf] %vm805_vm5, %v933_v42  ;;  %v762_v53 = vmax.f32 %v753_v45, 0.0  ;;  %v738_v33 = vadd.f32 %v712_v22, %v617_v46 }
 0x113   : > { %v1046_v39 = vpop.f32.mrf.mxu1  ;;  %v594_v54 = vpop.f32.mrf.mxu0 }
 0x114   : > { %v934_v56 = vpack.c.bf16 %v762_v53, %v762_v53  ;;  %v754_v57 = vadd.f32 %v1252_v4, %v738_v33  ;;  %v618_v58 = vadd.f32 %v594_v54, %v423_v52 }
 0x115   : > { %v723_v59 = vpop.f32.mrf.mxu1  ;;  %v1021_v60 = vpop.f32.mrf.mxu0 }
 0x116   : > { %809 = vst.msk [vmem:[%s1259_s4 + $0xc] sm:$0xf] %vm805_vm5, %v934_v56  ;;  %v763_v62 = vmax.f32 %v754_v57, 0.0  ;;  %v739_v36 = vadd.f32 %v715_v34, %v618_v58 }
 0x117   : > { %v1047_v43 = vpop.f32.mrf.mxu1  ;;  %v599_v63 = vpop.f32.mrf.mxu0 }
 0x118   : > { %v935_v1 = vpack.c.bf16 %v763_v62, %v763_v62  ;;  %v755_v2 = vadd.f32 %v1252_v4, %v739_v36  ;;  %v619_v3 = vadd.f32 %v599_v63, %v428_v61 }
 0x119   : > { %v728_v5 = vpop.f32.mrf.mxu1  ;;  %v1024_v6 = vpop.f32.mrf.mxu0 }
 0x11a   : > { %810 = vst.msk [vmem:[%s1259_s4 + $0x10] sm:$0xf] %vm805_vm5, %v935_v1  ;;  %v764_v8 = vmax.f32 %v755_v2, 0.0  ;;  %v740_v40 = vadd.f32 %v720_v49, %v619_v3 }
 0x11b   : > { %v1050_v47 = vpop.f32.mrf.mxu1  ;;  %v602_v9 = vpop.f32.mrf.mxu0 }
 0x11c   : > { %v936_v10 = vpack.c.bf16 %v764_v8, %v764_v8  ;;  %v756_v11 = vadd.f32 %v1252_v4, %v740_v40  ;;  %v620_v12 = vadd.f32 %v602_v9, %v431_v7 }
 0x11d   : > { %v731_v13 = vpop.f32.mrf.mxu1  ;;  %v1025_v14 = vpop.f32.mrf.mxu0 }
 0x11e   : > { %811 = vst.msk [vmem:[%s1259_s4 + $0x14] sm:$0xf] %vm805_vm5, %v936_v10  ;;  %v765_v44 = vmax.f32 %v756_v11, 0.0  ;;  %v741_v51 = vadd.f32 %v723_v59, %v620_v12 }
 0x11f   : > { %v1051_v16 = vpop.f32.mrf.mxu1  ;;  %v607_v17 = vpop.f32.mrf.mxu0 }
 0x120   : > { %v937_v18 = vpack.c.bf16 %v765_v44, %v765_v44  ;;  %v757_v19 = vadd.f32 %v1252_v4, %v741_v51  ;;  %v621_v20 = vadd.f32 %v607_v17, %v436_v15 }
 0x121   : > { %v1028_v21 = vpop.f32.mrf.mxu0 }
 0x122   : > { %812 = vst.msk [vmem:[%s1259_s4 + $0x18] sm:$0xf] %vm805_vm5, %v937_v18  ;;  %v766_v22 = vmax.f32 %v757_v19, 0.0  ;;  %v742_v23 = vadd.f32 %v728_v5, %v621_v20 }
 0x123   : > { %v610_v24 = vpop.f32.mrf.mxu0 }
 0x124   : > { %v938_v25 = vpack.c.bf16 %v766_v22, %v766_v22  ;;  %v758_v48 = vadd.f32 %v1252_v4, %v742_v23 }
 0x125   : > { %v1029_v55 = vpop.f32.mrf.mxu0 }
 0x126   : > { %813 = vst.msk [vmem:[%s1259_s4 + $0x1c] sm:$0xf] %vm805_vm5, %v938_v25  ;;  %v767_v26 = vmax.f32 %v758_v48, 0.0 }
 0x128   : > { %v939_v27 = vpack.c.bf16 %v767_v26, %v767_v26 }
 0x12a   : > { %814 = vst.msk [vmem:[%s1259_s4 + $0x20] sm:$0xf] %vm805_vm5, %v939_v27 }
 0x12b PF: > { %s13_s12 = sadd.s32 1, %s1086_s12  }
 0x12c   : > { %p10_p4 = scmp.ge.s32.totalorder %s13_s12, 4  }
 0x12e   :  { %12 = sbr.rel (!%p10_p4) target bundleno = 1 (0x1), region = 65 }

// kernel: net_forward.9
= control target key start
LH: loop header
LB: loop body
LE: loop exit
PB: predicated region body
PF: predicated region fallthrough
CT: control target
= control target key end

     0   :  { %s769_s12 = smov 0   ;;  %s827_s0 = inlined_call_operand.vmem [shape: bf16[2,30,32], index: 0, kind: input, shape index: {}]   ;;  %s828_s1 = inlined_call_operand.vmem [shape: bf16[4,32,16], index: 1, kind: input, shape index: {}]   ;;  %s829_s2 = inlined_call_operand.vmem [shape: f32[1,16], index: 2, kind: input, shape index: {}]   ;;  %s830_s3 = inlined_call_operand.vmem [shape: bf16[2,20,16], index: 3, kind: output, shape index: {}]  }
   0x1 LB: > { %s618_s13 = sadd.s32 4294967295, %s747_s12   ;;  %p622_p0 = scmp.ge.s32.totalorder %s747_s12, 1  ;;  %s747_s12 = sphi %s769_s12, %s13_s12  }
   0x2   : > { %p137_p1 = scmp.lt.s32.totalorder %s747_s12, 3 }
   0x4   : > { %p138_p2 = pnand %p622_p0, %p137_p1 }
   0x5   : > { %p161_p3 = scmp.lt.s32.totalorder (!%p138_p2), %s618_s13, 1 }
   0x6   : > { %141 = sbr.rel (%p138_p2) target bundleno = 241 (0xf1), region = 32 }
   0xb   : > { %v727_v0 = vld [vmem:[%s828_s1 + $0x8] sm:$0xff]   ;;  %v728_v1 = vld [vmem:[%s828_s1 + $0x18] sm:$0xff]   ;;  %v729_v2 = vld [vmem:[%s828_s1] sm:$0xff]   ;;  %s832_s13 = smov (!%p161_p3, %s618_s13), 1  ;;  %vm221_vm0 = vcmask 261120   ;;  %vm459_vm2 = vcmask 1044480  }
   0xc   : > { %694 = vmatprep.subr.bf16.mxu1 %v727_v0  ;;  %686 = vmatprep.subr.bf16.mxu0 %v728_v1  ;;  %v730_v3 = vld [vmem:[%s828_s1 + $0x10] sm:$0xff]   ;;  %s666_s22 = sshll.u32 %s832_s13, 4  ;;  %v733_v4 = vld [vmem:[%s828_s1 + $0x38] sm:$0xff]   ;;  %vm193_vm1 = vsmask.f32 7424  ;;  %v735_v7 = vld [vmem:[%s828_s1 + $0x28] sm:$0xff]  }
   0xd   : > { %695 = vmatpush3.bf16.msra.mxu1 %v727_v0  ;;  %687 = vmatpush3.bf16.msra.mxu0 %v728_v1  ;;  %s165_s27 = scalar_lea.vmem %s827_s0, %s666_s22  ;;  %v736_v11 = vld [vmem:[%s828_s1 + $0x30] sm:$0xff]   ;;  %v737_v27 = vld [vmem:[%s828_s1 + $0x20] sm:$0xff]   ;;  %vm363_vm3 = vsmask.f32 5376  ;;  %s718_s9 = smul.u32 12, %s832_s13  ;;  %vm561_vm4 = vcmask 123904  }
   0xe   : > { %696 = vmatprep.subr.bf16.mxu1 %v729_v2  ;;  %688 = vmatprep.subr.bf16.mxu0 %v730_v3  ;;  %v731_v5 = vld [vmem:[%s165_s27] sm:$0xff]   ;;  %v732_v6 = vld [vmem:[%s165_s27 + $0x8] ss:$0 sps:$4 sm:$0x33]   ;;  %vm558_vm5 = vcmask 125952  }
   0xf   : > { %698 = vmatprep.mubr.msk.bf16.mxu1 %vm221_vm0, %v731_v5  ;;  %v734_v8 = vld [vmem:[%s165_s27 + $0x8] ss:$0 sps:$4 sm:$0x77]   ;;  %v195_v9 = vshrl.u32 %v731_v5, 16  ;;  %v197_v10 = vshll.u32 %v731_v5, 16  ;;  %s170_s14 = scalar_lea.vmem %s830_s3, %s718_s9 }
  0x10   : > { %v202_v12 = vshll.u32 %v734_v8, 16  ;;  %v206_v13 = vshrl.u32 %v734_v8, 16  ;;  %v344_v15 = vld [vmem:[%s165_s27] sm:$0xc]  ;;  %v345_v16 = vld [vmem:[%s165_s27 + $0x4] sm:$0xf] }
  0x11   : > { %697 = vmatpush3.bf16.msra.mxu1 %v729_v2  ;;  %689 = vmatpush3.bf16.msra.mxu0 %v730_v3  ;;  %v199_v14 = vrot.slane %v197_v10, 1  ;;  %v645_v18 = vcombine.low %v344_v15, %v345_v16  ;;  %v739_v20 = vld [vmem:[%s165_s27 + $0x8] sm:$0x1f]   ;;  %v450_v21 = vld [vmem:[%s165_s27] sm:$0x8] }
  0x12   : > { %710 = vmatprep.subr.bf16.mxu1 %v733_v4  ;;  %702 = vmatprep.subr.bf16.mxu0 %v735_v7  ;;  %v204_v17 = vrot.slane %v202_v12, 1  ;;  %v655_v23 = vcombine.low %v450_v21, %v345_v16  ;;  %v461_v28 = vrot.slane %v739_v20, 3  ;;  %v373_v29 = vshrl.u32 %v739_v20, 16  ;;  %v660_v55 = vld [vmem:[%s829_s2] ss:$0 sm:$0xff] }
  0x13   : > { %v200_v19 = vor.u32 %v199_v14, %v195_v9  ;;  %v365_v24 = vshrl.u32 %v645_v18, 16  ;;  %v368_v25 = vshll.u32 %v645_v18, 16  ;;  %v376_v30 = vshll.u32 %v739_v20, 16 }
  0x14   : > { %699 = vmatmul.mubr.msk.bf16.vlgmr.msra.gmra.mxu1 %vm221_vm0, %v732_v6  ;;  %v208_v22 = vor.u32 %v206_v13, %v204_v17  ;;  %v460_v31 = vrot.slane %v655_v23, 3  ;;  %v375_v34 = vrot.slane %v373_v29, 2 }
  0x15   : > { %711 = vmatpush3.bf16.msra.mxu1 %v733_v4  ;;  %v205_v26 = vsel %vm193_vm1, %v200_v19, %v204_v17  ;;  %v367_v32 = vrot.slane %v365_v24, 2  ;;  %v370_v33 = vrot.slane %v368_v25, 3  ;;  %v378_v35 = vrot.slane %v376_v30, 3 }
  0x16   : > { %712 = vmatprep.subr.bf16.mxu1 %v736_v11  ;;  %690 = vmatprep.mubr.msk.bf16.mxu0 %vm221_vm0, %v205_v26  ;;  %v462_v36 = vsel %vm459_vm2, %v460_v31, %v461_v28 }
  0x17   : > { %691 = vmatmul.mubr.msk.bf16.vlgmr.msra.gmra.mxu0 %vm221_vm0, %v208_v22  ;;  %v371_v37 = vor.u32 %v370_v33, %v367_v32  ;;  %714 = vmatprep.mubr.msk.bf16.mxu1 %vm221_vm0, %v462_v36  ;;  %v379_v38 = vor.u32 %v378_v35, %v375_v34 }
  0x18   : > { %703 = vmatpush3.bf16.msra.mxu0 %v735_v7 }
  0x19   : > { %713 = vmatpush3.bf16.msra.mxu1 %v736_v11  ;;  %704 = vmatprep.subr.bf16.mxu0 %v737_v27  ;;  %v380_v39 = vsel %vm363_vm3, %v371_v37, %v379_v38 }
  0x1a   : > { %706 = vmatprep.mubr.msk.bf16.mxu0 %vm221_vm0, %v380_v39 }
  0x1c   : > { %715 = vmatmul.mubr.msk.bf16.vlgmr.msra.gmra.mxu1 %vm221_vm0, %v461_v28  ;;  %705 = vmatpush3.bf16.msra.mxu0 %v737_v27 }
  0x1f   : > { %707 = vmatmul.mubr.msk.bf16.vlgmr.msra.gmra.mxu0 %vm221_vm0, %v379_v38 }
  0xd4   : > { %v700_v40 = vpop.f32.mrf.mxu1 }
  0xd6   : > { %v330_v41 = vpop.f32.mrf.mxu1 }
  0xd7   : > { %v692_v44 = vpop.f32.mrf.mxu0 }
  0xd8   : > { %v701_v42 = vpop.f32.mrf.mxu1  ;;  %v339_v50 = vadd.f32 %v700_v40, %v692_v44 }
  0xd9   : > { %v262_v45 = vpop.f32.mrf.mxu0 }
  0xda   : > { %v333_v43 = vpop.f32.mrf.mxu1  ;;  %v331_v53 = vadd.f32 %v330_v41, %v262_v45 }
  0xdb   : > { %v693_v47 = vpop.f32.mrf.mxu0 }
  0xdc   : > { %v716_v46 = vpop.f32.mrf.mxu1 }
  0xdd   : > { %v265_v49 = vpop.f32.mrf.mxu0 }
  0xde   : > { %v515_v48 = vpop.f32.mrf.mxu1  ;;  %v334_v60 = vadd.f32 %v333_v43, %v265_v49 }
  0xdf   : > { %v708_v52 = vpop.f32.mrf.mxu0 }
  0xe0   : > { %v717_v51 = vpop.f32.mrf.mxu1  ;;  %v449_v54 = vadd.f32 %v708_v52, %v339_v50 }
  0xe1   : > { %v433_v56 = vpop.f32.mrf.mxu0 }
  0xe2   : > { %v531_v57 = vadd.f32 %v716_v46, %v449_v54  ;;  %v447_v58 = vadd.f32 %v433_v56, %v331_v53  ;;  %v518_v3 = vpop.f32.mrf.mxu1 }
  0xe3   : > { %v709_v59 = vpop.f32.mrf.mxu0 }
  0xe4   : > { %v541_v61 = vadd.f32 %v660_v55, %v531_v57  ;;  %v529_v62 = vadd.f32 %v515_v48, %v447_v58 }
  0xe5   : > { %v436_v63 = vpop.f32.mrf.mxu0 }
  0xe6   : > { %v544_v0 = vmax.f32 %v541_v61, 0.0  ;;  %v539_v1 = vadd.f32 %v660_v55, %v529_v62  ;;  %v448_v2 = vadd.f32 %v436_v63, %v334_v60 }
  0xe8   : > { %v669_v4 = vpack.c.bf16 %v544_v0, %v544_v0  ;;  %v542_v5 = vmax.f32 %v539_v1, 0.0  ;;  %v530_v6 = vadd.f32 %v518_v3, %v448_v2 }
  0xea   : > { %562 = vst.msk [vmem:[%s170_s14 + $0x8] sm:$0x3] %vm561_vm4, %v669_v4  ;;  %v667_v7 = vpack.c.bf16 %v542_v5, %v542_v5  ;;  %v540_v8 = vadd.f32 %v660_v55, %v530_v6 }
  0xec   : > { %559 = vst.msk [vmem:[%s170_s14] sm:$0xf] %vm558_vm5, %v667_v7  ;;  %v543_v9 = vmax.f32 %v540_v8, 0.0 }
  0xee   : > { %v668_v10 = vpack.c.bf16 %v543_v9, %v543_v9 }
  0xf0   : > { %560 = vst.msk [vmem:[%s170_s14 + $0x4] sm:$0xf] %vm558_vm5, %v668_v10 }
  0xf1 PF: > { %s13_s12 = sadd.s32 1, %s747_s12  }
  0xf2   : > { %p10_p4 = scmp.ge.s32.totalorder %s13_s12, 4  }
  0xf4   :  { %12 = sbr.rel (!%p10_p4) target bundleno = 1 (0x1), region = 65 }

// kernel: tile.23
= control target key start
LH: loop header
LB: loop body
LE: loop exit
PB: predicated region body
PF: predicated region fallthrough
CT: control target
= control target key end

     0   :  { %s22_s0 = inlined_call_operand.vmem [shape: f32[32], index: 0, kind: input, shape index: {}]   ;;  %s23_s1 = inlined_call_operand.vmem [shape: f32[4,32], index: 1, kind: output, shape index: {}]  }
   0x1   :  { %v4_v0 = vld [vmem:[%s22_s0] ss:$0 sm:$0xff] }
   0x2   :  { %5 = vst [vmem:[%s23_s1] sm:$0xf] %v4_v0 }

// kernel: tile.24
= control target key start
LH: loop header
LB: loop body
LE: loop exit
PB: predicated region body
PF: predicated region fallthrough
CT: control target
= control target key end

     0   :  { %vm8_vm0 = vcmask 261120   ;;  %s40_s8 = smov 32   ;;  %s41_s9 = smov 64   ;;  %vm14_vm1 = vcmask 1048320   ;;  %vm20_vm2 = vcmask 785920   ;;  %vm26_vm3 = vcmask 523520   ;;  %s58_s0 = inlined_call_operand.vmem [shape: f32[4,32], index: 0, kind: input, shape index: {}]   ;;  %s59_s1 = inlined_call_operand.vmem [shape: f32[1,128], index: 1, kind: output, shape index: {}]  }
   0x1   :  { %v5_v0 = vld [vmem:[%s58_s0] sm:$0xf]  ;;  %s39_s0 = smov 96  }
   0x2   :  { %6 = vst [vmem:[#allocation1] sm:$0xf] %v5_v0 }
   0x9   :  { %v11_v1 = vld [vmem:[#allocation1 + $0x3] sm:$0x1]   ;;  %v23_v2 = vld [vmem:[#allocation1 + $0x1] sm:$0x1]   ;;  %v7_v3 = vld [vmem:[#allocation1] sm:$0x1]  }
   0xa   :  { %12 = vrot.lane.b32.xlu0 %v11_v1, %s39_s0  ;;  %24 = vrot.lane.b32.xlu1 %v23_v2, %s40_s8  ;;  %v17_v4 = vld [vmem:[#allocation1 + $0x2] sm:$0x1]   ;;  %9 = vst.msk [vmem:[#allocation0] sm:$0x1] %vm8_vm0, %v7_v3  }
   0xe   :  { %18 = vrot.lane.b32.xlu0 %v17_v4, %s41_s9 }
  0x7c   :  { %v13_v5 = vpop.permute.xlu0 %12   ;;  %v25_v6 = vpop.permute.xlu1 %24  }
  0x7d   :  { %15 = vst.msk [vmem:[#allocation0] sm:$0x1] %vm14_vm1, %v13_v5  }
  0x80   :  { %v19_v7 = vpop.permute.xlu0 %18  }
  0x81   :  { %21 = vst.msk [vmem:[#allocation0] sm:$0x1] %vm20_vm2, %v19_v7  }
  0x82   :  { %27 = vst.msk [vmem:[#allocation0] sm:$0x1] %vm26_vm3, %v25_v6  }
  0x89   :  { %v32_v8 = vld [vmem:[#allocation0] sm:$0x1] }
  0x8a   :  { %35 = vst [vmem:[%s59_s1] sm:$0x1] %v32_v8 }

// kernel: net_forward.10
= control target key start
LH: loop header
LB: loop body
LE: loop exit
PB: predicated region body
PF: predicated region fallthrough
CT: control target
= control target key end

     0   :  { %s759_s12 = smov 0   ;;  %s866_s0 = inlined_call_operand.vmem [shape: bf16[2,12,64], index: 0, kind: input, shape index: {}]   ;;  %s867_s1 = inlined_call_operand.vmem [shape: bf16[4,64,32], index: 1, kind: input, shape index: {}]   ;;  %s868_s2 = inlined_call_operand.vmem [shape: f32[1,32], index: 2, kind: input, shape index: {}]   ;;  %s869_s3 = inlined_call_operand.vmem [shape: bf16[2,6,32], index: 3, kind: output, shape index: {}]  }
   0x1 LB: > { %s573_s13 = sadd.s32 4294967295, %s735_s12   ;;  %p577_p0 = scmp.ge.s32.totalorder %s735_s12, 1  ;;  %s735_s12 = sphi %s759_s12, %s13_s12  }
   0x2   : > { %p137_p1 = scmp.lt.s32.totalorder %s735_s12, 3 }
   0x4   : > { %p138_p2 = pnand %p577_p0, %p137_p1 }
   0x5   : > { %p160_p3 = scmp.lt.s32.totalorder (!%p138_p2), %s573_s13, 1 }
   0x6   : > { %141 = sbr.rel (%p138_p2) target bundleno = 248 (0xf8), region = 32 }
   0xb   : > { %v710_v0 = vld [vmem:[%s867_s1 + $0x38] sm:$0xff]   ;;  %v737_v1 = vmov 0.0   ;;  %v712_v3 = vld [vmem:[%s867_s1 + $0x30] sm:$0xff]   ;;  %vm738_vm0 = vmmov 0   ;;  %s871_s13 = smov (!%p160_p3, %s573_s13), 1  ;;  %v714_v5 = vld [vmem:[%s867_s1 + $0x28] sm:$0xff]  }
   0xc   : > { %652 = vmatprep.subr.bf16.mxu0 %v737_v1  ;;  %664 = vmatprep.subr.bf16.mxu1 %v737_v1  ;;  %v711_v2 = vld [vmem:[%s867_s1 + $0x18] sm:$0xff]   ;;  %v713_v4 = vld [vmem:[%s867_s1 + $0x10] sm:$0xff]   ;;  %s631_s24 = sshll.u32 %s871_s13, 3  ;;  %v715_v6 = vld [vmem:[%s867_s1 + $0x8] sm:$0xff]   ;;  %vm223_vm1 = vcmask 523264   ;;  %s580_s27 = sshll.u32 %s871_s13, 2 }
   0xd   : > { %653 = vmatpush3.bf16.msra.mxu0 %v710_v0  ;;  %660 = vmatprep.mubr.msk.bf16.mxu0 %vm738_vm0, %v737_v1  ;;  %s800_s29 = scalar_lea.vmem %s866_s0, %s631_s24  ;;  %v716_v8 = vld [vmem:[%s867_s1 + $0x20] sm:$0xff]   ;;  %v719_v15 = vld [vmem:[%s867_s1 + $0x58] sm:$0xff]   ;;  %v721_v19 = vld [vmem:[%s867_s1 + $0x50] sm:$0xff]   ;;  %s168_s30 = scalar_lea.vmem %s869_s3, %s580_s27  ;;  %vm518_vm2 = vcmask 256000  }
   0xe   : > { %665 = vmatpush3.bf16.msra.mxu1 %v711_v2  ;;  %654 = vmatprep.subr.bf16.mxu0 %v737_v1  ;;  %v718_v7 = vld [vmem:[%s800_s29] ss:$0 sps:$4 sm:$0xff]   ;;  %v720_v16 = vld [vmem:[%s867_s1 + $0x78] sm:$0xff]   ;;  %v334_v17 = vld [vmem:[%s800_s29] sm:$0xe] }
   0xf   : > { %666 = vmatprep.subr.bf16.mxu1 %v737_v1  ;;  %672 = vmatprep.mubr.msk.bf16.mxu1 %vm738_vm0, %v737_v1  ;;  %v193_v9 = vshrl.u32 %v718_v7, 16  ;;  %v195_v10 = vshll.u32 %v718_v7, 16  ;;  %v717_v11 = vld [vmem:[%s867_s1] sm:$0xff]   ;;  %v722_v21 = vld [vmem:[%s867_s1 + $0x70] sm:$0xff]   ;;  %v723_v24 = vld [vmem:[%s867_s1 + $0x48] sm:$0xff]  }
  0x10   : > { %v170_v13 = vld [vmem:[%s800_s29] sm:$0x7]  ;;  %v335_v18 = vld [vmem:[%s800_s29 + $0x4] sm:$0x1]  ;;  %v724_v25 = vld [vmem:[%s867_s1 + $0x68] sm:$0xff]  }
  0x11   : > { %655 = vmatpush3.bf16.msra.mxu0 %v712_v3  ;;  %v197_v12 = vrot.slane %v195_v10, 1  ;;  %v608_v20 = vcombine.low %v334_v17, %v335_v18  ;;  %v426_v26 = vld [vmem:[%s800_s29] sm:$0xc]  ;;  %v628_v46 = vld [vmem:[%s868_s2] ss:$0 sm:$0xff] }
  0x12   : > { %667 = vmatpush3.bf16.msra.mxu1 %v713_v4  ;;  %656 = vmatprep.subr.bf16.mxu0 %v737_v1  ;;  %v725_v29 = vld [vmem:[%s867_s1 + $0x40] sm:$0xff]   ;;  %v622_v30 = vcombine.low %v426_v26, %v335_v18 }
  0x13   : > { %668 = vmatprep.subr.bf16.mxu1 %v737_v1  ;;  %v198_v14 = vor.u32 %v197_v12, %v193_v9  ;;  %v351_v22 = vshrl.u32 %v608_v20, 16  ;;  %v354_v23 = vshll.u32 %v608_v20, 16  ;;  %v726_v31 = vld [vmem:[%s867_s1 + $0x60] sm:$0xff]  }
  0x14   : > { %v439_v33 = vrot.slane %v622_v30, 2 }
  0x15   : > { %657 = vmatpush3.bf16.msra.mxu0 %v714_v5  ;;  %v353_v27 = vrot.slane %v351_v22, 1  ;;  %v356_v28 = vrot.slane %v354_v23, 2 }
  0x16   : > { %669 = vmatpush3.bf16.msra.mxu1 %v715_v6  ;;  %658 = vmatprep.subr.bf16.mxu0 %v737_v1 }
  0x17   : > { %670 = vmatprep.subr.bf16.mxu1 %v737_v1  ;;  %v357_v32 = vor.u32 %v356_v28, %v353_v27 }
  0x19   : > { %659 = vmatpush3.bf16.msra.mxu0 %v716_v8 }
  0x1a   : > { %671 = vmatpush3.bf16.msra.mxu1 %v717_v11  ;;  %676 = vmatprep.subr.bf16.mxu0 %v737_v1 }
  0x1b   : > { %688 = vmatprep.subr.bf16.mxu1 %v737_v1 }
  0x1c   : > { %661 = vmatmul.mubr.msk.bf16.vlgmr.msra.gmra.mxu0 %vm223_vm1, %v198_v14 }
  0x1d   : > { %673 = vmatmul.mubr.msk.bf16.vlgmr.msra.gmra.mxu1 %vm223_vm1, %v170_v13  ;;  %677 = vmatpush3.bf16.msra.mxu0 %v719_v15 }
  0x1e   : > { %689 = vmatpush3.bf16.msra.mxu1 %v720_v16  ;;  %678 = vmatprep.subr.bf16.mxu0 %v737_v1 }
  0x1f   : > { %690 = vmatprep.subr.bf16.mxu1 %v737_v1  ;;  %684 = vmatprep.mubr.msk.bf16.mxu0 %vm738_vm0, %v737_v1 }
  0x20   : > { %696 = vmatprep.mubr.msk.bf16.mxu1 %vm738_vm0, %v737_v1 }
  0x21   : > { %679 = vmatpush3.bf16.msra.mxu0 %v721_v19 }
  0x22   : > { %691 = vmatpush3.bf16.msra.mxu1 %v722_v21  ;;  %680 = vmatprep.subr.bf16.mxu0 %v737_v1 }
  0x23   : > { %692 = vmatprep.subr.bf16.mxu1 %v737_v1 }
  0x25   : > { %681 = vmatpush3.bf16.msra.mxu0 %v723_v24 }
  0x26   : > { %693 = vmatpush3.bf16.msra.mxu1 %v724_v25  ;;  %682 = vmatprep.subr.bf16.mxu0 %v737_v1 }
  0x27   : > { %694 = vmatprep.subr.bf16.mxu1 %v737_v1 }
  0x29   : > { %683 = vmatpush3.bf16.msra.mxu0 %v725_v29 }
  0x2a   : > { %695 = vmatpush3.bf16.msra.mxu1 %v726_v31 }
  0x2c   : > { %685 = vmatmul.mubr.msk.bf16.vlgmr.msra.gmra.mxu0 %vm223_vm1, %v357_v32 }
  0x2d   : > { %697 = vmatmul.mubr.msk.bf16.vlgmr.msra.gmra.mxu1 %vm223_vm1, %v439_v33 }
  0xdc   : > { %v261_v34 = vpop.f32.mrf.mxu0 }
  0xdd   : > { %v328_v35 = vpop.f32.mrf.mxu1 }
  0xde   : > { %v662_v36 = vpop.f32.mrf.mxu0  ;;  %v329_v42 = vadd.f32 %v328_v35, %v261_v34 }
  0xdf   : > { %v674_v37 = vpop.f32.mrf.mxu1 }
  0xe0   : > { %v264_v38 = vpop.f32.mrf.mxu0 }
  0xe1   : > { %v331_v39 = vpop.f32.mrf.mxu1 }
  0xe2   : > { %v663_v40 = vpop.f32.mrf.mxu0 }
  0xe3   : > { %v675_v41 = vpop.f32.mrf.mxu1 }
  0xec   : > { %v419_v43 = vpop.f32.mrf.mxu0 }
  0xed   : > { %v425_v44 = vadd.f32 %v419_v43, %v329_v42  ;;  %v501_v45 = vpop.f32.mrf.mxu1 }
  0xee   : > { %v686_v47 = vpop.f32.mrf.mxu0 }
  0xef   : > { %v507_v48 = vadd.f32 %v501_v45, %v425_v44  ;;  %v698_v49 = vpop.f32.mrf.mxu1 }
  0xf0   : > { %v422_v50 = vpop.f32.mrf.mxu0 }
  0xf1   : > { %v515_v51 = vadd.f32 %v628_v46, %v507_v48  ;;  %v504_v52 = vpop.f32.mrf.mxu1 }
  0xf2   : > { %v687_v53 = vpop.f32.mrf.mxu0 }
  0xf3   : > { %v516_v54 = vmax.f32 %v515_v51, 0.0  ;;  %v699_v55 = vpop.f32.mrf.mxu1 }
  0xf5   : > { %v517_v56 = vpack.c.bf16 %v516_v54, %v516_v54 }
  0xf7   : > { %519 = vst.msk [vmem:[%s168_s30] sm:$0x7] %vm518_vm2, %v517_v56 }
  0xf8 PF: > { %s13_s12 = sadd.s32 1, %s735_s12  }
  0xf9   : > { %p10_p4 = scmp.ge.s32.totalorder %s13_s12, 4  }
  0xfb   :  { %12 = sbr.rel (!%p10_p4) target bundleno = 1 (0x1), region = 65 }

// kernel: net_forward.11
= control target key start
LH: loop header
LB: loop body
LE: loop exit
PB: predicated region body
PF: predicated region fallthrough
CT: control target
= control target key end

     0   :  { %s960_s12 = smov 0   ;;  %s1126_s0 = inlined_call_operand.vmem [shape: bf16[2,6,128], index: 0, kind: input, shape index: {}]   ;;  %s1127_s1 = inlined_call_operand.vmem [shape: bf16[4,128,64], index: 1, kind: input, shape index: {}]   ;;  %s1128_s2 = inlined_call_operand.vmem [shape: f32[1,64], index: 2, kind: input, shape index: {}]   ;;  %s1129_s3 = inlined_call_operand.vmem [shape: bf16[2,2,64], index: 3, kind: output, shape index: {}]  }
   0x1 LB: > { %s677_s13 = sadd.s32 4294967295, %s936_s12   ;;  %p681_p0 = scmp.ge.s32.totalorder %s936_s12, 1  ;;  %s936_s12 = sphi %s960_s12, %s13_s12  }
   0x2   : > { %p136_p1 = scmp.lt.s32.totalorder %s936_s12, 3 }
   0x4   : > { %p137_p2 = pnand %p681_p0, %p136_p1 }
   0x5   : > { %p157_p3 = scmp.lt.s32.totalorder (!%p137_p2), %s677_s13, 1 }
   0x6   : > { %140 = sbr.rel (%p137_p2) target bundleno = 280 (0x118), region = 32 }
   0xb   : > { %v895_v0 = vld [vmem:[%s1127_s1 + $0x78] sm:$0xff]   ;;  %v938_v1 = vmov 0.0   ;;  %v897_v3 = vld [vmem:[%s1127_s1 + $0x70] sm:$0xff]   ;;  %vm939_vm0 = vmmov 0   ;;  %v899_v5 = vld [vmem:[%s1127_s1 + $0x68] sm:$0xff]   ;;  %s1131_s13 = smov (!%p157_p3, %s677_s13), 1 }
   0xc   : > { %805 = vmatprep.subr.bf16.mxu0 %v938_v1  ;;  %825 = vmatprep.subr.bf16.mxu1 %v938_v1  ;;  %v896_v2 = vld [vmem:[%s1127_s1 + $0x38] sm:$0xff]   ;;  %v898_v4 = vld [vmem:[%s1127_s1 + $0x30] sm:$0xff]   ;;  %v900_v6 = vld [vmem:[%s1127_s1 + $0x28] sm:$0xff]   ;;  %s682_s28 = sshll.u32 %s1131_s13, 2  ;;  %s163_s10 = scalar_lea.vmem %s1129_s3, %s1131_s13  ;;  %vm628_vm1 = vcmask 516096  }
   0xd   : > { %806 = vmatpush3.bf16.msra.mxu0 %v895_v0  ;;  %821 = vmatprep.mubr.msk.bf16.mxu0 %vm939_vm0, %v938_v1  ;;  %v901_v7 = vld [vmem:[%s1127_s1 + $0x60] sm:$0xff]   ;;  %s1010_s6 = scalar_lea.vmem %s1126_s0, %s682_s28  ;;  %v903_v9 = vld [vmem:[%s1127_s1 + $0x58] sm:$0xff]   ;;  %v905_v12 = vld [vmem:[%s1127_s1 + $0x50] sm:$0xff]  }
   0xe   : > { %826 = vmatpush3.bf16.msra.mxu1 %v896_v2  ;;  %807 = vmatprep.subr.bf16.mxu0 %v938_v1  ;;  %v902_v8 = vld [vmem:[%s1127_s1 + $0x20] sm:$0xff]   ;;  %v904_v10 = vld [vmem:[%s1127_s1 + $0x18] sm:$0xff]   ;;  %v906_v13 = vld [vmem:[%s1127_s1 + $0x10] sm:$0xff]  }
   0xf   : > { %827 = vmatprep.subr.bf16.mxu1 %v938_v1  ;;  %841 = vmatprep.mubr.msk.bf16.mxu1 %vm939_vm0, %v938_v1  ;;  %v911_v11 = vld [vmem:[%s1010_s6] ss:$0 sps:$4 sm:$0x33]   ;;  %v907_v15 = vld [vmem:[%s1127_s1 + $0x48] sm:$0xff]   ;;  %v912_v22 = vld [vmem:[%s1127_s1 + $0xb8] sm:$0xff]  }
  0x10   : > { %v206_v14 = vshll.u32 %v911_v11, 16  ;;  %v908_v16 = vld [vmem:[%s1127_s1 + $0x8] sm:$0xff]   ;;  %v204_v17 = vshrl.u32 %v911_v11, 16  ;;  %v909_v19 = vld [vmem:[%s1127_s1 + $0x40] sm:$0xff]   ;;  %v913_v24 = vld [vmem:[%s1127_s1 + $0xf8] sm:$0xff]  }
  0x11   : > { %808 = vmatpush3.bf16.msra.mxu0 %v897_v3  ;;  %v910_v20 = vld [vmem:[%s1127_s1] sm:$0xff]   ;;  %v914_v25 = vld [vmem:[%s1127_s1 + $0xb0] sm:$0xff]   ;;  %v916_v27 = vld [vmem:[%s1127_s1 + $0xa8] sm:$0xff]  }
  0x12   : > { %828 = vmatpush3.bf16.msra.mxu1 %v898_v4  ;;  %809 = vmatprep.subr.bf16.mxu0 %v938_v1  ;;  %v208_v18 = vrot.slane %v206_v14, 1  ;;  %v165_v23 = vld [vmem:[%s1010_s6] sm:$0x1]  ;;  %v915_v26 = vld [vmem:[%s1127_s1 + $0xf0] sm:$0xff]   ;;  %v917_v28 = vld [vmem:[%s1127_s1 + $0xe8] sm:$0xff]  }
  0x13   : > { %829 = vmatprep.subr.bf16.mxu1 %v938_v1  ;;  %v918_v29 = vld [vmem:[%s1127_s1 + $0xa0] sm:$0xff]   ;;  %v920_v31 = vld [vmem:[%s1127_s1 + $0x98] sm:$0xff]   ;;  %v922_v33 = vld [vmem:[%s1127_s1 + $0x90] sm:$0xff]  }
  0x14   : > { %v209_v21 = vor.u32 %v208_v18, %v204_v17  ;;  %v919_v30 = vld [vmem:[%s1127_s1 + $0xe0] sm:$0xff]   ;;  %v921_v32 = vld [vmem:[%s1127_s1 + $0xd8] sm:$0xff]   ;;  %v923_v35 = vld [vmem:[%s1127_s1 + $0xd0] sm:$0xff]  }
  0x15   : > { %810 = vmatpush3.bf16.msra.mxu0 %v899_v5  ;;  %v929_v34 = vld [vmem:[%s1010_s6] ss:$0 sps:$4 sm:$0x66]   ;;  %v924_v36 = vld [vmem:[%s1127_s1 + $0x88] sm:$0xff]  }
  0x16   : > { %830 = vmatpush3.bf16.msra.mxu1 %v900_v6  ;;  %811 = vmatprep.subr.bf16.mxu0 %v938_v1  ;;  %v521_v37 = vshrl.u32 %v929_v34, 16  ;;  %v524_v38 = vshll.u32 %v929_v34, 16  ;;  %v925_v39 = vld [vmem:[%s1127_s1 + $0xc8] sm:$0xff]   ;;  %v928_v40 = vld [vmem:[%s1010_s6] ss:$0 sps:$4 sm:$0x22]  }
  0x17   : > { %831 = vmatprep.subr.bf16.mxu1 %v938_v1  ;;  %v926_v41 = vld [vmem:[%s1127_s1 + $0x80] sm:$0xff]   ;;  %v408_v45 = vrot.slane %v928_v40, 1 }
  0x18   : > { %v523_v42 = vrot.slane %v521_v37, 1  ;;  %v526_v43 = vrot.slane %v524_v38, 2  ;;  %v927_v44 = vld [vmem:[%s1127_s1 + $0xc0] sm:$0xff]  }
  0x19   : > { %812 = vmatpush3.bf16.msra.mxu0 %v901_v7  ;;  %v766_v59 = vld [vmem:[%s1128_s2] ss:$0 sm:$0xff] }
  0x1a   : > { %832 = vmatpush3.bf16.msra.mxu1 %v902_v8  ;;  %813 = vmatprep.subr.bf16.mxu0 %v938_v1  ;;  %v527_v46 = vor.u32 %v526_v43, %v523_v42 }
  0x1b   : > { %833 = vmatprep.subr.bf16.mxu1 %v938_v1 }
  0x1d   : > { %814 = vmatpush3.bf16.msra.mxu0 %v903_v9 }
  0x1e   : > { %834 = vmatpush3.bf16.msra.mxu1 %v904_v10  ;;  %815 = vmatprep.subr.bf16.mxu0 %v938_v1 }
  0x1f   : > { %835 = vmatprep.subr.bf16.mxu1 %v938_v1 }
  0x21   : > { %816 = vmatpush3.bf16.msra.mxu0 %v905_v12 }
  0x22   : > { %836 = vmatpush3.bf16.msra.mxu1 %v906_v13  ;;  %817 = vmatprep.subr.bf16.mxu0 %v938_v1 }
  0x23   : > { %837 = vmatprep.subr.bf16.mxu1 %v938_v1 }
  0x25   : > { %818 = vmatpush3.bf16.msra.mxu0 %v907_v15 }
  0x26   : > { %838 = vmatpush3.bf16.msra.mxu1 %v908_v16  ;;  %819 = vmatprep.subr.bf16.mxu0 %v938_v1 }
  0x27   : > { %839 = vmatprep.subr.bf16.mxu1 %v938_v1 }
  0x29   : > { %820 = vmatpush3.bf16.msra.mxu0 %v909_v19 }
  0x2a   : > { %840 = vmatpush3.bf16.msra.mxu1 %v910_v20  ;;  %845 = vmatprep.subr.bf16.mxu0 %v938_v1 }
  0x2b   : > { %865 = vmatprep.subr.bf16.mxu1 %v938_v1 }
  0x2c   : > { %822 = vmatmul.mubr.bf16.vlgmr.msra.gmra.mxu0 %v209_v21 }
  0x2d   : > { %842 = vmatmul.mubr.bf16.vlgmr.msra.gmra.mxu1 %v165_v23  ;;  %846 = vmatpush3.bf16.msra.mxu0 %v912_v22 }
  0x2e   : > { %866 = vmatpush3.bf16.msra.mxu1 %v913_v24  ;;  %847 = vmatprep.subr.bf16.mxu0 %v938_v1 }
  0x2f   : > { %867 = vmatprep.subr.bf16.mxu1 %v938_v1  ;;  %861 = vmatprep.mubr.msk.bf16.mxu0 %vm939_vm0, %v938_v1 }
  0x30   : > { %881 = vmatprep.mubr.msk.bf16.mxu1 %vm939_vm0, %v938_v1 }
  0x31   : > { %848 = vmatpush3.bf16.msra.mxu0 %v914_v25 }
  0x32   : > { %868 = vmatpush3.bf16.msra.mxu1 %v915_v26  ;;  %849 = vmatprep.subr.bf16.mxu0 %v938_v1 }
  0x33   : > { %869 = vmatprep.subr.bf16.mxu1 %v938_v1 }
  0x35   : > { %850 = vmatpush3.bf16.msra.mxu0 %v916_v27 }
  0x36   : > { %870 = vmatpush3.bf16.msra.mxu1 %v917_v28  ;;  %851 = vmatprep.subr.bf16.mxu0 %v938_v1 }
  0x37   : > { %871 = vmatprep.subr.bf16.mxu1 %v938_v1 }
  0x39   : > { %852 = vmatpush3.bf16.msra.mxu0 %v918_v29 }
  0x3a   : > { %872 = vmatpush3.bf16.msra.mxu1 %v919_v30  ;;  %853 = vmatprep.subr.bf16.mxu0 %v938_v1 }
  0x3b   : > { %873 = vmatprep.subr.bf16.mxu1 %v938_v1 }
  0x3d   : > { %854 = vmatpush3.bf16.msra.mxu0 %v920_v31 }
  0x3e   : > { %874 = vmatpush3.bf16.msra.mxu1 %v921_v32  ;;  %855 = vmatprep.subr.bf16.mxu0 %v938_v1 }
  0x3f   : > { %875 = vmatprep.subr.bf16.mxu1 %v938_v1 }
  0x41   : > { %856 = vmatpush3.bf16.msra.mxu0 %v922_v33 }
  0x42   : > { %876 = vmatpush3.bf16.msra.mxu1 %v923_v35  ;;  %857 = vmatprep.subr.bf16.mxu0 %v938_v1 }
  0x43   : > { %877 = vmatprep.subr.bf16.mxu1 %v938_v1 }
  0x45   : > { %858 = vmatpush3.bf16.msra.mxu0 %v924_v36 }
  0x46   : > { %878 = vmatpush3.bf16.msra.mxu1 %v925_v39  ;;  %859 = vmatprep.subr.bf16.mxu0 %v938_v1 }
  0x47   : > { %879 = vmatprep.subr.bf16.mxu1 %v938_v1 }
  0x49   : > { %860 = vmatpush3.bf16.msra.mxu0 %v926_v41 }
  0x4a   : > { %880 = vmatpush3.bf16.msra.mxu1 %v927_v44 }
  0x4c   : > { %862 = vmatmul.mubr.bf16.vlgmr.msra.gmra.mxu0 %v408_v45 }
  0x4d   : > { %882 = vmatmul.mubr.bf16.vlgmr.msra.gmra.mxu1 %v527_v46 }
  0xec   : > { %v293_v47 = vpop.f32.mrf.mxu0 }
  0xed   : > { %v381_v48 = vpop.f32.mrf.mxu1 }
  0xee   : > { %v823_v49 = vpop.f32.mrf.mxu0  ;;  %v382_v55 = vadd.f32 %v381_v48, %v293_v47 }
  0xef   : > { %v843_v50 = vpop.f32.mrf.mxu1 }
  0xf0   : > { %v296_v51 = vpop.f32.mrf.mxu0 }
  0xf1   : > { %v384_v52 = vpop.f32.mrf.mxu1 }
  0xf2   : > { %v824_v53 = vpop.f32.mrf.mxu0 }
  0xf3   : > { %v844_v54 = vpop.f32.mrf.mxu1 }
 0x10c   : > { %v492_v56 = vpop.f32.mrf.mxu0 }
 0x10d   : > { %v498_v57 = vadd.f32 %v492_v56, %v382_v55  ;;  %v611_v58 = vpop.f32.mrf.mxu1 }
 0x10e   : > { %v863_v60 = vpop.f32.mrf.mxu0 }
 0x10f   : > { %v617_v61 = vadd.f32 %v611_v58, %v498_v57  ;;  %v883_v62 = vpop.f32.mrf.mxu1 }
 0x110   : > { %v495_v63 = vpop.f32.mrf.mxu0 }
 0x111   : > { %v625_v0 = vadd.f32 %v766_v59, %v617_v61  ;;  %v614_v1 = vpop.f32.mrf.mxu1 }
 0x112   : > { %v864_v2 = vpop.f32.mrf.mxu0 }
 0x113   : > { %v626_v3 = vmax.f32 %v625_v0, 0.0  ;;  %v884_v4 = vpop.f32.mrf.mxu1 }
 0x115   : > { %v627_v5 = vpack.c.bf16 %v626_v3, %v626_v3 }
 0x117   : > { %629 = vst.msk [vmem:[%s163_s10] sm:$0x1] %vm628_vm1, %v627_v5 }
 0x118 PF: > { %s13_s12 = sadd.s32 1, %s936_s12  }
 0x119   : > { %p10_p4 = scmp.ge.s32.totalorder %s13_s12, 4  }
 0x11b   :  { %12 = sbr.rel (!%p10_p4) target bundleno = 1 (0x1), region = 65 }

// kernel: tile.28
= control target key start
LH: loop header
LB: loop body
LE: loop exit
PB: predicated region body
PF: predicated region fallthrough
CT: control target
= control target key end

     0   :  { %s22_s0 = inlined_call_operand.vmem [shape: f32[16], index: 0, kind: input, shape index: {}]   ;;  %s23_s1 = inlined_call_operand.vmem [shape: f32[4,16], index: 1, kind: output, shape index: {}]  }
   0x1   :  { %v4_v0 = vld [vmem:[%s22_s0] ss:$0 sm:$0xff] }
   0x2   :  { %5 = vst [vmem:[%s23_s1] sm:$0xf] %v4_v0 }

// kernel: tile.29
= control target key start
LH: loop header
LB: loop body
LE: loop exit
PB: predicated region body
PF: predicated region fallthrough
CT: control target
= control target key end

     0   :  { %vm8_vm0 = vcmask 130048   ;;  %s40_s8 = smov 16   ;;  %s41_s9 = smov 32   ;;  %vm14_vm1 = vcmask 523648   ;;  %vm20_vm2 = vcmask 392448   ;;  %vm26_vm3 = vcmask 261248   ;;  %s58_s0 = inlined_call_operand.vmem [shape: f32[4,16], index: 0, kind: input, shape index: {}]   ;;  %s59_s1 = inlined_call_operand.vmem [shape: f32[1,64], index: 1, kind: output, shape index: {}]  }
   0x1   :  { %v5_v0 = vld [vmem:[%s58_s0] sm:$0xf]  ;;  %s39_s0 = smov 48  }
   0x2   :  { %6 = vst [vmem:[#allocation1] sm:$0xf] %v5_v0 }
   0x9   :  { %v11_v1 = vld [vmem:[#allocation1 + $0x3] sm:$0x1]   ;;  %v23_v2 = vld [vmem:[#allocation1 + $0x1] sm:$0x1]   ;;  %v7_v3 = vld [vmem:[#allocation1] sm:$0x1]  }
   0xa   :  { %12 = vrot.lane.b32.xlu0 %v11_v1, %s39_s0  ;;  %24 = vrot.lane.b32.xlu1 %v23_v2, %s40_s8  ;;  %v17_v4 = vld [vmem:[#allocation1 + $0x2] sm:$0x1]   ;;  %9 = vst.msk [vmem:[#allocation0] sm:$0x1] %vm8_vm0, %v7_v3  }
   0xe   :  { %18 = vrot.lane.b32.xlu0 %v17_v4, %s41_s9 }
  0x7c   :  { %v13_v5 = vpop.permute.xlu0 %12   ;;  %v25_v6 = vpop.permute.xlu1 %24  }
  0x7d   :  { %15 = vst.msk [vmem:[#allocation0] sm:$0x1] %vm14_vm1, %v13_v5  }
  0x80   :  { %v19_v7 = vpop.permute.xlu0 %18  }
  0x81   :  { %21 = vst.msk [vmem:[#allocation0] sm:$0x1] %vm20_vm2, %v19_v7  }
  0x82   :  { %27 = vst.msk [vmem:[#allocation0] sm:$0x1] %vm26_vm3, %v25_v6  }
  0x89   :  { %v32_v8 = vld [vmem:[#allocation0] sm:$0x1] }
  0x8a   :  { %35 = vst [vmem:[%s59_s1] sm:$0x1] %v32_v8 }

// kernel: net_forward.12
= control target key start
LH: loop header
LB: loop body
LE: loop exit
PB: predicated region body
PF: predicated region fallthrough
CT: control target
= control target key end

     0   :  { %s1342_s12 = smov 0   ;;  %s1544_s0 = inlined_call_operand.vmem [shape: bf16[2,12,64], index: 0, kind: input, shape index: {}]   ;;  %s1545_s1 = inlined_call_operand.vmem [shape: bf16[9,64,128], index: 1, kind: input, shape index: {}]   ;;  %s1546_s2 = inlined_call_operand.vmem [shape: f32[1,128], index: 2, kind: input, shape index: {}]   ;;  %s1547_s3 = inlined_call_operand.vmem [shape: bf16[2,3,128], index: 3, kind: output, shape index: {}]  }
   0x1 LB: > { %s984_s13 = sadd.s32 4294967295, %s1318_s12   ;;  %p988_p0 = scmp.ge.s32.totalorder %s1318_s12, 1  ;;  %s1318_s12 = sphi %s1342_s12, %s13_s12  }
   0x2   : > { %p137_p1 = scmp.lt.s32.totalorder %s1318_s12, 3 }
   0x4   : > { %p138_p2 = pnand %p988_p0, %p137_p1 }
   0x5   : > { %p160_p3 = scmp.lt.s32.totalorder (!%p138_p2), %s984_s13, 1 }
   0x6   : > { %141 = sbr.rel (%p138_p2) target bundleno = 295 (0x127), region = 32 }
   0xb   : > { %v1272_v0 = vld [vmem:[%s1545_s1 + $0x38] sm:$0xff]   ;;  %v1320_v1 = vmov 0.0   ;;  %v1274_v3 = vld [vmem:[%s1545_s1 + $0x30] sm:$0xff]   ;;  %vm1321_vm0 = vmmov 0   ;;  %s1549_s13 = smov (!%p160_p3, %s984_s13), 1  ;;  %v1276_v5 = vld [vmem:[%s1545_s1 + $0x28] sm:$0xff]  }
   0xc   : > { %1154 = vmatprep.subr.bf16.mxu0 %v1320_v1  ;;  %1166 = vmatprep.subr.bf16.mxu1 %v1320_v1  ;;  %v1273_v2 = vld [vmem:[%s1545_s1 + $0x18] sm:$0xff]   ;;  %v1275_v4 = vld [vmem:[%s1545_s1 + $0x10] sm:$0xff]   ;;  %s1108_s24 = sshll.u32 %s1549_s13, 3  ;;  %v1277_v6 = vld [vmem:[%s1545_s1 + $0x8] sm:$0xff]   ;;  %vm222_vm1 = vcmask 523264   ;;  %vm925_vm2 = vcmask 1041408  }
   0xd   : > { %1155 = vmatpush3.bf16.msra.mxu0 %v1272_v0  ;;  %1162 = vmatprep.mubr.msk.bf16.mxu0 %vm1321_vm0, %v1320_v1  ;;  %s1383_s29 = scalar_lea.vmem %s1544_s0, %s1108_s24  ;;  %v1278_v9 = vld [vmem:[%s1545_s1 + $0x20] sm:$0xff]   ;;  %v1281_v14 = vld [vmem:[%s1545_s1 + $0x58] sm:$0xff]   ;;  %v1283_v17 = vld [vmem:[%s1545_s1 + $0x50] sm:$0xff]   ;;  %vm926_vm3 = vsmask.f32 1280 }
   0xe   : > { %1167 = vmatpush3.bf16.msra.mxu1 %v1273_v2  ;;  %1156 = vmatprep.subr.bf16.mxu0 %v1320_v1  ;;  %v170_v7 = vld [vmem:[%s1383_s29] sm:$0x3]  ;;  %v1282_v16 = vld [vmem:[%s1545_s1 + $0x78] sm:$0xff]   ;;  %v1284_v18 = vld [vmem:[%s1545_s1 + $0x70] sm:$0xff]  }
   0xf   : > { %1168 = vmatprep.subr.bf16.mxu1 %v1320_v1  ;;  %1174 = vmatprep.mubr.msk.bf16.mxu1 %vm1321_vm0, %v1320_v1  ;;  %v1000_v8 = vcombine.low %v170_v7, %v170_v7  ;;  %v1279_v10 = vld [vmem:[%s1545_s1] sm:$0xff]   ;;  %v1285_v20 = vld [vmem:[%s1545_s1 + $0x48] sm:$0xff]   ;;  %v1290_v29 = vld [vmem:[%s1545_s1 + $0x98] sm:$0xff]  }
  0x10   : > { %v1289_v19 = vld [vmem:[%s1383_s29] ss:$0 sps:$4 sm:$0x66]   ;;  %v1286_v23 = vld [vmem:[%s1545_s1 + $0x68] sm:$0xff]   ;;  %v1291_v31 = vld [vmem:[%s1545_s1 + $0xb8] sm:$0xff]  }
  0x11   : > { %1157 = vmatpush3.bf16.msra.mxu0 %v1274_v3  ;;  %v192_v11 = vshrl.u32 %v1000_v8, 16  ;;  %v194_v12 = vshll.u32 %v1000_v8, 16  ;;  %v425_v21 = vshrl.u32 %v1289_v19, 16  ;;  %v428_v22 = vshll.u32 %v1289_v19, 16  ;;  %v1287_v24 = vld [vmem:[%s1545_s1 + $0x40] sm:$0xff]   ;;  %v1292_v33 = vld [vmem:[%s1545_s1 + $0x90] sm:$0xff]   ;;  %vm927_vm4 = vmand %vm925_vm2, %vm926_vm3 }
  0x12   : > { %1169 = vmatpush3.bf16.msra.mxu1 %v1275_v4  ;;  %1158 = vmatprep.subr.bf16.mxu0 %v1320_v1  ;;  %v1288_v27 = vld [vmem:[%s1545_s1 + $0x60] sm:$0xff]   ;;  %v346_v28 = vrot.slane %v1289_v19, 1  ;;  %v1293_v34 = vld [vmem:[%s1545_s1 + $0xb0] sm:$0xff]   ;;  %v1294_v35 = vld [vmem:[%s1545_s1 + $0x88] sm:$0xff]  }
  0x13   : > { %1170 = vmatprep.subr.bf16.mxu1 %v1320_v1  ;;  %v196_v13 = vrot.slane %v194_v12, 1  ;;  %v427_v25 = vrot.slane %v425_v21, 1  ;;  %v430_v26 = vrot.slane %v428_v22, 2  ;;  %v1298_v32 = vld [vmem:[%s1383_s29] ss:$0 sps:$4 sm:$0xcc]  }
  0x14   : > { %v592_v36 = vshrl.u32 %v1298_v32, 16  ;;  %v595_v37 = vshll.u32 %v1298_v32, 16  ;;  %v1295_v38 = vld [vmem:[%s1545_s1 + $0xa8] sm:$0xff]   ;;  %v1296_v39 = vld [vmem:[%s1545_s1 + $0x80] sm:$0xff]   ;;  %v513_v43 = vrot.slane %v1298_v32, 2  ;;  %v1299_v44 = vld [vmem:[%s1545_s1 + $0xd8] sm:$0xff]  }
  0x15   : > { %1159 = vmatpush3.bf16.msra.mxu0 %v1276_v5  ;;  %v197_v15 = vor.u32 %v196_v13, %v192_v11  ;;  %v431_v30 = vor.u32 %v430_v26, %v427_v25  ;;  %v1297_v42 = vld [vmem:[%s1545_s1 + $0xa0] sm:$0xff]   ;;  %v1300_v46 = vld [vmem:[%s1545_s1 + $0xf8] sm:$0xff]   ;;  %v1301_v47 = vld [vmem:[%s1545_s1 + $0xd0] sm:$0xff]  }
  0x16   : > { %1171 = vmatpush3.bf16.msra.mxu1 %v1277_v6  ;;  %1160 = vmatprep.subr.bf16.mxu0 %v1320_v1  ;;  %v594_v40 = vrot.slane %v592_v36, 2  ;;  %v597_v41 = vrot.slane %v595_v37, 3  ;;  %v1307_v48 = vld [vmem:[%s1383_s29] sm:$0x18]   ;;  %v1302_v49 = vld [vmem:[%s1545_s1 + $0xf0] sm:$0xff]   ;;  %v1303_v50 = vld [vmem:[%s1545_s1 + $0xc8] sm:$0xff]  }
  0x17   : > { %1172 = vmatprep.subr.bf16.mxu1 %v1320_v1  ;;  %v762_v51 = vshrl.u32 %v1307_v48, 16  ;;  %v765_v52 = vshll.u32 %v1307_v48, 16  ;;  %v1304_v53 = vld [vmem:[%s1545_s1 + $0xe8] sm:$0xff]   ;;  %v1305_v54 = vld [vmem:[%s1545_s1 + $0xc0] sm:$0xff]   ;;  %v683_v58 = vrot.slane %v1307_v48, 3  ;;  %v1308_v59 = vld [vmem:[%s1545_s1 + $0x118] sm:$0xff]  }
  0x18   : > { %v598_v45 = vor.u32 %v597_v41, %v594_v40  ;;  %v1306_v57 = vld [vmem:[%s1545_s1 + $0xe0] sm:$0xff]   ;;  %v1309_v61 = vld [vmem:[%s1545_s1 + $0x110] sm:$0xff]   ;;  %v1310_v62 = vld [vmem:[%s1545_s1 + $0x108] sm:$0xff]  }
  0x19   : > { %1161 = vmatpush3.bf16.msra.mxu0 %v1278_v9  ;;  %v764_v55 = vrot.slane %v762_v51, 3  ;;  %v767_v56 = vrot.slane %v765_v52, 4  ;;  %v1311_v63 = vld [vmem:[%s1545_s1 + $0x100] sm:$0xff]  }
  0x1a   : > { %1173 = vmatpush3.bf16.msra.mxu1 %v1279_v10  ;;  %1178 = vmatprep.subr.bf16.mxu0 %v1320_v1  ;;  %v837_v0 = vld [vmem:[%s1383_s29 + $0x4] sm:$0x3]  ;;  %s991_s29 = sshll.u32 %s1549_s13, 1  ;;  %v1105_v41 = vld [vmem:[%s1546_s2] ss:$0 sm:$0xff] }
  0x1b   : > { %1190 = vmatprep.subr.bf16.mxu1 %v1320_v1  ;;  %v768_v60 = vor.u32 %v767_v56, %v764_v55  ;;  %s168_s21 = scalar_lea.vmem %s1547_s3, %s991_s29 }
  0x1c   : > { %1163 = vmatmul.mubr.msk.bf16.vlgmr.msra.gmra.mxu0 %vm222_vm1, %v197_v15 }
  0x1d   : > { %1175 = vmatmul.mubr.msk.bf16.vlgmr.msra.gmra.mxu1 %vm222_vm1, %v170_v7  ;;  %1179 = vmatpush3.bf16.msra.mxu0 %v1281_v14 }
  0x1e   : > { %1191 = vmatpush3.bf16.msra.mxu1 %v1282_v16  ;;  %1180 = vmatprep.subr.bf16.mxu0 %v1320_v1 }
  0x1f   : > { %1192 = vmatprep.subr.bf16.mxu1 %v1320_v1  ;;  %1186 = vmatprep.mubr.msk.bf16.mxu0 %vm1321_vm0, %v1320_v1 }
  0x20   : > { %1198 = vmatprep.mubr.msk.bf16.mxu1 %vm1321_vm0, %v1320_v1 }
  0x21   : > { %1181 = vmatpush3.bf16.msra.mxu0 %v1283_v17 }
  0x22   : > { %1193 = vmatpush3.bf16.msra.mxu1 %v1284_v18  ;;  %1182 = vmatprep.subr.bf16.mxu0 %v1320_v1 }
  0x23   : > { %1194 = vmatprep.subr.bf16.mxu1 %v1320_v1 }
  0x25   : > { %1183 = vmatpush3.bf16.msra.mxu0 %v1285_v20 }
  0x26   : > { %1195 = vmatpush3.bf16.msra.mxu1 %v1286_v23  ;;  %1184 = vmatprep.subr.bf16.mxu0 %v1320_v1 }
  0x27   : > { %1196 = vmatprep.subr.bf16.mxu1 %v1320_v1 }
  0x29   : > { %1185 = vmatpush3.bf16.msra.mxu0 %v1287_v24 }
  0x2a   : > { %1197 = vmatpush3.bf16.msra.mxu1 %v1288_v27  ;;  %1202 = vmatprep.subr.bf16.mxu0 %v1320_v1 }
  0x2b   : > { %1214 = vmatprep.subr.bf16.mxu1 %v1320_v1 }
  0x2c   : > { %1187 = vmatmul.mubr.msk.bf16.vlgmr.msra.gmra.mxu0 %vm222_vm1, %v346_v28 }
  0x2d   : > { %1203 = vmatpush3.bf16.msra.mxu0 %v1290_v29  ;;  %1199 = vmatmul.mubr.msk.bf16.vlgmr.msra.gmra.mxu1 %vm222_vm1, %v431_v30 }
  0x2e   : > { %1215 = vmatpush3.bf16.msra.mxu1 %v1291_v31  ;;  %1204 = vmatprep.subr.bf16.mxu0 %v1320_v1 }
  0x2f   : > { %1216 = vmatprep.subr.bf16.mxu1 %v1320_v1  ;;  %1210 = vmatprep.mubr.msk.bf16.mxu0 %vm1321_vm0, %v1320_v1 }
  0x30   : > { %1222 = vmatprep.mubr.msk.bf16.mxu1 %vm1321_vm0, %v1320_v1 }
  0x31   : > { %1205 = vmatpush3.bf16.msra.mxu0 %v1292_v33 }
  0x32   : > { %1217 = vmatpush3.bf16.msra.mxu1 %v1293_v34  ;;  %1206 = vmatprep.subr.bf16.mxu0 %v1320_v1 }
  0x33   : > { %1218 = vmatprep.subr.bf16.mxu1 %v1320_v1 }
  0x35   : > { %1207 = vmatpush3.bf16.msra.mxu0 %v1294_v35 }
  0x36   : > { %1219 = vmatpush3.bf16.msra.mxu1 %v1295_v38  ;;  %1208 = vmatprep.subr.bf16.mxu0 %v1320_v1 }
  0x37   : > { %1220 = vmatprep.subr.bf16.mxu1 %v1320_v1 }
  0x39   : > { %1209 = vmatpush3.bf16.msra.mxu0 %v1296_v39 }
  0x3a   : > { %1221 = vmatpush3.bf16.msra.mxu1 %v1297_v42  ;;  %1226 = vmatprep.subr.bf16.mxu0 %v1320_v1 }
  0x3b   : > { %1238 = vmatprep.subr.bf16.mxu1 %v1320_v1 }
  0x3c   : > { %1211 = vmatmul.mubr.msk.bf16.vlgmr.msra.gmra.mxu0 %vm222_vm1, %v513_v43 }
  0x3d   : > { %1227 = vmatpush3.bf16.msra.mxu0 %v1299_v44  ;;  %1223 = vmatmul.mubr.msk.bf16.vlgmr.msra.gmra.mxu1 %vm222_vm1, %v598_v45 }
  0x3e   : > { %1239 = vmatpush3.bf16.msra.mxu1 %v1300_v46  ;;  %1228 = vmatprep.subr.bf16.mxu0 %v1320_v1 }
  0x3f   : > { %1240 = vmatprep.subr.bf16.mxu1 %v1320_v1  ;;  %1234 = vmatprep.mubr.msk.bf16.mxu0 %vm1321_vm0, %v1320_v1 }
  0x40   : > { %1246 = vmatprep.mubr.msk.bf16.mxu1 %vm1321_vm0, %v1320_v1 }
  0x41   : > { %1229 = vmatpush3.bf16.msra.mxu0 %v1301_v47  ;;  %v928_v47 = vld [vmem:[%s168_s21] sm:$0x3] }
  0x42   : > { %1241 = vmatpush3.bf16.msra.mxu1 %v1302_v49  ;;  %1230 = vmatprep.subr.bf16.mxu0 %v1320_v1 }
  0x43   : > { %1242 = vmatprep.subr.bf16.mxu1 %v1320_v1 }
  0x45   : > { %1231 = vmatpush3.bf16.msra.mxu0 %v1303_v50 }
  0x46   : > { %1243 = vmatpush3.bf16.msra.mxu1 %v1304_v53  ;;  %1232 = vmatprep.subr.bf16.mxu0 %v1320_v1 }
  0x47   : > { %1244 = vmatprep.subr.bf16.mxu1 %v1320_v1 }
  0x49   : > { %1233 = vmatpush3.bf16.msra.mxu0 %v1305_v54 }
  0x4a   : > { %1245 = vmatpush3.bf16.msra.mxu1 %v1306_v57  ;;  %1250 = vmatprep.subr.bf16.mxu0 %v1320_v1 }
  0x4c   : > { %1235 = vmatmul.mubr.msk.bf16.vlgmr.msra.gmra.mxu0 %vm222_vm1, %v683_v58 }
  0x4d   : > { %1251 = vmatpush3.bf16.msra.mxu0 %v1308_v59  ;;  %1247 = vmatmul.mubr.msk.bf16.vlgmr.msra.gmra.mxu1 %vm222_vm1, %v768_v60 }
  0x4e   : > { %1252 = vmatprep.subr.bf16.mxu0 %v1320_v1  ;;  %1258 = vmatprep.mubr.msk.bf16.mxu0 %vm1321_vm0, %v1320_v1 }
  0x51   : > { %1253 = vmatpush3.bf16.msra.mxu0 %v1309_v61 }
  0x52   : > { %1254 = vmatprep.subr.bf16.mxu0 %v1320_v1 }
  0x55   : > { %1255 = vmatpush3.bf16.msra.mxu0 %v1310_v62 }
  0x56   : > { %1256 = vmatprep.subr.bf16.mxu0 %v1320_v1 }
  0x59   : > { %1257 = vmatpush3.bf16.msra.mxu0 %v1311_v63 }
  0x5c   : > { %1259 = vmatmul.mubr.msk.bf16.vlgmr.msra.gmra.mxu0 %vm222_vm1, %v837_v0 }
  0xdc   : > { %v260_v2 = vpop.f32.mrf.mxu0 }
  0xdd   : > { %v327_v3 = vpop.f32.mrf.mxu1 }
  0xde   : > { %v1164_v4 = vpop.f32.mrf.mxu0  ;;  %v328_v25 = vadd.f32 %v327_v3, %v260_v2 }
  0xdf   : > { %v1176_v5 = vpop.f32.mrf.mxu1 }
  0xe0   : > { %v263_v6 = vpop.f32.mrf.mxu0 }
  0xe1   : > { %v330_v7 = vpop.f32.mrf.mxu1 }
  0xe2   : > { %v1165_v8 = vpop.f32.mrf.mxu0 }
  0xe3   : > { %v1177_v9 = vpop.f32.mrf.mxu1 }
  0xec   : > { %v408_v10 = vpop.f32.mrf.mxu0 }
  0xed   : > { %v493_v11 = vpop.f32.mrf.mxu1  ;;  %v414_v26 = vadd.f32 %v408_v10, %v328_v25 }
  0xee   : > { %v1188_v12 = vpop.f32.mrf.mxu0 }
  0xef   : > { %v1200_v13 = vpop.f32.mrf.mxu1  ;;  %v499_v30 = vadd.f32 %v493_v11, %v414_v26 }
  0xf0   : > { %v411_v14 = vpop.f32.mrf.mxu0 }
  0xf1   : > { %v496_v15 = vpop.f32.mrf.mxu1 }
  0xf2   : > { %v1189_v16 = vpop.f32.mrf.mxu0 }
  0xf3   : > { %v1201_v1 = vpop.f32.mrf.mxu1 }
  0xfc   : > { %v575_v17 = vpop.f32.mrf.mxu0 }
  0xfd   : > { %v660_v18 = vpop.f32.mrf.mxu1  ;;  %v581_v33 = vadd.f32 %v575_v17, %v499_v30 }
  0xfe   : > { %v1212_v19 = vpop.f32.mrf.mxu0 }
  0xff   : > { %v1224_v20 = vpop.f32.mrf.mxu1  ;;  %v666_v37 = vadd.f32 %v660_v18, %v581_v33 }
 0x100   : > { %v578_v21 = vpop.f32.mrf.mxu0 }
 0x101   : > { %v663_v22 = vpop.f32.mrf.mxu1 }
 0x102   : > { %v1213_v23 = vpop.f32.mrf.mxu0 }
 0x103   : > { %v1225_v24 = vpop.f32.mrf.mxu1 }
 0x10c   : > { %v745_v27 = vpop.f32.mrf.mxu0 }
 0x10d   : > { %v830_v28 = vpop.f32.mrf.mxu1  ;;  %v751_v38 = vadd.f32 %v745_v27, %v666_v37 }
 0x10e   : > { %v1236_v29 = vpop.f32.mrf.mxu0 }
 0x10f   : > { %v1248_v31 = vpop.f32.mrf.mxu1  ;;  %v836_v39 = vadd.f32 %v830_v28, %v751_v38 }
 0x110   : > { %v748_v32 = vpop.f32.mrf.mxu0 }
 0x111   : > { %v833_v34 = vpop.f32.mrf.mxu1 }
 0x112   : > { %v1237_v35 = vpop.f32.mrf.mxu0 }
 0x113   : > { %v1249_v36 = vpop.f32.mrf.mxu1 }
 0x11c   : > { %v908_v40 = vpop.f32.mrf.mxu0 }
 0x11d   : > { %v914_v42 = vadd.f32 %v908_v40, %v836_v39 }
 0x11e   : > { %v1260_v43 = vpop.f32.mrf.mxu0 }
 0x11f   : > { %v922_v44 = vadd.f32 %v1105_v41, %v914_v42 }
 0x120   : > { %v911_v45 = vpop.f32.mrf.mxu0 }
 0x121   : > { %v923_v46 = vmax.f32 %v922_v44, 0.0 }
 0x122   : > { %v1261_v48 = vpop.f32.mrf.mxu0 }
 0x123   : > { %v924_v49 = vpack.c.bf16 %v923_v46, %v923_v46 }
 0x125   : > { %v929_v50 = vsel %vm927_vm4, %v924_v49, %v928_v47 }
 0x126   : > { %930 = vst [vmem:[%s168_s21] sm:$0x3] %v929_v50 }
 0x127 PF: > { %s13_s12 = sadd.s32 1, %s1318_s12  }
 0x128   : > { %p10_p4 = scmp.ge.s32.totalorder %s13_s12, 4  }
 0x12a   :  { %12 = sbr.rel (!%p10_p4) target bundleno = 1 (0x1), region = 70 }

// kernel: tile.33
= control target key start
LH: loop header
LB: loop body
LE: loop exit
PB: predicated region body
PF: predicated region fallthrough
CT: control target
= control target key end

     0   :  { %s22_s0 = inlined_call_operand.vmem [shape: f32[8], index: 0, kind: input, shape index: {}]   ;;  %s23_s1 = inlined_call_operand.vmem [shape: f32[4,8], index: 1, kind: output, shape index: {}]  }
   0x1   :  { %v4_v0 = vld [vmem:[%s22_s0] ss:$0 sm:$0xff] }
   0x2   :  { %5 = vst [vmem:[%s23_s1] sm:$0xf] %v4_v0 }

// kernel: tile.34
= control target key start
LH: loop header
LB: loop body
LE: loop exit
PB: predicated region body
PF: predicated region fallthrough
CT: control target
= control target key end

     0   :  { %vm8_vm0 = vcmask 64512   ;;  %s40_s8 = smov 8   ;;  %s41_s9 = smov 16   ;;  %vm14_vm1 = vcmask 261312   ;;  %vm20_vm2 = vcmask 195712   ;;  %vm26_vm3 = vcmask 130112   ;;  %s58_s0 = inlined_call_operand.vmem [shape: f32[4,8], index: 0, kind: input, shape index: {}]   ;;  %s59_s1 = inlined_call_operand.vmem [shape: f32[1,32], index: 1, kind: output, shape index: {}]  }
   0x1   :  { %v5_v0 = vld [vmem:[%s58_s0] sm:$0xf]  ;;  %s39_s0 = smov 24  }
   0x2   :  { %6 = vst [vmem:[#allocation1] sm:$0xf] %v5_v0 }
   0x9   :  { %v11_v1 = vld [vmem:[#allocation1 + $0x3] sm:$0x1]   ;;  %v23_v2 = vld [vmem:[#allocation1 + $0x1] sm:$0x1]   ;;  %v7_v3 = vld [vmem:[#allocation1] sm:$0x1]  }
   0xa   :  { %12 = vrot.lane.b32.xlu0 %v11_v1, %s39_s0  ;;  %24 = vrot.lane.b32.xlu1 %v23_v2, %s40_s8  ;;  %v17_v4 = vld [vmem:[#allocation1 + $0x2] sm:$0x1]   ;;  %9 = vst.msk [vmem:[#allocation0] sm:$0x1] %vm8_vm0, %v7_v3  }
   0xe   :  { %18 = vrot.lane.b32.xlu0 %v17_v4, %s41_s9 }
  0x7c   :  { %v13_v5 = vpop.permute.xlu0 %12   ;;  %v25_v6 = vpop.permute.xlu1 %24  }
  0x7d   :  { %15 = vst.msk [vmem:[#allocation0] sm:$0x1] %vm14_vm1, %v13_v5  }
  0x80   :  { %v19_v7 = vpop.permute.xlu0 %18  }
  0x81   :  { %21 = vst.msk [vmem:[#allocation0] sm:$0x1] %vm20_vm2, %v19_v7  }
  0x82   :  { %27 = vst.msk [vmem:[#allocation0] sm:$0x1] %vm26_vm3, %v25_v6  }
  0x89   :  { %v32_v8 = vld [vmem:[#allocation0] sm:$0x1] }
  0x8a   :  { %35 = vst [vmem:[%s59_s1] sm:$0x1] %v32_v8 }

// kernel: net_forward.13
= control target key start
LH: loop header
LB: loop body
LE: loop exit
PB: predicated region body
PF: predicated region fallthrough
CT: control target
= control target key end

     0   :  { %s1987_s18 = smov 0   ;;  %s2255_s0 = inlined_call_operand.vmem [shape: bf16[2,20,32], index: 0, kind: input, shape index: {}]   ;;  %s2256_s1 = inlined_call_operand.vmem [shape: bf16[2,20,32], index: 1, kind: input, shape index: {}]   ;;  %s2257_s2 = inlined_call_operand.vmem [shape: bf16[9,32,64], index: 2, kind: input, shape index: {}]   ;;  %s2258_s3 = inlined_call_operand.vmem [shape: bf16[9,32,64], index: 3, kind: input, shape index: {}]   ;;  %s2259_s4 = inlined_call_operand.vmem [shape: f32[1,64], index: 4, kind: input, shape index: {}]   ;;  %s2260_s5 = inlined_call_operand.vmem [shape: bf16[2,8,64], index: 5, kind: output, shape index: {}]  }
   0x1 LB: > { %s1545_s19 = sadd.s32 4294967295, %s1953_s18   ;;  %p1549_p0 = scmp.ge.s32.totalorder %s1953_s18, 1  ;;  %s1953_s18 = sphi %s1987_s18, %s15_s18  }
   0x2   : > { %p197_p1 = scmp.lt.s32.totalorder %s1953_s18, 3 }
   0x4   : > { %p198_p2 = pnand %p1549_p0, %p197_p1 }
   0x5   : > { %p229_p3 = scmp.lt.s32.totalorder (!%p198_p2), %s1545_s19, 1 }
   0x6   : > { %201 = sbr.rel (%p198_p2) target bundleno = 293 (0x125), region = 40 }
   0xb   : > { %v1897_v0 = vld [vmem:[%s2257_s2 + $0x8] sm:$0xff]   ;;  %v1955_v1 = vmov 0.0   ;;  %v1898_v2 = vld [vmem:[%s2257_s2 + $0x18] sm:$0xff]   ;;  %v1899_v3 = vld [vmem:[%s2257_s2] sm:$0xff]   ;;  %vm1956_vm0 = vmmov 0   ;;  %s2262_s19 = smov (!%p229_p3, %s1545_s19), 1 }
   0xc   : > { %1750 = vmatprep.subr.bf16.mxu1 %v1955_v1  ;;  %1742 = vmatprep.subr.bf16.mxu0 %v1955_v1  ;;  %v1900_v4 = vld [vmem:[%s2257_s2 + $0x10] sm:$0xff]   ;;  %s1886_s28 = smul.u32 12, %s2262_s19  ;;  %vm279_vm1 = vcmask 261120   ;;  %v1903_v5 = vld [vmem:[%s2257_s2 + $0x38] sm:$0xff]   ;;  %v1904_v16 = vld [vmem:[%s2257_s2 + $0x28] sm:$0xff]   ;;  %s1552_s9 = sshll.u32 %s2262_s19, 2 }
   0xd   : > { %1751 = vmatpush3.bf16.msra.mxu1 %v1897_v0  ;;  %1754 = vmatprep.mubr.msk.bf16.mxu1 %vm1956_vm0, %v1955_v1  ;;  %v1905_v11 = vld [vmem:[%s2257_s2 + $0x30] sm:$0xff]   ;;  %v1908_v17 = vld [vmem:[%s2257_s2 + $0x58] sm:$0xff]   ;;  %v1906_v25 = vld [vmem:[%s2257_s2 + $0x20] sm:$0xff]   ;;  %s242_s13 = scalar_lea.vmem %s2260_s5, %s1552_s9  ;;  %vm1478_vm2 = vcmask 519168  }
   0xe   : > { %1743 = vmatpush3.bf16.msra.mxu0 %v1898_v2  ;;  %1752 = vmatprep.subr.bf16.mxu1 %v1955_v1  ;;  %s2027_s8 = scalar_lea.vmem %s2255_s0, %s1886_s28  ;;  %v1910_v27 = vld [vmem:[%s2257_s2 + $0x50] sm:$0xff]   ;;  %v1909_v31 = vld [vmem:[%s2257_s2 + $0x48] sm:$0xff]   ;;  %v1914_v36 = vld [vmem:[%s2257_s2 + $0x78] sm:$0xff]   ;;  %s2105_s12 = scalar_lea.vmem %s2256_s1, %s1886_s28 }
   0xf   : > { %1744 = vmatprep.subr.bf16.mxu0 %v1955_v1  ;;  %1746 = vmatprep.mubr.msk.bf16.mxu0 %vm1956_vm0, %v1955_v1  ;;  %v244_v6 = vld [vmem:[%s2027_s8] sm:$0xf]  ;;  %v249_v7 = vld [vmem:[%s2027_s8 + $0x4] sm:$0x1]  ;;  %v2061_v29 = vld [vmem:[%s2027_s8 + $0x8] sm:$0x1] }
  0x10   : > { %v1557_v8 = vcombine.low %v244_v6, %v249_v7  ;;  %v444_v9 = vld [vmem:[%s2027_s8] sm:$0xc]  ;;  %v445_v10 = vld [vmem:[%s2027_s8 + $0x4] sm:$0x3]  ;;  %v1916_v43 = vld [vmem:[%s2257_s2 + $0x70] sm:$0xff]  }
  0x11   : > { %1753 = vmatpush3.bf16.msra.mxu1 %v1899_v3  ;;  %v1576_v12 = vcombine.low %v444_v9, %v445_v10  ;;  %v378_v15 = vld [vmem:[%s2027_s8] sm:$0xe]  ;;  %v513_v20 = vld [vmem:[%s2027_s8 + $0x4] sm:$0x7]  ;;  %v1915_v45 = vld [vmem:[%s2257_s2 + $0x68] sm:$0xff]  }
  0x12   : > { %1745 = vmatpush3.bf16.msra.mxu0 %v1900_v4  ;;  %1766 = vmatprep.subr.bf16.mxu1 %v1955_v1  ;;  %v261_v13 = vshrl.u32 %v1557_v8, 16  ;;  %v263_v14 = vshll.u32 %v1557_v8, 16  ;;  %v586_v21 = vld [vmem:[%s2027_s8] sm:$0x8]  ;;  %v1584_v23 = vcombine.low %v444_v9, %v513_v20  ;;  %v1568_v24 = vcombine.low %v378_v15, %v249_v7  ;;  %v714_v28 = vld [vmem:[%s2027_s8 + $0x4] sm:$0xf] }
  0x13   : > { %1758 = vmatprep.subr.bf16.mxu0 %v1955_v1  ;;  %v456_v19 = vrot.slane %v1576_v12, 2  ;;  %v1592_v26 = vcombine.low %v586_v21, %v513_v20  ;;  %v1607_v30 = vcombine.low %v714_v28, %v2061_v29  ;;  %v1911_v38 = vld [vmem:[%s2257_s2 + $0x40] sm:$0xff]   ;;  %v1919_v47 = vld [vmem:[%s2258_s3 + $0x8] sm:$0xff]   ;;  %v1925_v8 = vld [vmem:[%s2258_s3 + $0x18] sm:$0xff]  }
  0x14   : > { %1755 = vmatmul.mubr.msk.bf16.vlgmr.msra.gmra.mxu1 %vm279_vm1, %v244_v6  ;;  %v265_v18 = vrot.slane %v263_v14, 1  ;;  %v523_v32 = vshrl.u32 %v1584_v23, 16  ;;  %v526_v33 = vshll.u32 %v1584_v23, 16  ;;  %v387_v34 = vrot.slane %v1568_v24, 1  ;;  %v1917_v48 = vld [vmem:[%s2257_s2 + $0x60] sm:$0xff]   ;;  %v1920_v52 = vld [vmem:[%s2257_s2 + $0x88] sm:$0xff]  }
  0x15   : > { %1767 = vmatpush3.bf16.msra.mxu1 %v1903_v5  ;;  %1770 = vmatprep.mubr.msk.bf16.mxu1 %vm1956_vm0, %v1955_v1  ;;  %v595_v35 = vrot.slane %v1592_v26, 3  ;;  %v729_v37 = vshll.u32 %v1607_v30, 16  ;;  %v727_v41 = vshrl.u32 %v1607_v30, 16  ;;  %v1921_v49 = vld [vmem:[%s2258_s3] sm:$0xff]   ;;  %v1923_v54 = vld [vmem:[%s2258_s3 + $0x28] sm:$0xff]   ;;  %v1927_v14 = vld [vmem:[%s2258_s3 + $0x10] sm:$0xff]  }
  0x16   : > { %1768 = vmatprep.subr.bf16.mxu1 %v1955_v1  ;;  %v266_v22 = vor.u32 %v265_v18, %v261_v13  ;;  %v525_v39 = vrot.slane %v523_v32, 2  ;;  %v528_v40 = vrot.slane %v526_v33, 3  ;;  %v789_v50 = vld [vmem:[%s2027_s8 + $0x4] sm:$0xe]  ;;  %v855_v53 = vld [vmem:[%s2105_s12] sm:$0xf] }
  0x17   : > { %v731_v42 = vrot.slane %v729_v37, 1  ;;  %v652_v51 = vld [vmem:[%s2027_s8 + $0x4] sm:$0xf]  ;;  %v916_v55 = vld [vmem:[%s2105_s12] sm:$0xf]  ;;  %v1615_v60 = vcombine.low %v789_v50, %v2061_v29  ;;  %v1930_v9 = vld [vmem:[%s2258_s3 + $0x48] sm:$0xff]  }
  0x18   : > { %1747 = vmatmul.mubr.msk.bf16.vlgmr.msra.gmra.mxu0 %vm279_vm1, %v266_v22  ;;  %v529_v44 = vor.u32 %v528_v40, %v525_v39  ;;  %v917_v56 = vld [vmem:[%s2105_s12 + $0x4] sm:$0x1]  ;;  %v991_v57 = vld [vmem:[%s2105_s12] sm:$0xe]  ;;  %v1931_v18 = vld [vmem:[%s2258_s3 + $0x38] sm:$0xff]  }
  0x19   : > { %1769 = vmatpush3.bf16.msra.mxu1 %v1905_v11  ;;  %1759 = vmatpush3.bf16.msra.mxu0 %v1904_v16  ;;  %v732_v46 = vor.u32 %v731_v42, %v727_v41  ;;  %v2134_v58 = vld [vmem:[%s2105_s12] sm:$0xc]  ;;  %v2137_v59 = vld [vmem:[%s2105_s12 + $0x4] sm:$0x7]  ;;  %v1626_v62 = vcombine.low %v916_v55, %v917_v56  ;;  %v1634_v63 = vcombine.low %v991_v57, %v917_v56  ;;  %v798_v3 = vrot.slane %v1615_v60, 1  ;;  %v1933_v22 = vld [vmem:[%s2258_s3 + $0x30] sm:$0xff]  }
  0x1a   : > { %1782 = vmatprep.subr.bf16.mxu1 %v1955_v1  ;;  %1760 = vmatprep.subr.bf16.mxu0 %v1955_v1  ;;  %v1922_v61 = vld [vmem:[%s2257_s2 + $0x80] sm:$0xff]   ;;  %v1650_v0 = vcombine.low %v2134_v58, %v2137_v59  ;;  %v1937_v24 = vld [vmem:[%s2258_s3 + $0x58] sm:$0xff]   ;;  %v1328_v30 = vld [vmem:[%s2105_s12 + $0x8] sm:$0x1] }
  0x1b   : > { %1762 = vmatprep.mubr.msk.bf16.mxu0 %vm1956_vm0, %v1955_v1  ;;  %v1926_v2 = vld [vmem:[%s2258_s3 + $0x20] sm:$0xff]   ;;  %v1000_v4 = vrot.slane %v1634_v63, 1  ;;  %v931_v5 = vshll.u32 %v1626_v62, 16  ;;  %v929_v10 = vshrl.u32 %v1626_v62, 16  ;;  %v1942_v40 = vld [vmem:[%s2258_s3 + $0x78] sm:$0xff]  }
  0x1c   : > { %1771 = vmatmul.mubr.msk.bf16.vlgmr.msra.gmra.mxu1 %vm279_vm1, %v456_v19  ;;  %v1136_v6 = vshrl.u32 %v1650_v0, 16  ;;  %v1139_v7 = vshll.u32 %v1650_v0, 16  ;;  %v1932_v15 = vld [vmem:[%s2258_s3 + $0x40] sm:$0xff]   ;;  %v1935_v19 = vld [vmem:[%s2258_s3 + $0x68] sm:$0xff]  }
  0x1d   : > { %1783 = vmatpush3.bf16.msra.mxu1 %v1908_v17  ;;  %1786 = vmatprep.mubr.msk.bf16.mxu1 %vm1956_vm0, %v1955_v1  ;;  %v933_v11 = vrot.slane %v931_v5, 1  ;;  %v1058_v20 = vld [vmem:[%s2105_s12 + $0x4] sm:$0x3]  ;;  %v1199_v28 = vld [vmem:[%s2105_s12] sm:$0x8] }
  0x1e   : > { %1784 = vmatprep.subr.bf16.mxu1 %v1955_v1  ;;  %1761 = vmatpush3.bf16.msra.mxu0 %v1906_v25  ;;  %v1138_v12 = vrot.slane %v1136_v6, 2  ;;  %v1141_v13 = vrot.slane %v1139_v7, 3  ;;  %v1642_v21 = vcombine.low %v2134_v58, %v1058_v20  ;;  %v1938_v23 = vld [vmem:[%s2258_s3 + $0x60] sm:$0xff]   ;;  %v1658_v32 = vcombine.low %v1199_v28, %v2137_v59 }
  0x1f   : > { %1774 = vmatprep.subr.bf16.mxu0 %v1955_v1  ;;  %v934_v16 = vor.u32 %v933_v11, %v929_v10  ;;  %v1265_v26 = vld [vmem:[%s2105_s12 + $0x4] sm:$0xf] }
  0x20   : > { %v1142_v17 = vor.u32 %v1141_v13, %v1138_v12  ;;  %v1069_v25 = vrot.slane %v1642_v21, 2  ;;  %v1327_v29 = vld [vmem:[%s2105_s12 + $0x4] sm:$0xf]  ;;  %v1208_v37 = vrot.slane %v1658_v32, 3 }
  0x21   : > { %1785 = vmatpush3.bf16.msra.mxu1 %v1910_v27  ;;  %1763 = vmatmul.mubr.msk.bf16.vlgmr.msra.gmra.mxu0 %vm279_vm1, %v387_v34  ;;  %v1940_v27 = vld [vmem:[%s2258_s3 + $0x88] sm:$0xff]   ;;  %v1673_v33 = vcombine.low %v1327_v29, %v1328_v30 }
  0x22   : > { %1798 = vmatprep.subr.bf16.mxu1 %v1955_v1  ;;  %1775 = vmatpush3.bf16.msra.mxu0 %v1909_v31  ;;  %v1402_v31 = vld [vmem:[%s2105_s12 + $0x4] sm:$0xe] }
  0x23   : > { %1776 = vmatprep.subr.bf16.mxu0 %v1955_v1  ;;  %1778 = vmatprep.mubr.msk.bf16.mxu0 %vm1956_vm0, %v1955_v1  ;;  %v1681_v34 = vcombine.low %v1402_v31, %v1328_v30  ;;  %v1342_v39 = vshll.u32 %v1673_v33, 16  ;;  %v1340_v41 = vshrl.u32 %v1673_v33, 16 }
  0x24   : > { %1787 = vmatmul.mubr.msk.bf16.vlgmr.msra.gmra.mxu1 %vm279_vm1, %v595_v35  ;;  %v1939_v35 = vld [vmem:[%s2258_s3 + $0x50] sm:$0xff]  }
  0x25   : > { %1799 = vmatpush3.bf16.msra.mxu1 %v1914_v36  ;;  %1802 = vmatprep.mubr.msk.bf16.mxu1 %vm1956_vm0, %v1955_v1  ;;  %v1943_v36 = vld [vmem:[%s2258_s3 + $0x80] sm:$0xff]   ;;  %v1344_v42 = vrot.slane %v1342_v39, 1 }
  0x26   : > { %1800 = vmatprep.subr.bf16.mxu1 %v1955_v1  ;;  %1777 = vmatpush3.bf16.msra.mxu0 %v1911_v38  ;;  %v1411_v38 = vrot.slane %v1681_v34, 1 }
  0x27   : > { %1790 = vmatprep.subr.bf16.mxu0 %v1955_v1 }
  0x29   : > { %1801 = vmatpush3.bf16.msra.mxu1 %v1916_v43  ;;  %1779 = vmatmul.mubr.msk.bf16.vlgmr.msra.gmra.mxu0 %vm279_vm1, %v529_v44  ;;  %v1944_v43 = vld [vmem:[%s2258_s3 + $0x70] sm:$0xff]   ;;  %v1345_v44 = vor.u32 %v1344_v42, %v1340_v41 }
  0x2a   : > { %1814 = vmatprep.subr.bf16.mxu1 %v1955_v1  ;;  %1791 = vmatpush3.bf16.msra.mxu0 %v1915_v45 }
  0x2b   : > { %1792 = vmatprep.subr.bf16.mxu0 %v1955_v1  ;;  %1794 = vmatprep.mubr.msk.bf16.mxu0 %vm1956_vm0, %v1955_v1 }
  0x2c   : > { %1803 = vmatmul.mubr.msk.bf16.vlgmr.msra.gmra.mxu1 %vm279_vm1, %v732_v46 }
  0x2d   : > { %1815 = vmatpush3.bf16.msra.mxu1 %v1919_v47  ;;  %1818 = vmatprep.mubr.msk.bf16.mxu1 %vm1956_vm0, %v1955_v1 }
  0x2e   : > { %1816 = vmatprep.subr.bf16.mxu1 %v1955_v1  ;;  %1793 = vmatpush3.bf16.msra.mxu0 %v1917_v48 }
  0x2f   : > { %1806 = vmatprep.subr.bf16.mxu0 %v1955_v1 }
  0x31   : > { %1817 = vmatpush3.bf16.msra.mxu1 %v1921_v49  ;;  %1795 = vmatmul.mubr.msk.bf16.vlgmr.msra.gmra.mxu0 %vm279_vm1, %v652_v51 }
  0x32   : > { %1830 = vmatprep.subr.bf16.mxu1 %v1955_v1  ;;  %1807 = vmatpush3.bf16.msra.mxu0 %v1920_v52 }
  0x33   : > { %1808 = vmatprep.subr.bf16.mxu0 %v1955_v1  ;;  %1810 = vmatprep.mubr.msk.bf16.mxu0 %vm1956_vm0, %v1955_v1 }
  0x34   : > { %1819 = vmatmul.mubr.msk.bf16.vlgmr.msra.gmra.mxu1 %vm279_vm1, %v855_v53 }
  0x35   : > { %1831 = vmatpush3.bf16.msra.mxu1 %v1923_v54  ;;  %1834 = vmatprep.mubr.msk.bf16.mxu1 %vm1956_vm0, %v1955_v1 }
  0x36   : > { %1832 = vmatprep.subr.bf16.mxu1 %v1955_v1  ;;  %1809 = vmatpush3.bf16.msra.mxu0 %v1922_v61 }
  0x37   : > { %1822 = vmatprep.subr.bf16.mxu0 %v1955_v1 }
  0x39   : > { %1833 = vmatpush3.bf16.msra.mxu1 %v1926_v2  ;;  %1811 = vmatmul.mubr.msk.bf16.vlgmr.msra.gmra.mxu0 %vm279_vm1, %v798_v3 }
  0x3a   : > { %1846 = vmatprep.subr.bf16.mxu1 %v1955_v1  ;;  %1823 = vmatpush3.bf16.msra.mxu0 %v1925_v8 }
  0x3b   : > { %1824 = vmatprep.subr.bf16.mxu0 %v1955_v1  ;;  %1826 = vmatprep.mubr.msk.bf16.mxu0 %vm1956_vm0, %v1955_v1 }
  0x3c   : > { %1835 = vmatmul.mubr.msk.bf16.vlgmr.msra.gmra.mxu1 %vm279_vm1, %v1000_v4 }
  0x3d   : > { %1847 = vmatpush3.bf16.msra.mxu1 %v1930_v9  ;;  %1850 = vmatprep.mubr.msk.bf16.mxu1 %vm1956_vm0, %v1955_v1 }
  0x3e   : > { %1848 = vmatprep.subr.bf16.mxu1 %v1955_v1  ;;  %1825 = vmatpush3.bf16.msra.mxu0 %v1927_v14 }
  0x3f   : > { %1838 = vmatprep.subr.bf16.mxu0 %v1955_v1 }
  0x41   : > { %1849 = vmatpush3.bf16.msra.mxu1 %v1932_v15  ;;  %1827 = vmatmul.mubr.msk.bf16.vlgmr.msra.gmra.mxu0 %vm279_vm1, %v934_v16 }
  0x42   : > { %1862 = vmatprep.subr.bf16.mxu1 %v1955_v1  ;;  %1839 = vmatpush3.bf16.msra.mxu0 %v1931_v18 }
  0x43   : > { %1840 = vmatprep.subr.bf16.mxu0 %v1955_v1  ;;  %1842 = vmatprep.mubr.msk.bf16.mxu0 %vm1956_vm0, %v1955_v1 }
  0x44   : > { %1851 = vmatmul.mubr.msk.bf16.vlgmr.msra.gmra.mxu1 %vm279_vm1, %v1142_v17 }
  0x45   : > { %1863 = vmatpush3.bf16.msra.mxu1 %v1935_v19  ;;  %1866 = vmatprep.mubr.msk.bf16.mxu1 %vm1956_vm0, %v1955_v1 }
  0x46   : > { %1864 = vmatprep.subr.bf16.mxu1 %v1955_v1  ;;  %1841 = vmatpush3.bf16.msra.mxu0 %v1933_v22 }
  0x47   : > { %1854 = vmatprep.subr.bf16.mxu0 %v1955_v1 }
  0x49   : > { %1865 = vmatpush3.bf16.msra.mxu1 %v1938_v23  ;;  %1843 = vmatmul.mubr.msk.bf16.vlgmr.msra.gmra.mxu0 %vm279_vm1, %v1069_v25 }
  0x4a   : > { %1878 = vmatprep.subr.bf16.mxu1 %v1955_v1  ;;  %1855 = vmatpush3.bf16.msra.mxu0 %v1937_v24 }
  0x4b   : > { %1856 = vmatprep.subr.bf16.mxu0 %v1955_v1  ;;  %1858 = vmatprep.mubr.msk.bf16.mxu0 %vm1956_vm0, %v1955_v1 }
  0x4c   : > { %1867 = vmatmul.mubr.msk.bf16.vlgmr.msra.gmra.mxu1 %vm279_vm1, %v1265_v26 }
  0x4d   : > { %1879 = vmatpush3.bf16.msra.mxu1 %v1940_v27  ;;  %1882 = vmatprep.mubr.msk.bf16.mxu1 %vm1956_vm0, %v1955_v1 }
  0x4e   : > { %1880 = vmatprep.subr.bf16.mxu1 %v1955_v1  ;;  %1857 = vmatpush3.bf16.msra.mxu0 %v1939_v35 }
  0x4f   : > { %1870 = vmatprep.subr.bf16.mxu0 %v1955_v1 }
  0x51   : > { %1881 = vmatpush3.bf16.msra.mxu1 %v1943_v36  ;;  %1859 = vmatmul.mubr.msk.bf16.vlgmr.msra.gmra.mxu0 %vm279_vm1, %v1208_v37 }
  0x52   : > { %1871 = vmatpush3.bf16.msra.mxu0 %v1942_v40  ;;  %1874 = vmatprep.mubr.msk.bf16.mxu0 %vm1956_vm0, %v1955_v1 }
  0x53   : > { %1872 = vmatprep.subr.bf16.mxu0 %v1955_v1 }
  0x54   : > { %1883 = vmatmul.mubr.msk.bf16.vlgmr.msra.gmra.mxu1 %vm279_vm1, %v1411_v38 }
  0x56   : > { %1873 = vmatpush3.bf16.msra.mxu0 %v1944_v43 }
  0x59   : > { %1875 = vmatmul.mubr.msk.bf16.vlgmr.msra.gmra.mxu0 %vm279_vm1, %v1345_v44 }
  0xd4   : > { %v372_v45 = vpop.f32.mrf.mxu1 }
  0xd6   : > { %v1756_v46 = vpop.f32.mrf.mxu1 }
  0xd8   : > { %v375_v47 = vpop.f32.mrf.mxu1  ;;  %v317_v49 = vpop.f32.mrf.mxu0 }
  0xd9   : > { %v373_v7 = vadd.f32 %v372_v45, %v317_v49 }
  0xda   : > { %v1757_v48 = vpop.f32.mrf.mxu1  ;;  %v1748_v51 = vpop.f32.mrf.mxu0 }
  0xdc   : > { %v506_v50 = vpop.f32.mrf.mxu1  ;;  %v320_v53 = vpop.f32.mrf.mxu0 }
  0xde   : > { %v1772_v52 = vpop.f32.mrf.mxu1  ;;  %v1749_v55 = vpop.f32.mrf.mxu0 }
  0xe0   : > { %v509_v54 = vpop.f32.mrf.mxu1 }
  0xe1   : > { %v437_v57 = vpop.f32.mrf.mxu0 }
  0xe2   : > { %v1773_v56 = vpop.f32.mrf.mxu1  ;;  %v443_v10 = vadd.f32 %v437_v57, %v373_v7 }
  0xe3   : > { %v1764_v59 = vpop.f32.mrf.mxu0 }
  0xe4   : > { %v645_v58 = vpop.f32.mrf.mxu1  ;;  %v512_v15 = vadd.f32 %v506_v50, %v443_v10 }
  0xe5   : > { %v440_v60 = vpop.f32.mrf.mxu0 }
  0xe6   : > { %v1788_v1 = vpop.f32.mrf.mxu1 }
  0xe7   : > { %v1765_v62 = vpop.f32.mrf.mxu0 }
  0xe8   : > { %v648_v61 = vpop.f32.mrf.mxu1 }
  0xe9   : > { %v579_v0 = vpop.f32.mrf.mxu0 }
  0xea   : > { %v1789_v63 = vpop.f32.mrf.mxu1  ;;  %v585_v18 = vadd.f32 %v579_v0, %v512_v15 }
  0xeb   : > { %v1780_v3 = vpop.f32.mrf.mxu0 }
  0xec   : > { %v782_v2 = vpop.f32.mrf.mxu1  ;;  %v651_v23 = vadd.f32 %v645_v58, %v585_v18 }
  0xed   : > { %v582_v5 = vpop.f32.mrf.mxu0 }
  0xee   : > { %v1804_v4 = vpop.f32.mrf.mxu1 }
  0xef   : > { %v1781_v8 = vpop.f32.mrf.mxu0 }
  0xf0   : > { %v785_v6 = vpop.f32.mrf.mxu1 }
  0xf1   : > { %v707_v11 = vpop.f32.mrf.mxu0 }
  0xf2   : > { %v1805_v9 = vpop.f32.mrf.mxu1  ;;  %v713_v26 = vadd.f32 %v707_v11, %v651_v23 }
  0xf3   : > { %v1796_v13 = vpop.f32.mrf.mxu0 }
  0xf4   : > { %v909_v12 = vpop.f32.mrf.mxu1  ;;  %v788_v31 = vadd.f32 %v782_v2, %v713_v26  ;;  %v1685_v2 = vld [vmem:[%s2259_s4] ss:$0 sm:$0xff] }
  0xf5   : > { %v710_v16 = vpop.f32.mrf.mxu0 }
  0xf6   : > { %v1820_v14 = vpop.f32.mrf.mxu1 }
  0xf7   : > { %v1797_v19 = vpop.f32.mrf.mxu0 }
  0xf8   : > { %v912_v17 = vpop.f32.mrf.mxu1 }
  0xf9   : > { %v848_v21 = vpop.f32.mrf.mxu0 }
  0xfa   : > { %v1821_v20 = vpop.f32.mrf.mxu1  ;;  %v854_v34 = vadd.f32 %v848_v21, %v788_v31 }
  0xfb   : > { %v1812_v24 = vpop.f32.mrf.mxu0 }
  0xfc   : > { %v1050_v22 = vpop.f32.mrf.mxu1  ;;  %v915_v39 = vadd.f32 %v909_v12, %v854_v34 }
  0xfd   : > { %v851_v27 = vpop.f32.mrf.mxu0 }
  0xfe   : > { %v1836_v25 = vpop.f32.mrf.mxu1 }
  0xff   : > { %v1813_v29 = vpop.f32.mrf.mxu0 }
 0x100   : > { %v1053_v28 = vpop.f32.mrf.mxu1 }
 0x101   : > { %v984_v32 = vpop.f32.mrf.mxu0 }
 0x102   : > { %v1837_v30 = vpop.f32.mrf.mxu1  ;;  %v990_v42 = vadd.f32 %v984_v32, %v915_v39 }
 0x103   : > { %v1828_v35 = vpop.f32.mrf.mxu0 }
 0x104   : > { %v1192_v33 = vpop.f32.mrf.mxu1  ;;  %v1056_v47 = vadd.f32 %v1050_v22, %v990_v42 }
 0x105   : > { %v987_v37 = vpop.f32.mrf.mxu0 }
 0x106   : > { %v1852_v36 = vpop.f32.mrf.mxu1 }
 0x107   : > { %v1829_v40 = vpop.f32.mrf.mxu0 }
 0x108   : > { %v1195_v38 = vpop.f32.mrf.mxu1 }
 0x109   : > { %v1119_v43 = vpop.f32.mrf.mxu0 }
 0x10a   : > { %v1853_v41 = vpop.f32.mrf.mxu1  ;;  %v1125_v50 = vadd.f32 %v1119_v43, %v1056_v47 }
 0x10b   : > { %v1844_v45 = vpop.f32.mrf.mxu0 }
 0x10c   : > { %v1320_v44 = vpop.f32.mrf.mxu1  ;;  %v1198_v55 = vadd.f32 %v1192_v33, %v1125_v50 }
 0x10d   : > { %v1122_v48 = vpop.f32.mrf.mxu0 }
 0x10e   : > { %v1868_v46 = vpop.f32.mrf.mxu1 }
 0x10f   : > { %v1845_v51 = vpop.f32.mrf.mxu0 }
 0x110   : > { %v1323_v49 = vpop.f32.mrf.mxu1 }
 0x111   : > { %v1258_v53 = vpop.f32.mrf.mxu0 }
 0x112   : > { %v1869_v52 = vpop.f32.mrf.mxu1  ;;  %v1264_v58 = vadd.f32 %v1258_v53, %v1198_v55 }
 0x113   : > { %v1860_v56 = vpop.f32.mrf.mxu0 }
 0x114   : > { %v1461_v54 = vpop.f32.mrf.mxu1  ;;  %v1326_v62 = vadd.f32 %v1320_v44, %v1264_v58 }
 0x115   : > { %v1261_v59 = vpop.f32.mrf.mxu0 }
 0x116   : > { %v1884_v57 = vpop.f32.mrf.mxu1 }
 0x117   : > { %v1861_v60 = vpop.f32.mrf.mxu0 }
 0x118   : > { %v1464_v1 = vpop.f32.mrf.mxu1 }
 0x119   : > { %v1395_v63 = vpop.f32.mrf.mxu0 }
 0x11a   : > { %v1885_v61 = vpop.f32.mrf.mxu1  ;;  %v1401_v0 = vadd.f32 %v1395_v63, %v1326_v62 }
 0x11b   : > { %v1876_v3 = vpop.f32.mrf.mxu0 }
 0x11c   : > { %v1467_v4 = vadd.f32 %v1461_v54, %v1401_v0 }
 0x11d   : > { %v1398_v5 = vpop.f32.mrf.mxu0 }
 0x11e   : > { %v1475_v6 = vadd.f32 %v1685_v2, %v1467_v4 }
 0x11f   : > { %v1877_v7 = vpop.f32.mrf.mxu0 }
 0x120   : > { %v1476_v8 = vmax.f32 %v1475_v6, 0.0 }
 0x122   : > { %v1477_v9 = vpack.c.bf16 %v1476_v8, %v1476_v8 }
 0x124   : > { %1479 = vst.msk [vmem:[%s242_s13] sm:$0xf] %vm1478_vm2, %v1477_v9 }
 0x125 PF: > { %s15_s18 = sadd.s32 1, %s1953_s18  }
 0x126   : > { %p12_p4 = scmp.ge.s32.totalorder %s15_s18, 4  }
 0x128   :  { %14 = sbr.rel (!%p12_p4) target bundleno = 1 (0x1), region = 89 }

// kernel: net_forward.14
= control target key start
LH: loop header
LB: loop body
LE: loop exit
PB: predicated region body
PF: predicated region fallthrough
CT: control target
= control target key end

     0   :  { %s2156_s18 = smov 0   ;;  %s2393_s0 = inlined_call_operand.vmem [shape: bf16[2,42,16], index: 0, kind: input, shape index: {}]   ;;  %s2394_s1 = inlined_call_operand.vmem [shape: bf16[2,42,16], index: 1, kind: input, shape index: {}]   ;;  %s2395_s2 = inlined_call_operand.vmem [shape: bf16[9,16,32], index: 2, kind: input, shape index: {}]   ;;  %s2396_s3 = inlined_call_operand.vmem [shape: bf16[9,16,32], index: 3, kind: input, shape index: {}]   ;;  %s2397_s4 = inlined_call_operand.vmem [shape: f32[1,32], index: 4, kind: input, shape index: {}]   ;;  %s2398_s5 = inlined_call_operand.vmem [shape: bf16[2,24,32], index: 5, kind: output, shape index: {}]  }
   0x1 LB: > { %s1771_s19 = sadd.s32 4294967295, %s2124_s18   ;;  %p1775_p0 = scmp.ge.s32.totalorder %s2124_s18, 1  ;;  %s2124_s18 = sphi %s2156_s18, %s15_s18  }
   0x2   : > { %p197_p1 = scmp.lt.s32.totalorder %s2124_s18, 3 }
   0x4   : > { %p198_p2 = pnand %p1775_p0, %p197_p1 }
   0x5   : > { %p230_p3 = scmp.lt.s32.totalorder (!%p198_p2), %s1771_s19, 1 }
   0x6   : > { %201 = sbr.rel (%p198_p2) target bundleno = 300 (0x12c), region = 40 }
   0xb   : > { %v2073_v0 = vld [vmem:[%s2395_s2] sm:$0xff]   ;;  %v2074_v1 = vld [vmem:[%s2395_s2 + $0x8] sm:$0xff]   ;;  %s2400_s19 = smov (!%p230_p3, %s1771_s19), 1  ;;  %v2175_v2 = vld [vmem:[%s2395_s2 + $0x10] sm:$0xff]   ;;  %vm287_vm0 = vcmask 130048   ;;  %vm487_vm2 = vcmask 1044480  }
   0xc   : > { %1961 = vmatprep.subr.bf16.mxu1 %v2073_v0  ;;  %1955 = vmatprep.subr.bf16.mxu0 %v2074_v1  ;;  %s2063_s26 = smul.u32 24, %s2400_s19  ;;  %v2080_v3 = vld [vmem:[%s2395_s2 + $0x18] sm:$0xff]   ;;  %vm265_vm1 = vsmask.f32 7424  ;;  %vm409_vm3 = vcmask 1046528   ;;  %v2197_v7 = vld [vmem:[%s2395_s2 + $0x28] sm:$0xff]  }
   0xd   : > { %1962 = vmatpush3.bf16.msra.mxu1 %v2073_v0  ;;  %1956 = vmatpush3.bf16.msra.mxu0 %v2074_v1  ;;  %v2083_v42 = vld [vmem:[%s2395_s2 + $0x20] sm:$0xff]   ;;  %v2089_v53 = vld [vmem:[%s2395_s2 + $0x38] sm:$0xff]   ;;  %vm561_vm4 = vsmask.f32 4352  ;;  %vm801_vm5 = vsmask.f32 5376 }
   0xe   : > { %1967 = vmatprep.subr.bf16.mxu0 %v2175_v2  ;;  %s2187_s6 = scalar_lea.vmem %s2393_s0, %s2063_s26  ;;  %1973 = vmatprep.subr.bf16.mxu1 %v2080_v3  ;;  %s2248_s13 = scalar_lea.vmem %s2394_s1, %s2063_s26  ;;  %vm727_vm6 = vcmask 1045504   ;;  %vm1700_vm7 = vcmask 257024  }
   0xf   : > { %v246_v4 = vld [vmem:[%s2187_s6] sm:$0xf]  ;;  %v2191_v5 = vld [vmem:[%s2187_s6 + $0x4] sm:$0xf]  ;;  %v2202_v10 = vld [vmem:[%s2187_s6 + $0x8] sm:$0xf] }
  0x10   : > { %v476_v6 = vld [vmem:[%s2187_s6] sm:$0x8]  ;;  %v1781_v8 = vcombine.low %v246_v4, %v2191_v5  ;;  %v251_v11 = vld [vmem:[%s2187_s6 + $0xc] sm:$0x1]  ;;  %v1786_v13 = vcombine.low %v2202_v10, %v2202_v10  ;;  %v710_v29 = vld [vmem:[%s2187_s6 + $0x4] sm:$0xc]  ;;  %v1811_v43 = vcombine.low %v2191_v5, %v2202_v10 }
  0x11   : > { %v1798_v9 = vcombine.low %v476_v6, %v2191_v5  ;;  %v477_v12 = vld [vmem:[%s2187_s6 + $0xc] sm:$0x7]  ;;  %v2209_v14 = vcombine.low %v2202_v10, %v251_v11  ;;  %v402_v16 = vld [vmem:[%s2187_s6] sm:$0xe]  ;;  %v2228_v34 = vld [vmem:[%s2187_s6 + $0x8] sm:$0xf] }
  0x12   : > { %v1799_v15 = vcombine.low %v2202_v10, %v477_v12  ;;  %v2214_v17 = vld [vmem:[%s2187_s6 + $0xc] sm:$0xf]  ;;  %1963 = vmatprep.mubr.msk.bf16.mxu1 %vm287_vm0, %v1781_v8  ;;  %v267_v18 = vshrl.u32 %v1781_v8, 16  ;;  %v269_v19 = vshll.u32 %v1781_v8, 16  ;;  %v1792_v21 = vcombine.low %v402_v16, %v2191_v5  ;;  %v794_v39 = vld [vmem:[%s2187_s6 + $0x10] sm:$0x7] }
  0x13   : > { %v488_v20 = vrot.slane %v1798_v9, 3  ;;  %1964 = vmatmul.mubr.msk.bf16.vlgmr.msra.gmra.mxu1 %vm287_vm0, %v1786_v13  ;;  %v274_v22 = vshll.u32 %v2209_v14, 16  ;;  %v278_v23 = vshrl.u32 %v2209_v14, 16  ;;  %v411_v25 = vrot.slane %v2209_v14, 1  ;;  %v712_v38 = vld [vmem:[%s2187_s6 + $0xc] sm:$0xf] }
  0x14   : > { %v489_v24 = vrot.slane %v1799_v15, 3  ;;  %v271_v26 = vrot.slane %v269_v19, 1  ;;  %1974 = vmatpush3.bf16.msra.mxu1 %v2080_v3  ;;  %v410_v27 = vrot.slane %v1792_v21, 1  ;;  %v1805_v28 = vcombine.low %v2202_v10, %v2214_v17  ;;  %v713_v60 = vld [vmem:[%s2187_s6 + $0x10] sm:$0x3]  ;;  %v2094_v6 = vld [vmem:[%s2396_s3] sm:$0xff]  }
  0x15   : > { %v276_v30 = vrot.slane %v274_v22, 1  ;;  %1985 = vmatprep.subr.bf16.mxu1 %v2197_v7  ;;  %v563_v32 = vshrl.u32 %v1798_v9, 16  ;;  %v566_v33 = vshll.u32 %v1798_v9, 16  ;;  %v1818_v44 = vcombine.low %v710_v29, %v2228_v34  ;;  %v2088_v3 = vld [vmem:[%s2395_s2 + $0x30] sm:$0xff]   ;;  %v882_v9 = vld [vmem:[%s2187_s6 + $0x4] sm:$0x8] }
  0x16   : > { %v490_v31 = vsel %vm487_vm2, %v488_v20, %v489_v24  ;;  %v272_v35 = vor.u32 %v271_v26, %v267_v18  ;;  %v571_v36 = vshrl.u32 %v1805_v28, 16  ;;  %v574_v37 = vshll.u32 %v1805_v28, 16  ;;  %v2278_v10 = vld [vmem:[%s2248_s13 + $0x4] sm:$0xf]  ;;  %v2281_v11 = vld [vmem:[%s2248_s13 + $0x8] sm:$0xf] }
  0x17   : > { %1975 = vmatprep.mubr.msk.bf16.mxu1 %vm287_vm0, %v490_v31  ;;  %v280_v40 = vor.u32 %v278_v23, %v276_v30  ;;  %v412_v41 = vsel %vm409_vm3, %v410_v27, %v411_v25  ;;  %v565_v46 = vrot.slane %v563_v32, 3  ;;  %v568_v47 = vrot.slane %v566_v33, 4  ;;  %v1034_v12 = vld [vmem:[%s2248_s13 + $0xc] sm:$0x1]  ;;  %v1126_v13 = vld [vmem:[%s2248_s13] sm:$0xe] }
  0x18   : > { %v277_v45 = vsel %vm265_vm1, %v272_v35, %v276_v30  ;;  %v2241_v48 = vcombine.low %v712_v38, %v794_v39  ;;  %v573_v49 = vrot.slane %v571_v36, 3  ;;  %v576_v50 = vrot.slane %v574_v37, 4  ;;  %v1031_v14 = vld [vmem:[%s2248_s13] sm:$0xf]  ;;  %v2289_v16 = vld [vmem:[%s2248_s13 + $0xc] sm:$0xf] }
  0x19   : > { %1957 = vmatprep.mubr.msk.bf16.mxu0 %vm287_vm0, %v277_v45  ;;  %v803_v51 = vshrl.u32 %v1818_v44, 16  ;;  %v806_v52 = vshll.u32 %v1818_v44, 16  ;;  %v569_v61 = vor.u32 %v568_v47, %v565_v46  ;;  %v1812_v1 = vcombine.low %v2214_v17, %v2214_v17  ;;  %v1199_v15 = vld [vmem:[%s2248_s13] sm:$0x8]  ;;  %v2096_v36 = vld [vmem:[%s2248_s13 + $0x8] ss:$0 sps:$4 sm:$0xff]  }
  0x1a   : > { %1958 = vmatmul.mubr.msk.bf16.vlgmr.msra.gmra.mxu0 %vm287_vm0, %v280_v40  ;;  %v811_v54 = vshrl.u32 %v2241_v48, 16  ;;  %v814_v55 = vshll.u32 %v2241_v48, 16  ;;  %v577_v62 = vor.u32 %v576_v50, %v573_v49  ;;  %v2093_v17 = vld [vmem:[%s2395_s2 + $0x40] sm:$0xff]   ;;  %v1831_v18 = vcombine.low %v882_v9, %v2228_v34  ;;  %s2064_s17 = smul.u32 12, %s2400_s19 }
  0x1b   : > { %1968 = vmatpush3.bf16.msra.mxu0 %v2175_v2  ;;  %1976 = vmatmul.mubr.msk.bf16.vlgmr.msra.gmra.mxu1 %vm287_vm0, %v489_v24  ;;  %v805_v56 = vrot.slane %v803_v51, 2  ;;  %v808_v57 = vrot.slane %v806_v52, 3  ;;  %v1819_v2 = vcombine.low %v712_v38, %v713_v60  ;;  %v2095_v20 = vld [vmem:[%s2248_s13] sm:$0xff]   ;;  %v2298_v21 = vcombine.low %v2281_v11, %v1034_v12  ;;  %v2099_v24 = vld [vmem:[%s2396_s3 + $0x10] sm:$0xff]   ;;  %v2098_v38 = vld [vmem:[%s2396_s3 + $0x8] sm:$0xff]  }
  0x1c   : > { %1969 = vmatprep.mubr.msk.bf16.mxu0 %vm287_vm0, %v412_v41  ;;  %1979 = vmatprep.subr.bf16.mxu0 %v2083_v42  ;;  %v813_v58 = vrot.slane %v811_v54, 2  ;;  %v816_v59 = vrot.slane %v814_v55, 3  ;;  %v578_v4 = vsel %vm561_vm4, %v569_v61, %v577_v62  ;;  %v1849_v22 = vcombine.low %v1126_v13, %v2278_v10  ;;  %v1200_v52 = vld [vmem:[%s2248_s13 + $0xc] sm:$0x7]  ;;  %v1432_v54 = vld [vmem:[%s2248_s13 + $0x8] sm:$0xf]  ;;  %s244_s22 = scalar_lea.vmem %s2398_s5, %s2064_s17 }
  0x1d   : > { %1986 = vmatpush3.bf16.msra.mxu1 %v2197_v7  ;;  %1987 = vmatprep.mubr.msk.bf16.mxu1 %vm287_vm0, %v1811_v43  ;;  %v809_v63 = vor.u32 %v808_v57, %v805_v56  ;;  %v728_v7 = vrot.slane %v1818_v44, 2  ;;  %v729_v8 = vrot.slane %v1819_v2, 2  ;;  %v1842_v23 = vcombine.low %v1031_v14, %v2278_v10  ;;  %v2104_v43 = vld [vmem:[%s2396_s3 + $0x20] sm:$0xff]   ;;  %v1433_v55 = vld [vmem:[%s2248_s13 + $0xc] sm:$0xf]  ;;  %v2103_v57 = vld [vmem:[%s2396_s3 + $0x18] sm:$0xff]  }
  0x1e   : > { %1997 = vmatprep.subr.bf16.mxu1 %v2089_v53  ;;  %v817_v0 = vor.u32 %v816_v59, %v813_v58  ;;  %v1862_v26 = vcombine.low %v2281_v11, %v2289_v16  ;;  %v889_v27 = vrot.slane %v1831_v18, 3  ;;  %v890_v28 = vrot.slane %v2241_v48, 3  ;;  %v1434_v56 = vld [vmem:[%s2248_s13 + $0x10] sm:$0x3]  ;;  %v2116_v14 = vld [vmem:[%s2396_s3 + $0x40] sm:$0xff]  }
  0x1f   : > { %v730_v19 = vsel %vm727_vm6, %v728_v7, %v729_v8  ;;  %v1133_v29 = vrot.slane %v1849_v22, 1  ;;  %v1134_v30 = vrot.slane %v2298_v21, 1  ;;  %v1051_v31 = vshll.u32 %v1842_v23, 16  ;;  %v1601_v7 = vld [vmem:[%s2248_s13 + $0x4] sm:$0x8] }
  0x20   : > { %v818_v5 = vsel %vm801_vm5, %v809_v63, %v817_v0  ;;  %v1292_v34 = vshrl.u32 %v1862_v26, 16  ;;  %v1295_v35 = vshll.u32 %v1862_v26, 16  ;;  %v891_v37 = vsel %vm487_vm2, %v889_v27, %v890_v28 }
  0x21   : > { %v1135_v39 = vsel %vm409_vm3, %v1133_v29, %v1134_v30  ;;  %v1049_v40 = vshrl.u32 %v1842_v23, 16  ;;  %v1053_v41 = vrot.slane %v1051_v31, 1  ;;  %v1856_v59 = vcombine.low %v2281_v11, %v1200_v52 }
  0x22   : > { %1970 = vmatmul.mubr.msk.bf16.vlgmr.msra.gmra.mxu0 %vm287_vm0, %v411_v25  ;;  %v2307_v25 = vcombine.low %v1199_v15, %v2278_v10  ;;  %v1294_v46 = vrot.slane %v1292_v34, 3  ;;  %v1297_v47 = vrot.slane %v1295_v35, 4  ;;  %v1060_v60 = vshrl.u32 %v2298_v21, 16 }
  0x23   : > { %1980 = vmatpush3.bf16.msra.mxu0 %v2083_v42  ;;  %1988 = vmatmul.mubr.msk.bf16.vlgmr.msra.gmra.mxu1 %vm287_vm0, %v1812_v1  ;;  %v1056_v42 = vshll.u32 %v2298_v21, 16  ;;  %v1054_v48 = vor.u32 %v1053_v41, %v1049_v40  ;;  %v1211_v2 = vrot.slane %v1856_v59, 3  ;;  %v1888_v15 = vcombine.low %v1601_v7, %v1432_v54 }
  0x24   : > { %1981 = vmatprep.mubr.msk.bf16.mxu0 %vm287_vm0, %v578_v4  ;;  %1991 = vmatprep.subr.bf16.mxu0 %v2088_v3  ;;  %v1284_v32 = vshrl.u32 %v2307_v25, 16  ;;  %v1287_v33 = vshll.u32 %v2307_v25, 16  ;;  %v1298_v51 = vor.u32 %v1297_v47, %v1294_v46  ;;  %v1210_v1 = vrot.slane %v2307_v25, 3 }
  0x25   : > { %1998 = vmatpush3.bf16.msra.mxu1 %v2089_v53  ;;  %1999 = vmatprep.mubr.msk.bf16.mxu1 %vm287_vm0, %v818_v5  ;;  %v1058_v49 = vrot.slane %v1056_v42, 1  ;;  %v1431_v53 = vld [vmem:[%s2248_s13 + $0x4] sm:$0xc]  ;;  %v1608_v21 = vrot.slane %v1888_v15, 3  ;;  %v1868_v23 = vcombine.low %v2278_v10, %v2281_v11 }
  0x26   : > { %2009 = vmatprep.subr.bf16.mxu1 %v2094_v6  ;;  %v1286_v44 = vrot.slane %v1284_v32, 3  ;;  %v1289_v45 = vrot.slane %v1287_v33, 4  ;;  %v1875_v63 = vcombine.low %v1431_v53, %v1432_v54  ;;  %v1212_v9 = vsel %vm487_vm2, %v1210_v1, %v1211_v2 }
  0x27   : > { %v1059_v58 = vsel %vm265_vm1, %v1054_v48, %v1058_v49 }
  0x28   : > { %v1290_v50 = vor.u32 %v1289_v45, %v1286_v44  ;;  %v1448_v4 = vrot.slane %v1875_v63, 2  ;;  %v1525_v18 = vshll.u32 %v1875_v63, 16 }
  0x2a   : > { %1982 = vmatmul.mubr.msk.bf16.vlgmr.msra.gmra.mxu0 %vm287_vm0, %v577_v62  ;;  %v1299_v61 = vsel %vm561_vm4, %v1290_v50, %v1298_v51  ;;  %v2109_v62 = vld [vmem:[%s2396_s3 + $0x30] sm:$0xff]   ;;  %v1527_v26 = vrot.slane %v1525_v18, 3 }
  0x2b   : > { %1992 = vmatpush3.bf16.msra.mxu0 %v2088_v3  ;;  %2000 = vmatmul.mubr.msk.bf16.vlgmr.msra.gmra.mxu1 %vm287_vm0, %v817_v0  ;;  %v1876_v0 = vcombine.low %v1433_v55, %v1434_v56  ;;  %v1062_v3 = vor.u32 %v1060_v60, %v1058_v49 }
  0x2c   : > { %1993 = vmatprep.mubr.msk.bf16.mxu0 %vm287_vm0, %v730_v19  ;;  %2003 = vmatprep.subr.bf16.mxu0 %v2093_v17 }
  0x2d   : > { %2010 = vmatpush3.bf16.msra.mxu1 %v2094_v6  ;;  %2011 = vmatprep.mubr.msk.bf16.mxu1 %vm287_vm0, %v2095_v20  ;;  %v1449_v5 = vrot.slane %v1876_v0, 2  ;;  %v1514_v6 = vld [vmem:[%s2248_s13 + $0x10] sm:$0x7] }
  0x2e   : > { %2021 = vmatprep.subr.bf16.mxu1 %v2099_v24  ;;  %v1882_v12 = vcombine.low %v1433_v55, %v1514_v6 }
  0x2f   : > { %v1450_v13 = vsel %vm727_vm6, %v1448_v4, %v1449_v5 }
  0x30   : > { %v1530_v19 = vshrl.u32 %v1882_v12, 16  ;;  %v1533_v20 = vshll.u32 %v1882_v12, 16  ;;  %v1609_v22 = vrot.slane %v1882_v12, 3 }
  0x32   : > { %1994 = vmatmul.mubr.msk.bf16.vlgmr.msra.gmra.mxu0 %vm287_vm0, %v729_v8  ;;  %v2108_v8 = vld [vmem:[%s2396_s3 + $0x28] sm:$0xff]   ;;  %v1532_v27 = vrot.slane %v1530_v19, 2  ;;  %v1610_v29 = vsel %vm487_vm2, %v1608_v21, %v1609_v22 }
  0x33   : > { %2004 = vmatpush3.bf16.msra.mxu0 %v2093_v17  ;;  %2012 = vmatmul.mubr.msk.bf16.vlgmr.msra.gmra.mxu1 %vm287_vm0, %v2096_v36  ;;  %v1522_v17 = vshrl.u32 %v1875_v63, 16 }
  0x34   : > { %2005 = vmatprep.mubr.msk.bf16.mxu0 %vm287_vm0, %v891_v37  ;;  %2015 = vmatprep.subr.bf16.mxu0 %v2098_v38 }
  0x35   : > { %2022 = vmatpush3.bf16.msra.mxu1 %v2099_v24  ;;  %2023 = vmatprep.mubr.msk.bf16.mxu1 %vm287_vm0, %v1135_v39  ;;  %v2114_v24 = vld [vmem:[%s2396_s3 + $0x38] sm:$0xff]   ;;  %v1524_v25 = vrot.slane %v1522_v17, 2 }
  0x36   : > { %2033 = vmatprep.subr.bf16.mxu1 %v2104_v43 }
  0x37   : > { %v1528_v10 = vor.u32 %v1527_v26, %v1524_v25 }
  0x3a   : > { %2006 = vmatmul.mubr.msk.bf16.vlgmr.msra.gmra.mxu0 %vm287_vm0, %v890_v28  ;;  %v1535_v28 = vrot.slane %v1533_v20, 3 }
  0x3b   : > { %2016 = vmatpush3.bf16.msra.mxu0 %v2098_v38  ;;  %2024 = vmatmul.mubr.msk.bf16.vlgmr.msra.gmra.mxu1 %vm287_vm0, %v1134_v30  ;;  %v1869_v30 = vcombine.low %v2289_v16, %v2289_v16 }
  0x3c   : > { %2017 = vmatprep.mubr.msk.bf16.mxu0 %vm287_vm0, %v1059_v58  ;;  %2027 = vmatprep.subr.bf16.mxu0 %v2103_v57  ;;  %v1536_v11 = vor.u32 %v1535_v28, %v1532_v27 }
  0x3d   : > { %2034 = vmatpush3.bf16.msra.mxu1 %v2104_v43  ;;  %2035 = vmatprep.mubr.msk.bf16.mxu1 %vm287_vm0, %v1299_v61 }
  0x3e   : > { %2045 = vmatprep.subr.bf16.mxu1 %v2109_v62  ;;  %v1537_v31 = vsel %vm801_vm5, %v1528_v10, %v1536_v11 }
  0x42   : > { %2018 = vmatmul.mubr.msk.bf16.vlgmr.msra.gmra.mxu0 %vm287_vm0, %v1062_v3 }
  0x43   : > { %2028 = vmatpush3.bf16.msra.mxu0 %v2103_v57  ;;  %2036 = vmatmul.mubr.msk.bf16.vlgmr.msra.gmra.mxu1 %vm287_vm0, %v1298_v51 }
  0x44   : > { %2029 = vmatprep.mubr.msk.bf16.mxu0 %vm287_vm0, %v1212_v9  ;;  %2039 = vmatprep.subr.bf16.mxu0 %v2108_v8 }
  0x45   : > { %2046 = vmatpush3.bf16.msra.mxu1 %v2109_v62  ;;  %2047 = vmatprep.mubr.msk.bf16.mxu1 %vm287_vm0, %v1450_v13 }
  0x46   : > { %2057 = vmatprep.subr.bf16.mxu1 %v2116_v14 }
  0x4a   : > { %2030 = vmatmul.mubr.msk.bf16.vlgmr.msra.gmra.mxu0 %vm287_vm0, %v1211_v2 }
  0x4b   : > { %2040 = vmatpush3.bf16.msra.mxu0 %v2108_v8  ;;  %2048 = vmatmul.mubr.msk.bf16.vlgmr.msra.gmra.mxu1 %vm287_vm0, %v1449_v5 }
  0x4c   : > { %2041 = vmatprep.mubr.msk.bf16.mxu0 %vm287_vm0, %v1868_v23  ;;  %2051 = vmatprep.subr.bf16.mxu0 %v2114_v24 }
  0x4d   : > { %2058 = vmatpush3.bf16.msra.mxu1 %v2116_v14  ;;  %2059 = vmatprep.mubr.msk.bf16.mxu1 %vm287_vm0, %v1610_v29 }
  0x52   : > { %2042 = vmatmul.mubr.msk.bf16.vlgmr.msra.gmra.mxu0 %vm287_vm0, %v1869_v30 }
  0x53   : > { %2052 = vmatpush3.bf16.msra.mxu0 %v2114_v24  ;;  %2060 = vmatmul.mubr.msk.bf16.vlgmr.msra.gmra.mxu1 %vm287_vm0, %v1609_v22 }
  0x54   : > { %2053 = vmatprep.mubr.msk.bf16.mxu0 %vm287_vm0, %v1537_v31 }
  0x5a   : > { %2054 = vmatmul.mubr.msk.bf16.vlgmr.msra.gmra.mxu0 %vm287_vm0, %v1536_v11 }
  0xd3   : > { %v1965_v32 = vpop.f32.mrf.mxu1 }
  0xd5   : > { %v388_v33 = vpop.f32.mrf.mxu1 }
  0xd7   : > { %v1966_v34 = vpop.f32.mrf.mxu1 }
  0xd9   : > { %v391_v35 = vpop.f32.mrf.mxu1 }
  0xda   : > { %v1959_v36 = vpop.f32.mrf.mxu0 }
  0xdb   : > { %v1977_v37 = vpop.f32.mrf.mxu1  ;;  %v397_v56 = vadd.f32 %v1965_v32, %v1959_v36 }
  0xdc   : > { %v328_v38 = vpop.f32.mrf.mxu0 }
  0xdd   : > { %v537_v39 = vpop.f32.mrf.mxu1  ;;  %v389_v59 = vadd.f32 %v388_v33, %v328_v38 }
  0xde   : > { %v1960_v16 = vpop.f32.mrf.mxu0 }
  0xdf   : > { %v1978_v40 = vpop.f32.mrf.mxu1 }
  0xe0   : > { %v331_v41 = vpop.f32.mrf.mxu0 }
  0xe1   : > { %v540_v42 = vpop.f32.mrf.mxu1  ;;  %v392_v2 = vadd.f32 %v391_v35, %v331_v41 }
  0xe2   : > { %v1971_v43 = vpop.f32.mrf.mxu0 }
  0xe3   : > { %v1989_v44 = vpop.f32.mrf.mxu1  ;;  %v475_v60 = vadd.f32 %v1971_v43, %v397_v56 }
  0xe4   : > { %v459_v45 = vpop.f32.mrf.mxu0 }
  0xe5   : > { %v693_v46 = vpop.f32.mrf.mxu1  ;;  %v473_v63 = vadd.f32 %v459_v45, %v389_v59  ;;  %v553_v3 = vadd.f32 %v1977_v37, %v475_v60 }
  0xe6   : > { %v1972_v47 = vpop.f32.mrf.mxu0 }
  0xe7   : > { %v1990_v48 = vpop.f32.mrf.mxu1  ;;  %v551_v8 = vadd.f32 %v537_v39, %v473_v63 }
  0xe8   : > { %v462_v49 = vpop.f32.mrf.mxu0 }
  0xe9   : > { %v696_v50 = vpop.f32.mrf.mxu1  ;;  %v474_v6 = vadd.f32 %v462_v49, %v392_v2 }
  0xea   : > { %v1983_v51 = vpop.f32.mrf.mxu0 }
  0xeb   : > { %v2001_v52 = vpop.f32.mrf.mxu1  ;;  %v641_v7 = vadd.f32 %v1983_v51, %v553_v3  ;;  %v552_v17 = vadd.f32 %v540_v42, %v474_v6 }
  0xec   : > { %v625_v53 = vpop.f32.mrf.mxu0 }
  0xed   : > { %v865_v54 = vpop.f32.mrf.mxu1  ;;  %v639_v13 = vadd.f32 %v625_v53, %v551_v8  ;;  %v709_v18 = vadd.f32 %v1989_v44, %v641_v7 }
  0xee   : > { %v1984_v55 = vpop.f32.mrf.mxu0 }
  0xef   : > { %v2002_v57 = vpop.f32.mrf.mxu1  ;;  %v707_v23 = vadd.f32 %v693_v46, %v639_v13 }
  0xf0   : > { %v628_v58 = vpop.f32.mrf.mxu0 }
  0xf1   : > { %v868_v61 = vpop.f32.mrf.mxu1  ;;  %v640_v21 = vadd.f32 %v628_v58, %v552_v17 }
  0xf2   : > { %v1995_v62 = vpop.f32.mrf.mxu0 }
  0xf3   : > { %v2013_v0 = vpop.f32.mrf.mxu1  ;;  %v793_v22 = vadd.f32 %v1995_v62, %v709_v18  ;;  %v708_v29 = vadd.f32 %v696_v50, %v640_v21 }
  0xf4   : > { %v777_v1 = vpop.f32.mrf.mxu0 }
  0xf5   : > { %v1014_v4 = vpop.f32.mrf.mxu1  ;;  %v791_v26 = vadd.f32 %v777_v1, %v707_v23  ;;  %v881_v10 = vadd.f32 %v2001_v52, %v793_v22 }
  0xf6   : > { %v1996_v5 = vpop.f32.mrf.mxu0 }
  0xf7   : > { %v2014_v9 = vpop.f32.mrf.mxu1  ;;  %v879_v33 = vadd.f32 %v865_v54, %v791_v26 }
  0xf8   : > { %v780_v12 = vpop.f32.mrf.mxu0 }
  0xf9   : > { %v1017_v14 = vpop.f32.mrf.mxu1  ;;  %v792_v31 = vadd.f32 %v780_v12, %v708_v29 }
  0xfa   : > { %v2007_v15 = vpop.f32.mrf.mxu0 }
  0xfb   : > { %v2025_v19 = vpop.f32.mrf.mxu1  ;;  %v954_v32 = vadd.f32 %v2007_v15, %v881_v10  ;;  %v880_v39 = vadd.f32 %v868_v61, %v792_v31 }
  0xfc   : > { %v938_v20 = vpop.f32.mrf.mxu0 }
  0xfd   : > { %v1182_v24 = vpop.f32.mrf.mxu1  ;;  %v952_v36 = vadd.f32 %v938_v20, %v879_v33  ;;  %v1030_v16 = vadd.f32 %v2013_v0, %v954_v32 }
  0xfe   : > { %v2008_v25 = vpop.f32.mrf.mxu0 }
  0xff   : > { %v2026_v27 = vpop.f32.mrf.mxu1  ;;  %v1028_v44 = vadd.f32 %v1014_v4, %v952_v36 }
 0x100   : > { %v941_v28 = vpop.f32.mrf.mxu0 }
 0x101   : > { %v1185_v11 = vpop.f32.mrf.mxu1  ;;  %v953_v42 = vadd.f32 %v941_v28, %v880_v39 }
 0x102   : > { %v2019_v30 = vpop.f32.mrf.mxu0 }
 0x103   : > { %v2037_v34 = vpop.f32.mrf.mxu1  ;;  %v1125_v43 = vadd.f32 %v2019_v30, %v1030_v16  ;;  %v1029_v50 = vadd.f32 %v1017_v14, %v953_v42 }
 0x104   : > { %v1109_v35 = vpop.f32.mrf.mxu0 }
 0x105   : > { %v1346_v37 = vpop.f32.mrf.mxu1  ;;  %v1123_v47 = vadd.f32 %v1109_v35, %v1028_v44  ;;  %v1198_v51 = vadd.f32 %v2025_v19, %v1125_v43  ;;  %v1892_v19 = vld [vmem:[%s2397_s4] ss:$0 sm:$0xff] }
 0x106   : > { %v2020_v38 = vpop.f32.mrf.mxu0 }
 0x107   : > { %v2038_v40 = vpop.f32.mrf.mxu1  ;;  %v1196_v56 = vadd.f32 %v1182_v24, %v1123_v47 }
 0x108   : > { %v1112_v41 = vpop.f32.mrf.mxu0 }
 0x109   : > { %v1349_v45 = vpop.f32.mrf.mxu1  ;;  %v1124_v54 = vadd.f32 %v1112_v41, %v1029_v50 }
 0x10a   : > { %v2031_v46 = vpop.f32.mrf.mxu0 }
 0x10b   : > { %v2049_v48 = vpop.f32.mrf.mxu1  ;;  %v1275_v55 = vadd.f32 %v2031_v46, %v1198_v51  ;;  %v1197_v62 = vadd.f32 %v1185_v11, %v1124_v54 }
 0x10c   : > { %v1259_v49 = vpop.f32.mrf.mxu0 }
 0x10d   : > { %v1497_v52 = vpop.f32.mrf.mxu1  ;;  %v1273_v59 = vadd.f32 %v1259_v49, %v1196_v56  ;;  %v1362_v63 = vadd.f32 %v2037_v34, %v1275_v55 }
 0x10e   : > { %v2032_v53 = vpop.f32.mrf.mxu0 }
 0x10f   : > { %v2050_v57 = vpop.f32.mrf.mxu1  ;;  %v1360_v4 = vadd.f32 %v1346_v37, %v1273_v59 }
 0x110   : > { %v1262_v58 = vpop.f32.mrf.mxu0 }
 0x111   : > { %v1500_v60 = vpop.f32.mrf.mxu1  ;;  %v1274_v2 = vadd.f32 %v1262_v58, %v1197_v62 }
 0x112   : > { %v2043_v61 = vpop.f32.mrf.mxu0 }
 0x113   : > { %v2061_v0 = vpop.f32.mrf.mxu1  ;;  %v1430_v3 = vadd.f32 %v2043_v61, %v1362_v63  ;;  %v1361_v12 = vadd.f32 %v1349_v45, %v1274_v2 }
 0x114   : > { %v1414_v1 = vpop.f32.mrf.mxu0 }
 0x115   : > { %v1657_v5 = vpop.f32.mrf.mxu1  ;;  %v1428_v7 = vadd.f32 %v1414_v1, %v1360_v4  ;;  %v1513_v13 = vadd.f32 %v2049_v48, %v1430_v3 }
 0x116   : > { %v2044_v6 = vpop.f32.mrf.mxu0 }
 0x117   : > { %v2062_v8 = vpop.f32.mrf.mxu1  ;;  %v1511_v18 = vadd.f32 %v1497_v52, %v1428_v7 }
 0x118   : > { %v1417_v9 = vpop.f32.mrf.mxu0 }
 0x119   : > { %v1429_v15 = vadd.f32 %v1417_v9, %v1361_v12  ;;  %v1660_v11 = vpop.f32.mrf.mxu1 }
 0x11a   : > { %v2055_v14 = vpop.f32.mrf.mxu0 }
 0x11b   : > { %v1600_v17 = vadd.f32 %v2055_v14, %v1513_v13  ;;  %v1512_v26 = vadd.f32 %v1500_v60, %v1429_v15 }
 0x11c   : > { %v1584_v20 = vpop.f32.mrf.mxu0 }
 0x11d   : > { %v1673_v21 = vadd.f32 %v2061_v0, %v1600_v17  ;;  %v1598_v22 = vadd.f32 %v1584_v20, %v1511_v18 }
 0x11e   : > { %v2056_v23 = vpop.f32.mrf.mxu0 }
 0x11f   : > { %v1683_v24 = vadd.f32 %v1892_v19, %v1673_v21  ;;  %v1671_v25 = vadd.f32 %v1657_v5, %v1598_v22 }
 0x120   : > { %v1587_v27 = vpop.f32.mrf.mxu0 }
 0x121   : > { %v1686_v28 = vmax.f32 %v1683_v24, 0.0  ;;  %v1681_v29 = vadd.f32 %v1892_v19, %v1671_v25  ;;  %v1599_v10 = vadd.f32 %v1587_v27, %v1512_v26 }
 0x123   : > { %v1900_v30 = vpack.c.bf16 %v1686_v28, %v1686_v28  ;;  %v1684_v31 = vmax.f32 %v1681_v29, 0.0  ;;  %v1672_v32 = vadd.f32 %v1660_v11, %v1599_v10 }
 0x125   : > { %1703 = vst.msk [vmem:[%s244_s22 + $0x8] sm:$0xf] %vm1700_vm7, %v1900_v30  ;;  %v1898_v33 = vpack.c.bf16 %v1684_v31, %v1684_v31  ;;  %v1682_v34 = vadd.f32 %v1892_v19, %v1672_v32 }
 0x127   : > { %1701 = vst.msk [vmem:[%s244_s22] sm:$0xf] %vm1700_vm7, %v1898_v33  ;;  %v1685_v35 = vmax.f32 %v1682_v34, 0.0 }
 0x129   : > { %v1899_v36 = vpack.c.bf16 %v1685_v35, %v1685_v35 }
 0x12b   : > { %1702 = vst.msk [vmem:[%s244_s22 + $0x4] sm:$0xf] %vm1700_vm7, %v1899_v36 }
 0x12c PF: > { %s15_s18 = sadd.s32 1, %s2124_s18  }
 0x12d   : > { %p12_p4 = scmp.ge.s32.totalorder %s15_s18, 4  }
 0x12f   :  { %14 = sbr.rel (!%p12_p4) target bundleno = 1 (0x1), region = 89 }

// kernel: tile.38
= control target key start
LH: loop header
LB: loop body
LE: loop exit
PB: predicated region body
PF: predicated region fallthrough
CT: control target
= control target key end

     0   :  { %s22_s0 = inlined_call_operand.vmem [shape: f32[3], index: 0, kind: input, shape index: {}]   ;;  %s23_s1 = inlined_call_operand.vmem [shape: f32[4,3], index: 1, kind: output, shape index: {}]  }
   0x1   :  { %v4_v0 = vld [vmem:[%s22_s0] ss:$0 sm:$0xff] }
   0x2   :  { %5 = vst [vmem:[%s23_s1] sm:$0xf] %v4_v0 }

// kernel: tile.39
= control target key start
LH: loop header
LB: loop body
LE: loop exit
PB: predicated region body
PF: predicated region fallthrough
CT: control target
= control target key end

     0   :  { %vm8_vm0 = vcmask 23552   ;;  %s40_s8 = smov 3   ;;  %s41_s9 = smov 6   ;;  %vm14_vm1 = vcmask 97352   ;;  %vm20_vm2 = vcmask 72752   ;;  %vm26_vm3 = vcmask 48152   ;;  %s58_s0 = inlined_call_operand.vmem [shape: f32[4,3], index: 0, kind: input, shape index: {}]   ;;  %s59_s1 = inlined_call_operand.vmem [shape: f32[1,12], index: 1, kind: output, shape index: {}]  }
   0x1   :  { %v5_v0 = vld [vmem:[%s58_s0] sm:$0xf]  ;;  %s39_s0 = smov 9  }
   0x2   :  { %6 = vst [vmem:[#allocation1] sm:$0xf] %v5_v0 }
   0x9   :  { %v11_v1 = vld [vmem:[#allocation1 + $0x3] sm:$0x1]   ;;  %v23_v2 = vld [vmem:[#allocation1 + $0x1] sm:$0x1]   ;;  %v7_v3 = vld [vmem:[#allocation1] sm:$0x1]  }
   0xa   :  { %12 = vrot.lane.b32.xlu0 %v11_v1, %s39_s0  ;;  %24 = vrot.lane.b32.xlu1 %v23_v2, %s40_s8  ;;  %v17_v4 = vld [vmem:[#allocation1 + $0x2] sm:$0x1]   ;;  %9 = vst.msk [vmem:[#allocation0] sm:$0x1] %vm8_vm0, %v7_v3  }
   0xe   :  { %18 = vrot.lane.b32.xlu0 %v17_v4, %s41_s9 }
  0x7c   :  { %v13_v5 = vpop.permute.xlu0 %12   ;;  %v25_v6 = vpop.permute.xlu1 %24  }
  0x7d   :  { %15 = vst.msk [vmem:[#allocation0] sm:$0x1] %vm14_vm1, %v13_v5  }
  0x80   :  { %v19_v7 = vpop.permute.xlu0 %18  }
  0x81   :  { %21 = vst.msk [vmem:[#allocation0] sm:$0x1] %vm20_vm2, %v19_v7  }
  0x82   :  { %27 = vst.msk [vmem:[#allocation0] sm:$0x1] %vm26_vm3, %v25_v6  }
  0x89   :  { %v32_v8 = vld [vmem:[#allocation0] sm:$0x1] }
  0x8a   :  { %35 = vst [vmem:[%s59_s1] sm:$0x1] %v32_v8 }

// kernel: net_forward.15
= control target key start
LH: loop header
LB: loop body
LE: loop exit
PB: predicated region body
PF: predicated region fallthrough
CT: control target
= control target key end

     0   :  { %s3800_s18 = smov 0   ;;  %s4754_s0 = inlined_call_operand.vmem [shape: bf16[2,110,8], index: 0, kind: input, shape index: {}]   ;;  %s4755_s1 = inlined_call_operand.vmem [shape: bf16[2,110,8], index: 1, kind: input, shape index: {}]   ;;  %s4756_s2 = inlined_call_operand.vmem [shape: bf16[9,8,12], index: 2, kind: input, shape index: {}]   ;;  %s4757_s3 = inlined_call_operand.vmem [shape: bf16[9,8,12], index: 3, kind: input, shape index: {}]   ;;  %s4758_s4 = inlined_call_operand.vmem [shape: f32[1,12], index: 4, kind: input, shape index: {}]   ;;  %s4759_s5 = inlined_call_operand.vmem [shape: f32[2,80,12], index: 5, kind: output, shape index: {}]  }
   0x1 LB: > { %s2985_s19 = sadd.s32 4294967295, %s3766_s18   ;;  %p2989_p0 = scmp.ge.s32.totalorder %s3766_s18, 1  ;;  %s3766_s18 = sphi %s3800_s18, %s15_s18  }
   0x2   : > { %p197_p1 = scmp.lt.s32.totalorder %s3766_s18, 3 }
   0x4   : > { %p198_p2 = pnand %p2989_p0, %p197_p1 }
   0x5   : > { %p230_p3 = scmp.lt.s32.totalorder (!%p198_p2), %s2985_s19, 1 }
   0x6   : > { %201 = sbr.rel (%p198_p2) target bundleno = 620 (0x26c), region = 40 }
   0xb   : > { %v256_v0 = vld [vmem:[%s4756_s2] sm:$0xf]  ;;  %vm349_vm0 = vcmask 1043456   ;;  %v3768_v1 = vmov 0.0   ;;  %v2993_v3 = vld [vmem:[%s4756_s2 + $0x4] sm:$0xf] }
   0xc   : > { %3283 = vmatprep.subr.bf16.mxu1 %v3768_v1  ;;  %v437_v2 = vsel %vm349_vm0, %v256_v0, 0  ;;  %3261 = vmatprep.subr.bf16.mxu0 %v3768_v1  ;;  %vm3769_vm1 = vmmov 0   ;;  %v351_v4 = vsel %vm349_vm0, %v2993_v3, 0  ;;  %s4761_s19 = smov (!%p230_p3, %s2985_s19), 1  ;;  %v3017_v5 = vld [vmem:[%s4756_s2 + $0xc] sm:$0xf] }
   0xd   : > { %3284 = vmatpush3.bf16.msra.mxu1 %v437_v2  ;;  %3285 = vmatprep.mubr.msk.bf16.mxu1 %vm3769_vm1, %v3768_v1  ;;  %s3657_s24 = smul.u32 56, %s4761_s19  ;;  %vm333_vm2 = vcmask 64512   ;;  %v699_v10 = vsel %vm349_vm0, %v3017_v5, 0  ;;  %v3010_v15 = vld [vmem:[%s4756_s2 + $0x8] sm:$0xf]  ;;  %vm518_vm4 = vcmask 1046528  }
   0xe   : > { %3262 = vmatpush3.bf16.msra.mxu0 %v351_v4  ;;  %3263 = vmatprep.mubr.msk.bf16.mxu0 %vm3769_vm1, %v3768_v1  ;;  %vm288_vm3 = vsmask.f32 7424  ;;  %v546_v21 = vsel %vm349_vm0, %v3010_v15, 0  ;;  %v3036_v50 = vld [vmem:[%s4756_s2 + $0x14] sm:$0xf]  ;;  %vm951_vm5 = vcmask 1045504  }
   0xf   : > { %3305 = vmatprep.subr.bf16.mxu0 %v3768_v1  ;;  %3327 = vmatprep.subr.bf16.mxu1 %v3768_v1  ;;  %s3835_s29 = scalar_lea.vmem %s4754_s0, %s3657_s24  ;;  %s3894_s9 = scalar_lea.vmem %s4755_s1, %s3657_s24  ;;  %v3029_v53 = vld [vmem:[%s4756_s2 + $0x10] sm:$0xf]  ;;  %v979_v56 = vsel %vm349_vm0, %v3036_v50, 0  ;;  %vm790_vm6 = vsmask.f32 6400  ;;  %vm1384_vm8 = vcmask 1044480  }
  0x10   : > { %v246_v6 = vld [vmem:[%s3835_s29] sm:$0xf]  ;;  %v3839_v7 = vld [vmem:[%s3835_s29 + $0x4] sm:$0xf]  ;;  %v3843_v9 = vld [vmem:[%s3835_s29 + $0x8] sm:$0xff]   ;;  %v860_v59 = vsel %vm349_vm0, %v3029_v53, 0 }
  0x11   : > { %v2994_v8 = vcombine.low %v246_v6, %v3839_v7  ;;  %v297_v13 = vshll.u32 %v3843_v9, 16  ;;  %v3849_v14 = vld [vmem:[%s3835_s29 + $0x10] sm:$0xff]   ;;  %v301_v19 = vshrl.u32 %v3843_v9, 16  ;;  %v3865_v25 = vld [vmem:[%s3835_s29 + $0x18] sm:$0xff]   ;;  %v3881_v31 = vld [vmem:[%s3835_s29 + $0x20] sm:$0xff]   ;;  %v520_v58 = vrot.slane %v3843_v9, 1 }
  0x12   : > { %v305_v20 = vshll.u32 %v3849_v14, 16  ;;  %v309_v27 = vshrl.u32 %v3849_v14, 16  ;;  %v313_v28 = vshll.u32 %v3865_v25, 16  ;;  %v317_v33 = vshrl.u32 %v3865_v25, 16  ;;  %v631_v38 = vld [vmem:[%s3835_s29 + $0x4] sm:$0xe] }
  0x13   : > { %3286 = vmatmul.mubr.msk.bf16.vlgmr.msra.gmra.mxu1 %vm333_vm2, %v2994_v8  ;;  %v290_v11 = vshrl.u32 %v2994_v8, 16  ;;  %v292_v12 = vshll.u32 %v2994_v8, 16  ;;  %v299_v17 = vrot.slane %v297_v13, 1  ;;  %v321_v34 = vshll.u32 %v3881_v31, 16  ;;  %v3907_v39 = vld [vmem:[%s3835_s29 + $0x8] sm:$0xf] }
  0x14   : > { %3328 = vmatpush3.bf16.msra.mxu1 %v699_v10  ;;  %3289 = vmatprep.mubr.msk.bf16.mxu1 %vm3769_vm1, %v3768_v1  ;;  %v307_v24 = vrot.slane %v305_v20, 1  ;;  %v315_v30 = vrot.slane %v313_v28, 1  ;;  %v3901_v37 = vld [vmem:[%s3835_s29 + $0x28] ss:$0 sps:$4 sm:$0x11]   ;;  %v325_v41 = vshrl.u32 %v3881_v31, 16  ;;  %v3913_v43 = vcombine.low %v631_v38, %v3907_v39 }
  0x15   : > { %v294_v16 = vrot.slane %v292_v12, 1  ;;  %3371 = vmatprep.subr.bf16.mxu1 %v3768_v1  ;;  %v303_v23 = vor.u32 %v301_v19, %v299_v17  ;;  %v323_v36 = vrot.slane %v321_v34, 1  ;;  %v329_v42 = vshll.u32 %v3901_v37, 16  ;;  %v3916_v44 = vld [vmem:[%s3835_s29 + $0xc] sm:$0xff]   ;;  %v512_v45 = vld [vmem:[%s3835_s29] sm:$0xe] }
  0x16   : > { %v311_v29 = vor.u32 %v309_v27, %v307_v24  ;;  %v319_v35 = vor.u32 %v317_v33, %v315_v30  ;;  %v672_v48 = vrot.slane %v3913_v43, 1  ;;  %v673_v49 = vrot.slane %v3916_v44, 1  ;;  %v3938_v55 = vld [vmem:[%s3835_s29 + $0x14] sm:$0xff]   ;;  %v3952_v61 = vld [vmem:[%s3835_s29 + $0x1c] sm:$0xff]   ;;  %v3968_v5 = vld [vmem:[%s3835_s29 + $0x24] sm:$0xff]   ;;  %s3658_s17 = smul.u32 80, %s4761_s19 }
  0x17   : > { %v295_v18 = vor.u32 %v294_v16, %v290_v11  ;;  %v308_v26 = vsel %vm288_vm3, %v303_v23, %v307_v24  ;;  %v327_v46 = vor.u32 %v325_v41, %v323_v36  ;;  %v331_v47 = vrot.slane %v329_v42, 1  ;;  %v3681_v10 = vld [vmem:[%s3835_s29 + $0x2c] ss:$0 sps:$4 sm:$0x11]   ;;  %v945_v13 = vld [vmem:[%s3835_s29 + $0x4] sm:$0xc] }
  0x18   : > { %v316_v32 = vsel %vm288_vm3, %v311_v29, %v315_v30  ;;  %v324_v40 = vsel %vm288_vm3, %v319_v35, %v323_v36  ;;  %v3011_v51 = vcombine.low %v512_v45, %v3839_v7  ;;  %v674_v54 = vsel %vm518_vm4, %v672_v48, %v673_v49  ;;  %s4719_s19 = scalar_lea.vmem %s4759_s5, %s3658_s17 }
  0x19   : > { %v300_v22 = vsel %vm288_vm3, %v295_v18, %v299_v17  ;;  %v332_v52 = vsel %vm288_vm3, %v327_v46, %v331_v47  ;;  %v675_v60 = vrot.slane %v3938_v55, 1  ;;  %v522_v0 = vrot.slane %v3849_v14, 1 }
  0x1a   : > { %3264 = vmatmul.mubr.msk.bf16.vlgmr.msra.gmra.mxu0 %vm333_vm2, %v300_v22  ;;  %v519_v57 = vrot.slane %v3011_v51, 1  ;;  %v677_v2 = vrot.slane %v3952_v61, 1  ;;  %v524_v6 = vrot.slane %v3865_v25, 1  ;;  %v679_v7 = vrot.slane %v3968_v5, 1 }
  0x1b   : > { %3306 = vmatpush3.bf16.msra.mxu0 %v546_v21  ;;  %3290 = vmatmul.mubr.msk.bf16.gmra.mxu1 %vm333_vm2, %v3843_v9  ;;  %v676_v63 = vsel %vm518_vm4, %v673_v49, %v675_v60  ;;  %v523_v3 = vsel %vm518_vm4, %v520_v58, %v522_v0  ;;  %v526_v11 = vrot.slane %v3881_v31, 1  ;;  %v681_v12 = vrot.slane %v3681_v10, 1 }
  0x1c   : > { %3267 = vmatprep.mubr.msk.bf16.mxu0 %vm3769_vm1, %v3768_v1  ;;  %3293 = vmatprep.mubr.msk.bf16.mxu1 %vm3769_vm1, %v3768_v1  ;;  %v521_v62 = vsel %vm518_vm4, %v519_v57, %v520_v58  ;;  %v678_v4 = vsel %vm518_vm4, %v675_v60, %v677_v2  ;;  %v525_v8 = vsel %vm518_vm4, %v522_v0, %v524_v6  ;;  %v528_v17 = vrot.slane %v3901_v37, 1  ;;  %v3043_v37 = vld [vmem:[%s4756_s2 + $0x18] sm:$0xf]  ;;  %v3683_v60 = vld [vmem:[%s3835_s29 + $0x2c] ss:$0 sps:$4 sm:$0x33]  }
  0x1d   : > { %3349 = vmatprep.subr.bf16.mxu0 %v3768_v1  ;;  %v680_v9 = vsel %vm518_vm4, %v677_v2, %v679_v7  ;;  %v682_v15 = vsel %vm518_vm4, %v679_v7, %v681_v12  ;;  %v3037_v16 = vcombine.low %v945_v13, %v3907_v39  ;;  %v792_v18 = vshrl.u32 %v3913_v43, 16 }
  0x1e   : > { %v795_v19 = vshll.u32 %v3913_v43, 16  ;;  %v800_v20 = vshrl.u32 %v3916_v44, 16  ;;  %v803_v21 = vshll.u32 %v3916_v44, 16  ;;  %v953_v23 = vrot.slane %v3916_v44, 2 }
  0x1f   : > { %v952_v22 = vrot.slane %v3037_v16, 2  ;;  %v529_v24 = vsel %vm518_vm4, %v526_v11, %v528_v17  ;;  %v809_v34 = vshrl.u32 %v3938_v55, 16  ;;  %v812_v35 = vshll.u32 %v3938_v55, 16  ;;  %v4069_v17 = vld [vmem:[%s3835_s29 + $0x18] sm:$0xff]  }
  0x20   : > { %v797_v27 = vrot.slane %v795_v19, 2  ;;  %v802_v28 = vrot.slane %v800_v20, 1  ;;  %v805_v29 = vrot.slane %v803_v21, 2  ;;  %v955_v36 = vrot.slane %v3938_v55, 2  ;;  %v1064_v55 = vld [vmem:[%s3835_s29 + $0x8] sm:$0xc] }
  0x21   : > { %v954_v30 = vsel %vm951_vm5, %v952_v22, %v953_v23  ;;  %v811_v39 = vrot.slane %v809_v34, 1  ;;  %v1132_v41 = vsel %vm349_vm0, %v3043_v37, 0  ;;  %v818_v44 = vshrl.u32 %v3952_v61, 16 }
  0x22   : > { %3268 = vmatmul.mubr.msk.bf16.gmra.mxu0 %vm333_vm2, %v308_v26  ;;  %v794_v26 = vrot.slane %v792_v18, 1  ;;  %v806_v33 = vor.u32 %v805_v29, %v802_v28  ;;  %v956_v42 = vsel %vm951_vm5, %v953_v23, %v955_v36  ;;  %v821_v45 = vshll.u32 %v3952_v61, 16  ;;  %v1507_v23 = vld [vmem:[%s4757_s3] sm:$0xf] }
  0x23   : > { %3294 = vmatmul.mubr.msk.bf16.gmra.mxu1 %vm333_vm2, %v3849_v14  ;;  %3271 = vmatprep.mubr.msk.bf16.mxu0 %vm3769_vm1, %v3768_v1  ;;  %v527_v14 = vsel %vm518_vm4, %v524_v6, %v526_v11  ;;  %v957_v46 = vrot.slane %v3952_v61, 2  ;;  %v820_v48 = vrot.slane %v818_v44, 1  ;;  %v830_v53 = vshll.u32 %v3968_v5, 16  ;;  %v4085_v28 = vld [vmem:[%s3835_s29 + $0x20] sm:$0xff]  }
  0x24   : > { %3297 = vmatprep.mubr.msk.bf16.mxu1 %vm3769_vm1, %v3768_v1  ;;  %v823_v49 = vrot.slane %v821_v45, 2  ;;  %v961_v2 = vrot.slane %v3683_v60, 2  ;;  %v1242_v21 = vshrl.u32 %v4069_v17, 16  ;;  %v1245_v22 = vshll.u32 %v4069_v17, 16 }
  0x25   : > { %v958_v50 = vsel %vm951_vm5, %v955_v36, %v957_v46  ;;  %vm1223_vm7 = vsmask.f32 5376  ;;  %v1549_v29 = vsel %vm349_vm0, %v1507_v23, 0  ;;  %v1254_v34 = vshll.u32 %v4085_v28, 16  ;;  %v1820_v23 = vld [vmem:[%s3894_s9] sm:$0xe] }
  0x26   : > { %v824_v51 = vor.u32 %v823_v49, %v820_v48  ;;  %vm2907_vm10 = vcmask 97280  }
  0x2a   : > { %3272 = vmatmul.mubr.msk.bf16.gmra.mxu0 %vm333_vm2, %v316_v32  ;;  %v798_v32 = vor.u32 %v797_v27, %v794_v26  ;;  %v1244_v26 = vrot.slane %v1242_v21, 2  ;;  %v1247_v27 = vrot.slane %v1245_v22, 3  ;;  %v1634_v21 = vld [vmem:[%s3894_s9] sm:$0xf]  ;;  %v1635_v22 = vld [vmem:[%s3894_s9 + $0x4] sm:$0xf] }
  0x2b   : > { %3298 = vmatmul.mubr.msk.bf16.gmra.mxu1 %vm333_vm2, %v3865_v25  ;;  %3275 = vmatprep.mubr.msk.bf16.mxu0 %vm3769_vm1, %v3768_v1  ;;  %v3055_v25 = vld [vmem:[%s4756_s2 + $0x1c] sm:$0xf] }
  0x2c   : > { %3301 = vmatprep.mubr.msk.bf16.mxu1 %vm3769_vm1, %v3768_v1  ;;  %v807_v38 = vsel %vm790_vm6, %v798_v32, %v806_v33  ;;  %v1248_v32 = vor.u32 %v1247_v27, %v1244_v26  ;;  %v3080_v26 = vcombine.low %v1634_v21, %v1635_v22  ;;  %v3698_v27 = vld [vmem:[%s3894_s9 + $0x8] sm:$0xff]  }
  0x32   : > { %3276 = vmatmul.mubr.msk.bf16.gmra.mxu0 %vm333_vm2, %v324_v40  ;;  %v814_v40 = vrot.slane %v812_v35, 2  ;;  %v3062_v35 = vld [vmem:[%s4756_s2 + $0x20] sm:$0xf] }
  0x33   : > { %3302 = vmatmul.mubr.msk.bf16.gmra.mxu1 %vm333_vm2, %v3881_v31  ;;  %3279 = vmatprep.mubr.msk.bf16.mxu0 %vm3769_vm1, %v3768_v1  ;;  %v1293_v31 = vsel %vm349_vm0, %v3055_v25, 0  ;;  %v1412_v37 = vsel %vm349_vm0, %v3062_v35, 0  ;;  %v3110_v35 = vld [vmem:[%s4757_s3 + $0x10] sm:$0xf] }
  0x34   : > { %3329 = vmatprep.mubr.msk.bf16.mxu1 %vm3769_vm1, %v3768_v1  ;;  %v815_v43 = vor.u32 %v814_v40, %v811_v39  ;;  %v1256_v40 = vrot.slane %v1254_v34, 3 }
  0x36   : > { %v816_v47 = vsel %vm790_vm6, %v806_v33, %v815_v43  ;;  %v825_v57 = vsel %vm790_vm6, %v815_v43, %v824_v51  ;;  %v1251_v33 = vshrl.u32 %v4085_v28, 16 }
  0x38   : > { %v1253_v39 = vrot.slane %v1251_v33, 2  ;;  %v1827_v33 = vrot.slane %v3698_v27, 1 }
  0x3a   : > { %3280 = vmatmul.mubr.msk.bf16.gmra.mxu0 %vm333_vm2, %v332_v52  ;;  %v827_v52 = vshrl.u32 %v3968_v5, 16  ;;  %v1257_v43 = vor.u32 %v1256_v40, %v1253_v39  ;;  %v1683_v40 = vshll.u32 %v3698_v27, 16 }
  0x3b   : > { %3330 = vmatmul.mubr.msk.bf16.vlgmr.msra.gmra.mxu1 %vm333_vm2, %v674_v54  ;;  %3307 = vmatprep.mubr.msk.bf16.mxu0 %vm3769_vm1, %v3768_v1  ;;  %v959_v54 = vrot.slane %v3968_v5, 2 }
  0x3c   : > { %3372 = vmatpush3.bf16.msra.mxu1 %v979_v56  ;;  %3333 = vmatprep.mubr.msk.bf16.mxu1 %vm3769_vm1, %v3768_v1  ;;  %v4049_v56 = vld [vmem:[%s3835_s29 + $0xc] sm:$0xf]  ;;  %v829_v58 = vrot.slane %v827_v52, 1 }
  0x3d   : > { %3415 = vmatprep.subr.bf16.mxu1 %v3768_v1  ;;  %v960_v61 = vsel %vm951_vm5, %v957_v46, %v959_v54  ;;  %v962_v10 = vsel %vm951_vm5, %v959_v54, %v961_v2 }
  0x42   : > { %3308 = vmatmul.mubr.msk.bf16.vlgmr.msra.gmra.mxu0 %vm333_vm2, %v521_v62  ;;  %v3044_v62 = vcombine.low %v1064_v55, %v4049_v56 }
  0x43   : > { %3350 = vmatpush3.bf16.msra.mxu0 %v860_v59  ;;  %3334 = vmatmul.mubr.msk.bf16.gmra.mxu1 %vm333_vm2, %v676_v63  ;;  %v832_v59 = vrot.slane %v830_v53, 2  ;;  %v4056_v63 = vld [vmem:[%s3835_s29 + $0x10] sm:$0xff]  }
  0x44   : > { %3311 = vmatprep.mubr.msk.bf16.mxu0 %vm3769_vm1, %v3768_v1  ;;  %3337 = vmatprep.mubr.msk.bf16.mxu1 %vm3769_vm1, %v3768_v1  ;;  %v1225_v5 = vshrl.u32 %v3044_v62, 16  ;;  %v1228_v6 = vshll.u32 %v3044_v62, 16  ;;  %v1233_v7 = vshrl.u32 %v4056_v63, 16 }
  0x45   : > { %3393 = vmatprep.subr.bf16.mxu0 %v3768_v1  ;;  %v833_v0 = vor.u32 %v832_v59, %v829_v58 }
  0x46   : > { %v1227_v13 = vrot.slane %v1225_v5, 2  ;;  %v3091_v5 = vld [vmem:[%s4757_s3 + $0x8] sm:$0xf] }
  0x4a   : > { %3312 = vmatmul.mubr.msk.bf16.gmra.mxu0 %vm333_vm2, %v523_v3  ;;  %v836_v3 = vshrl.u32 %v3683_v60, 16 }
  0x4b   : > { %3338 = vmatmul.mubr.msk.bf16.gmra.mxu1 %vm333_vm2, %v678_v4  ;;  %3315 = vmatprep.mubr.msk.bf16.mxu0 %vm3769_vm1, %v3768_v1  ;;  %v839_v4 = vshll.u32 %v3683_v60, 16 }
  0x4c   : > { %3341 = vmatprep.mubr.msk.bf16.mxu1 %vm3769_vm1, %v3768_v1  ;;  %v838_v11 = vrot.slane %v836_v3, 1 }
  0x4d   : > { %v841_v12 = vrot.slane %v839_v4, 2  ;;  %v1378_v4 = vld [vmem:[%s3835_s29 + $0x8] sm:$0x8] }
  0x4f   : > { %v842_v18 = vor.u32 %v841_v12, %v838_v11  ;;  %v1386_v11 = vrot.slane %v4056_v63, 3 }
  0x52   : > { %3316 = vmatmul.mubr.msk.bf16.gmra.mxu0 %vm333_vm2, %v525_v8  ;;  %v1236_v8 = vshll.u32 %v4056_v63, 16 }
  0x53   : > { %3342 = vmatmul.mubr.msk.bf16.gmra.mxu1 %vm333_vm2, %v680_v9  ;;  %3319 = vmatprep.mubr.msk.bf16.mxu0 %vm3769_vm1, %v3768_v1  ;;  %v834_v9 = vsel %vm790_vm6, %v824_v51, %v833_v0  ;;  %v1110_v51 = vrot.slane %v4085_v28, 2 }
  0x54   : > { %3345 = vmatprep.mubr.msk.bf16.mxu1 %vm3769_vm1, %v3768_v1  ;;  %v1238_v16 = vrot.slane %v1236_v8, 3  ;;  %v3063_v8 = vcombine.low %v1378_v4, %v4049_v56  ;;  %v3079_v56 = vld [vmem:[%s4757_s3 + $0x4] sm:$0xf] }
  0x5a   : > { %3320 = vmatmul.mubr.msk.bf16.gmra.mxu0 %vm333_vm2, %v527_v14  ;;  %v1230_v14 = vrot.slane %v1228_v6, 3 }
  0x5b   : > { %3346 = vmatmul.mubr.msk.bf16.gmra.mxu1 %vm333_vm2, %v682_v15  ;;  %3323 = vmatprep.mubr.msk.bf16.mxu0 %vm3769_vm1, %v3768_v1  ;;  %v1235_v15 = vrot.slane %v1233_v7, 2  ;;  %v3691_v7 = vld [vmem:[%s3894_s9] sm:$0xff]  }
  0x5c   : > { %3373 = vmatprep.mubr.msk.bf16.mxu1 %vm3769_vm1, %v3768_v1  ;;  %v1231_v19 = vor.u32 %v1230_v14, %v1227_v13  ;;  %v3693_v13 = vld [vmem:[%s3894_s9 + $0x8] sm:$0xff]   ;;  %v1735_v14 = vsel %vm349_vm0, %v3079_v56, 0 }
  0x5d   : > { %v1239_v20 = vor.u32 %v1238_v16, %v1235_v15  ;;  %v3694_v16 = vld [vmem:[%s3894_s9 + $0x10] sm:$0xff]  }
  0x5f   : > { %v1240_v25 = vsel %vm1223_vm7, %v1231_v19, %v1239_v20  ;;  %v3695_v19 = vld [vmem:[%s3894_s9 + $0x18] sm:$0xff]  }
  0x62   : > { %3324 = vmatmul.mubr.msk.bf16.gmra.mxu0 %vm333_vm2, %v529_v24  ;;  %v843_v24 = vsel %vm790_vm6, %v833_v0, %v842_v18  ;;  %v3690_v0 = vld [vmem:[%s3835_s29 + $0x30] ss:$0 sps:$4 sm:$0x33]  }
  0x63   : > { %3374 = vmatmul.mubr.msk.bf16.vlgmr.msra.gmra.mxu1 %vm333_vm2, %v954_v30  ;;  %3351 = vmatprep.mubr.msk.bf16.mxu0 %vm3769_vm1, %v3768_v1  ;;  %v1105_v30 = vrot.slane %v3044_v62, 2  ;;  %v1114_v3 = vrot.slane %v3690_v0, 2 }
  0x64   : > { %3416 = vmatpush3.bf16.msra.mxu1 %v1293_v31  ;;  %3377 = vmatprep.mubr.msk.bf16.mxu1 %vm3769_vm1, %v3768_v1  ;;  %v1106_v31 = vrot.slane %v4056_v63, 2  ;;  %v1388_v63 = vrot.slane %v4069_v17, 3 }
  0x65   : > { %3459 = vmatprep.subr.bf16.mxu1 %v3768_v1 }
  0x66   : > { %v1107_v36 = vsel %vm951_vm5, %v1105_v30, %v1106_v31  ;;  %v1389_v15 = vsel %vm1384_vm8, %v1386_v11, %v1388_v63 }
  0x6a   : > { %3352 = vmatmul.mubr.msk.bf16.vlgmr.msra.gmra.mxu0 %vm333_vm2, %v807_v38  ;;  %v1249_v38 = vsel %vm1223_vm7, %v1239_v20, %v1248_v32 }
  0x6b   : > { %3394 = vmatpush3.bf16.msra.mxu0 %v1132_v41  ;;  %3378 = vmatmul.mubr.msk.bf16.gmra.mxu1 %vm333_vm2, %v956_v42  ;;  %v4105_v41 = vld [vmem:[%s3835_s29 + $0x28] sm:$0xff]   ;;  %v1108_v42 = vrot.slane %v4069_v17, 2  ;;  %v1390_v17 = vrot.slane %v4085_v28, 3  ;;  %v3092_v28 = vcombine.low %v1820_v23, %v1635_v22 }
  0x6c   : > { %3355 = vmatprep.mubr.msk.bf16.mxu0 %vm3769_vm1, %v3768_v1  ;;  %3381 = vmatprep.mubr.msk.bf16.mxu1 %vm3769_vm1, %v3768_v1  ;;  %v1260_v44 = vshrl.u32 %v4105_v41, 16  ;;  %v1263_v45 = vshll.u32 %v4105_v41, 16  ;;  %v1112_v60 = vrot.slane %v4105_v41, 2  ;;  %v1392_v20 = vrot.slane %v4105_v41, 3 }
  0x6d   : > { %3437 = vmatprep.subr.bf16.mxu0 %v3768_v1  ;;  %v1109_v46 = vsel %vm951_vm5, %v1106_v31, %v1108_v42  ;;  %v1111_v55 = vsel %vm951_vm5, %v1108_v42, %v1110_v51  ;;  %v1391_v18 = vsel %vm1384_vm8, %v1388_v63, %v1390_v17  ;;  %v1678_v31 = vshll.u32 %v3080_v26, 16  ;;  %v3700_v42 = vld [vmem:[%s3894_s9 + $0x10] sm:$0xff]  }
  0x6e   : > { %v1262_v48 = vrot.slane %v1260_v44, 2  ;;  %v1265_v49 = vrot.slane %v1263_v45, 3  ;;  %v1113_v62 = vsel %vm951_vm5, %v1110_v51, %v1112_v60  ;;  %v1115_v6 = vsel %vm951_vm5, %v1112_v60, %v1114_v3 }
  0x6f   : > { %v1680_v39 = vrot.slane %v1678_v31, 1  ;;  %v2166_v44 = vsel %vm349_vm0, %v3110_v35, 0  ;;  %v1829_v51 = vrot.slane %v3700_v42, 1  ;;  %v1691_v60 = vshll.u32 %v3700_v42, 16 }
  0x70   : > { %v1266_v52 = vor.u32 %v1265_v49, %v1262_v48  ;;  %v1685_v49 = vrot.slane %v1683_v40, 1  ;;  %v1695_v63 = vshrl.u32 %v3700_v42, 16  ;;  %v4274_v40 = vld [vmem:[%s3894_s9 + $0xc] sm:$0xff]  }
  0x71   : > { %v1830_v0 = vsel %vm518_vm4, %v1827_v33, %v1829_v51 }
  0x72   : > { %3356 = vmatmul.mubr.msk.bf16.gmra.mxu0 %vm333_vm2, %v816_v47  ;;  %v1258_v47 = vsel %vm1223_vm7, %v1248_v32, %v1257_v43  ;;  %v1826_v32 = vrot.slane %v3092_v28, 1  ;;  %v1938_v28 = vld [vmem:[%s3894_s9 + $0x4] sm:$0xe] }
  0x73   : > { %3382 = vmatmul.mubr.msk.bf16.gmra.mxu1 %vm333_vm2, %v958_v50  ;;  %3359 = vmatprep.mubr.msk.bf16.mxu0 %vm3769_vm1, %v3768_v1  ;;  %v4120_v50 = vld [vmem:[%s3835_s29 + $0x30] ss:$0 sps:$4 sm:$0x77]  }
  0x74   : > { %3385 = vmatprep.mubr.msk.bf16.mxu1 %vm3769_vm1, %v3768_v1  ;;  %v1269_v53 = vshrl.u32 %v4120_v50, 16  ;;  %v1272_v54 = vshll.u32 %v4120_v50, 16  ;;  %v1394_v30 = vrot.slane %v4120_v50, 3  ;;  %v1828_v41 = vsel %vm518_vm4, %v1826_v32, %v1827_v33 }
  0x76   : > { %v1271_v58 = vrot.slane %v1269_v53, 2  ;;  %v1274_v59 = vrot.slane %v1272_v54, 3  ;;  %v3098_v53 = vld [vmem:[%s4757_s3 + $0xc] sm:$0xf] }
  0x7a   : > { %3360 = vmatmul.mubr.msk.bf16.gmra.mxu0 %vm333_vm2, %v825_v57  ;;  %v1267_v57 = vsel %vm1223_vm7, %v1257_v43, %v1266_v52 }
  0x7b   : > { %3386 = vmatmul.mubr.msk.bf16.gmra.mxu1 %vm333_vm2, %v960_v61  ;;  %3363 = vmatprep.mubr.msk.bf16.mxu0 %vm3769_vm1, %v3768_v1  ;;  %v1275_v61 = vor.u32 %v1274_v59, %v1271_v58  ;;  %v1687_v59 = vshrl.u32 %v3698_v27, 16 }
  0x7c   : > { %3389 = vmatprep.mubr.msk.bf16.mxu1 %vm3769_vm1, %v3768_v1 }
  0x7d   : > { %v1276_v2 = vsel %vm1223_vm7, %v1266_v52, %v1275_v61 }
  0x82   : > { %3364 = vmatmul.mubr.msk.bf16.gmra.mxu0 %vm333_vm2, %v834_v9  ;;  %v1853_v9 = vsel %vm349_vm0, %v3091_v5, 0 }
  0x83   : > { %3390 = vmatmul.mubr.msk.bf16.gmra.mxu1 %vm333_vm2, %v962_v10  ;;  %3367 = vmatprep.mubr.msk.bf16.mxu0 %vm3769_vm1, %v3768_v1  ;;  %v1385_v10 = vrot.slane %v3063_v8, 3  ;;  %v1693_v8 = vrot.slane %v1691_v60, 1 }
  0x84   : > { %3417 = vmatprep.mubr.msk.bf16.mxu1 %vm3769_vm1, %v3768_v1 }
  0x85   : > { %v1387_v12 = vsel %vm1384_vm8, %v1385_v10, %v1386_v11  ;;  %v1697_v23 = vor.u32 %v1695_v63, %v1693_v8 }
  0x8a   : > { %3368 = vmatmul.mubr.msk.bf16.gmra.mxu0 %vm333_vm2, %v843_v24  ;;  %v1393_v24 = vsel %vm1384_vm8, %v1390_v17, %v1392_v20 }
  0x8b   : > { %3418 = vmatmul.mubr.msk.bf16.vlgmr.msra.gmra.mxu1 %vm333_vm2, %v1240_v25  ;;  %3395 = vmatprep.mubr.msk.bf16.mxu0 %vm3769_vm1, %v3768_v1  ;;  %v3696_v25 = vld [vmem:[%s3894_s9 + $0x20] sm:$0xff]  }
  0x8c   : > { %3460 = vmatpush3.bf16.msra.mxu1 %v1549_v29  ;;  %3421 = vmatprep.mubr.msk.bf16.mxu1 %vm3769_vm1, %v3768_v1 }
  0x8d   : > { %3503 = vmatprep.subr.bf16.mxu1 %v3768_v1 }
  0x92   : > { %3396 = vmatmul.mubr.msk.bf16.vlgmr.msra.gmra.mxu0 %vm333_vm2, %v1107_v36 }
  0x93   : > { %3438 = vmatpush3.bf16.msra.mxu0 %v1412_v37  ;;  %3422 = vmatmul.mubr.msk.bf16.gmra.mxu1 %vm333_vm2, %v1249_v38  ;;  %v1395_v37 = vsel %vm1384_vm8, %v1392_v20, %v1394_v30  ;;  %v1676_v38 = vshrl.u32 %v3080_v26, 16 }
  0x94   : > { %3399 = vmatprep.mubr.msk.bf16.mxu0 %vm3769_vm1, %v3768_v1  ;;  %3425 = vmatprep.mubr.msk.bf16.mxu1 %vm3769_vm1, %v3768_v1 }
  0x95   : > { %3481 = vmatprep.subr.bf16.mxu0 %v3768_v1  ;;  %v1681_v48 = vor.u32 %v1680_v39, %v1676_v38 }
  0x97   : > { %v1686_v58 = vsel %vm288_vm3, %v1681_v48, %v1685_v49 }
  0x9a   : > { %3400 = vmatmul.mubr.msk.bf16.gmra.mxu0 %vm333_vm2, %v1109_v46 }
  0x9b   : > { %3426 = vmatmul.mubr.msk.bf16.gmra.mxu1 %vm333_vm2, %v1258_v47  ;;  %3403 = vmatprep.mubr.msk.bf16.mxu0 %vm3769_vm1, %v3768_v1 }
  0x9c   : > { %3429 = vmatprep.mubr.msk.bf16.mxu1 %vm3769_vm1, %v3768_v1 }
  0xa2   : > { %3404 = vmatmul.mubr.msk.bf16.gmra.mxu0 %vm333_vm2, %v1111_v55 }
  0xa3   : > { %3430 = vmatmul.mubr.msk.bf16.gmra.mxu1 %vm333_vm2, %v1267_v57  ;;  %3407 = vmatprep.mubr.msk.bf16.mxu0 %vm3769_vm1, %v3768_v1 }
  0xa4   : > { %3433 = vmatprep.mubr.msk.bf16.mxu1 %vm3769_vm1, %v3768_v1 }
  0xaa   : > { %3408 = vmatmul.mubr.msk.bf16.gmra.mxu0 %vm333_vm2, %v1113_v62  ;;  %v2006_v62 = vsel %vm349_vm0, %v3098_v53, 0  ;;  %v2109_v53 = vshll.u32 %v4274_v40, 16 }
  0xab   : > { %3434 = vmatmul.mubr.msk.bf16.gmra.mxu1 %vm333_vm2, %v1276_v2  ;;  %3411 = vmatprep.mubr.msk.bf16.mxu0 %vm3769_vm1, %v3768_v1  ;;  %v3701_v2 = vld [vmem:[%s3894_s9 + $0x18] sm:$0xff]  }
  0xac   : > { %3461 = vmatprep.mubr.msk.bf16.mxu1 %vm3769_vm1, %v3768_v1  ;;  %v1831_v10 = vrot.slane %v3701_v2, 1  ;;  %v1703_v31 = vshrl.u32 %v3701_v2, 16 }
  0xae   : > { %v1832_v17 = vsel %vm518_vm4, %v1829_v51, %v1831_v10 }
  0xb2   : > { %3412 = vmatmul.mubr.msk.bf16.gmra.mxu0 %vm333_vm2, %v1115_v6 }
  0xb3   : > { %3462 = vmatmul.mubr.msk.bf16.vlgmr.msra.gmra.mxu1 %vm333_vm2, %v3691_v7  ;;  %3439 = vmatprep.mubr.msk.bf16.mxu0 %vm3769_vm1, %v3768_v1  ;;  %v1689_v7 = vor.u32 %v1687_v59, %v1685_v49 }
  0xb4   : > { %3504 = vmatpush3.bf16.msra.mxu1 %v1853_v9  ;;  %3465 = vmatprep.mubr.msk.bf16.mxu1 %vm3769_vm1, %v3768_v1 }
  0xb5   : > { %3547 = vmatprep.subr.bf16.mxu1 %v3768_v1 }
  0xba   : > { %3440 = vmatmul.mubr.msk.bf16.vlgmr.msra.gmra.mxu0 %vm333_vm2, %v1387_v12 }
  0xbb   : > { %3482 = vmatpush3.bf16.msra.mxu0 %v1735_v14  ;;  %3466 = vmatmul.mubr.msk.bf16.gmra.mxu1 %vm333_vm2, %v3693_v13  ;;  %v1694_v14 = vsel %vm288_vm3, %v1689_v7, %v1693_v8  ;;  %v2111_v7 = vrot.slane %v2109_v53, 2  ;;  %v4294_v8 = vld [vmem:[%s3894_s9 + $0x14] sm:$0xff]  }
  0xbc   : > { %3443 = vmatprep.mubr.msk.bf16.mxu0 %vm3769_vm1, %v3768_v1  ;;  %3469 = vmatprep.mubr.msk.bf16.mxu1 %vm3769_vm1, %v3768_v1 }
  0xbd   : > { %3525 = vmatprep.subr.bf16.mxu0 %v3768_v1 }
  0xc2   : > { %3444 = vmatmul.mubr.msk.bf16.gmra.mxu0 %vm333_vm2, %v1389_v15  ;;  %v1699_v15 = vshll.u32 %v3701_v2, 16 }
  0xc3   : > { %3470 = vmatmul.mubr.msk.bf16.gmra.mxu1 %vm333_vm2, %v3694_v16  ;;  %3447 = vmatprep.mubr.msk.bf16.mxu0 %vm3769_vm1, %v3768_v1 }
  0xc4   : > { %3473 = vmatprep.mubr.msk.bf16.mxu1 %vm3769_vm1, %v3768_v1 }
  0xca   : > { %3448 = vmatmul.mubr.msk.bf16.gmra.mxu0 %vm333_vm2, %v1391_v18  ;;  %v4249_v18 = vld [vmem:[%s3894_s9 + $0x20] sm:$0xff]  }
  0xcb   : > { %3474 = vmatmul.mubr.msk.bf16.gmra.mxu1 %vm333_vm2, %v3695_v19  ;;  %3451 = vmatprep.mubr.msk.bf16.mxu0 %vm3769_vm1, %v3768_v1  ;;  %v1833_v26 = vrot.slane %v4249_v18, 1  ;;  %v1707_v32 = vshll.u32 %v4249_v18, 16 }
  0xcc   : > { %3477 = vmatprep.mubr.msk.bf16.mxu1 %vm3769_vm1, %v3768_v1 }
  0xcd   : > { %v1834_v38 = vsel %vm518_vm4, %v1831_v10, %v1833_v26 }
  0xd2   : > { %3452 = vmatmul.mubr.msk.bf16.gmra.mxu0 %vm333_vm2, %v1393_v24  ;;  %v1701_v24 = vrot.slane %v1699_v15, 1 }
  0xd3   : > { %v473_v29 = vpop.f32.mrf.mxu1  ;;  %3478 = vmatmul.mubr.msk.bf16.gmra.mxu1 %vm333_vm2, %v3696_v25  ;;  %3455 = vmatprep.mubr.msk.bf16.mxu0 %vm3769_vm1, %v3768_v1 }
  0xd4   : > { %3505 = vmatprep.mubr.msk.bf16.mxu1 %vm3769_vm1, %v3768_v1  ;;  %v1702_v35 = vsel %vm288_vm3, %v1697_v23, %v1701_v24 }
  0xd5   : > { %v3287_v34 = vpop.f32.mrf.mxu1 }
  0xd7   : > { %v476_v36 = vpop.f32.mrf.mxu1 }
  0xd9   : > { %v3288_v43 = vpop.f32.mrf.mxu1 }
  0xda   : > { %v387_v45 = vpop.f32.mrf.mxu0  ;;  %3456 = vmatmul.mubr.msk.bf16.gmra.mxu0 %vm333_vm2, %v1395_v37  ;;  %v1705_v43 = vor.u32 %v1703_v31, %v1701_v24  ;;  %v4314_v31 = vld [vmem:[%s3894_s9 + $0x1c] sm:$0xff]  }
  0xdb   : > { %v4218_v46 = vadd.f32 %v473_v29, %v387_v45  ;;  %v481_v47 = vpop.f32.mrf.mxu1  ;;  %3506 = vmatmul.mubr.msk.bf16.vlgmr.msra.gmra.mxu1 %vm333_vm2, %v1828_v41  ;;  %3483 = vmatprep.mubr.msk.bf16.mxu0 %vm3769_vm1, %v3768_v1  ;;  %v4262_v29 = vld [vmem:[%s3894_s9 + $0x8] sm:$0xf] }
  0xdc   : > { %v3265_v50 = vpop.f32.mrf.mxu0  ;;  %3548 = vmatpush3.bf16.msra.mxu1 %v2166_v44  ;;  %3509 = vmatprep.mubr.msk.bf16.mxu1 %vm3769_vm1, %v3768_v1  ;;  %v4271_v39 = vcombine.low %v1938_v28, %v4262_v29  ;;  %v1709_v44 = vrot.slane %v1707_v32, 1 }
  0xdd   : > { %v3291_v52 = vpop.f32.mrf.mxu1  ;;  %3591 = vmatprep.subr.bf16.mxu1 %v3768_v1 }
  0xde   : > { %v390_v54 = vpop.f32.mrf.mxu0  ;;  %v2098_v50 = vshrl.u32 %v4271_v39, 16  ;;  %v2101_v51 = vshll.u32 %v4271_v39, 16  ;;  %v2106_v52 = vshrl.u32 %v4274_v40, 16 }
  0xdf   : > { %v4229_v55 = vadd.f32 %v476_v36, %v390_v54  ;;  %v484_v57 = vpop.f32.mrf.mxu1  ;;  %v3703_v36 = vld [vmem:[%s3894_s9 + $0x28] ss:$0 sps:$4 sm:$0x11]  }
  0xe0   : > { %v3266_v61 = vpop.f32.mrf.mxu0  ;;  %v1835_v48 = vrot.slane %v3703_v36, 1 }
  0xe1   : > { %v3292_v3 = vpop.f32.mrf.mxu1 }
  0xe2   : > { %v395_v4 = vpop.f32.mrf.mxu0  ;;  %3484 = vmatmul.mubr.msk.bf16.vlgmr.msra.gmra.mxu0 %vm333_vm2, %v1686_v58  ;;  %v1710_v58 = vsel %vm288_vm3, %v1705_v43, %v1709_v44  ;;  %v1836_v61 = vsel %vm518_vm4, %v1833_v26, %v1835_v48  ;;  %v2100_v3 = vrot.slane %v2098_v50, 1  ;;  %v3117_v48 = vld [vmem:[%s4757_s3 + $0x14] sm:$0xf] }
  0xe3   : > { %v4236_v5 = vadd.f32 %v481_v47, %v395_v4  ;;  %3526 = vmatpush3.bf16.msra.mxu0 %v2006_v62  ;;  %v489_v6 = vpop.f32.mrf.mxu1  ;;  %3510 = vmatmul.mubr.msk.bf16.gmra.mxu1 %vm333_vm2, %v1830_v0  ;;  %v1711_v62 = vshrl.u32 %v4249_v18, 16  ;;  %v1715_v0 = vshll.u32 %v3703_v36, 16  ;;  %v2103_v4 = vrot.slane %v2101_v51, 2 }
  0xe4   : > { %v3269_v9 = vpop.f32.mrf.mxu0  ;;  %3487 = vmatprep.mubr.msk.bf16.mxu0 %vm3769_vm1, %v3768_v1  ;;  %3513 = vmatprep.mubr.msk.bf16.mxu1 %vm3769_vm1, %v3768_v1  ;;  %v2118_v18 = vshll.u32 %v4294_v8, 16 }
  0xe5   : > { %v3295_v11 = vpop.f32.mrf.mxu1  ;;  %3569 = vmatprep.subr.bf16.mxu0 %v3768_v1  ;;  %v2104_v15 = vor.u32 %v2103_v4, %v2100_v3  ;;  %v1982_v4 = vrot.slane %v4294_v8, 1 }
  0xe6   : > { %v398_v56 = vpop.f32.mrf.mxu0 }
  0xe7   : > { %v4244_v12 = vadd.f32 %v484_v57, %v398_v56  ;;  %v492_v13 = vpop.f32.mrf.mxu1 }
  0xe8   : > { %v3270_v16 = vpop.f32.mrf.mxu0 }
  0xe9   : > { %v3296_v19 = vpop.f32.mrf.mxu1 }
  0xea   : > { %v403_v20 = vpop.f32.mrf.mxu0  ;;  %3488 = vmatmul.mubr.msk.bf16.gmra.mxu0 %vm333_vm2, %v1694_v14  ;;  %v1717_v14 = vrot.slane %v1715_v0, 1 }
  0xeb   : > { %v4252_v21 = vadd.f32 %v489_v6, %v403_v20  ;;  %v497_v22 = vpop.f32.mrf.mxu1  ;;  %3514 = vmatmul.mubr.msk.bf16.gmra.mxu1 %vm333_vm2, %v1832_v17  ;;  %3491 = vmatprep.mubr.msk.bf16.mxu0 %vm3769_vm1, %v3768_v1  ;;  %v2108_v6 = vrot.slane %v2106_v52, 1  ;;  %v2115_v17 = vshrl.u32 %v4294_v8, 16 }
  0xec   : > { %v3273_v25 = vpop.f32.mrf.mxu0  ;;  %3517 = vmatprep.mubr.msk.bf16.mxu1 %vm3769_vm1, %v3768_v1 }
  0xed   : > { %v3299_v27 = vpop.f32.mrf.mxu1  ;;  %v2112_v16 = vor.u32 %v2111_v7, %v2108_v6  ;;  %v2117_v28 = vrot.slane %v2115_v17, 1 }
  0xee   : > { %v406_v30 = vpop.f32.mrf.mxu0 }
  0xef   : > { %v4265_v33 = vadd.f32 %v492_v13, %v406_v30  ;;  %v500_v34 = vpop.f32.mrf.mxu1  ;;  %v1713_v13 = vor.u32 %v1711_v62, %v1709_v44  ;;  %v2113_v27 = vsel %vm790_vm6, %v2104_v15, %v2112_v16  ;;  %v2120_v30 = vrot.slane %v2118_v18, 2 }
  0xf0   : > { %v3274_v37 = vpop.f32.mrf.mxu0  ;;  %v2124_v44 = vshrl.u32 %v4314_v31, 16 }
  0xf1   : > { %v3300_v41 = vpop.f32.mrf.mxu1  ;;  %v1718_v25 = vsel %vm288_vm3, %v1713_v13, %v1717_v14  ;;  %v2121_v43 = vor.u32 %v2120_v30, %v2117_v28 }
  0xf2   : > { %v411_v42 = vpop.f32.mrf.mxu0  ;;  %3492 = vmatmul.mubr.msk.bf16.gmra.mxu0 %vm333_vm2, %v1702_v35  ;;  %v1980_v41 = vrot.slane %v4274_v40, 1 }
  0xf3   : > { %v4277_v45 = vadd.f32 %v497_v22, %v411_v42  ;;  %v505_v47 = vpop.f32.mrf.mxu1  ;;  %3518 = vmatmul.mubr.msk.bf16.gmra.mxu1 %vm333_vm2, %v1834_v38  ;;  %3495 = vmatprep.mubr.msk.bf16.mxu0 %vm3769_vm1, %v3768_v1  ;;  %v3124_v22 = vld [vmem:[%s4757_s3 + $0x18] sm:$0xf]  ;;  %v1979_v38 = vrot.slane %v4271_v39, 1 }
  0xf4   : > { %v3277_v49 = vpop.f32.mrf.mxu0  ;;  %3521 = vmatprep.mubr.msk.bf16.mxu1 %vm3769_vm1, %v3768_v1  ;;  %v1983_v15 = vsel %vm518_vm4, %v1980_v41, %v1982_v4 }
  0xf5   : > { %v3303_v54 = vpop.f32.mrf.mxu1  ;;  %v1981_v52 = vsel %vm518_vm4, %v1979_v38, %v1980_v41 }
  0xf6   : > { %v414_v57 = vpop.f32.mrf.mxu0  ;;  %v2284_v54 = vsel %vm349_vm0, %v3117_v48, 0 }
  0xf7   : > { %v4289_v59 = vadd.f32 %v500_v34, %v414_v57  ;;  %v508_v60 = vpop.f32.mrf.mxu1  ;;  %v2437_v34 = vsel %vm349_vm0, %v3124_v22, 0  ;;  %v2122_v57 = vsel %vm790_vm6, %v2112_v16, %v2121_v43 }
  0xf8   : > { %v3278_v2 = vpop.f32.mrf.mxu0 }
  0xf9   : > { %v3304_v9 = vpop.f32.mrf.mxu1 }
  0xfa   : > { %v419_v10 = vpop.f32.mrf.mxu0  ;;  %3496 = vmatmul.mubr.msk.bf16.gmra.mxu0 %vm333_vm2, %v1710_v58  ;;  %v2126_v58 = vrot.slane %v2124_v44, 1 }
  0xfb   : > { %v4297_v11 = vadd.f32 %v505_v47, %v419_v10  ;;  %v735_v56 = vpop.f32.mrf.mxu1  ;;  %3522 = vmatmul.mubr.msk.bf16.gmra.mxu1 %vm333_vm2, %v1836_v61  ;;  %3499 = vmatprep.mubr.msk.bf16.mxu0 %vm3769_vm1, %v3768_v1  ;;  %v4339_v61 = vld [vmem:[%s3894_s9 + $0x24] sm:$0xff]  }
  0xfc   : > { %v3281_v63 = vpop.f32.mrf.mxu0  ;;  %3549 = vmatprep.mubr.msk.bf16.mxu1 %vm3769_vm1, %v3768_v1  ;;  %v2133_v9 = vshrl.u32 %v4339_v61, 16  ;;  %v2136_v10 = vshll.u32 %v4339_v61, 16 }
  0xfd   : > { %v3331_v19 = vpop.f32.mrf.mxu1 }
  0xfe   : > { %v422_v20 = vpop.f32.mrf.mxu0  ;;  %v2135_v18 = vrot.slane %v2133_v9, 1  ;;  %v2138_v19 = vrot.slane %v2136_v10, 2  ;;  %v4403_v9 = vld [vmem:[%s3894_s9 + $0x10] sm:$0xff]  }
  0xff   : > { %v4309_v23 = vadd.f32 %v508_v60, %v422_v20  ;;  %v738_v24 = vpop.f32.mrf.mxu1  ;;  %v4360_v20 = vld [vmem:[%s3894_s9 + $0x2c] ss:$0 sps:$4 sm:$0x33]  }
 0x100   : > { %v3282_v26 = vpop.f32.mrf.mxu0  ;;  %v2139_v30 = vor.u32 %v2138_v19, %v2135_v18  ;;  %v2251_v18 = vld [vmem:[%s3894_s9 + $0x4] sm:$0xc] }
 0x101   : > { %v3332_v32 = vpop.f32.mrf.mxu1 }
 0x102   : > { %v582_v35 = vpop.f32.mrf.mxu0  ;;  %3500 = vmatmul.mubr.msk.bf16.gmra.mxu0 %vm333_vm2, %v1718_v25  ;;  %v2142_v32 = vshrl.u32 %v4360_v20, 16 }
 0x103   : > { %v621_v36 = vadd.f32 %v582_v35, %v4218_v46  ;;  %v743_v37 = vpop.f32.mrf.mxu1  ;;  %3550 = vmatmul.mubr.msk.bf16.vlgmr.msra.gmra.mxu1 %vm333_vm2, %v2113_v27  ;;  %3527 = vmatprep.mubr.msk.bf16.mxu0 %vm3769_vm1, %v3768_v1  ;;  %v2127_v46 = vshll.u32 %v4314_v31, 16 }
 0x104   : > { %v3309_v42 = vpop.f32.mrf.mxu0  ;;  %3592 = vmatpush3.bf16.msra.mxu1 %v2437_v34  ;;  %3553 = vmatprep.mubr.msk.bf16.mxu1 %vm3769_vm1, %v3768_v1  ;;  %v2145_v34 = vshll.u32 %v4360_v20, 16  ;;  %v2144_v44 = vrot.slane %v2142_v32, 1 }
 0x105   : > { %v3335_v47 = vpop.f32.mrf.mxu1  ;;  %v4331_v49 = vadd.f32 %v735_v56, %v621_v36  ;;  %3635 = vmatprep.subr.bf16.mxu1 %v3768_v1  ;;  %v2129_v60 = vrot.slane %v2127_v46, 2 }
 0x106   : > { %v585_v39 = vpop.f32.mrf.mxu0  ;;  %v2147_v46 = vrot.slane %v2145_v34, 2  ;;  %v4427_v34 = vld [vmem:[%s3894_s9 + $0x18] sm:$0xff]  }
 0x107   : > { %v622_v50 = vadd.f32 %v585_v39, %v4229_v55  ;;  %v746_v51 = vpop.f32.mrf.mxu1  ;;  %v2130_v7 = vor.u32 %v2129_v60, %v2126_v58  ;;  %v4391_v58 = vld [vmem:[%s3894_s9 + $0xc] sm:$0xf] }
 0x108   : > { %v3310_v53 = vpop.f32.mrf.mxu0 }
 0x109   : > { %v3336_v62 = vpop.f32.mrf.mxu1  ;;  %v4341_v0 = vadd.f32 %v738_v24, %v622_v50  ;;  %v2131_v17 = vsel %vm790_vm6, %v2121_v43, %v2130_v7  ;;  %v2140_v43 = vsel %vm790_vm6, %v2130_v7, %v2139_v30  ;;  %v2148_v53 = vor.u32 %v2147_v46, %v2144_v44 }
 0x10a   : > { %v590_v2 = vpop.f32.mrf.mxu0  ;;  %3528 = vmatmul.mubr.msk.bf16.vlgmr.msra.gmra.mxu0 %vm333_vm2, %v1981_v52  ;;  %v2413_v44 = vrot.slane %v4427_v34, 2 }
 0x10b   : > { %v623_v55 = vadd.f32 %v590_v2, %v4236_v5  ;;  %3570 = vmatpush3.bf16.msra.mxu0 %v2284_v54  ;;  %v751_v3 = vpop.f32.mrf.mxu1  ;;  %3554 = vmatmul.mubr.msk.bf16.gmra.mxu1 %vm333_vm2, %v2122_v57  ;;  %v2369_v57 = vld [vmem:[%s3894_s9 + $0x8] sm:$0xc] }
 0x10c   : > { %v3313_v6 = vpop.f32.mrf.mxu0  ;;  %3531 = vmatprep.mubr.msk.bf16.mxu0 %vm3769_vm1, %v3768_v1  ;;  %3557 = vmatprep.mubr.msk.bf16.mxu1 %vm3769_vm1, %v3768_v1  ;;  %v4400_v7 = vcombine.low %v2369_v57, %v4391_v58 }
 0x10d   : > { %v3339_v5 = vpop.f32.mrf.mxu1  ;;  %3613 = vmatprep.subr.bf16.mxu0 %v3768_v1  ;;  %v4354_v56 = vadd.f32 %v743_v37, %v623_v55  ;;  %v2149_v6 = vsel %vm790_vm6, %v2139_v30, %v2148_v53 }
 0x10e   : > { %v593_v13 = vpop.f32.mrf.mxu0 }
 0x10f   : > { %v624_v14 = vadd.f32 %v593_v13, %v4244_v12  ;;  %v754_v63 = vpop.f32.mrf.mxu1  ;;  %v1984_v12 = vrot.slane %v4314_v31, 1 }
 0x110   : > { %v3314_v16 = vpop.f32.mrf.mxu0 }
 0x111   : > { %v3340_v22 = vpop.f32.mrf.mxu1  ;;  %v4362_v24 = vadd.f32 %v746_v51, %v624_v14  ;;  %v1985_v41 = vsel %vm518_vm4, %v1982_v4, %v1984_v12  ;;  %v1986_v51 = vrot.slane %v4339_v61, 1  ;;  %v2410_v16 = vrot.slane %v4400_v7, 2 }
 0x112   : > { %v598_v25 = vpop.f32.mrf.mxu0  ;;  %3532 = vmatmul.mubr.msk.bf16.gmra.mxu0 %vm333_vm2, %v1983_v15 }
 0x113   : > { %v625_v26 = vadd.f32 %v598_v25, %v4252_v21  ;;  %v759_v27 = vpop.f32.mrf.mxu1  ;;  %3558 = vmatmul.mubr.msk.bf16.gmra.mxu1 %vm333_vm2, %v2131_v17  ;;  %3535 = vmatprep.mubr.msk.bf16.mxu0 %vm3769_vm1, %v3768_v1  ;;  %v1987_v55 = vsel %vm518_vm4, %v1984_v12, %v1986_v51  ;;  %v2411_v17 = vrot.slane %v4403_v9, 2  ;;  %v3143_v25 = vld [vmem:[%s4757_s3 + $0x20] sm:$0xf] }
 0x114   : > { %v3317_v28 = vpop.f32.mrf.mxu0  ;;  %3561 = vmatprep.mubr.msk.bf16.mxu1 %vm3769_vm1, %v3768_v1 }
 0x115   : > { %v3343_v35 = vpop.f32.mrf.mxu1  ;;  %v4374_v36 = vadd.f32 %v751_v3, %v625_v26  ;;  %v3710_v3 = vld [vmem:[%s3894_s9 + $0x2c] ss:$0 sps:$4 sm:$0x11]   ;;  %v3118_v28 = vcombine.low %v2251_v18, %v4262_v29  ;;  %v2412_v32 = vsel %vm951_vm5, %v2410_v16, %v2411_v17  ;;  %v2414_v53 = vsel %vm951_vm5, %v2411_v17, %v2413_v44 }
 0x116   : > { %v601_v21 = vpop.f32.mrf.mxu0 }
 0x117   : > { %v626_v37 = vadd.f32 %v601_v21, %v4265_v33  ;;  %v762_v38 = vpop.f32.mrf.mxu1  ;;  %v2715_v21 = vsel %vm349_vm0, %v3143_v25, 0  ;;  %v2257_v29 = vrot.slane %v3118_v28, 2 }
 0x118   : > { %v3318_v42 = vpop.f32.mrf.mxu0 }
 0x119   : > { %v3344_v47 = vpop.f32.mrf.mxu1  ;;  %v4379_v48 = vadd.f32 %v754_v63, %v626_v37  ;;  %v1988_v63 = vrot.slane %v3710_v3, 1  ;;  %v2258_v42 = vrot.slane %v4274_v40, 2 }
 0x11a   : > { %v606_v39 = vpop.f32.mrf.mxu0  ;;  %3536 = vmatmul.mubr.msk.bf16.gmra.mxu0 %vm333_vm2, %v1985_v41 }
 0x11b   : > { %v627_v50 = vadd.f32 %v606_v39, %v4277_v45  ;;  %v767_v33 = vpop.f32.mrf.mxu1  ;;  %3562 = vmatmul.mubr.msk.bf16.gmra.mxu1 %vm333_vm2, %v2140_v43  ;;  %3539 = vmatprep.mubr.msk.bf16.mxu0 %vm3769_vm1, %v3768_v1  ;;  %v1989_v12 = vsel %vm518_vm4, %v1986_v51, %v1988_v63  ;;  %v2259_v40 = vsel %vm951_vm5, %v2257_v29, %v2258_v42 }
 0x11c   : > { %v3321_v52 = vpop.f32.mrf.mxu0  ;;  %3565 = vmatprep.mubr.msk.bf16.mxu1 %vm3769_vm1, %v3768_v1 }
 0x11d   : > { %v3347_v54 = vpop.f32.mrf.mxu1  ;;  %v4393_v45 = vadd.f32 %v759_v27, %v627_v50 }
 0x11e   : > { %v609_v60 = vpop.f32.mrf.mxu0  ;;  %v4451_v54 = vld [vmem:[%s3894_s9 + $0x20] sm:$0xff]  }
 0x11f   : > { %v628_v62 = vadd.f32 %v609_v60, %v4289_v59  ;;  %v770_v2 = vpop.f32.mrf.mxu1 }
 0x120   : > { %v3322_v4 = vpop.f32.mrf.mxu0 }
 0x121   : > { %v3348_v10 = vpop.f32.mrf.mxu1  ;;  %v4405_v5 = vadd.f32 %v762_v38, %v628_v62  ;;  %v2415_v4 = vrot.slane %v4451_v54, 2 }
 0x122   : > { %v614_v13 = vpop.f32.mrf.mxu0  ;;  %3540 = vmatmul.mubr.msk.bf16.gmra.mxu0 %vm333_vm2, %v1987_v55  ;;  %v2260_v55 = vrot.slane %v4294_v8, 2 }
 0x123   : > { %v629_v59 = vadd.f32 %v614_v13, %v4297_v11  ;;  %v1015_v14 = vpop.f32.mrf.mxu1  ;;  %3566 = vmatmul.mubr.msk.bf16.gmra.mxu1 %vm333_vm2, %v2149_v6  ;;  %3543 = vmatprep.mubr.msk.bf16.mxu0 %vm3769_vm1, %v3768_v1  ;;  %v2416_v8 = vsel %vm951_vm5, %v2413_v44, %v2415_v4 }
 0x124   : > { %v3325_v15 = vpop.f32.mrf.mxu0  ;;  %3593 = vmatprep.mubr.msk.bf16.mxu1 %vm3769_vm1, %v3768_v1 }
 0x125   : > { %v3375_v19 = vpop.f32.mrf.mxu1  ;;  %v4417_v22 = vadd.f32 %v767_v33, %v629_v59  ;;  %v4470_v15 = vld [vmem:[%s3894_s9 + $0x28] sm:$0xff]  }
 0x126   : > { %v617_v11 = vpop.f32.mrf.mxu0 }
 0x127   : > { %v630_v26 = vadd.f32 %v617_v11, %v4309_v23  ;;  %v1018_v27 = vpop.f32.mrf.mxu1 }
 0x128   : > { %v3326_v30 = vpop.f32.mrf.mxu0 }
 0x129   : > { %v3376_v35 = vpop.f32.mrf.mxu1  ;;  %v4430_v37 = vadd.f32 %v770_v2, %v630_v26  ;;  %v2417_v26 = vrot.slane %v4470_v15, 2 }
 0x12a   : > { %v896_v38 = vpop.f32.mrf.mxu0  ;;  %3544 = vmatmul.mubr.msk.bf16.gmra.mxu0 %vm333_vm2, %v1989_v12 }
 0x12b   : > { %v935_v23 = vadd.f32 %v896_v38, %v4331_v49  ;;  %v1023_v41 = vpop.f32.mrf.mxu1  ;;  %3594 = vmatmul.mubr.msk.bf16.vlgmr.msra.gmra.mxu1 %vm333_vm2, %v2412_v32  ;;  %3571 = vmatprep.mubr.msk.bf16.mxu0 %vm3769_vm1, %v3768_v1  ;;  %v3136_v49 = vld [vmem:[%s4757_s3 + $0x1c] sm:$0xf] }
 0x12c   : > { %v3353_v43 = vpop.f32.mrf.mxu0  ;;  %3636 = vmatpush3.bf16.msra.mxu1 %v2715_v21  ;;  %3597 = vmatprep.mubr.msk.bf16.mxu1 %vm3769_vm1, %v3768_v1  ;;  %v2597_v52 = vsel %vm349_vm0, %v3136_v49, 0  ;;  %v2418_v21 = vsel %vm951_vm5, %v2415_v4, %v2417_v26  ;;  %v2682_v49 = vld [vmem:[%s3894_s9 + $0x8] sm:$0x8]  ;;  %v2540_v4 = vshll.u32 %v4403_v9, 16 }
 0x12d   : > { %v3379_v46 = vpop.f32.mrf.mxu1  ;;  %v4444_v47 = vadd.f32 %v1015_v14, %v935_v23  ;;  %v2261_v14 = vsel %vm951_vm5, %v2258_v42, %v2260_v55 }
 0x12e   : > { %v899_v39 = vpop.f32.mrf.mxu0 }
 0x12f   : > { %v936_v50 = vadd.f32 %v899_v39, %v4341_v0  ;;  %v1026_v33 = vpop.f32.mrf.mxu1 }
 0x130   : > { %v3354_v51 = vpop.f32.mrf.mxu0 }
 0x131   : > { %v3380_v57 = vpop.f32.mrf.mxu1  ;;  %v4453_v60 = vadd.f32 %v1018_v27, %v936_v50 }
 0x132   : > { %v904_v62 = vpop.f32.mrf.mxu0  ;;  %3572 = vmatmul.mubr.msk.bf16.vlgmr.msra.gmra.mxu0 %vm333_vm2, %v2259_v40 }
 0x133   : > { %v937_v2 = vadd.f32 %v904_v62, %v4354_v56  ;;  %3614 = vmatpush3.bf16.msra.mxu0 %v2597_v52  ;;  %v1031_v0 = vpop.f32.mrf.mxu1  ;;  %3598 = vmatmul.mubr.msk.bf16.gmra.mxu1 %vm333_vm2, %v2414_v53 }
 0x134   : > { %v3357_v3 = vpop.f32.mrf.mxu0  ;;  %3575 = vmatprep.mubr.msk.bf16.mxu0 %vm3769_vm1, %v3768_v1  ;;  %3601 = vmatprep.mubr.msk.bf16.mxu1 %vm3769_vm1, %v3768_v1 }
 0x135   : > { %v3383_v6 = vpop.f32.mrf.mxu1  ;;  %v4464_v10 = vadd.f32 %v1023_v41, %v937_v2  ;;  %v2529_v2 = vshrl.u32 %v4400_v7, 16  ;;  %v2537_v3 = vshrl.u32 %v4403_v9, 16 }
 0x136   : > { %v907_v56 = vpop.f32.mrf.mxu0 }
 0x137   : > { %v938_v13 = vadd.f32 %v907_v56, %v4362_v24  ;;  %v1034_v59 = vpop.f32.mrf.mxu1  ;;  %v2262_v24 = vrot.slane %v4314_v31, 2  ;;  %v3717_v31 = vld [vmem:[%s3894_s9 + $0x30] ss:$0 sps:$4 sm:$0x33]  }
 0x138   : > { %v3358_v63 = vpop.f32.mrf.mxu0  ;;  %v2419_v44 = vrot.slane %v3717_v31, 2 }
 0x139   : > { %v3384_v16 = vpop.f32.mrf.mxu1  ;;  %v4472_v17 = vadd.f32 %v1026_v33, %v938_v13  ;;  %v2263_v32 = vsel %vm951_vm5, %v2260_v55, %v2262_v24 }
 0x13a   : > { %v912_v18 = vpop.f32.mrf.mxu0  ;;  %3576 = vmatmul.mubr.msk.bf16.gmra.mxu0 %vm333_vm2, %v2261_v14  ;;  %v2420_v52 = vsel %vm951_vm5, %v2417_v26, %v2419_v44  ;;  %v2531_v14 = vrot.slane %v2529_v2, 2 }
 0x13b   : > { %v939_v19 = vadd.f32 %v912_v18, %v4374_v36  ;;  %v1039_v11 = vpop.f32.mrf.mxu1  ;;  %3602 = vmatmul.mubr.msk.bf16.gmra.mxu1 %vm333_vm2, %v2416_v8  ;;  %3579 = vmatprep.mubr.msk.bf16.mxu0 %vm3769_vm1, %v3768_v1  ;;  %v2539_v18 = vrot.slane %v2537_v3, 2 }
 0x13c   : > { %v3361_v25 = vpop.f32.mrf.mxu0  ;;  %3605 = vmatprep.mubr.msk.bf16.mxu1 %vm3769_vm1, %v3768_v1 }
 0x13d   : > { %v3387_v27 = vpop.f32.mrf.mxu1  ;;  %v4483_v12 = vadd.f32 %v1031_v0, %v939_v19  ;;  %v2532_v0 = vshll.u32 %v4400_v7, 16  ;;  %v2689_v7 = vrot.slane %v4403_v9, 3  ;;  %v2542_v19 = vrot.slane %v2540_v4, 3 }
 0x13e   : > { %v915_v28 = vpop.f32.mrf.mxu0 }
 0x13f   : > { %v940_v36 = vadd.f32 %v915_v28, %v4379_v48  ;;  %v1042_v30 = vpop.f32.mrf.mxu1  ;;  %v2264_v48 = vrot.slane %v4339_v61, 2  ;;  %v3144_v61 = vcombine.low %v2682_v49, %v4391_v58  ;;  %v2266_v58 = vrot.slane %v4360_v20, 2 }
 0x140   : > { %v3362_v35 = vpop.f32.mrf.mxu0  ;;  %v2534_v63 = vrot.slane %v2532_v0, 3 }
 0x141   : > { %v3388_v38 = vpop.f32.mrf.mxu1  ;;  %v4489_v23 = vadd.f32 %v1034_v59, %v940_v36  ;;  %v2265_v40 = vsel %vm951_vm5, %v2262_v24, %v2264_v48  ;;  %v2688_v56 = vrot.slane %v3144_v61, 3  ;;  %v2267_v16 = vsel %vm951_vm5, %v2264_v48, %v2266_v58 }
 0x142   : > { %v920_v41 = vpop.f32.mrf.mxu0  ;;  %3580 = vmatmul.mubr.msk.bf16.gmra.mxu0 %vm333_vm2, %v2263_v32  ;;  %v2535_v27 = vor.u32 %v2534_v63, %v2531_v14  ;;  %v2549_v32 = vshll.u32 %v4427_v34, 16  ;;  %v2693_v61 = vrot.slane %v4451_v54, 3  ;;  %v2567_v14 = vshll.u32 %v4470_v15, 16 }
 0x143   : > { %v941_v29 = vadd.f32 %v920_v41, %v4393_v45  ;;  %v1047_v42 = vpop.f32.mrf.mxu1  ;;  %3606 = vmatmul.mubr.msk.bf16.gmra.mxu1 %vm333_vm2, %v2418_v21  ;;  %3583 = vmatprep.mubr.msk.bf16.mxu0 %vm3769_vm1, %v3768_v1  ;;  %v2690_v24 = vsel %vm1384_vm8, %v2688_v56, %v2689_v7  ;;  %v2691_v21 = vrot.slane %v4427_v34, 3 }
 0x144   : > { %v3365_v43 = vpop.f32.mrf.mxu0  ;;  %3609 = vmatprep.mubr.msk.bf16.mxu1 %vm3769_vm1, %v3768_v1 }
 0x145   : > { %v3391_v46 = vpop.f32.mrf.mxu1  ;;  %v4500_v39 = vadd.f32 %v1039_v11, %v941_v29  ;;  %v2551_v43 = vrot.slane %v2549_v32, 3  ;;  %v2694_v4 = vsel %vm1384_vm8, %v2691_v21, %v2693_v61 }
 0x146   : > { %v923_v50 = vpop.f32.mrf.mxu0  ;;  %v2692_v46 = vsel %vm1384_vm8, %v2689_v7, %v2691_v21 }
 0x147   : > { %v942_v45 = vadd.f32 %v923_v50, %v4405_v5  ;;  %v1050_v33 = vpop.f32.mrf.mxu1 }
 0x148   : > { %v3366_v51 = vpop.f32.mrf.mxu0 }
 0x149   : > { %v3392_v53 = vpop.f32.mrf.mxu1  ;;  %v4506_v57 = vadd.f32 %v1042_v30, %v942_v45  ;;  %v2546_v30 = vshrl.u32 %v4427_v34, 16  ;;  %v2558_v51 = vshll.u32 %v4451_v54, 16 }
 0x14a   : > { %v928_v62 = vpop.f32.mrf.mxu0  ;;  %3584 = vmatmul.mubr.msk.bf16.gmra.mxu0 %vm333_vm2, %v2265_v40  ;;  %v2555_v40 = vshrl.u32 %v4451_v54, 16 }
 0x14b   : > { %v943_v5 = vadd.f32 %v928_v62, %v4417_v22  ;;  %v1329_v55 = vpop.f32.mrf.mxu1  ;;  %3610 = vmatmul.mubr.msk.bf16.gmra.mxu1 %vm333_vm2, %v2420_v52  ;;  %3587 = vmatprep.mubr.msk.bf16.mxu0 %vm3769_vm1, %v3768_v1  ;;  %v2548_v48 = vrot.slane %v2546_v30, 2  ;;  %v2560_v58 = vrot.slane %v2558_v51, 3 }
 0x14c   : > { %v3369_v6 = vpop.f32.mrf.mxu0  ;;  %3637 = vmatprep.mubr.msk.bf16.mxu1 %vm3769_vm1, %v3768_v1 }
 0x14d   : > { %v3419_v22 = vpop.f32.mrf.mxu1  ;;  %v4521_v13 = vadd.f32 %v1047_v42, %v943_v5 }
 0x14e   : > { %v931_v59 = vpop.f32.mrf.mxu0 }
 0x14f   : > { %v944_v8 = vadd.f32 %v931_v59, %v4430_v37  ;;  %v1332_v20 = vpop.f32.mrf.mxu1  ;;  %v2543_v37 = vor.u32 %v2542_v19, %v2539_v18  ;;  %v2564_v59 = vshrl.u32 %v4470_v15, 16 }
 0x150   : > { %v3370_v11 = vpop.f32.mrf.mxu0 }
 0x151   : > { %v3420_v25 = vpop.f32.mrf.mxu1  ;;  %v4526_v26 = vadd.f32 %v1050_v33, %v944_v8  ;;  %v2544_v42 = vsel %vm1223_vm7, %v2535_v27, %v2543_v37  ;;  %v2695_v8 = vrot.slane %v4470_v15, 3 }
 0x152   : > { %v1168_v9 = vpop.f32.mrf.mxu0  ;;  %3588 = vmatmul.mubr.msk.bf16.gmra.mxu0 %vm333_vm2, %v2267_v16  ;;  %v2569_v25 = vrot.slane %v2567_v14, 3 }
 0x153   : > { %v1207_v28 = vadd.f32 %v1168_v9, %v4444_v47  ;;  %v1337_v36 = vpop.f32.mrf.mxu1  ;;  %3638 = vmatmul.mubr.msk.bf16.vlgmr.msra.gmra.mxu1 %vm333_vm2, %v2690_v24  ;;  %3615 = vmatprep.mubr.msk.bf16.mxu0 %vm3769_vm1, %v3768_v1  ;;  %v2566_v24 = vrot.slane %v2564_v59, 2  ;;  %v3719_v9 = vld [vmem:[%s3894_s9 + $0x30] ss:$0 sps:$4 sm:$0x77]  }
 0x154   : > { %v3397_v35 = vpop.f32.mrf.mxu0  ;;  %3641 = vmatprep.mubr.msk.bf16.mxu1 %vm3769_vm1, %v3768_v1  ;;  %v2576_v21 = vshll.u32 %v3719_v9, 16 }
 0x155   : > { %v3423_v31 = vpop.f32.mrf.mxu1  ;;  %v4538_v38 = vadd.f32 %v1329_v55, %v1207_v28  ;;  %v2557_v55 = vrot.slane %v2555_v40, 2  ;;  %v2696_v28 = vsel %vm1384_vm8, %v2693_v61, %v2695_v8  ;;  %v2573_v35 = vshrl.u32 %v3719_v9, 16 }
 0x156   : > { %v1171_v47 = vpop.f32.mrf.mxu0 }
 0x157   : > { %v1208_v41 = vadd.f32 %v1171_v47, %v4453_v60  ;;  %v1340_v29 = vpop.f32.mrf.mxu1  ;;  %v2552_v60 = vor.u32 %v2551_v43, %v2548_v48  ;;  %v2697_v47 = vrot.slane %v3719_v9, 3 }
 0x158   : > { %v3398_v44 = vpop.f32.mrf.mxu0 }
 0x159   : > { %v3424_v49 = vpop.f32.mrf.mxu1  ;;  %v4543_v50 = vadd.f32 %v1332_v20, %v1208_v41  ;;  %v2553_v5 = vsel %vm1223_vm7, %v2543_v37, %v2552_v60  ;;  %v2575_v44 = vrot.slane %v2573_v35, 2 }
 0x15a   : > { %v1176_v45 = vpop.f32.mrf.mxu0  ;;  %3616 = vmatmul.mubr.msk.bf16.vlgmr.msra.gmra.mxu0 %vm333_vm2, %v2544_v42 }
 0x15b   : > { %v1209_v34 = vadd.f32 %v1176_v45, %v4464_v10  ;;  %v1345_v33 = vpop.f32.mrf.mxu1  ;;  %3642 = vmatmul.mubr.msk.bf16.gmra.mxu1 %vm333_vm2, %v2692_v46  ;;  %3619 = vmatprep.mubr.msk.bf16.mxu0 %vm3769_vm1, %v3768_v1  ;;  %v2578_v46 = vrot.slane %v2576_v21, 3  ;;  %v2698_v45 = vsel %vm1384_vm8, %v2695_v8, %v2697_v47 }
 0x15c   : > { %v3401_v52 = vpop.f32.mrf.mxu0  ;;  %3645 = vmatprep.mubr.msk.bf16.mxu1 %vm3769_vm1, %v3768_v1 }
 0x15d   : > { %v3427_v53 = vpop.f32.mrf.mxu1  ;;  %v4555_v62 = vadd.f32 %v1337_v36, %v1209_v34 }
 0x15e   : > { %v1179_v10 = vpop.f32.mrf.mxu0 }
 0x15f   : > { %v1210_v2 = vadd.f32 %v1179_v10, %v4472_v17  ;;  %v1348_v0 = vpop.f32.mrf.mxu1  ;;  %v2561_v17 = vor.u32 %v2560_v58, %v2557_v55 }
 0x160   : > { %v3402_v3 = vpop.f32.mrf.mxu0 }
 0x161   : > { %v3428_v6 = vpop.f32.mrf.mxu1  ;;  %v4560_v56 = vadd.f32 %v1340_v29, %v1210_v2  ;;  %v2562_v11 = vsel %vm1223_vm7, %v2552_v60, %v2561_v17 }
 0x162   : > { %v1184_v7 = vpop.f32.mrf.mxu0  ;;  %3620 = vmatmul.mubr.msk.bf16.gmra.mxu0 %vm333_vm2, %v2553_v5 }
 0x163   : > { %v1211_v54 = vadd.f32 %v1184_v7, %v4483_v12  ;;  %v1353_v22 = vpop.f32.mrf.mxu1  ;;  %3646 = vmatmul.mubr.msk.bf16.gmra.mxu1 %vm333_vm2, %v2694_v4  ;;  %3623 = vmatprep.mubr.msk.bf16.mxu0 %vm3769_vm1, %v3768_v1 }
 0x164   : > { %v3405_v63 = vpop.f32.mrf.mxu0  ;;  %3649 = vmatprep.mubr.msk.bf16.mxu1 %vm3769_vm1, %v3768_v1 }
 0x165   : > { %v3431_v20 = vpop.f32.mrf.mxu1  ;;  %v4572_v12 = vadd.f32 %v1345_v33, %v1211_v54 }
 0x166   : > { %v1187_v16 = vpop.f32.mrf.mxu0 }
 0x167   : > { %v1212_v18 = vadd.f32 %v1187_v16, %v4489_v23  ;;  %v1356_v19 = vpop.f32.mrf.mxu1  ;;  %v2570_v23 = vor.u32 %v2569_v25, %v2566_v24 }
 0x168   : > { %v3406_v27 = vpop.f32.mrf.mxu0 }
 0x169   : > { %v3432_v36 = vpop.f32.mrf.mxu1  ;;  %v4578_v37 = vadd.f32 %v1348_v0, %v1212_v18  ;;  %v2571_v43 = vsel %vm1223_vm7, %v2561_v17, %v2570_v23 }
 0x16a   : > { %v1192_v30 = vpop.f32.mrf.mxu0  ;;  %3624 = vmatmul.mubr.msk.bf16.gmra.mxu0 %vm333_vm2, %v2562_v11 }
 0x16b   : > { %v1213_v15 = vadd.f32 %v1192_v30, %v4500_v39  ;;  %v1361_v32 = vpop.f32.mrf.mxu1  ;;  %3650 = vmatmul.mubr.msk.bf16.gmra.mxu1 %vm333_vm2, %v2696_v28  ;;  %3627 = vmatprep.mubr.msk.bf16.mxu0 %vm3769_vm1, %v3768_v1 }
 0x16c   : > { %v3409_v31 = vpop.f32.mrf.mxu0  ;;  %3653 = vmatprep.mubr.msk.bf16.mxu1 %vm3769_vm1, %v3768_v1 }
 0x16d   : > { %v3435_v41 = vpop.f32.mrf.mxu1  ;;  %v4587_v29 = vadd.f32 %v1353_v22, %v1213_v15 }
 0x16e   : > { %v1195_v42 = vpop.f32.mrf.mxu0 }
 0x16f   : > { %v1214_v39 = vadd.f32 %v1195_v42, %v4506_v57  ;;  %v1364_v48 = vpop.f32.mrf.mxu1  ;;  %v2579_v57 = vor.u32 %v2578_v46, %v2575_v44 }
 0x170   : > { %v3410_v49 = vpop.f32.mrf.mxu0 }
 0x171   : > { %v3436_v34 = vpop.f32.mrf.mxu1  ;;  %v1375_v33 = vadd.f32 %v1356_v19, %v1214_v39  ;;  %v2580_v5 = vsel %vm1223_vm7, %v2570_v23, %v2579_v57 }
 0x172   : > { %v1200_v60 = vpop.f32.mrf.mxu0  ;;  %3628 = vmatmul.mubr.msk.bf16.gmra.mxu0 %vm333_vm2, %v2571_v43 }
 0x173   : > { %v1215_v40 = vadd.f32 %v1200_v60, %v4521_v13  ;;  %v1585_v51 = vpop.f32.mrf.mxu1  ;;  %3654 = vmatmul.mubr.msk.bf16.gmra.mxu1 %vm333_vm2, %v2698_v45  ;;  %3631 = vmatprep.mubr.msk.bf16.mxu0 %vm3769_vm1, %v3768_v1 }
 0x174   : > { %v3413_v52 = vpop.f32.mrf.mxu0 }
 0x175   : > { %v3463_v61 = vpop.f32.mrf.mxu1  ;;  %v1376_v53 = vadd.f32 %v1361_v32, %v1215_v40 }
 0x176   : > { %v1203_v10 = vpop.f32.mrf.mxu0 }
 0x177   : > { %v1216_v2 = vadd.f32 %v1203_v10, %v4526_v26  ;;  %v1588_v0 = vpop.f32.mrf.mxu1 }
 0x178   : > { %v3414_v55 = vpop.f32.mrf.mxu0 }
 0x179   : > { %v3464_v58 = vpop.f32.mrf.mxu1  ;;  %v1377_v3 = vadd.f32 %v1364_v48, %v1216_v2 }
 0x17a   : > { %v1448_v13 = vpop.f32.mrf.mxu0  ;;  %3632 = vmatmul.mubr.msk.bf16.gmra.mxu0 %vm333_vm2, %v2580_v5 }
 0x17b   : > { %v1487_v4 = vadd.f32 %v1448_v13, %v4538_v38  ;;  %v1593_v6 = vpop.f32.mrf.mxu1 }
 0x17c   : > { %v3441_v1 = vpop.f32.mrf.mxu0 }
 0x17d   : > { %v3467_v7 = vpop.f32.mrf.mxu1  ;;  %v1624_v54 = vadd.f32 %v1585_v51, %v1487_v4 }
 0x17e   : > { %v1451_v22 = vpop.f32.mrf.mxu0 }
 0x17f   : > { %v1488_v17 = vadd.f32 %v1451_v22, %v4543_v50  ;;  %v1596_v59 = vpop.f32.mrf.mxu1 }
 0x180   : > { %v3442_v26 = vpop.f32.mrf.mxu0 }
 0x181   : > { %v3468_v14 = vpop.f32.mrf.mxu1  ;;  %v1625_v63 = vadd.f32 %v1588_v0, %v1488_v17 }
 0x182   : > { %v1456_v8 = vpop.f32.mrf.mxu0 }
 0x183   : > { %v1489_v20 = vadd.f32 %v1456_v8, %v4555_v62  ;;  %v1601_v16 = vpop.f32.mrf.mxu1 }
 0x184   : > { %v3445_v18 = vpop.f32.mrf.mxu0 }
 0x185   : > { %v3471_v19 = vpop.f32.mrf.mxu1  ;;  %v1626_v11 = vadd.f32 %v1593_v6, %v1489_v20 }
 0x186   : > { %v1459_v24 = vpop.f32.mrf.mxu0 }
 0x187   : > { %v1490_v38 = vadd.f32 %v1459_v24, %v4560_v56  ;;  %v1604_v25 = vpop.f32.mrf.mxu1 }
 0x188   : > { %v3446_v9 = vpop.f32.mrf.mxu0 }
 0x189   : > { %v3472_v27 = vpop.f32.mrf.mxu1  ;;  %v1627_v28 = vadd.f32 %v1596_v59, %v1490_v38 }
 0x18a   : > { %v1464_v36 = vpop.f32.mrf.mxu0 }
 0x18b   : > { %v1491_v50 = vadd.f32 %v1464_v36, %v4572_v12  ;;  %v1609_v30 = vpop.f32.mrf.mxu1 }
 0x18c   : > { %v3449_v15 = vpop.f32.mrf.mxu0 }
 0x18d   : > { %v3475_v32 = vpop.f32.mrf.mxu1  ;;  %v1628_v23 = vadd.f32 %v1601_v16, %v1491_v50 }
 0x18e   : > { %v1467_v35 = vpop.f32.mrf.mxu0 }
 0x18f   : > { %v1492_v62 = vadd.f32 %v1467_v35, %v4578_v37  ;;  %v1612_v21 = vpop.f32.mrf.mxu1 }
 0x190   : > { %v3450_v31 = vpop.f32.mrf.mxu0 }
 0x191   : > { %v3476_v47 = vpop.f32.mrf.mxu1  ;;  %v1629_v41 = vadd.f32 %v1604_v25, %v1492_v62 }
 0x192   : > { %v1472_v42 = vpop.f32.mrf.mxu0 }
 0x193   : > { %v1493_v56 = vadd.f32 %v1472_v42, %v4587_v29  ;;  %v1617_v39 = vpop.f32.mrf.mxu1 }
 0x194   : > { %v3453_v48 = vpop.f32.mrf.mxu0 }
 0x195   : > { %v3479_v43 = vpop.f32.mrf.mxu1  ;;  %v1630_v44 = vadd.f32 %v1609_v30, %v1493_v56 }
 0x196   : > { %v1475_v46 = vpop.f32.mrf.mxu0 }
 0x197   : > { %v1494_v12 = vadd.f32 %v1475_v46, %v1375_v33  ;;  %v1620_v49 = vpop.f32.mrf.mxu1 }
 0x198   : > { %v3454_v45 = vpop.f32.mrf.mxu0 }
 0x199   : > { %v3480_v34 = vpop.f32.mrf.mxu1  ;;  %v1631_v60 = vadd.f32 %v1612_v21, %v1494_v12 }
 0x19a   : > { %v1480_v40 = vpop.f32.mrf.mxu0 }
 0x19b   : > { %v1495_v51 = vadd.f32 %v1480_v40, %v1376_v53  ;;  %v1889_v37 = vpop.f32.mrf.mxu1 }
 0x19c   : > { %v3457_v57 = vpop.f32.mrf.mxu0 }
 0x19d   : > { %v3507_v52 = vpop.f32.mrf.mxu1  ;;  %v1632_v61 = vadd.f32 %v1617_v39, %v1495_v51 }
 0x19e   : > { %v1483_v10 = vpop.f32.mrf.mxu0 }
 0x19f   : > { %v1496_v2 = vadd.f32 %v1483_v10, %v1377_v3  ;;  %v1892_v0 = vpop.f32.mrf.mxu1 }
 0x1a0   : > { %v3458_v29 = vpop.f32.mrf.mxu0 }
 0x1a1   : > { %v3508_v5 = vpop.f32.mrf.mxu1  ;;  %v1633_v55 = vadd.f32 %v1620_v49, %v1496_v2 }
 0x1a2   : > { %v1771_v58 = vpop.f32.mrf.mxu0 }
 0x1a3   : > { %v1810_v13 = vadd.f32 %v1771_v58, %v1624_v54  ;;  %v1897_v4 = vpop.f32.mrf.mxu1 }
 0x1a4   : > { %v3485_v33 = vpop.f32.mrf.mxu0 }
 0x1a5   : > { %v3511_v6 = vpop.f32.mrf.mxu1  ;;  %v1928_v1 = vadd.f32 %v1889_v37, %v1810_v13 }
 0x1a6   : > { %v1774_v7 = vpop.f32.mrf.mxu0 }
 0x1a7   : > { %v1811_v22 = vadd.f32 %v1774_v7, %v1625_v63  ;;  %v1900_v17 = vpop.f32.mrf.mxu1 }
 0x1a8   : > { %v3486_v53 = vpop.f32.mrf.mxu0 }
 0x1a9   : > { %v3512_v59 = vpop.f32.mrf.mxu1  ;;  %v1929_v26 = vadd.f32 %v1892_v0, %v1811_v22 }
 0x1aa   : > { %v1779_v14 = vpop.f32.mrf.mxu0 }
 0x1ab   : > { %v1812_v8 = vadd.f32 %v1779_v14, %v1626_v11  ;;  %v1905_v20 = vpop.f32.mrf.mxu1 }
 0x1ac   : > { %v3489_v3 = vpop.f32.mrf.mxu0 }
 0x1ad   : > { %v3515_v16 = vpop.f32.mrf.mxu1  ;;  %v1930_v18 = vadd.f32 %v1897_v4, %v1812_v8 }
 0x1ae   : > { %v1782_v19 = vpop.f32.mrf.mxu0 }
 0x1af   : > { %v1813_v24 = vadd.f32 %v1782_v19, %v1627_v28  ;;  %v1908_v38 = vpop.f32.mrf.mxu1 }
 0x1b0   : > { %v3490_v54 = vpop.f32.mrf.mxu0 }
 0x1b1   : > { %v3516_v25 = vpop.f32.mrf.mxu1  ;;  %v1931_v9 = vadd.f32 %v1900_v17, %v1813_v24 }
 0x1b2   : > { %v1787_v27 = vpop.f32.mrf.mxu0 }
 0x1b3   : > { %v1814_v36 = vadd.f32 %v1787_v27, %v1628_v23  ;;  %v1913_v50 = vpop.f32.mrf.mxu1 }
 0x1b4   : > { %v3493_v63 = vpop.f32.mrf.mxu0 }
 0x1b5   : > { %v3519_v30 = vpop.f32.mrf.mxu1  ;;  %v1932_v15 = vadd.f32 %v1905_v20, %v1814_v36 }
 0x1b6   : > { %v1790_v32 = vpop.f32.mrf.mxu0 }
 0x1b7   : > { %v1815_v35 = vadd.f32 %v1790_v32, %v1629_v41  ;;  %v1916_v62 = vpop.f32.mrf.mxu1 }
 0x1b8   : > { %v3494_v11 = vpop.f32.mrf.mxu0 }
 0x1b9   : > { %v3520_v21 = vpop.f32.mrf.mxu1  ;;  %v1933_v31 = vadd.f32 %v1908_v38, %v1815_v35 }
 0x1ba   : > { %v1795_v47 = vpop.f32.mrf.mxu0 }
 0x1bb   : > { %v1816_v42 = vadd.f32 %v1795_v47, %v1630_v44  ;;  %v1921_v56 = vpop.f32.mrf.mxu1 }
 0x1bc   : > { %v3497_v28 = vpop.f32.mrf.mxu0 }
 0x1bd   : > { %v3523_v39 = vpop.f32.mrf.mxu1  ;;  %v1934_v48 = vadd.f32 %v1913_v50, %v1816_v42 }
 0x1be   : > { %v1798_v43 = vpop.f32.mrf.mxu0 }
 0x1bf   : > { %v1817_v46 = vadd.f32 %v1798_v43, %v1631_v60  ;;  %v1924_v12 = vpop.f32.mrf.mxu1 }
 0x1c0   : > { %v3498_v23 = vpop.f32.mrf.mxu0 }
 0x1c1   : > { %v3524_v49 = vpop.f32.mrf.mxu1  ;;  %v1935_v45 = vadd.f32 %v1916_v62, %v1817_v46 }
 0x1c2   : > { %v1803_v34 = vpop.f32.mrf.mxu0 }
 0x1c3   : > { %v1818_v40 = vadd.f32 %v1803_v34, %v1632_v61  ;;  %v2202_v51 = vpop.f32.mrf.mxu1 }
 0x1c4   : > { %v3501_v41 = vpop.f32.mrf.mxu0 }
 0x1c5   : > { %v3551_v37 = vpop.f32.mrf.mxu1  ;;  %v1936_v57 = vadd.f32 %v1921_v56, %v1818_v40 }
 0x1c6   : > { %v1806_v52 = vpop.f32.mrf.mxu0 }
 0x1c7   : > { %v1819_v10 = vadd.f32 %v1806_v52, %v1633_v55  ;;  %v2205_v2 = vpop.f32.mrf.mxu1 }
 0x1c8   : > { %v3502_v44 = vpop.f32.mrf.mxu0 }
 0x1c9   : > { %v3552_v0 = vpop.f32.mrf.mxu1  ;;  %v1937_v29 = vadd.f32 %v1924_v12, %v1819_v10 }
 0x1ca   : > { %v2042_v5 = vpop.f32.mrf.mxu0 }
 0x1cb   : > { %v2081_v58 = vadd.f32 %v2042_v5, %v1928_v1  ;;  %v2210_v13 = vpop.f32.mrf.mxu1 }
 0x1cc   : > { %v3529_v60 = vpop.f32.mrf.mxu0 }
 0x1cd   : > { %v3555_v4 = vpop.f32.mrf.mxu1  ;;  %v4607_v33 = vadd.f32 %v2202_v51, %v2081_v58 }
 0x1ce   : > { %v2045_v6 = vpop.f32.mrf.mxu0 }
 0x1cf   : > { %v2082_v7 = vadd.f32 %v2045_v6, %v1929_v26  ;;  %v2213_v61 = vpop.f32.mrf.mxu1 }
 0x1d0   : > { %v3530_v22 = vpop.f32.mrf.mxu0 }
 0x1d1   : > { %v3556_v17 = vpop.f32.mrf.mxu1  ;;  %v4609_v53 = vadd.f32 %v2205_v2, %v2082_v7 }
 0x1d2   : > { %v2050_v59 = vpop.f32.mrf.mxu0 }
 0x1d3   : > { %v2083_v55 = vadd.f32 %v2050_v59, %v1930_v18  ;;  %v2218_v14 = vpop.f32.mrf.mxu1 }
 0x1d4   : > { %v3533_v8 = vpop.f32.mrf.mxu0 }
 0x1d5   : > { %v3559_v20 = vpop.f32.mrf.mxu1  ;;  %v4611_v3 = vadd.f32 %v2210_v13, %v2083_v55 }
 0x1d6   : > { %v2053_v1 = vpop.f32.mrf.mxu0 }
 0x1d7   : > { %v2084_v16 = vadd.f32 %v2053_v1, %v1931_v9  ;;  %v2221_v19 = vpop.f32.mrf.mxu1 }
 0x1d8   : > { %v3534_v24 = vpop.f32.mrf.mxu0 }
 0x1d9   : > { %v3560_v38 = vpop.f32.mrf.mxu1  ;;  %v4613_v54 = vadd.f32 %v2213_v61, %v2084_v16 }
 0x1da   : > { %v2058_v26 = vpop.f32.mrf.mxu0 }
 0x1db   : > { %v2085_v25 = vadd.f32 %v2058_v26, %v1932_v15  ;;  %v2226_v27 = vpop.f32.mrf.mxu1 }
 0x1dc   : > { %v3537_v36 = vpop.f32.mrf.mxu0 }
 0x1dd   : > { %v3563_v50 = vpop.f32.mrf.mxu1  ;;  %v4615_v63 = vadd.f32 %v2218_v14, %v2085_v25 }
 0x1de   : > { %v2061_v18 = vpop.f32.mrf.mxu0 }
 0x1df   : > { %v2086_v30 = vadd.f32 %v2061_v18, %v1933_v31  ;;  %v2229_v32 = vpop.f32.mrf.mxu1 }
 0x1e0   : > { %v3538_v35 = vpop.f32.mrf.mxu0 }
 0x1e1   : > { %v3564_v62 = vpop.f32.mrf.mxu1  ;;  %v4617_v11 = vadd.f32 %v2221_v19, %v2086_v30 }
 0x1e2   : > { %v2066_v9 = vpop.f32.mrf.mxu0 }
 0x1e3   : > { %v2087_v21 = vadd.f32 %v2066_v9, %v1934_v48  ;;  %v2234_v47 = vpop.f32.mrf.mxu1 }
 0x1e4   : > { %v3541_v42 = vpop.f32.mrf.mxu0 }
 0x1e5   : > { %v3567_v56 = vpop.f32.mrf.mxu1  ;;  %v4619_v28 = vadd.f32 %v2226_v27, %v2087_v21 }
 0x1e6   : > { %v2069_v15 = vpop.f32.mrf.mxu0 }
 0x1e7   : > { %v2088_v39 = vadd.f32 %v2069_v15, %v1935_v45  ;;  %v2237_v43 = vpop.f32.mrf.mxu1 }
 0x1e8   : > { %v3542_v46 = vpop.f32.mrf.mxu0 }
 0x1e9   : > { %v3568_v12 = vpop.f32.mrf.mxu1  ;;  %v4621_v23 = vadd.f32 %v2229_v32, %v2088_v39 }
 0x1ea   : > { %v2074_v31 = vpop.f32.mrf.mxu0 }
 0x1eb   : > { %v2089_v49 = vadd.f32 %v2074_v31, %v1936_v57  ;;  %v2473_v34 = vpop.f32.mrf.mxu1 }
 0x1ec   : > { %v3545_v40 = vpop.f32.mrf.mxu0 }
 0x1ed   : > { %v3595_v51 = vpop.f32.mrf.mxu1  ;;  %v4623_v41 = vadd.f32 %v2234_v47, %v2089_v49  ;;  %v4654_v40 = vld [vmem:[%s4758_s4] ss:$0 sm:$0xff] }
 0x1ee   : > { %v2077_v48 = vpop.f32.mrf.mxu0 }
 0x1ef   : > { %v2090_v37 = vadd.f32 %v2077_v48, %v1937_v29  ;;  %v2476_v52 = vpop.f32.mrf.mxu1 }
 0x1f0   : > { %v3546_v10 = vpop.f32.mrf.mxu0 }
 0x1f1   : > { %v3596_v2 = vpop.f32.mrf.mxu1  ;;  %v4625_v44 = vadd.f32 %v2237_v43, %v2090_v37 }
 0x1f2   : > { %v2320_v45 = vpop.f32.mrf.mxu0 }
 0x1f3   : > { %v2481_v0 = vpop.f32.mrf.mxu1  ;;  %v2359_v21 = vadd.f32 %v2320_v45, %v4607_v33 }
 0x1f4   : > { %v3573_v5 = vpop.f32.mrf.mxu0 }
 0x1f5   : > { %v3599_v58 = vpop.f32.mrf.mxu1  ;;  %v2512_v43 = vadd.f32 %v2473_v34, %v2359_v21 }
 0x1f6   : > { %v2323_v13 = vpop.f32.mrf.mxu0 }
 0x1f7   : > { %v4627_v60 = vpop.f32.mrf.mxu1  ;;  %v2360_v39 = vadd.f32 %v2323_v13, %v4609_v53 }
 0x1f8   : > { %v3574_v57 = vpop.f32.mrf.mxu0 }
 0x1f9   : > { %v3600_v4 = vpop.f32.mrf.mxu1  ;;  %v2513_v37 = vadd.f32 %v2476_v52, %v2360_v39 }
 0x1fa   : > { %v2328_v6 = vpop.f32.mrf.mxu0 }
 0x1fb   : > { %v4629_v7 = vpop.f32.mrf.mxu1  ;;  %v2361_v33 = vadd.f32 %v2328_v6, %v4611_v3 }
 0x1fc   : > { %v3577_v61 = vpop.f32.mrf.mxu0 }
 0x1fd   : > { %v3603_v22 = vpop.f32.mrf.mxu1  ;;  %v2514_v4 = vadd.f32 %v2481_v0, %v2361_v33 }
 0x1fe   : > { %v2331_v29 = vpop.f32.mrf.mxu0 }
 0x1ff   : > { %v4631_v17 = vpop.f32.mrf.mxu1  ;;  %v2362_v58 = vadd.f32 %v2331_v29, %v4613_v54 }
 0x200   : > { %v3578_v59 = vpop.f32.mrf.mxu0 }
 0x201   : > { %v3604_v55 = vpop.f32.mrf.mxu1  ;;  %v2515_v54 = vadd.f32 %v4627_v60, %v2362_v58 }
 0x202   : > { %v2336_v14 = vpop.f32.mrf.mxu0 }
 0x203   : > { %v4633_v8 = vpop.f32.mrf.mxu1  ;;  %v2363_v55 = vadd.f32 %v2336_v14, %v4615_v63 }
 0x204   : > { %v3581_v20 = vpop.f32.mrf.mxu0 }
 0x205   : > { %v3607_v1 = vpop.f32.mrf.mxu1 }
 0x206   : > { %v2339_v16 = vpop.f32.mrf.mxu0 }
 0x207   : > { %v4635_v19 = vpop.f32.mrf.mxu1  ;;  %v2364_v63 = vadd.f32 %v2339_v16, %v4617_v11 }
 0x208   : > { %v3582_v24 = vpop.f32.mrf.mxu0 }
 0x209   : > { %v3608_v38 = vpop.f32.mrf.mxu1 }
 0x20a   : > { %v4637_v26 = vpop.f32.mrf.mxu0 }
 0x20b   : > { %v4639_v25 = vpop.f32.mrf.mxu1 }
 0x20c   : > { %v3585_v27 = vpop.f32.mrf.mxu0 }
 0x20d   : > { %v3611_v36 = vpop.f32.mrf.mxu1 }
 0x20e   : > { %v4641_v50 = vpop.f32.mrf.mxu0 }
 0x20f   : > { %v4643_v18 = vpop.f32.mrf.mxu1 }
 0x210   : > { %v3586_v30 = vpop.f32.mrf.mxu0 }
 0x211   : > { %v3612_v32 = vpop.f32.mrf.mxu1 }
 0x212   : > { %v4645_v35 = vpop.f32.mrf.mxu0 }
 0x213   : > { %v2751_v62 = vpop.f32.mrf.mxu1 }
 0x214   : > { %v3589_v9 = vpop.f32.mrf.mxu0 }
 0x215   : > { %v3639_v47 = vpop.f32.mrf.mxu1  ;;  %v2516_v9 = vadd.f32 %v4629_v7, %v2363_v55 }
 0x216   : > { %v4648_v42 = vpop.f32.mrf.mxu0 }
 0x217   : > { %v2754_v56 = vpop.f32.mrf.mxu1 }
 0x218   : > { %v3590_v15 = vpop.f32.mrf.mxu0 }
 0x219   : > { %v3640_v46 = vpop.f32.mrf.mxu1 }
 0x21a   : > { %v2633_v12 = vpop.f32.mrf.mxu0 }
 0x21b   : > { %v2672_v31 = vadd.f32 %v2633_v12, %v2512_v43  ;;  %v2759_v49 = vpop.f32.mrf.mxu1  ;;  %v2365_v12 = vadd.f32 %v4637_v26, %v4619_v28  ;;  %v2366_v28 = vadd.f32 %v4641_v50, %v4621_v23 }
 0x21c   : > { %v3617_v51 = vpop.f32.mrf.mxu0 }
 0x21d   : > { %v2790_v48 = vadd.f32 %v2751_v62, %v2672_v31  ;;  %v3643_v10 = vpop.f32.mrf.mxu1  ;;  %v2519_v55 = vadd.f32 %v4635_v19, %v2366_v28 }
 0x21e   : > { %v2636_v2 = vpop.f32.mrf.mxu0 }
 0x21f   : > { %v4658_v45 = vadd.f32 %v4654_v40, %v2790_v48  ;;  %v2673_v53 = vadd.f32 %v2636_v2, %v2513_v37  ;;  %v2762_v34 = vpop.f32.mrf.mxu1 }
 0x220   : > { %v3618_v5 = vpop.f32.mrf.mxu0 }
 0x221   : > { %v2817_v13 = vand.u32 2147483647, %v4658_v45  ;;  %v2791_v57 = vadd.f32 %v2754_v56, %v2673_v53  ;;  %v3644_v61 = vpop.f32.mrf.mxu1  ;;  %vm2857_vm9 = vcmp.ge.f32.partialorder %v4658_v45, 0.0 }
 0x222   : > { %v2641_v22 = vpop.f32.mrf.mxu0 }
 0x223   : > { %v2827_v59 = vsub.f32 0.0, %v2817_v13  ;;  %v4663_v3 = vadd.f32 %v4654_v40, %v2791_v57  ;;  %v2674_v52 = vadd.f32 %v2641_v22, %v2514_v4  ;;  %v2767_v6 = vpop.f32.mrf.mxu1 }
 0x224   : > { %v3621_v20 = vpop.f32.mrf.mxu0 }
 0x225   : > { %v2837_v1 = vmul.f32 1.442695, %v2827_v59  ;;  %v2818_v24 = vand.u32 2147483647, %v4663_v3  ;;  %v2792_v38 = vadd.f32 %v2759_v49, %v2674_v52  ;;  %v3647_v29 = vpop.f32.mrf.mxu1  ;;  %v2517_v49 = vadd.f32 %v4631_v17, %v2364_v63 }
 0x226   : > { %v2644_v27 = vpop.f32.mrf.mxu0  ;;  %vm2858_vm11 = vcmp.ge.f32.partialorder %v4663_v3, 0.0 }
 0x227   : > { %3720 = vpow2.f32 %v2837_v1  ;;  %v2828_v0 = vsub.f32 0.0, %v2818_v24  ;;  %v4669_v36 = vadd.f32 %v4654_v40, %v2792_v38  ;;  %v2675_v30 = vadd.f32 %v2644_v27, %v2515_v54  ;;  %v2770_v32 = vpop.f32.mrf.mxu1 }
 0x228   : > { %v3622_v62 = vpop.f32.mrf.mxu0 }
 0x229   : > { %v2839_v14 = vmul.f32 1.442695, %v2828_v0  ;;  %v2819_v21 = vand.u32 2147483647, %v4669_v36  ;;  %v2793_v47 = vadd.f32 %v2762_v34, %v2675_v30  ;;  %v3648_v56 = vpop.f32.mrf.mxu1  ;;  %v2518_v34 = vadd.f32 %v4633_v8, %v2365_v12 }
 0x22a   : > { %v2649_v60 = vpop.f32.mrf.mxu0  ;;  %v2367_v8 = vadd.f32 %v4645_v35, %v4623_v41  ;;  %v2368_v30 = vadd.f32 %v4648_v42, %v4625_v44  ;;  %vm2859_vm12 = vcmp.ge.f32.partialorder %v4669_v36, 0.0 }
 0x22b   : > { %3722 = vpow2.f32 %v2839_v14  ;;  %v2829_v15 = vsub.f32 0.0, %v2819_v21  ;;  %v4675_v39 = vadd.f32 %v4654_v40, %v2793_v47  ;;  %v2676_v43 = vadd.f32 %v2649_v60, %v2516_v9  ;;  %v2775_v46 = vpop.f32.mrf.mxu1 }
 0x22c   : > { %v3625_v31 = vpop.f32.mrf.mxu0  ;;  %v2520_v35 = vadd.f32 %v4639_v25, %v2367_v8  ;;  %v2521_v42 = vadd.f32 %v4643_v18, %v2368_v30 }
 0x22d   : > { %v2841_v7 = vmul.f32 1.442695, %v2829_v15  ;;  %v2820_v11 = vand.u32 2147483647, %v4675_v39  ;;  %v2794_v16 = vadd.f32 %v2767_v6, %v2676_v43  ;;  %v3651_v51 = vpop.f32.mrf.mxu1  ;;  %vm2860_vm13 = vcmp.ge.f32.partialorder %v4675_v39, 0.0 }
 0x22e   : > { %v2652_v33 = vpop.f32.mrf.mxu0 }
 0x22f   : > { %3724 = vpow2.f32 %v2841_v7  ;;  %v2830_v48 = vsub.f32 0.0, %v2820_v11  ;;  %v4682_v37 = vadd.f32 %v4654_v40, %v2794_v16  ;;  %v2677_v10 = vadd.f32 %v2652_v33, %v2517_v49  ;;  %v2778_v2 = vpop.f32.mrf.mxu1 }
 0x230   : > { %v3626_v53 = vpop.f32.mrf.mxu0 }
 0x231   : > { %v2843_v26 = vmul.f32 1.442695, %v2830_v48  ;;  %v2821_v5 = vand.u32 2147483647, %v4682_v37  ;;  %v2795_v58 = vadd.f32 %v2770_v32, %v2677_v10  ;;  %v3652_v17 = vpop.f32.mrf.mxu1  ;;  %vm2861_vm14 = vcmp.ge.f32.partialorder %v4682_v37, 0.0 }
 0x232   : > { %v2657_v13 = vpop.f32.mrf.mxu0 }
 0x233   : > { %3726 = vpow2.f32 %v2843_v26  ;;  %v2831_v57 = vsub.f32 0.0, %v2821_v5  ;;  %v4689_v4 = vadd.f32 %v4654_v40, %v2795_v58  ;;  %v2678_v61 = vadd.f32 %v2657_v13, %v2518_v34  ;;  %v2783_v22 = vpop.f32.mrf.mxu1 }
 0x234   : > { %v3721_v59 = vpop.eup %3720  ;;  %v3629_v52 = vpop.f32.mrf.mxu0 }
 0x235   : > { %v2877_v6 = vadd.f32 1.0, %v3721_v59  ;;  %v2845_v23 = vmul.f32 1.442695, %v2831_v57  ;;  %v2822_v50 = vand.u32 2147483647, %v4689_v4  ;;  %v3655_v20 = vpop.f32.mrf.mxu1  ;;  %v2796_v1 = vadd.f32 %v2775_v46, %v2678_v61 }
 0x236   : > { %v2660_v24 = vpop.f32.mrf.mxu0  ;;  %v2867_v53 = vsel %vm2857_vm9, 1.0, %v3721_v59  ;;  %vm2862_vm15 = vcmp.ge.f32.partialorder %v4689_v4, 0.0 }
 0x237   : > { %3728 = vrcp.f32 %v2877_v6  ;;  %v2832_v38 = vsub.f32 0.0, %v2822_v50  ;;  %v2679_v54 = vadd.f32 %v2660_v24, %v2519_v55  ;;  %v2786_v29 = vpop.f32.mrf.mxu1  ;;  %v4696_v0 = vadd.f32 %v4654_v40, %v2796_v1 }
 0x238   : > { %v3723_v27 = vpop.eup %3722  ;;  %3730 = vpow2.f32 %v2845_v23  ;;  %v3630_v41 = vpop.f32.mrf.mxu0 }
 0x239   : > { %v2878_v32 = vadd.f32 1.0, %v3723_v27  ;;  %v2847_v19 = vmul.f32 1.442695, %v2832_v38  ;;  %v2797_v62 = vadd.f32 %v2778_v2, %v2679_v54  ;;  %v3656_v9 = vpop.f32.mrf.mxu1  ;;  %v2823_v63 = vand.u32 2147483647, %v4696_v0 }
 0x23a   : > { %v2665_v14 = vpop.f32.mrf.mxu0  ;;  %v2868_v13 = vsel %vm2858_vm11, 1.0, %v3723_v27  ;;  %vm2863_vm0 = vcmp.ge.f32.partialorder %v4696_v0, 0.0 }
 0x23b   : > { %3732 = vrcp.f32 %v2878_v32  ;;  %v4703_v21 = vadd.f32 %v4654_v40, %v2797_v62  ;;  %v2680_v47 = vadd.f32 %v2665_v14, %v2520_v35  ;;  %v2833_v60 = vsub.f32 0.0, %v2823_v63 }
 0x23c   : > { %v3725_v56 = vpop.eup %3724  ;;  %3734 = vpow2.f32 %v2847_v19  ;;  %v3633_v25 = vpop.f32.mrf.mxu0 }
 0x23d   : > { %v2879_v15 = vadd.f32 1.0, %v3725_v56  ;;  %v2824_v44 = vand.u32 2147483647, %v4703_v21  ;;  %v2849_v43 = vmul.f32 1.442695, %v2833_v60  ;;  %v2798_v46 = vadd.f32 %v2783_v22, %v2680_v47 }
 0x23e   : > { %v2668_v12 = vpop.f32.mrf.mxu0  ;;  %v2869_v52 = vsel %vm2859_vm12, 1.0, %v3725_v56  ;;  %vm2864_vm1 = vcmp.ge.f32.partialorder %v4703_v21, 0.0 }
 0x23f   : > { %3736 = vrcp.f32 %v2879_v15  ;;  %v2834_v31 = vsub.f32 0.0, %v2824_v44  ;;  %v2681_v7 = vadd.f32 %v2668_v12, %v2521_v42  ;;  %v4709_v16 = vadd.f32 %v4654_v40, %v2798_v46 }
 0x240   : > { %v3727_v11 = vpop.eup %3726  ;;  %3738 = vpow2.f32 %v2849_v43  ;;  %v3634_v49 = vpop.f32.mrf.mxu0 }
 0x241   : > { %v2880_v51 = vadd.f32 1.0, %v3727_v11  ;;  %v2851_v33 = vmul.f32 1.442695, %v2834_v31  ;;  %v2799_v48 = vadd.f32 %v2786_v29, %v2681_v7  ;;  %v2825_v10 = vand.u32 2147483647, %v4709_v16 }
 0x242   : > { %v2870_v55 = vsel %vm2860_vm13, 1.0, %v3727_v11  ;;  %vm2865_vm2 = vcmp.ge.f32.partialorder %v4709_v16, 0.0 }
 0x243   : > { %3740 = vrcp.f32 %v2880_v51  ;;  %v4714_v18 = vadd.f32 %v4654_v40, %v2799_v48  ;;  %v2835_v34 = vsub.f32 0.0, %v2825_v10 }
 0x244   : > { %v3729_v2 = vpop.eup %3728  ;;  %3742 = vpow2.f32 %v2851_v33 }
 0x245   : > { %v3731_v28 = vpop.eup %3730  ;;  %v2888_v26 = vmul.f32 %v3729_v2, %v2867_v53  ;;  %v2826_v45 = vand.u32 2147483647, %v4714_v18  ;;  %v2853_v58 = vmul.f32 1.442695, %v2835_v34  ;;  %vm2866_vm3 = vcmp.ge.f32.partialorder %v4714_v18, 0.0 }
 0x246   : > { %v2881_v5 = vadd.f32 1.0, %v3731_v28  ;;  %v2871_v38 = vsel %vm2861_vm14, 1.0, %v3731_v28 }
 0x247   : > { %2908 = vst.msk [vmem:[%s4719_s19] sm:$0xff] %vm2907_vm10, %v2888_v26  ;;  %v2836_v40 = vsub.f32 0.0, %v2826_v45 }
 0x248   : > { %v3733_v17 = vpop.eup %3732  ;;  %3744 = vrcp.f32 %v2881_v5 }
 0x249   : > { %v3735_v57 = vpop.eup %3734  ;;  %v2890_v61 = vmul.f32 %v3733_v17, %v2868_v13  ;;  %3746 = vpow2.f32 %v2853_v58  ;;  %v2855_v22 = vmul.f32 1.442695, %v2836_v40 }
 0x24a   : > { %v2882_v59 = vadd.f32 1.0, %v3735_v57  ;;  %v2872_v35 = vsel %vm2862_vm15, 1.0, %v3735_v57 }
 0x24b   : > { %2909 = vst.msk [vmem:[%s4719_s19 + $0x8] sm:$0xff] %vm2907_vm10, %v2890_v61  ;;  %3748 = vpow2.f32 %v2855_v22 }
 0x24c   : > { %v3737_v8 = vpop.eup %3736  ;;  %3750 = vrcp.f32 %v2882_v59 }
 0x24d   : > { %v3739_v3 = vpop.eup %3738  ;;  %v2892_v6 = vmul.f32 %v3737_v8, %v2869_v52 }
 0x24e   : > { %v2883_v23 = vadd.f32 1.0, %v3739_v3  ;;  %v2873_v19 = vsel %vm2863_vm0, 1.0, %v3739_v3 }
 0x24f   : > { %2910 = vst.msk [vmem:[%s4719_s19 + $0x10] sm:$0xff] %vm2907_vm10, %v2892_v6 }
 0x250   : > { %v3741_v50 = vpop.eup %3740  ;;  %3752 = vrcp.f32 %v2883_v23 }
 0x251   : > { %v3743_v20 = vpop.eup %3742  ;;  %v2894_v1 = vmul.f32 %v3741_v50, %v2870_v55 }
 0x252   : > { %v2884_v24 = vadd.f32 1.0, %v3743_v20  ;;  %v2874_v9 = vsel %vm2864_vm1, 1.0, %v3743_v20 }
 0x253   : > { %2911 = vst.msk [vmem:[%s4719_s19 + $0x18] sm:$0xff] %vm2907_vm10, %v2894_v1 }
 0x254   : > { %3754 = vrcp.f32 %v2884_v24 }
 0x255   : > { %v3745_v36 = vpop.eup %3744 }
 0x256   : > { %v3747_v54 = vpop.eup %3746  ;;  %v2896_v29 = vmul.f32 %v3745_v36, %v2871_v38 }
 0x257   : > { %v2885_v27 = vadd.f32 1.0, %v3747_v54  ;;  %v2875_v47 = vsel %vm2865_vm2, 1.0, %v3747_v54 }
 0x258   : > { %v3749_v39 = vpop.eup %3748  ;;  %2912 = vst.msk [vmem:[%s4719_s19 + $0x20] sm:$0xff] %vm2907_vm10, %v2896_v29 }
 0x259   : > { %v3751_v41 = vpop.eup %3750  ;;  %3756 = vrcp.f32 %v2885_v27  ;;  %v2886_v30 = vadd.f32 1.0, %v3749_v39  ;;  %v2876_v60 = vsel %vm2866_vm3, 1.0, %v3749_v39 }
 0x25a   : > { %v2898_v32 = vmul.f32 %v3751_v41, %v2872_v35 }
 0x25b   : > { %3758 = vrcp.f32 %v2886_v30 }
 0x25c   : > { %2913 = vst.msk [vmem:[%s4719_s19 + $0x28] sm:$0xff] %vm2907_vm10, %v2898_v32 }
 0x25d   : > { %v3753_v37 = vpop.eup %3752 }
 0x25e   : > { %v2900_v62 = vmul.f32 %v3753_v37, %v2873_v19 }
 0x260   : > { %2914 = vst.msk [vmem:[%s4719_s19 + $0x30] sm:$0xff] %vm2907_vm10, %v2900_v62 }
 0x261   : > { %v3755_v4 = vpop.eup %3754 }
 0x262   : > { %v2902_v63 = vmul.f32 %v3755_v4, %v2874_v9 }
 0x264   : > { %2915 = vst.msk [vmem:[%s4719_s19 + $0x38] sm:$0xff] %vm2907_vm10, %v2902_v63 }
 0x266   : > { %v3757_v14 = vpop.eup %3756 }
 0x267   : > { %v2904_v56 = vmul.f32 %v3757_v14, %v2875_v47 }
 0x268   : > { %v3759_v0 = vpop.eup %3758 }
 0x269   : > { %2916 = vst.msk [vmem:[%s4719_s19 + $0x40] sm:$0xff] %vm2907_vm10, %v2904_v56  ;;  %v2906_v25 = vmul.f32 %v3759_v0, %v2876_v60 }
 0x26b   : > { %2917 = vst.msk [vmem:[%s4719_s19 + $0x48] sm:$0xff] %vm2907_vm10, %v2906_v25 }
 0x26c PF: > { %s15_s18 = sadd.s32 1, %s3766_s18  }
 0x26d   : > { %p12_p4 = scmp.ge.s32.totalorder %s15_s18, 4  }
 0x26f   :  { %14 = sbr.rel (!%p12_p4) target bundleno = 1 (0x1), region = 89 }

</bundles_post_ra>
